<compile_context>
chip_gen: v7x
topology: tpu7x:2x2x1
jax: 0.10.0
libtpu: 0.0.40
codegen_flags: <defaults>
</compile_context>

<pallas_src>
import functools

import jax
import jax.numpy as jnp
from jax import lax
from jax.experimental import pallas as pl
from jax.experimental.pallas import tpu as pltpu

_LN_EPS = 1e-5
_VMEM_LIMIT = 32 * 1024 * 1024   # safe on v5e / v6e / v7x (v7x physical VMEM = 64 MiB)


# ----------------------------------------------------------------------------- helpers

def _row_tile(n, pref):
    """Largest tile <= pref that divides n and is a multiple of 8 (else n itself).

    NOTE: falls back to the full extent when n has no multiple-of-8 divisor <= pref;
    all callers in this script pass multiple-of-8 token counts (pad upstream otherwise).
    """
    if n <= pref:
        return n
    t = (pref // 8) * 8
    while t >= 8:
        if n % t == 0:
            return t
        t -= 8
    return n


# ----------------------------------------------------------------------------- kernels

def _linear_kernel(x_ref, w_ref, b_ref, o_ref):
    # dtype-agnostic: bf16 x bf16 -> bf16 MXU; f32 x f32 (patch embed) -> f32 MXU passes.
    # Accumulation / bias always f32.
    y = jnp.dot(x_ref[...], w_ref[...], preferred_element_type=jnp.float32) + b_ref[...]
    o_ref[...] = y.astype(o_ref.dtype)


def _ffn_res_ln_kernel(x_ref, w1_ref, b1_ref, w2_ref, b2_ref, g_ref, beta_ref, o_ref):
    # Fused FFN: x@W1 -> GELU -> @W2 (hidden never leaves VMEM) + residual + LayerNorm.
    x = x_ref[...]
    h = jnp.dot(x, w1_ref[...], preferred_element_type=jnp.float32) + b1_ref[...]
    h = jax.nn.gelu(h)
    y = jnp.dot(h.astype(jnp.bfloat16), w2_ref[...],
                preferred_element_type=jnp.float32) + b2_ref[...]
    y = y + x.astype(jnp.float32)
    mu = jnp.mean(y, axis=-1, keepdims=True)
    var = jnp.mean((y - mu) ** 2, axis=-1, keepdims=True)
    o_ref[...] = ((y - mu) * lax.rsqrt(var + _LN_EPS) * g_ref[...] + beta_ref[...]
                  ).astype(o_ref.dtype)


def _attn_proj_kernel(q_ref, k_ref, v_ref, wo_ref, bo_ref, res_ref, g_ref, beta_ref,
                      o_ref, m_sc, l_sc, acc_sc, *, scale):
    """Online-softmax attention + fused out-projection/bias/residual/LayerNorm epilogue."""
    ki = pl.program_id(2)

    @pl.when(ki == 0)
    def _():
        m_sc[...] = jnp.full_like(m_sc, -jnp.inf)
        l_sc[...] = jnp.zeros_like(l_sc)
        acc_sc[...] = jnp.zeros_like(acc_sc)

    q = q_ref[0]                                          # (tq, D) bf16, no per-step cast
    k = k_ref[0]                                          # (tk, D) bf16
    # NT contraction (no in-kernel K transpose needed by Mosaic).
    s = lax.dot_general(q, k, (((1,), (1,)), ((), ())),
                        preferred_element_type=jnp.float32) * scale   # (tq, tk) f32

    m_prev = m_sc[...]
    m_new = jnp.maximum(m_prev, jnp.max(s, axis=-1, keepdims=True))
    alpha = jnp.exp(m_prev - m_new)
    p = jnp.exp(s - m_new)
    l_sc[...] = alpha * l_sc[...] + jnp.sum(p, axis=-1, keepdims=True)
    acc_sc[...] = alpha * acc_sc[...] + jnp.dot(
        p.astype(jnp.bfloat16), v_ref[0], preferred_element_type=jnp.float32)
    m_sc[...] = m_new

    @pl.when(ki == pl.num_programs(2) - 1)
    def _():
        attn = acc_sc[...] * pl.reciprocal(l_sc[...], approx=True)    # (tq, D) f32
        y = jnp.dot(attn.astype(jnp.bfloat16), wo_ref[...],
                    preferred_element_type=jnp.float32) + bo_ref[...]
        y = y + res_ref[0].astype(jnp.float32)
        mu = jnp.mean(y, axis=-1, keepdims=True)
        var = jnp.mean((y - mu) ** 2, axis=-1, keepdims=True)
        o_ref[0] = ((y - mu) * lax.rsqrt(var + _LN_EPS) * g_ref[...] + beta_ref[...]
                    ).astype(o_ref.dtype)


def _corr_flash_kernel(q_ref, k_ref, v_ref, o_ref, m_sc, l_sc, acc_sc, *, scale):
    """Global-correlation softmax expectation: softmax(f0 f1^T / sqrt(D)) @ coord_grid.

    Output is a pixel coordinate -> exact divide and f32 P@V matmul (review concern)."""
    ki = pl.program_id(2)

    @pl.when(ki == 0)
    def _():
        m_sc[...] = jnp.full_like(m_sc, -jnp.inf)
        l_sc[...] = jnp.zeros_like(l_sc)
        acc_sc[...] = jnp.zeros_like(acc_sc)

    s = lax.dot_general(q_ref[0], k_ref[0], (((1,), (1,)), ((), ())),
                        preferred_element_type=jnp.float32) * scale

    m_prev = m_sc[...]
    m_new = jnp.maximum(m_prev, jnp.max(s, axis=-1, keepdims=True))
    alpha = jnp.exp(m_prev - m_new)
    p = jnp.exp(s - m_new)
    l_sc[...] = alpha * l_sc[...] + jnp.sum(p, axis=-1, keepdims=True)
    acc_sc[...] = alpha * acc_sc[...] + jnp.dot(p, v_ref[0],
                                                preferred_element_type=jnp.float32)
    m_sc[...] = m_new

    @pl.when(ki == pl.num_programs(2) - 1)
    def _():
        o_ref[0] = (acc_sc[...] / l_sc[...]).astype(o_ref.dtype)      # exact normalization


# ----------------------------------------------------------------------------- wrappers

def linear(x, w, b, out_dtype=jnp.bfloat16, tm=512):
    # x: (N, Din) -> (N, Dout); token-tiled, full weight block resident.
    N, Din = x.shape
    Dout = w.shape[1]
    tm = _row_tile(N, min(tm, max(8, N // 2)))   # >= 2 grid steps -> both v7x TCs get work
    return pl.pallas_call(
        _linear_kernel,
        grid=(N // tm,),
        out_shape=jax.ShapeDtypeStruct((N, Dout), out_dtype),
        in_specs=[
            pl.BlockSpec((tm, Din), lambda i: (i, 0)),
            pl.BlockSpec((Din, Dout), lambda i: (0, 0)),
            pl.BlockSpec((1, Dout), lambda i: (0, 0)),
        ],
        out_specs=pl.BlockSpec((tm, Dout), lambda i: (i, 0)),
        compiler_params=pltpu.CompilerParams(
            dimension_semantics=("parallel",),
            vmem_limit_bytes=_VMEM_LIMIT),
    )(x, w, b)


def ffn_res_ln(x, w1, b1, w2, b2, g, beta, out_dtype=jnp.bfloat16, tm=512):
    # Fused FFN with residual + LayerNorm; token-tiled; bf16 activation streaming.
    N, D = x.shape
    hid = w1.shape[1]
    tm = _row_tile(N, min(tm, max(8, N // 2)))
    return pl.pallas_call(
        _ffn_res_ln_kernel,
        grid=(N // tm,),
        out_shape=jax.ShapeDtypeStruct((N, D), out_dtype),
        in_specs=[
            pl.BlockSpec((tm, D), lambda i: (i, 0)),
            pl.BlockSpec((D, hid), lambda i: (0, 0)),
            pl.BlockSpec((1, hid), lambda i: (0, 0)),
            pl.BlockSpec((hid, D), lambda i: (0, 0)),
            pl.BlockSpec((1, D), lambda i: (0, 0)),
            pl.BlockSpec((1, D), lambda i: (0, 0)),
            pl.BlockSpec((1, D), lambda i: (0, 0)),
        ],
        out_specs=pl.BlockSpec((tm, D), lambda i: (i, 0)),
        compiler_params=pltpu.CompilerParams(
            dimension_semantics=("parallel",),
            vmem_limit_bytes=_VMEM_LIMIT),
    )(x, w1, b1, w2, b2, g, beta)


def fused_attention(qkv, res, wo, bo, g, beta, *, scale, swap, tq=512, tk=512):
    """softmax(QK^T * scale) V -> @Wo + bias + residual -> LayerNorm, one pallas_call.

    qkv : (2B, L, 3D) bf16 — the SAME array is passed three times; Q/K/V are selected via
          the last-dim block index in each index_map (no HBM slices / copies).
    swap: cross-attention — K/V read from the other frame via ((b + B) % 2B) in the index_map.
    res : (2B, L, D) bf16 residual (the attention-block input).
    """
    B2, L, D3 = qkv.shape
    D = D3 // 3
    B = B2 // 2
    tq = _row_tile(L, tq)
    tk = _row_tile(L, tk)

    if swap:
        k_map = lambda b, qi, ki: ((b + B) % B2, ki, 1)
        v_map = lambda b, qi, ki: ((b + B) % B2, ki, 2)
    else:
        k_map = lambda b, qi, ki: (b, ki, 1)
        v_map = lambda b, qi, ki: (b, ki, 2)

    kern = functools.partial(_attn_proj_kernel, scale=scale)
    return pl.pallas_call(
        kern,
        grid=(B2, L // tq, L // tk),
        out_shape=jax.ShapeDtypeStruct((B2, L, D), jnp.bfloat16),
        in_specs=[
            pl.BlockSpec((1, tq, D), lambda b, qi, ki: (b, qi, 0)),   # Q  (last-dim block 0)
            pl.BlockSpec((1, tk, D), k_map),                          # K  (last-dim block 1)
            pl.BlockSpec((1, tk, D), v_map),                          # V  (last-dim block 2)
            pl.BlockSpec((D, D), lambda b, qi, ki: (0, 0)),           # Wo (resident)
            pl.BlockSpec((1, D), lambda b, qi, ki: (0, 0)),           # bo
            pl.BlockSpec((1, tq, D), lambda b, qi, ki: (b, qi, 0)),   # residual
            pl.BlockSpec((1, D), lambda b, qi, ki: (0, 0)),           # gamma
            pl.BlockSpec((1, D), lambda b, qi, ki: (0, 0)),           # beta
        ],
        out_specs=pl.BlockSpec((1, tq, D), lambda b, qi, ki: (b, qi, 0)),
        scratch_shapes=[
            pltpu.VMEM((tq, 1), jnp.float32),   # running max m
            pltpu.VMEM((tq, 1), jnp.float32),   # running sum l
            pltpu.VMEM((tq, D), jnp.float32),   # accumulator
        ],
        compiler_params=pltpu.CompilerParams(
            dimension_semantics=("parallel", "parallel", "arbitrary"),
            vmem_limit_bytes=_VMEM_LIMIT),
    )(qkv, qkv, qkv, wo, bo, res, g, beta)


def correlation_softmax(f0, f1, grid_pad, scale, tq=512, tk=512):
    """Expected correspondence via global correlation softmax.

    f0, f1  : (B, L, D) bf16 features.
    grid_pad: (1, L, 128) f32 lane-padded pixel-coordinate grid, mapped to block 0 for
              every batch (never broadcast / re-DMA'd per batch)."""
    B, L, D = f0.shape
    Dv = grid_pad.shape[-1]
    tq = _row_tile(L, tq)
    tk = _row_tile(L, tk)
    kern = functools.partial(_corr_flash_kernel, scale=scale)
    return pl.pallas_call(
        kern,
        grid=(B, L // tq, L // tk),
        out_shape=jax.ShapeDtypeStruct((B, L, Dv), jnp.float32),
        in_specs=[
            pl.BlockSpec((1, tq, D), lambda b, qi, ki: (b, qi, 0)),
            pl.BlockSpec((1, tk, D), lambda b, qi, ki: (b, ki, 0)),
            pl.BlockSpec((1, tk, Dv), lambda b, qi, ki: (0, ki, 0)),  # shared coord grid
        ],
        out_specs=pl.BlockSpec((1, tq, Dv), lambda b, qi, ki: (b, qi, 0)),
        scratch_shapes=[
            pltpu.VMEM((tq, 1), jnp.float32),
            pltpu.VMEM((tq, 1), jnp.float32),
            pltpu.VMEM((tq, Dv), jnp.float32),
        ],
        compiler_params=pltpu.CompilerParams(
            dimension_semantics=("parallel", "parallel", "arbitrary"),
            vmem_limit_bytes=_VMEM_LIMIT),
    )(f0, f1, grid_pad)


# ----------------------------------------------------------------------------- model glue

def transformer_layer(x, p, scale):
    # x: (2B, L, D) bf16 — both frames stacked on batch (shared weights).
    B2, L, D = x.shape
    N = B2 * L

    # self-attention: fused QKV projection -> flash attn + out-proj/res/LN epilogue
    qkv = linear(x.reshape(N, D), p["self_qkv_w"], p["self_qkv_b"]).reshape(B2, L, 3 * D)
    x = fused_attention(qkv, x, p["self_o_w"], p["self_o_b"], p["ln1_g"], p["ln1_b"],
                        scale=scale, swap=False)

    # cross-attention: frame0 attends to frame1 (and vice versa) via index_map swap
    qkv = linear(x.reshape(N, D), p["cross_qkv_w"], p["cross_qkv_b"]).reshape(B2, L, 3 * D)
    x = fused_attention(qkv, x, p["cross_o_w"], p["cross_o_b"], p["ln2_g"], p["ln2_b"],
                        scale=scale, swap=True)

    # fused FFN (W1 -> GELU -> W2) + residual + LayerNorm
    x = ffn_res_ln(x.reshape(N, D), p["ffn_w1"], p["ffn_b1"], p["ffn_w2"], p["ffn_b2"],
                   p["ln3_g"], p["ln3_b"]).reshape(B2, L, D)
    return x


def gmflow_forward(x, params, *, patch, feat_dim):
    """x: (B, 3, 2, H, W) in [0, 255]  ->  forward flow (B, 2, H, W) float32."""
    B, C, T, H, W = x.shape
    assert T == 2 and C == 3
    frame0 = x[:, :, 0]
    frame1 = x[:, :, 1]
    h, w = H // patch, W // patch
    L = h * w
    P = patch * patch * C

    def patchify(f):
        f = jnp.transpose(f, (0, 2, 3, 1))                  # NCHW -> NHWC
        f = f.reshape(B, h, patch, w, patch, C)
        f = jnp.transpose(f, (0, 1, 3, 2, 4, 5))            # (B, h, w, p, p, C)
        return f.reshape(B, L, P)

    tokens = jnp.concatenate([patchify(frame0), patchify(frame1)], axis=0)
    tokens = tokens.reshape(2 * B * L, P).astype(jnp.float32)

    # image normalization folded into embed weights (f32 weights / f32 pixel LHS)
    feats = linear(tokens, params["embed_w"], params["embed_b"],
                   out_dtype=jnp.bfloat16).reshape(2 * B, L, feat_dim)

    scale = 1.0 / float(feat_dim) ** 0.5
    for layer in params["layers"]:
        feats = transformer_layer(feats, layer, scale)
    f0, f1 = feats[:B], feats[B:]                           # already bf16 for the corr kernel

    # --- global correlation softmax -> expected correspondence -> flow ------------------
    xs = jnp.arange(w, dtype=jnp.float32)
    ys = jnp.arange(h, dtype=jnp.float32)
    gx, gy = jnp.meshgrid(xs, ys)                            # (h, w), xy indexing
    grid = jnp.stack([gx, gy], axis=-1).reshape(1, L, 2)     # coords_grid order (x, y)

    # Lane-dense V: pad (1, L, 2) coordinate grid to 128 lanes; kept at batch size 1 and
    # mapped to block 0 for every batch inside the kernel (no broadcast_to).
    grid_pad = jnp.concatenate(
        [grid, jnp.zeros((1, L, 128 - 2), jnp.float32)], axis=-1)

    corr = correlation_softmax(f0, f1, grid_pad, scale)      # (B, L, 128) f32
    correspondence = corr[:, :, :2]                          # (B, L, 2)
    flow_lr = correspondence - grid                          # broadcast (1, L, 2)

    flow_lr = flow_lr.reshape(B, h, w, 2).transpose(0, 3, 1, 2)         # (B, 2, h, w)
    flow_up = jax.image.resize(flow_lr, (B, 2, H, W), method="bilinear") * float(patch)
    return flow_up


# ----------------------------------------------------------------------------- params

def init_params(key, *, patch, feat_dim, num_layers, ffn_expansion=4, in_ch=3):
    P = patch * patch * in_ch
    mean = jnp.array([0.485, 0.456, 0.406], jnp.float32)
    std = jnp.array([0.229, 0.224, 0.225], jnp.float32)
    # flattened patch is ordered (p, p, C) -> channel is fastest axis
    img_scale = jnp.tile(1.0 / (255.0 * std), patch * patch)       # (P,)
    img_shift = jnp.tile(-mean / std, patch * patch)               # (P,)

    keys = iter(jax.random.split(key, 256))

    def dense(din, dout):
        return jax.random.normal(next(keys), (din, dout), jnp.float32) / jnp.sqrt(
            jnp.asarray(din, jnp.float32))

    embed_w = dense(P, feat_dim)
    embed_b = jnp.zeros((feat_dim,), jnp.float32)
    # Fold the normalization into the projection:
    #   (x*scale + shift) @ W + b == x @ (diag(scale) @ W) + (shift @ W + b)
    folded_w = img_scale[:, None] * embed_w                        # kept f32 (pixel precision)
    folded_b = img_shift @ embed_w + embed_b

    params = {
        "embed_w": folded_w,                                       # (P, D) f32
        "embed_b": folded_b[None, :],                              # (1, D) f32
        "layers": [],
    }
    hid = feat_dim * ffn_expansion
    for _ in range(num_layers):
        layer = {}
        for name in ("self", "cross"):
            wq = dense(feat_dim, feat_dim)
            wk = dense(feat_dim, feat_dim)
            wv = dense(feat_dim, feat_dim)
            layer[f"{name}_qkv_w"] = jnp.concatenate([wq, wk, wv], axis=1).astype(jnp.bfloat16)
            layer[f"{name}_qkv_b"] = jnp.zeros((1, 3 * feat_dim), jnp.float32)
            layer[f"{name}_o_w"] = dense(feat_dim, feat_dim).astype(jnp.bfloat16)
            layer[f"{name}_o_b"] = jnp.zeros((1, feat_dim), jnp.float32)
        layer["ffn_w1"] = dense(feat_dim, hid).astype(jnp.bfloat16)
        layer["ffn_b1"] = jnp.zeros((1, hid), jnp.float32)
        layer["ffn_w2"] = dense(hid, feat_dim).astype(jnp.bfloat16)
        layer["ffn_b2"] = jnp.zeros((1, feat_dim), jnp.float32)
        for ln in ("ln1", "ln2", "ln3"):
            layer[f"{ln}_g"] = jnp.ones((1, feat_dim), jnp.float32)
            layer[f"{ln}_b"] = jnp.zeros((1, feat_dim), jnp.float32)
        params["layers"].append(layer)
    return params


# ----------------------------------------------------------------------------- main

if __name__ == "__main__":
    B, C, H, W = 2, 3, 32, 32
    PATCH = 4          # upsample_factor / feature downsampling rate
    FEAT_DIM = 128     # feature_channels (GMFlow default, lane-aligned)
    NUM_LAYERS = 2     # num_transformer_layers (small config)

    key = jax.random.PRNGKey(0)
    kx, kp = jax.random.split(key)
    x = jax.random.uniform(kx, (B, C, 2, H, W), jnp.float32, minval=0.0, maxval=255.0)
    params = init_params(kp, patch=PATCH, feat_dim=FEAT_DIM, num_layers=NUM_LAYERS)

    fwd = jax.jit(lambda inp, prm: gmflow_forward(inp, prm, patch=PATCH, feat_dim=FEAT_DIM))
    flow = fwd(x, params)
    jax.block_until_ready(flow)

    assert flow.shape == (B, 2, H, W), flow.shape
    assert flow.dtype == jnp.float32
    assert bool(jnp.all(jnp.isfinite(flow)))
    print("KERNEL_OK")
</pallas_src>

<mosaic_0001>
module attributes {stable_mosaic.version = 11 : i64} {
  func.func @_attn_proj_kernel(%arg0: i32, %arg1: i32, %arg2: i32, %arg3: memref<1x64x128xbf16, #tpu.memory_space<vmem>>, %arg4: memref<1x64x128xbf16, #tpu.memory_space<vmem>>, %arg5: memref<1x64x128xbf16, #tpu.memory_space<vmem>>, %arg6: memref<128x128xbf16, #tpu.memory_space<vmem>>, %arg7: memref<1x128xf32, #tpu.memory_space<vmem>>, %arg8: memref<1x64x128xbf16, #tpu.memory_space<vmem>>, %arg9: memref<1x128xf32, #tpu.memory_space<vmem>>, %arg10: memref<1x128xf32, #tpu.memory_space<vmem>>, %arg11: memref<1x64x128xbf16, #tpu.memory_space<vmem>>, %arg12: memref<64x1xf32, #tpu.memory_space<vmem>>, %arg13: memref<64x1xf32, #tpu.memory_space<vmem>>, %arg14: memref<64x128xf32, #tpu.memory_space<vmem>>) attributes {dimension_semantics = [#tpu.dimension_semantics<parallel>, #tpu.dimension_semantics<parallel>, #tpu.dimension_semantics<arbitrary>], iteration_bounds = array<i64: 4, 1, 1>, scalar_prefetch = 0 : i64, scratch_operands = 3 : i64, tpu.core_type = #tpu.core_type<tc>, window_params = [{transform_indices = @transform_0, window_bounds = array<i64: 1, 64, 128>}, {transform_indices = @transform_1, window_bounds = array<i64: 1, 64, 128>}, {transform_indices = @transform_2, window_bounds = array<i64: 1, 64, 128>}, {pipeline_mode = #tpu.pipeline_mode<synchronous>, transform_indices = @transform_3, window_bounds = array<i64: 128, 128>}, {pipeline_mode = #tpu.pipeline_mode<synchronous>, transform_indices = @transform_4, window_bounds = array<i64: 1, 128>}, {transform_indices = @transform_5, window_bounds = array<i64: 1, 64, 128>}, {pipeline_mode = #tpu.pipeline_mode<synchronous>, transform_indices = @transform_6, window_bounds = array<i64: 1, 128>}, {pipeline_mode = #tpu.pipeline_mode<synchronous>, transform_indices = @transform_7, window_bounds = array<i64: 1, 128>}, {transform_indices = @transform_8, window_bounds = array<i64: 1, 64, 128>}]} {
    %c0_i32 = arith.constant 0 : i32
    %0 = arith.cmpi eq, %arg2, %c0_i32 : i32
    %1 = arith.extui %0 : i1 to i32
    %c0_i32_0 = arith.constant 0 : i32
    %2 = arith.cmpi ne, %1, %c0_i32_0 : i32
    scf.if %2 {
      %cst_27 = arith.constant 0xFF800000 : f32
      %38 = vector.broadcast %cst_27 : f32 to vector<64x1xf32>
      %c0_28 = arith.constant 0 : index
      %c0_29 = arith.constant 0 : index
      %39 = vector.load %arg12[%c0_28, %c0_29] : memref<64x1xf32, #tpu.memory_space<vmem>>, vector<64x1xf32>
      tpu.vector_store %arg12[%c0_28, %c0_29], %38 {strides = array<i32>} : memref<64x1xf32, #tpu.memory_space<vmem>>, vector<64x1xf32>,
      %cst_30 = arith.constant 0.000000e+00 : f32
      %40 = vector.broadcast %cst_30 : f32 to vector<64x1xf32>
      %c0_31 = arith.constant 0 : index
      %c0_32 = arith.constant 0 : index
      %41 = vector.load %arg13[%c0_31, %c0_32] : memref<64x1xf32, #tpu.memory_space<vmem>>, vector<64x1xf32>
      tpu.vector_store %arg13[%c0_31, %c0_32], %40 {strides = array<i32>} : memref<64x1xf32, #tpu.memory_space<vmem>>, vector<64x1xf32>,
      %cst_33 = arith.constant 0.000000e+00 : f32
      %42 = vector.broadcast %cst_33 : f32 to vector<64x128xf32>
      %c0_34 = arith.constant 0 : index
      %c0_35 = arith.constant 0 : index
      %43 = vector.load %arg14[%c0_34, %c0_35] : memref<64x128xf32, #tpu.memory_space<vmem>>, vector<64x128xf32>
      tpu.vector_store %arg14[%c0_34, %c0_35], %42 {strides = array<i32>} : memref<64x128xf32, #tpu.memory_space<vmem>>, vector<64x128xf32>,
    } else {
    }
    %c0 = arith.constant 0 : index
    %c0_1 = arith.constant 0 : index
    %c0_2 = arith.constant 0 : index
    %3 = vector.load %arg3[%c0, %c0_1, %c0_2] : memref<1x64x128xbf16, #tpu.memory_space<vmem>>, vector<1x64x128xbf16>
    %4 = vector.shape_cast %3 : vector<1x64x128xbf16> to vector<64x128xbf16>
    %c0_3 = arith.constant 0 : index
    %c0_4 = arith.constant 0 : index
    %c0_5 = arith.constant 0 : index
    %5 = vector.load %arg4[%c0_3, %c0_4, %c0_5] : memref<1x64x128xbf16, #tpu.memory_space<vmem>>, vector<1x64x128xbf16>
    %6 = vector.shape_cast %5 : vector<1x64x128xbf16> to vector<64x128xbf16>
    %cst = arith.constant dense<0.000000e+00> : vector<64x64xf32>
    %7 = tpu.matmul %4, %6, %cst {dimension_numbers = #tpu.dot_dimension_numbers<[1], [1], [0], [0], [0, 0, 1, 0], [], []>} : vector<64x128xbf16>, vector<64x128xbf16>, vector<64x64xf32> -> vector<64x64xf32>
    %cst_6 = arith.constant 0.0883883461 : f32
    %8 = vector.broadcast %cst_6 : f32 to vector<64x64xf32>
    %9 = arith.mulf %7, %8 : vector<64x64xf32>
    %c0_7 = arith.constant 0 : index
    %c0_8 = arith.constant 0 : index
    %10 = vector.load %arg12[%c0_7, %c0_8] : memref<64x1xf32, #tpu.memory_space<vmem>>, vector<64x1xf32>
    %cst_9 = arith.constant dense<0xFF800000> : vector<64xf32>
    %11 = vector.multi_reduction <maximumf>, %9, %cst_9 [1] : vector<64x64xf32> to vector<64xf32>
    %12 = vector.shape_cast %11 : vector<64xf32> to vector<64x1xf32>
    %13 = arith.maximumf %10, %12 : vector<64x1xf32>
    %14 = arith.subf %10, %13 : vector<64x1xf32>
    %15 = math.exp %14 : vector<64x1xf32>
    %16 = vector.broadcast %13 : vector<64x1xf32> to vector<64x64xf32>
    %17 = arith.subf %9, %16 : vector<64x64xf32>
    %18 = math.exp %17 : vector<64x64xf32>
    %c0_10 = arith.constant 0 : index
    %c0_11 = arith.constant 0 : index
    %19 = vector.load %arg13[%c0_10, %c0_11] : memref<64x1xf32, #tpu.memory_space<vmem>>, vector<64x1xf32>
    %20 = arith.mulf %15, %19 : vector<64x1xf32>
    %cst_12 = arith.constant dense<0.000000e+00> : vector<64xf32>
    %21 = vector.multi_reduction <add>, %18, %cst_12 [1] : vector<64x64xf32> to vector<64xf32>
    %22 = vector.shape_cast %21 : vector<64xf32> to vector<64x1xf32>
    %23 = arith.addf %20, %22 : vector<64x1xf32>
    %c0_13 = arith.constant 0 : index
    %c0_14 = arith.constant 0 : index
    %24 = vector.load %arg13[%c0_13, %c0_14] : memref<64x1xf32, #tpu.memory_space<vmem>>, vector<64x1xf32>
    tpu.vector_store %arg13[%c0_13, %c0_14], %23 {strides = array<i32>} : memref<64x1xf32, #tpu.memory_space<vmem>>, vector<64x1xf32>,
    %c0_15 = arith.constant 0 : index
    %c0_16 = arith.constant 0 : index
    %25 = vector.load %arg14[%c0_15, %c0_16] : memref<64x128xf32, #tpu.memory_space<vmem>>, vector<64x128xf32>
    %26 = vector.broadcast %15 : vector<64x1xf32> to vector<64x128xf32>
    %27 = arith.mulf %26, %25 : vector<64x128xf32>
    %28 = arith.truncf %18 : vector<64x64xf32> to vector<64x64xbf16>
    %c0_17 = arith.constant 0 : index
    %c0_18 = arith.constant 0 : index
    %c0_19 = arith.constant 0 : index
    %29 = vector.load %arg5[%c0_17, %c0_18, %c0_19] : memref<1x64x128xbf16, #tpu.memory_space<vmem>>, vector<1x64x128xbf16>
    %30 = vector.shape_cast %29 : vector<1x64x128xbf16> to vector<64x128xbf16>
    %cst_20 = arith.constant dense<0.000000e+00> : vector<64x128xf32>
    %31 = tpu.matmul %28, %30, %cst_20 {dimension_numbers = #tpu.dot_dimension_numbers<[1], [0], [0], [1], [0, 0, 1, 1], [], []>} : vector<64x64xbf16>, vector<64x128xbf16>, vector<64x128xf32> -> vector<64x128xf32>
    %32 = arith.addf %27, %31 : vector<64x128xf32>
    %c0_21 = arith.constant 0 : index
    %c0_22 = arith.constant 0 : index
    %33 = vector.load %arg14[%c0_21, %c0_22] : memref<64x128xf32, #tpu.memory_space<vmem>>, vector<64x128xf32>
    tpu.vector_store %arg14[%c0_21, %c0_22], %32 {strides = array<i32>} : memref<64x128xf32, #tpu.memory_space<vmem>>, vector<64x128xf32>,
    %c0_23 = arith.constant 0 : index
    %c0_24 = arith.constant 0 : index
    %34 = vector.load %arg12[%c0_23, %c0_24] : memref<64x1xf32, #tpu.memory_space<vmem>>, vector<64x1xf32>
    tpu.vector_store %arg12[%c0_23, %c0_24], %13 {strides = array<i32>} : memref<64x1xf32, #tpu.memory_space<vmem>>, vector<64x1xf32>,
    %c0_i32_25 = arith.constant 0 : i32
    %35 = arith.cmpi eq, %arg2, %c0_i32_25 : i32
    %36 = arith.extui %35 : i1 to i32
    %c0_i32_26 = arith.constant 0 : i32
    %37 = arith.cmpi ne, %36, %c0_i32_26 : i32
    scf.if %37 {
      %c0_27 = arith.constant 0 : index
      %c0_28 = arith.constant 0 : index
      %38 = vector.load %arg14[%c0_27, %c0_28] : memref<64x128xf32, #tpu.memory_space<vmem>>, vector<64x128xf32>
      %c0_29 = arith.constant 0 : index
      %c0_30 = arith.constant 0 : index
      %39 = vector.load %arg13[%c0_29, %c0_30] : memref<64x1xf32, #tpu.memory_space<vmem>>, vector<64x1xf32>
      %40 = tpu.reciprocal %39 {approx = true} : vector<64x1xf32> -> vector<64x1xf32>
      %41 = vector.broadcast %40 : vector<64x1xf32> to vector<64x128xf32>
      %42 = arith.mulf %38, %41 : vector<64x128xf32>
      %43 = arith.truncf %42 : vector<64x128xf32> to vector<64x128xbf16>
      %c0_31 = arith.constant 0 : index
      %c0_32 = arith.constant 0 : index
      %44 = vector.load %arg6[%c0_31, %c0_32] : memref<128x128xbf16, #tpu.memory_space<vmem>>, vector<128x128xbf16>
      %cst_33 = arith.constant dense<0.000000e+00> : vector<64x128xf32>
      %45 = tpu.matmul %43, %44, %cst_33 {dimension_numbers = #tpu.dot_dimension_numbers<[1], [0], [0], [1], [0, 0, 1, 1], [], []>} : vector<64x128xbf16>, vector<128x128xbf16>, vector<64x128xf32> -> vector<64x128xf32>
      %c0_34 = arith.constant 0 : index
      %c0_35 = arith.constant 0 : index
      %46 = vector.load %arg7[%c0_34, %c0_35] : memref<1x128xf32, #tpu.memory_space<vmem>>, vector<1x128xf32>
      %47 = vector.broadcast %46 : vector<1x128xf32> to vector<64x128xf32>
      %48 = arith.addf %45, %47 : vector<64x128xf32>
      %c0_36 = arith.constant 0 : index
      %c0_37 = arith.constant 0 : index
      %c0_38 = arith.constant 0 : index
      %49 = vector.load %arg8[%c0_36, %c0_37, %c0_38] : memref<1x64x128xbf16, #tpu.memory_space<vmem>>, vector<1x64x128xbf16>
      %50 = vector.shape_cast %49 : vector<1x64x128xbf16> to vector<64x128xbf16>
      %51 = arith.extf %50 : vector<64x128xbf16> to vector<64x128xf32>
      %52 = arith.addf %48, %51 : vector<64x128xf32>
      %cst_39 = arith.constant dense<0.000000e+00> : vector<64xf32>
      %53 = vector.multi_reduction <add>, %52, %cst_39 [1] : vector<64x128xf32> to vector<64xf32>
      %54 = vector.shape_cast %53 : vector<64xf32> to vector<64x1xf32>
      %cst_40 = arith.constant 1.280000e+02 : f32
      %55 = vector.broadcast %cst_40 : f32 to vector<64x1xf32>
      %56 = arith.divf %54, %55 : vector<64x1xf32>
      %57 = vector.broadcast %56 : vector<64x1xf32> to vector<64x128xf32>
      %58 = arith.subf %52, %57 : vector<64x128xf32>
      %59 = arith.mulf %58, %58 : vector<64x128xf32>
      %cst_41 = arith.constant dense<0.000000e+00> : vector<64xf32>
      %60 = vector.multi_reduction <add>, %59, %cst_41 [1] : vector<64x128xf32> to vector<64xf32>
      %61 = vector.shape_cast %60 : vector<64xf32> to vector<64x1xf32>
      %cst_42 = arith.constant 1.280000e+02 : f32
      %62 = vector.broadcast %cst_42 : f32 to vector<64x1xf32>
      %63 = arith.divf %61, %62 : vector<64x1xf32>
      %64 = vector.broadcast %56 : vector<64x1xf32> to vector<64x128xf32>
      %65 = arith.subf %52, %64 : vector<64x128xf32>
      %cst_43 = arith.constant 9.99999974E-6 : f32
      %66 = vector.broadcast %cst_43 : f32 to vector<64x1xf32>
      %67 = arith.addf %63, %66 : vector<64x1xf32>
      %68 = math.rsqrt %67 : vector<64x1xf32>
      %69 = vector.broadcast %68 : vector<64x1xf32> to vector<64x128xf32>
      %70 = arith.mulf %65, %69 : vector<64x128xf32>
      %c0_44 = arith.constant 0 : index
      %c0_45 = arith.constant 0 : index
      %71 = vector.load %arg9[%c0_44, %c0_45] : memref<1x128xf32, #tpu.memory_space<vmem>>, vector<1x128xf32>
      %72 = vector.broadcast %71 : vector<1x128xf32> to vector<64x128xf32>
      %73 = arith.mulf %70, %72 : vector<64x128xf32>
      %c0_46 = arith.constant 0 : index
      %c0_47 = arith.constant 0 : index
      %74 = vector.load %arg10[%c0_46, %c0_47] : memref<1x128xf32, #tpu.memory_space<vmem>>, vector<1x128xf32>
      %75 = vector.broadcast %74 : vector<1x128xf32> to vector<64x128xf32>
      %76 = arith.addf %73, %75 : vector<64x128xf32>
      %77 = arith.truncf %76 : vector<64x128xf32> to vector<64x128xbf16>
      %c0_48 = arith.constant 0 : index
      %c0_49 = arith.constant 0 : index
      %c0_50 = arith.constant 0 : index
      %78 = vector.load %arg11[%c0_48, %c0_49, %c0_50] : memref<1x64x128xbf16, #tpu.memory_space<vmem>>, vector<1x64x128xbf16>
      %79 = vector.shape_cast %78 : vector<1x64x128xbf16> to vector<64x128xbf16>
      %80 = vector.shape_cast %77 : vector<64x128xbf16> to vector<1x64x128xbf16>
      tpu.vector_store %arg11[%c0_48, %c0_49, %c0_50], %80 {strides = array<i32>} : memref<1x64x128xbf16, #tpu.memory_space<vmem>>, vector<1x64x128xbf16>,
    } else {
    }
    return
  }
  func.func @transform_0(%arg0: i32, %arg1: i32, %arg2: i32) -> (i32, i32, i32) {
    %c0_i32 = arith.constant 0 : i32
    %c0_i32_0 = arith.constant 0 : i32
    return %arg0, %arg1, %c0_i32 : i32, i32, i32
  }
  func.func @transform_1(%arg0: i32, %arg1: i32, %arg2: i32) -> (i32, i32, i32) {
    %c1_i32 = arith.constant 1 : i32
    %c0_i32 = arith.constant 0 : i32
    return %arg0, %arg2, %c1_i32 : i32, i32, i32
  }
  func.func @transform_2(%arg0: i32, %arg1: i32, %arg2: i32) -> (i32, i32, i32) {
    %c2_i32 = arith.constant 2 : i32
    %c0_i32 = arith.constant 0 : i32
    return %arg0, %arg2, %c2_i32 : i32, i32, i32
  }
  func.func @transform_3(%arg0: i32, %arg1: i32, %arg2: i32) -> (i32, i32) {
    %c0_i32 = arith.constant 0 : i32
    %c0_i32_0 = arith.constant 0 : i32
    %c0_i32_1 = arith.constant 0 : i32
    return %c0_i32, %c0_i32_0 : i32, i32
  }
  func.func @transform_4(%arg0: i32, %arg1: i32, %arg2: i32) -> (i32, i32) {
    %c0_i32 = arith.constant 0 : i32
    %c0_i32_0 = arith.constant 0 : i32
    %c0_i32_1 = arith.constant 0 : i32
    return %c0_i32, %c0_i32_0 : i32, i32
  }
  func.func @transform_5(%arg0: i32, %arg1: i32, %arg2: i32) -> (i32, i32, i32) {
    %c0_i32 = arith.constant 0 : i32
    %c0_i32_0 = arith.constant 0 : i32
    return %arg0, %arg1, %c0_i32 : i32, i32, i32
  }
  func.func @transform_6(%arg0: i32, %arg1: i32, %arg2: i32) -> (i32, i32) {
    %c0_i32 = arith.constant 0 : i32
    %c0_i32_0 = arith.constant 0 : i32
    %c0_i32_1 = arith.constant 0 : i32
    return %c0_i32, %c0_i32_0 : i32, i32
  }
  func.func @transform_7(%arg0: i32, %arg1: i32, %arg2: i32) -> (i32, i32) {
    %c0_i32 = arith.constant 0 : i32
    %c0_i32_0 = arith.constant 0 : i32
    %c0_i32_1 = arith.constant 0 : i32
    return %c0_i32, %c0_i32_0 : i32, i32
  }
  func.func @transform_8(%arg0: i32, %arg1: i32, %arg2: i32) -> (i32, i32, i32) {
    %c0_i32 = arith.constant 0 : i32
    %c0_i32_0 = arith.constant 0 : i32
    return %arg0, %arg1, %c0_i32 : i32, i32, i32
  }
}

module attributes {stable_mosaic.version = 11 : i64} {
  func.func @_linear_kernel(%arg0: i32, %arg1: memref<128x48xf32, #tpu.memory_space<vmem>>, %arg2: memref<48x128xf32, #tpu.memory_space<vmem>>, %arg3: memref<1x128xf32, #tpu.memory_space<vmem>>, %arg4: memref<128x128xbf16, #tpu.memory_space<vmem>>) attributes {dimension_semantics = [#tpu.dimension_semantics<parallel>], iteration_bounds = array<i64: 2>, scalar_prefetch = 0 : i64, scratch_operands = 0 : i64, tpu.core_type = #tpu.core_type<tc>, window_params = [{transform_indices = @transform_0, window_bounds = array<i64: 128, 48>}, {pipeline_mode = #tpu.pipeline_mode<synchronous>, transform_indices = @transform_1, window_bounds = array<i64: 48, 128>}, {pipeline_mode = #tpu.pipeline_mode<synchronous>, transform_indices = @transform_2, window_bounds = array<i64: 1, 128>}, {transform_indices = @transform_3, window_bounds = array<i64: 128, 128>}]} {
    %c0 = arith.constant 0 : index
    %c0_0 = arith.constant 0 : index
    %0 = vector.load %arg1[%c0, %c0_0] : memref<128x48xf32, #tpu.memory_space<vmem>>, vector<128x48xf32>
    %c0_1 = arith.constant 0 : index
    %c0_2 = arith.constant 0 : index
    %1 = vector.load %arg2[%c0_1, %c0_2] : memref<48x128xf32, #tpu.memory_space<vmem>>, vector<48x128xf32>
    %cst = arith.constant dense<0.000000e+00> : vector<128x128xf32>
    %2 = tpu.matmul %0, %1, %cst {dimension_numbers = #tpu.dot_dimension_numbers<[1], [0], [0], [1], [0, 0, 1, 1], [], []>} : vector<128x48xf32>, vector<48x128xf32>, vector<128x128xf32> -> vector<128x128xf32>
    %c0_3 = arith.constant 0 : index
    %c0_4 = arith.constant 0 : index
    %3 = vector.load %arg3[%c0_3, %c0_4] : memref<1x128xf32, #tpu.memory_space<vmem>>, vector<1x128xf32>
    %4 = vector.broadcast %3 : vector<1x128xf32> to vector<128x128xf32>
    %5 = arith.addf %2, %4 : vector<128x128xf32>
    %6 = arith.truncf %5 : vector<128x128xf32> to vector<128x128xbf16>
    %c0_5 = arith.constant 0 : index
    %c0_6 = arith.constant 0 : index
    %7 = vector.load %arg4[%c0_5, %c0_6] : memref<128x128xbf16, #tpu.memory_space<vmem>>, vector<128x128xbf16>
    tpu.vector_store %arg4[%c0_5, %c0_6], %6 {strides = array<i32>} : memref<128x128xbf16, #tpu.memory_space<vmem>>, vector<128x128xbf16>,
    return
  }
  func.func @transform_0(%arg0: i32) -> (i32, i32) {
    %c0_i32 = arith.constant 0 : i32
    %c0_i32_0 = arith.constant 0 : i32
    return %arg0, %c0_i32 : i32, i32
  }
  func.func @transform_1(%arg0: i32) -> (i32, i32) {
    %c0_i32 = arith.constant 0 : i32
    %c0_i32_0 = arith.constant 0 : i32
    %c0_i32_1 = arith.constant 0 : i32
    return %c0_i32, %c0_i32_0 : i32, i32
  }
  func.func @transform_2(%arg0: i32) -> (i32, i32) {
    %c0_i32 = arith.constant 0 : i32
    %c0_i32_0 = arith.constant 0 : i32
    %c0_i32_1 = arith.constant 0 : i32
    return %c0_i32, %c0_i32_0 : i32, i32
  }
  func.func @transform_3(%arg0: i32) -> (i32, i32) {
    %c0_i32 = arith.constant 0 : i32
    %c0_i32_0 = arith.constant 0 : i32
    return %arg0, %c0_i32 : i32, i32
  }
}

module attributes {stable_mosaic.version = 11 : i64} {
  func.func @_linear_kernel(%arg0: i32, %arg1: memref<128x128xbf16, #tpu.memory_space<vmem>>, %arg2: memref<128x384xbf16, #tpu.memory_space<vmem>>, %arg3: memref<1x384xf32, #tpu.memory_space<vmem>>, %arg4: memref<128x384xbf16, #tpu.memory_space<vmem>>) attributes {dimension_semantics = [#tpu.dimension_semantics<parallel>], iteration_bounds = array<i64: 2>, scalar_prefetch = 0 : i64, scratch_operands = 0 : i64, tpu.core_type = #tpu.core_type<tc>, window_params = [{transform_indices = @transform_0, window_bounds = array<i64: 128, 128>}, {pipeline_mode = #tpu.pipeline_mode<synchronous>, transform_indices = @transform_1, window_bounds = array<i64: 128, 384>}, {pipeline_mode = #tpu.pipeline_mode<synchronous>, transform_indices = @transform_2, window_bounds = array<i64: 1, 384>}, {transform_indices = @transform_3, window_bounds = array<i64: 128, 384>}]} {
    %c0 = arith.constant 0 : index
    %c0_0 = arith.constant 0 : index
    %0 = vector.load %arg1[%c0, %c0_0] : memref<128x128xbf16, #tpu.memory_space<vmem>>, vector<128x128xbf16>
    %c0_1 = arith.constant 0 : index
    %c0_2 = arith.constant 0 : index
    %1 = vector.load %arg2[%c0_1, %c0_2] : memref<128x384xbf16, #tpu.memory_space<vmem>>, vector<128x384xbf16>
    %cst = arith.constant dense<0.000000e+00> : vector<128x384xf32>
    %2 = tpu.matmul %0, %1, %cst {dimension_numbers = #tpu.dot_dimension_numbers<[1], [0], [0], [1], [0, 0, 1, 1], [], []>} : vector<128x128xbf16>, vector<128x384xbf16>, vector<128x384xf32> -> vector<128x384xf32>
    %c0_3 = arith.constant 0 : index
    %c0_4 = arith.constant 0 : index
    %3 = vector.load %arg3[%c0_3, %c0_4] : memref<1x384xf32, #tpu.memory_space<vmem>>, vector<1x384xf32>
    %4 = vector.broadcast %3 : vector<1x384xf32> to vector<128x384xf32>
    %5 = arith.addf %2, %4 : vector<128x384xf32>
    %6 = arith.truncf %5 : vector<128x384xf32> to vector<128x384xbf16>
    %c0_5 = arith.constant 0 : index
    %c0_6 = arith.constant 0 : index
    %7 = vector.load %arg4[%c0_5, %c0_6] : memref<128x384xbf16, #tpu.memory_space<vmem>>, vector<128x384xbf16>
    tpu.vector_store %arg4[%c0_5, %c0_6], %6 {strides = array<i32>} : memref<128x384xbf16, #tpu.memory_space<vmem>>, vector<128x384xbf16>,
    return
  }
  func.func @transform_0(%arg0: i32) -> (i32, i32) {
    %c0_i32 = arith.constant 0 : i32
    %c0_i32_0 = arith.constant 0 : i32
    return %arg0, %c0_i32 : i32, i32
  }
  func.func @transform_1(%arg0: i32) -> (i32, i32) {
    %c0_i32 = arith.constant 0 : i32
    %c0_i32_0 = arith.constant 0 : i32
    %c0_i32_1 = arith.constant 0 : i32
    return %c0_i32, %c0_i32_0 : i32, i32
  }
  func.func @transform_2(%arg0: i32) -> (i32, i32) {
    %c0_i32 = arith.constant 0 : i32
    %c0_i32_0 = arith.constant 0 : i32
    %c0_i32_1 = arith.constant 0 : i32
    return %c0_i32, %c0_i32_0 : i32, i32
  }
  func.func @transform_3(%arg0: i32) -> (i32, i32) {
    %c0_i32 = arith.constant 0 : i32
    %c0_i32_0 = arith.constant 0 : i32
    return %arg0, %c0_i32 : i32, i32
  }
}

module attributes {stable_mosaic.version = 11 : i64} {
  func.func @_attn_proj_kernel(%arg0: i32, %arg1: i32, %arg2: i32, %arg3: memref<1x64x128xbf16, #tpu.memory_space<vmem>>, %arg4: memref<1x64x128xbf16, #tpu.memory_space<vmem>>, %arg5: memref<1x64x128xbf16, #tpu.memory_space<vmem>>, %arg6: memref<128x128xbf16, #tpu.memory_space<vmem>>, %arg7: memref<1x128xf32, #tpu.memory_space<vmem>>, %arg8: memref<1x64x128xbf16, #tpu.memory_space<vmem>>, %arg9: memref<1x128xf32, #tpu.memory_space<vmem>>, %arg10: memref<1x128xf32, #tpu.memory_space<vmem>>, %arg11: memref<1x64x128xbf16, #tpu.memory_space<vmem>>, %arg12: memref<64x1xf32, #tpu.memory_space<vmem>>, %arg13: memref<64x1xf32, #tpu.memory_space<vmem>>, %arg14: memref<64x128xf32, #tpu.memory_space<vmem>>) attributes {dimension_semantics = [#tpu.dimension_semantics<parallel>, #tpu.dimension_semantics<parallel>, #tpu.dimension_semantics<arbitrary>], iteration_bounds = array<i64: 4, 1, 1>, scalar_prefetch = 0 : i64, scratch_operands = 3 : i64, tpu.core_type = #tpu.core_type<tc>, window_params = [{transform_indices = @transform_0, window_bounds = array<i64: 1, 64, 128>}, {transform_indices = @transform_1, window_bounds = array<i64: 1, 64, 128>}, {transform_indices = @transform_2, window_bounds = array<i64: 1, 64, 128>}, {pipeline_mode = #tpu.pipeline_mode<synchronous>, transform_indices = @transform_3, window_bounds = array<i64: 128, 128>}, {pipeline_mode = #tpu.pipeline_mode<synchronous>, transform_indices = @transform_4, window_bounds = array<i64: 1, 128>}, {transform_indices = @transform_5, window_bounds = array<i64: 1, 64, 128>}, {pipeline_mode = #tpu.pipeline_mode<synchronous>, transform_indices = @transform_6, window_bounds = array<i64: 1, 128>}, {pipeline_mode = #tpu.pipeline_mode<synchronous>, transform_indices = @transform_7, window_bounds = array<i64: 1, 128>}, {transform_indices = @transform_8, window_bounds = array<i64: 1, 64, 128>}]} {
    %c0_i32 = arith.constant 0 : i32
    %0 = arith.cmpi eq, %arg2, %c0_i32 : i32
    %1 = arith.extui %0 : i1 to i32
    %c0_i32_0 = arith.constant 0 : i32
    %2 = arith.cmpi ne, %1, %c0_i32_0 : i32
    scf.if %2 {
      %cst_27 = arith.constant 0xFF800000 : f32
      %38 = vector.broadcast %cst_27 : f32 to vector<64x1xf32>
      %c0_28 = arith.constant 0 : index
      %c0_29 = arith.constant 0 : index
      %39 = vector.load %arg12[%c0_28, %c0_29] : memref<64x1xf32, #tpu.memory_space<vmem>>, vector<64x1xf32>
      tpu.vector_store %arg12[%c0_28, %c0_29], %38 {strides = array<i32>} : memref<64x1xf32, #tpu.memory_space<vmem>>, vector<64x1xf32>,
      %cst_30 = arith.constant 0.000000e+00 : f32
      %40 = vector.broadcast %cst_30 : f32 to vector<64x1xf32>
      %c0_31 = arith.constant 0 : index
      %c0_32 = arith.constant 0 : index
      %41 = vector.load %arg13[%c0_31, %c0_32] : memref<64x1xf32, #tpu.memory_space<vmem>>, vector<64x1xf32>
      tpu.vector_store %arg13[%c0_31, %c0_32], %40 {strides = array<i32>} : memref<64x1xf32, #tpu.memory_space<vmem>>, vector<64x1xf32>,
      %cst_33 = arith.constant 0.000000e+00 : f32
      %42 = vector.broadcast %cst_33 : f32 to vector<64x128xf32>
      %c0_34 = arith.constant 0 : index
      %c0_35 = arith.constant 0 : index
      %43 = vector.load %arg14[%c0_34, %c0_35] : memref<64x128xf32, #tpu.memory_space<vmem>>, vector<64x128xf32>
      tpu.vector_store %arg14[%c0_34, %c0_35], %42 {strides = array<i32>} : memref<64x128xf32, #tpu.memory_space<vmem>>, vector<64x128xf32>,
    } else {
    }
    %c0 = arith.constant 0 : index
    %c0_1 = arith.constant 0 : index
    %c0_2 = arith.constant 0 : index
    %3 = vector.load %arg3[%c0, %c0_1, %c0_2] : memref<1x64x128xbf16, #tpu.memory_space<vmem>>, vector<1x64x128xbf16>
    %4 = vector.shape_cast %3 : vector<1x64x128xbf16> to vector<64x128xbf16>
    %c0_3 = arith.constant 0 : index
    %c0_4 = arith.constant 0 : index
    %c0_5 = arith.constant 0 : index
    %5 = vector.load %arg4[%c0_3, %c0_4, %c0_5] : memref<1x64x128xbf16, #tpu.memory_space<vmem>>, vector<1x64x128xbf16>
    %6 = vector.shape_cast %5 : vector<1x64x128xbf16> to vector<64x128xbf16>
    %cst = arith.constant dense<0.000000e+00> : vector<64x64xf32>
    %7 = tpu.matmul %4, %6, %cst {dimension_numbers = #tpu.dot_dimension_numbers<[1], [1], [0], [0], [0, 0, 1, 0], [], []>} : vector<64x128xbf16>, vector<64x128xbf16>, vector<64x64xf32> -> vector<64x64xf32>
    %cst_6 = arith.constant 0.0883883461 : f32
    %8 = vector.broadcast %cst_6 : f32 to vector<64x64xf32>
    %9 = arith.mulf %7, %8 : vector<64x64xf32>
    %c0_7 = arith.constant 0 : index
    %c0_8 = arith.constant 0 : index
    %10 = vector.load %arg12[%c0_7, %c0_8] : memref<64x1xf32, #tpu.memory_space<vmem>>, vector<64x1xf32>
    %cst_9 = arith.constant dense<0xFF800000> : vector<64xf32>
    %11 = vector.multi_reduction <maximumf>, %9, %cst_9 [1] : vector<64x64xf32> to vector<64xf32>
    %12 = vector.shape_cast %11 : vector<64xf32> to vector<64x1xf32>
    %13 = arith.maximumf %10, %12 : vector<64x1xf32>
    %14 = arith.subf %10, %13 : vector<64x1xf32>
    %15 = math.exp %14 : vector<64x1xf32>
    %16 = vector.broadcast %13 : vector<64x1xf32> to vector<64x64xf32>
    %17 = arith.subf %9, %16 : vector<64x64xf32>
    %18 = math.exp %17 : vector<64x64xf32>
    %c0_10 = arith.constant 0 : index
    %c0_11 = arith.constant 0 : index
    %19 = vector.load %arg13[%c0_10, %c0_11] : memref<64x1xf32, #tpu.memory_space<vmem>>, vector<64x1xf32>
    %20 = arith.mulf %15, %19 : vector<64x1xf32>
    %cst_12 = arith.constant dense<0.000000e+00> : vector<64xf32>
    %21 = vector.multi_reduction <add>, %18, %cst_12 [1] : vector<64x64xf32> to vector<64xf32>
    %22 = vector.shape_cast %21 : vector<64xf32> to vector<64x1xf32>
    %23 = arith.addf %20, %22 : vector<64x1xf32>
    %c0_13 = arith.constant 0 : index
    %c0_14 = arith.constant 0 : index
    %24 = vector.load %arg13[%c0_13, %c0_14] : memref<64x1xf32, #tpu.memory_space<vmem>>, vector<64x1xf32>
    tpu.vector_store %arg13[%c0_13, %c0_14], %23 {strides = array<i32>} : memref<64x1xf32, #tpu.memory_space<vmem>>, vector<64x1xf32>,
    %c0_15 = arith.constant 0 : index
    %c0_16 = arith.constant 0 : index
    %25 = vector.load %arg14[%c0_15, %c0_16] : memref<64x128xf32, #tpu.memory_space<vmem>>, vector<64x128xf32>
    %26 = vector.broadcast %15 : vector<64x1xf32> to vector<64x128xf32>
    %27 = arith.mulf %26, %25 : vector<64x128xf32>
    %28 = arith.truncf %18 : vector<64x64xf32> to vector<64x64xbf16>
    %c0_17 = arith.constant 0 : index
    %c0_18 = arith.constant 0 : index
    %c0_19 = arith.constant 0 : index
    %29 = vector.load %arg5[%c0_17, %c0_18, %c0_19] : memref<1x64x128xbf16, #tpu.memory_space<vmem>>, vector<1x64x128xbf16>
    %30 = vector.shape_cast %29 : vector<1x64x128xbf16> to vector<64x128xbf16>
    %cst_20 = arith.constant dense<0.000000e+00> : vector<64x128xf32>
    %31 = tpu.matmul %28, %30, %cst_20 {dimension_numbers = #tpu.dot_dimension_numbers<[1], [0], [0], [1], [0, 0, 1, 1], [], []>} : vector<64x64xbf16>, vector<64x128xbf16>, vector<64x128xf32> -> vector<64x128xf32>
    %32 = arith.addf %27, %31 : vector<64x128xf32>
    %c0_21 = arith.constant 0 : index
    %c0_22 = arith.constant 0 : index
    %33 = vector.load %arg14[%c0_21, %c0_22] : memref<64x128xf32, #tpu.memory_space<vmem>>, vector<64x128xf32>
    tpu.vector_store %arg14[%c0_21, %c0_22], %32 {strides = array<i32>} : memref<64x128xf32, #tpu.memory_space<vmem>>, vector<64x128xf32>,
    %c0_23 = arith.constant 0 : index
    %c0_24 = arith.constant 0 : index
    %34 = vector.load %arg12[%c0_23, %c0_24] : memref<64x1xf32, #tpu.memory_space<vmem>>, vector<64x1xf32>
    tpu.vector_store %arg12[%c0_23, %c0_24], %13 {strides = array<i32>} : memref<64x1xf32, #tpu.memory_space<vmem>>, vector<64x1xf32>,
    %c0_i32_25 = arith.constant 0 : i32
    %35 = arith.cmpi eq, %arg2, %c0_i32_25 : i32
    %36 = arith.extui %35 : i1 to i32
    %c0_i32_26 = arith.constant 0 : i32
    %37 = arith.cmpi ne, %36, %c0_i32_26 : i32
    scf.if %37 {
      %c0_27 = arith.constant 0 : index
      %c0_28 = arith.constant 0 : index
      %38 = vector.load %arg14[%c0_27, %c0_28] : memref<64x128xf32, #tpu.memory_space<vmem>>, vector<64x128xf32>
      %c0_29 = arith.constant 0 : index
      %c0_30 = arith.constant 0 : index
      %39 = vector.load %arg13[%c0_29, %c0_30] : memref<64x1xf32, #tpu.memory_space<vmem>>, vector<64x1xf32>
      %40 = tpu.reciprocal %39 {approx = true} : vector<64x1xf32> -> vector<64x1xf32>
      %41 = vector.broadcast %40 : vector<64x1xf32> to vector<64x128xf32>
      %42 = arith.mulf %38, %41 : vector<64x128xf32>
      %43 = arith.truncf %42 : vector<64x128xf32> to vector<64x128xbf16>
      %c0_31 = arith.constant 0 : index
      %c0_32 = arith.constant 0 : index
      %44 = vector.load %arg6[%c0_31, %c0_32] : memref<128x128xbf16, #tpu.memory_space<vmem>>, vector<128x128xbf16>
      %cst_33 = arith.constant dense<0.000000e+00> : vector<64x128xf32>
      %45 = tpu.matmul %43, %44, %cst_33 {dimension_numbers = #tpu.dot_dimension_numbers<[1], [0], [0], [1], [0, 0, 1, 1], [], []>} : vector<64x128xbf16>, vector<128x128xbf16>, vector<64x128xf32> -> vector<64x128xf32>
      %c0_34 = arith.constant 0 : index
      %c0_35 = arith.constant 0 : index
      %46 = vector.load %arg7[%c0_34, %c0_35] : memref<1x128xf32, #tpu.memory_space<vmem>>, vector<1x128xf32>
      %47 = vector.broadcast %46 : vector<1x128xf32> to vector<64x128xf32>
      %48 = arith.addf %45, %47 : vector<64x128xf32>
      %c0_36 = arith.constant 0 : index
      %c0_37 = arith.constant 0 : index
      %c0_38 = arith.constant 0 : index
      %49 = vector.load %arg8[%c0_36, %c0_37, %c0_38] : memref<1x64x128xbf16, #tpu.memory_space<vmem>>, vector<1x64x128xbf16>
      %50 = vector.shape_cast %49 : vector<1x64x128xbf16> to vector<64x128xbf16>
      %51 = arith.extf %50 : vector<64x128xbf16> to vector<64x128xf32>
      %52 = arith.addf %48, %51 : vector<64x128xf32>
      %cst_39 = arith.constant dense<0.000000e+00> : vector<64xf32>
      %53 = vector.multi_reduction <add>, %52, %cst_39 [1] : vector<64x128xf32> to vector<64xf32>
      %54 = vector.shape_cast %53 : vector<64xf32> to vector<64x1xf32>
      %cst_40 = arith.constant 1.280000e+02 : f32
      %55 = vector.broadcast %cst_40 : f32 to vector<64x1xf32>
      %56 = arith.divf %54, %55 : vector<64x1xf32>
      %57 = vector.broadcast %56 : vector<64x1xf32> to vector<64x128xf32>
      %58 = arith.subf %52, %57 : vector<64x128xf32>
      %59 = arith.mulf %58, %58 : vector<64x128xf32>
      %cst_41 = arith.constant dense<0.000000e+00> : vector<64xf32>
      %60 = vector.multi_reduction <add>, %59, %cst_41 [1] : vector<64x128xf32> to vector<64xf32>
      %61 = vector.shape_cast %60 : vector<64xf32> to vector<64x1xf32>
      %cst_42 = arith.constant 1.280000e+02 : f32
      %62 = vector.broadcast %cst_42 : f32 to vector<64x1xf32>
      %63 = arith.divf %61, %62 : vector<64x1xf32>
      %64 = vector.broadcast %56 : vector<64x1xf32> to vector<64x128xf32>
      %65 = arith.subf %52, %64 : vector<64x128xf32>
      %cst_43 = arith.constant 9.99999974E-6 : f32
      %66 = vector.broadcast %cst_43 : f32 to vector<64x1xf32>
      %67 = arith.addf %63, %66 : vector<64x1xf32>
      %68 = math.rsqrt %67 : vector<64x1xf32>
      %69 = vector.broadcast %68 : vector<64x1xf32> to vector<64x128xf32>
      %70 = arith.mulf %65, %69 : vector<64x128xf32>
      %c0_44 = arith.constant 0 : index
      %c0_45 = arith.constant 0 : index
      %71 = vector.load %arg9[%c0_44, %c0_45] : memref<1x128xf32, #tpu.memory_space<vmem>>, vector<1x128xf32>
      %72 = vector.broadcast %71 : vector<1x128xf32> to vector<64x128xf32>
      %73 = arith.mulf %70, %72 : vector<64x128xf32>
      %c0_46 = arith.constant 0 : index
      %c0_47 = arith.constant 0 : index
      %74 = vector.load %arg10[%c0_46, %c0_47] : memref<1x128xf32, #tpu.memory_space<vmem>>, vector<1x128xf32>
      %75 = vector.broadcast %74 : vector<1x128xf32> to vector<64x128xf32>
      %76 = arith.addf %73, %75 : vector<64x128xf32>
      %77 = arith.truncf %76 : vector<64x128xf32> to vector<64x128xbf16>
      %c0_48 = arith.constant 0 : index
      %c0_49 = arith.constant 0 : index
      %c0_50 = arith.constant 0 : index
      %78 = vector.load %arg11[%c0_48, %c0_49, %c0_50] : memref<1x64x128xbf16, #tpu.memory_space<vmem>>, vector<1x64x128xbf16>
      %79 = vector.shape_cast %78 : vector<1x64x128xbf16> to vector<64x128xbf16>
      %80 = vector.shape_cast %77 : vector<64x128xbf16> to vector<1x64x128xbf16>
      tpu.vector_store %arg11[%c0_48, %c0_49, %c0_50], %80 {strides = array<i32>} : memref<1x64x128xbf16, #tpu.memory_space<vmem>>, vector<1x64x128xbf16>,
    } else {
    }
    return
  }
  func.func @transform_0(%arg0: i32, %arg1: i32, %arg2: i32) -> (i32, i32, i32) {
    %c0_i32 = arith.constant 0 : i32
    %c0_i32_0 = arith.constant 0 : i32
    return %arg0, %arg1, %c0_i32 : i32, i32, i32
  }
  func.func @transform_1(%arg0: i32, %arg1: i32, %arg2: i32) -> (i32, i32, i32) {
    %c2_i32 = arith.constant 2 : i32
    %0 = arith.addi %arg0, %c2_i32 : i32
    %c4_i32 = arith.constant 4 : i32
    %c0_i32 = arith.constant 0 : i32
    %1 = arith.cmpi eq, %c4_i32, %c0_i32 : i32
    %c1_i32 = arith.constant 1 : i32
    %2 = arith.select %1, %c1_i32, %c4_i32 : i32
    %3 = arith.remsi %0, %2 : i32
    %c0_i32_0 = arith.constant 0 : i32
    %4 = arith.cmpi ne, %3, %c0_i32_0 : i32
    %c0_i32_1 = arith.constant 0 : i32
    %5 = arith.cmpi slt, %3, %c0_i32_1 : i32
    %c0_i32_2 = arith.constant 0 : i32
    %6 = arith.cmpi slt, %2, %c0_i32_2 : i32
    %7 = arith.xori %5, %6 : i1
    %8 = arith.andi %7, %4 : i1
    %9 = arith.addi %3, %2 : i32
    %10 = arith.select %8, %9, %3 : i32
    %c1_i32_3 = arith.constant 1 : i32
    %c0_i32_4 = arith.constant 0 : i32
    return %10, %arg2, %c1_i32_3 : i32, i32, i32
  }
  func.func @transform_2(%arg0: i32, %arg1: i32, %arg2: i32) -> (i32, i32, i32) {
    %c2_i32 = arith.constant 2 : i32
    %0 = arith.addi %arg0, %c2_i32 : i32
    %c4_i32 = arith.constant 4 : i32
    %c0_i32 = arith.constant 0 : i32
    %1 = arith.cmpi eq, %c4_i32, %c0_i32 : i32
    %c1_i32 = arith.constant 1 : i32
    %2 = arith.select %1, %c1_i32, %c4_i32 : i32
    %3 = arith.remsi %0, %2 : i32
    %c0_i32_0 = arith.constant 0 : i32
    %4 = arith.cmpi ne, %3, %c0_i32_0 : i32
    %c0_i32_1 = arith.constant 0 : i32
    %5 = arith.cmpi slt, %3, %c0_i32_1 : i32
    %c0_i32_2 = arith.constant 0 : i32
    %6 = arith.cmpi slt, %2, %c0_i32_2 : i32
    %7 = arith.xori %5, %6 : i1
    %8 = arith.andi %7, %4 : i1
    %9 = arith.addi %3, %2 : i32
    %10 = arith.select %8, %9, %3 : i32
    %c2_i32_3 = arith.constant 2 : i32
    %c0_i32_4 = arith.constant 0 : i32
    return %10, %arg2, %c2_i32_3 : i32, i32, i32
  }
  func.func @transform_3(%arg0: i32, %arg1: i32, %arg2: i32) -> (i32, i32) {
    %c0_i32 = arith.constant 0 : i32
    %c0_i32_0 = arith.constant 0 : i32
    %c0_i32_1 = arith.constant 0 : i32
    return %c0_i32, %c0_i32_0 : i32, i32
  }
  func.func @transform_4(%arg0: i32, %arg1: i32, %arg2: i32) -> (i32, i32) {
    %c0_i32 = arith.constant 0 : i32
    %c0_i32_0 = arith.constant 0 : i32
    %c0_i32_1 = arith.constant 0 : i32
    return %c0_i32, %c0_i32_0 : i32, i32
  }
  func.func @transform_5(%arg0: i32, %arg1: i32, %arg2: i32) -> (i32, i32, i32) {
    %c0_i32 = arith.constant 0 : i32
    %c0_i32_0 = arith.constant 0 : i32
    return %arg0, %arg1, %c0_i32 : i32, i32, i32
  }
  func.func @transform_6(%arg0: i32, %arg1: i32, %arg2: i32) -> (i32, i32) {
    %c0_i32 = arith.constant 0 : i32
    %c0_i32_0 = arith.constant 0 : i32
    %c0_i32_1 = arith.constant 0 : i32
    return %c0_i32, %c0_i32_0 : i32, i32
  }
  func.func @transform_7(%arg0: i32, %arg1: i32, %arg2: i32) -> (i32, i32) {
    %c0_i32 = arith.constant 0 : i32
    %c0_i32_0 = arith.constant 0 : i32
    %c0_i32_1 = arith.constant 0 : i32
    return %c0_i32, %c0_i32_0 : i32, i32
  }
  func.func @transform_8(%arg0: i32, %arg1: i32, %arg2: i32) -> (i32, i32, i32) {
    %c0_i32 = arith.constant 0 : i32
    %c0_i32_0 = arith.constant 0 : i32
    return %arg0, %arg1, %c0_i32 : i32, i32, i32
  }
}

module attributes {stable_mosaic.version = 11 : i64} {
  func.func @_ffn_res_ln_kernel(%arg0: i32, %arg1: memref<128x128xbf16, #tpu.memory_space<vmem>>, %arg2: memref<128x512xbf16, #tpu.memory_space<vmem>>, %arg3: memref<1x512xf32, #tpu.memory_space<vmem>>, %arg4: memref<512x128xbf16, #tpu.memory_space<vmem>>, %arg5: memref<1x128xf32, #tpu.memory_space<vmem>>, %arg6: memref<1x128xf32, #tpu.memory_space<vmem>>, %arg7: memref<1x128xf32, #tpu.memory_space<vmem>>, %arg8: memref<128x128xbf16, #tpu.memory_space<vmem>>) attributes {dimension_semantics = [#tpu.dimension_semantics<parallel>], iteration_bounds = array<i64: 2>, scalar_prefetch = 0 : i64, scratch_operands = 0 : i64, tpu.core_type = #tpu.core_type<tc>, window_params = [{transform_indices = @transform_0, window_bounds = array<i64: 128, 128>}, {pipeline_mode = #tpu.pipeline_mode<synchronous>, transform_indices = @transform_1, window_bounds = array<i64: 128, 512>}, {pipeline_mode = #tpu.pipeline_mode<synchronous>, transform_indices = @transform_2, window_bounds = array<i64: 1, 512>}, {pipeline_mode = #tpu.pipeline_mode<synchronous>, transform_indices = @transform_3, window_bounds = array<i64: 512, 128>}, {pipeline_mode = #tpu.pipeline_mode<synchronous>, transform_indices = @transform_4, window_bounds = array<i64: 1, 128>}, {pipeline_mode = #tpu.pipeline_mode<synchronous>, transform_indices = @transform_5, window_bounds = array<i64: 1, 128>}, {pipeline_mode = #tpu.pipeline_mode<synchronous>, transform_indices = @transform_6, window_bounds = array<i64: 1, 128>}, {transform_indices = @transform_7, window_bounds = array<i64: 128, 128>}]} {
    %c0 = arith.constant 0 : index
    %c0_0 = arith.constant 0 : index
    %0 = vector.load %arg1[%c0, %c0_0] : memref<128x128xbf16, #tpu.memory_space<vmem>>, vector<128x128xbf16>
    %c0_1 = arith.constant 0 : index
    %c0_2 = arith.constant 0 : index
    %1 = vector.load %arg2[%c0_1, %c0_2] : memref<128x512xbf16, #tpu.memory_space<vmem>>, vector<128x512xbf16>
    %cst = arith.constant dense<0.000000e+00> : vector<128x512xf32>
    %2 = tpu.matmul %0, %1, %cst {dimension_numbers = #tpu.dot_dimension_numbers<[1], [0], [0], [1], [0, 0, 1, 1], [], []>} : vector<128x128xbf16>, vector<128x512xbf16>, vector<128x512xf32> -> vector<128x512xf32>
    %c0_3 = arith.constant 0 : index
    %c0_4 = arith.constant 0 : index
    %3 = vector.load %arg3[%c0_3, %c0_4] : memref<1x512xf32, #tpu.memory_space<vmem>>, vector<1x512xf32>
    %4 = vector.broadcast %3 : vector<1x512xf32> to vector<128x512xf32>
    %5 = arith.addf %2, %4 : vector<128x512xf32>
    %6 = arith.mulf %5, %5 : vector<128x512xf32>
    %7 = arith.mulf %5, %6 : vector<128x512xf32>
    %cst_5 = arith.constant 4.471500e-02 : f32
    %8 = vector.broadcast %cst_5 : f32 to vector<128x512xf32>
    %9 = arith.mulf %8, %7 : vector<128x512xf32>
    %10 = arith.addf %5, %9 : vector<128x512xf32>
    %cst_6 = arith.constant 0.797884583 : f32
    %11 = vector.broadcast %cst_6 : f32 to vector<128x512xf32>
    %12 = arith.mulf %11, %10 : vector<128x512xf32>
    %13 = math.tanh %12 : vector<128x512xf32>
    %cst_7 = arith.constant 1.000000e+00 : f32
    %14 = vector.broadcast %cst_7 : f32 to vector<128x512xf32>
    %15 = arith.addf %14, %13 : vector<128x512xf32>
    %cst_8 = arith.constant 5.000000e-01 : f32
    %16 = vector.broadcast %cst_8 : f32 to vector<128x512xf32>
    %17 = arith.mulf %16, %15 : vector<128x512xf32>
    %18 = arith.mulf %5, %17 : vector<128x512xf32>
    %19 = arith.truncf %18 : vector<128x512xf32> to vector<128x512xbf16>
    %c0_9 = arith.constant 0 : index
    %c0_10 = arith.constant 0 : index
    %20 = vector.load %arg4[%c0_9, %c0_10] : memref<512x128xbf16, #tpu.memory_space<vmem>>, vector<512x128xbf16>
    %cst_11 = arith.constant dense<0.000000e+00> : vector<128x128xf32>
    %21 = tpu.matmul %19, %20, %cst_11 {dimension_numbers = #tpu.dot_dimension_numbers<[1], [0], [0], [1], [0, 0, 1, 1], [], []>} : vector<128x512xbf16>, vector<512x128xbf16>, vector<128x128xf32> -> vector<128x128xf32>
    %c0_12 = arith.constant 0 : index
    %c0_13 = arith.constant 0 : index
    %22 = vector.load %arg5[%c0_12, %c0_13] : memref<1x128xf32, #tpu.memory_space<vmem>>, vector<1x128xf32>
    %23 = vector.broadcast %22 : vector<1x128xf32> to vector<128x128xf32>
    %24 = arith.addf %21, %23 : vector<128x128xf32>
    %25 = arith.extf %0 : vector<128x128xbf16> to vector<128x128xf32>
    %26 = arith.addf %24, %25 : vector<128x128xf32>
    %cst_14 = arith.constant dense<0.000000e+00> : vector<128xf32>
    %27 = vector.multi_reduction <add>, %26, %cst_14 [1] : vector<128x128xf32> to vector<128xf32>
    %28 = vector.shape_cast %27 : vector<128xf32> to vector<128x1xf32>
    %cst_15 = arith.constant 1.280000e+02 : f32
    %29 = vector.broadcast %cst_15 : f32 to vector<128x1xf32>
    %30 = arith.divf %28, %29 : vector<128x1xf32>
    %31 = vector.broadcast %30 : vector<128x1xf32> to vector<128x128xf32>
    %32 = arith.subf %26, %31 : vector<128x128xf32>
    %33 = arith.mulf %32, %32 : vector<128x128xf32>
    %cst_16 = arith.constant dense<0.000000e+00> : vector<128xf32>
    %34 = vector.multi_reduction <add>, %33, %cst_16 [1] : vector<128x128xf32> to vector<128xf32>
    %35 = vector.shape_cast %34 : vector<128xf32> to vector<128x1xf32>
    %cst_17 = arith.constant 1.280000e+02 : f32
    %36 = vector.broadcast %cst_17 : f32 to vector<128x1xf32>
    %37 = arith.divf %35, %36 : vector<128x1xf32>
    %38 = vector.broadcast %30 : vector<128x1xf32> to vector<128x128xf32>
    %39 = arith.subf %26, %38 : vector<128x128xf32>
    %cst_18 = arith.constant 9.99999974E-6 : f32
    %40 = vector.broadcast %cst_18 : f32 to vector<128x1xf32>
    %41 = arith.addf %37, %40 : vector<128x1xf32>
    %42 = math.rsqrt %41 : vector<128x1xf32>
    %43 = vector.broadcast %42 : vector<128x1xf32> to vector<128x128xf32>
    %44 = arith.mulf %39, %43 : vector<128x128xf32>
    %c0_19 = arith.constant 0 : index
    %c0_20 = arith.constant 0 : index
    %45 = vector.load %arg6[%c0_19, %c0_20] : memref<1x128xf32, #tpu.memory_space<vmem>>, vector<1x128xf32>
    %46 = vector.broadcast %45 : vector<1x128xf32> to vector<128x128xf32>
    %47 = arith.mulf %44, %46 : vector<128x128xf32>
    %c0_21 = arith.constant 0 : index
    %c0_22 = arith.constant 0 : index
    %48 = vector.load %arg7[%c0_21, %c0_22] : memref<1x128xf32, #tpu.memory_space<vmem>>, vector<1x128xf32>
    %49 = vector.broadcast %48 : vector<1x128xf32> to vector<128x128xf32>
    %50 = arith.addf %47, %49 : vector<128x128xf32>
    %51 = arith.truncf %50 : vector<128x128xf32> to vector<128x128xbf16>
    %c0_23 = arith.constant 0 : index
    %c0_24 = arith.constant 0 : index
    %52 = vector.load %arg8[%c0_23, %c0_24] : memref<128x128xbf16, #tpu.memory_space<vmem>>, vector<128x128xbf16>
    tpu.vector_store %arg8[%c0_23, %c0_24], %51 {strides = array<i32>} : memref<128x128xbf16, #tpu.memory_space<vmem>>, vector<128x128xbf16>,
    return
  }
  func.func @transform_0(%arg0: i32) -> (i32, i32) {
    %c0_i32 = arith.constant 0 : i32
    %c0_i32_0 = arith.constant 0 : i32
    return %arg0, %c0_i32 : i32, i32
  }
  func.func @transform_1(%arg0: i32) -> (i32, i32) {
    %c0_i32 = arith.constant 0 : i32
    %c0_i32_0 = arith.constant 0 : i32
    %c0_i32_1 = arith.constant 0 : i32
    return %c0_i32, %c0_i32_0 : i32, i32
  }
  func.func @transform_2(%arg0: i32) -> (i32, i32) {
    %c0_i32 = arith.constant 0 : i32
    %c0_i32_0 = arith.constant 0 : i32
    %c0_i32_1 = arith.constant 0 : i32
    return %c0_i32, %c0_i32_0 : i32, i32
  }
  func.func @transform_3(%arg0: i32) -> (i32, i32) {
    %c0_i32 = arith.constant 0 : i32
    %c0_i32_0 = arith.constant 0 : i32
    %c0_i32_1 = arith.constant 0 : i32
    return %c0_i32, %c0_i32_0 : i32, i32
  }
  func.func @transform_4(%arg0: i32) -> (i32, i32) {
    %c0_i32 = arith.constant 0 : i32
    %c0_i32_0 = arith.constant 0 : i32
    %c0_i32_1 = arith.constant 0 : i32
    return %c0_i32, %c0_i32_0 : i32, i32
  }
  func.func @transform_5(%arg0: i32) -> (i32, i32) {
    %c0_i32 = arith.constant 0 : i32
    %c0_i32_0 = arith.constant 0 : i32
    %c0_i32_1 = arith.constant 0 : i32
    return %c0_i32, %c0_i32_0 : i32, i32
  }
  func.func @transform_6(%arg0: i32) -> (i32, i32) {
    %c0_i32 = arith.constant 0 : i32
    %c0_i32_0 = arith.constant 0 : i32
    %c0_i32_1 = arith.constant 0 : i32
    return %c0_i32, %c0_i32_0 : i32, i32
  }
  func.func @transform_7(%arg0: i32) -> (i32, i32) {
    %c0_i32 = arith.constant 0 : i32
    %c0_i32_0 = arith.constant 0 : i32
    return %arg0, %c0_i32 : i32, i32
  }
}

module attributes {stable_mosaic.version = 11 : i64} {
  func.func @_corr_flash_kernel(%arg0: i32, %arg1: i32, %arg2: i32, %arg3: memref<1x64x128xbf16, #tpu.memory_space<vmem>>, %arg4: memref<1x64x128xbf16, #tpu.memory_space<vmem>>, %arg5: memref<1x64x128xf32, #tpu.memory_space<vmem>>, %arg6: memref<1x64x128xf32, #tpu.memory_space<vmem>>, %arg7: memref<64x1xf32, #tpu.memory_space<vmem>>, %arg8: memref<64x1xf32, #tpu.memory_space<vmem>>, %arg9: memref<64x128xf32, #tpu.memory_space<vmem>>) attributes {dimension_semantics = [#tpu.dimension_semantics<parallel>, #tpu.dimension_semantics<parallel>, #tpu.dimension_semantics<arbitrary>], iteration_bounds = array<i64: 2, 1, 1>, scalar_prefetch = 0 : i64, scratch_operands = 3 : i64, tpu.core_type = #tpu.core_type<tc>, window_params = [{transform_indices = @transform_0, window_bounds = array<i64: 1, 64, 128>}, {transform_indices = @transform_1, window_bounds = array<i64: 1, 64, 128>}, {transform_indices = @transform_2, window_bounds = array<i64: 1, 64, 128>}, {transform_indices = @transform_3, window_bounds = array<i64: 1, 64, 128>}]} {
    %c0_i32 = arith.constant 0 : i32
    %0 = arith.cmpi eq, %arg2, %c0_i32 : i32
    %1 = arith.extui %0 : i1 to i32
    %c0_i32_0 = arith.constant 0 : i32
    %2 = arith.cmpi ne, %1, %c0_i32_0 : i32
    scf.if %2 {
      %cst_27 = arith.constant 0xFF800000 : f32
      %37 = vector.broadcast %cst_27 : f32 to vector<64x1xf32>
      %c0_28 = arith.constant 0 : index
      %c0_29 = arith.constant 0 : index
      %38 = vector.load %arg7[%c0_28, %c0_29] : memref<64x1xf32, #tpu.memory_space<vmem>>, vector<64x1xf32>
      tpu.vector_store %arg7[%c0_28, %c0_29], %37 {strides = array<i32>} : memref<64x1xf32, #tpu.memory_space<vmem>>, vector<64x1xf32>,
      %cst_30 = arith.constant 0.000000e+00 : f32
      %39 = vector.broadcast %cst_30 : f32 to vector<64x1xf32>
      %c0_31 = arith.constant 0 : index
      %c0_32 = arith.constant 0 : index
      %40 = vector.load %arg8[%c0_31, %c0_32] : memref<64x1xf32, #tpu.memory_space<vmem>>, vector<64x1xf32>
      tpu.vector_store %arg8[%c0_31, %c0_32], %39 {strides = array<i32>} : memref<64x1xf32, #tpu.memory_space<vmem>>, vector<64x1xf32>,
      %cst_33 = arith.constant 0.000000e+00 : f32
      %41 = vector.broadcast %cst_33 : f32 to vector<64x128xf32>
      %c0_34 = arith.constant 0 : index
      %c0_35 = arith.constant 0 : index
      %42 = vector.load %arg9[%c0_34, %c0_35] : memref<64x128xf32, #tpu.memory_space<vmem>>, vector<64x128xf32>
      tpu.vector_store %arg9[%c0_34, %c0_35], %41 {strides = array<i32>} : memref<64x128xf32, #tpu.memory_space<vmem>>, vector<64x128xf32>,
    } else {
    }
    %c0 = arith.constant 0 : index
    %c0_1 = arith.constant 0 : index
    %c0_2 = arith.constant 0 : index
    %3 = vector.load %arg3[%c0, %c0_1, %c0_2] : memref<1x64x128xbf16, #tpu.memory_space<vmem>>, vector<1x64x128xbf16>
    %4 = vector.shape_cast %3 : vector<1x64x128xbf16> to vector<64x128xbf16>
    %c0_3 = arith.constant 0 : index
    %c0_4 = arith.constant 0 : index
    %c0_5 = arith.constant 0 : index
    %5 = vector.load %arg4[%c0_3, %c0_4, %c0_5] : memref<1x64x128xbf16, #tpu.memory_space<vmem>>, vector<1x64x128xbf16>
    %6 = vector.shape_cast %5 : vector<1x64x128xbf16> to vector<64x128xbf16>
    %cst = arith.constant dense<0.000000e+00> : vector<64x64xf32>
    %7 = tpu.matmul %4, %6, %cst {dimension_numbers = #tpu.dot_dimension_numbers<[1], [1], [0], [0], [0, 0, 1, 0], [], []>} : vector<64x128xbf16>, vector<64x128xbf16>, vector<64x64xf32> -> vector<64x64xf32>
    %cst_6 = arith.constant 0.0883883461 : f32
    %8 = vector.broadcast %cst_6 : f32 to vector<64x64xf32>
    %9 = arith.mulf %7, %8 : vector<64x64xf32>
    %c0_7 = arith.constant 0 : index
    %c0_8 = arith.constant 0 : index
    %10 = vector.load %arg7[%c0_7, %c0_8] : memref<64x1xf32, #tpu.memory_space<vmem>>, vector<64x1xf32>
    %cst_9 = arith.constant dense<0xFF800000> : vector<64xf32>
    %11 = vector.multi_reduction <maximumf>, %9, %cst_9 [1] : vector<64x64xf32> to vector<64xf32>
    %12 = vector.shape_cast %11 : vector<64xf32> to vector<64x1xf32>
    %13 = arith.maximumf %10, %12 : vector<64x1xf32>
    %14 = arith.subf %10, %13 : vector<64x1xf32>
    %15 = math.exp %14 : vector<64x1xf32>
    %16 = vector.broadcast %13 : vector<64x1xf32> to vector<64x64xf32>
    %17 = arith.subf %9, %16 : vector<64x64xf32>
    %18 = math.exp %17 : vector<64x64xf32>
    %c0_10 = arith.constant 0 : index
    %c0_11 = arith.constant 0 : index
    %19 = vector.load %arg8[%c0_10, %c0_11] : memref<64x1xf32, #tpu.memory_space<vmem>>, vector<64x1xf32>
    %20 = arith.mulf %15, %19 : vector<64x1xf32>
    %cst_12 = arith.constant dense<0.000000e+00> : vector<64xf32>
    %21 = vector.multi_reduction <add>, %18, %cst_12 [1] : vector<64x64xf32> to vector<64xf32>
    %22 = vector.shape_cast %21 : vector<64xf32> to vector<64x1xf32>
    %23 = arith.addf %20, %22 : vector<64x1xf32>
    %c0_13 = arith.constant 0 : index
    %c0_14 = arith.constant 0 : index
    %24 = vector.load %arg8[%c0_13, %c0_14] : memref<64x1xf32, #tpu.memory_space<vmem>>, vector<64x1xf32>
    tpu.vector_store %arg8[%c0_13, %c0_14], %23 {strides = array<i32>} : memref<64x1xf32, #tpu.memory_space<vmem>>, vector<64x1xf32>,
    %c0_15 = arith.constant 0 : index
    %c0_16 = arith.constant 0 : index
    %25 = vector.load %arg9[%c0_15, %c0_16] : memref<64x128xf32, #tpu.memory_space<vmem>>, vector<64x128xf32>
    %26 = vector.broadcast %15 : vector<64x1xf32> to vector<64x128xf32>
    %27 = arith.mulf %26, %25 : vector<64x128xf32>
    %c0_17 = arith.constant 0 : index
    %c0_18 = arith.constant 0 : index
    %c0_19 = arith.constant 0 : index
    %28 = vector.load %arg5[%c0_17, %c0_18, %c0_19] : memref<1x64x128xf32, #tpu.memory_space<vmem>>, vector<1x64x128xf32>
    %29 = vector.shape_cast %28 : vector<1x64x128xf32> to vector<64x128xf32>
    %cst_20 = arith.constant dense<0.000000e+00> : vector<64x128xf32>
    %30 = tpu.matmul %18, %29, %cst_20 {dimension_numbers = #tpu.dot_dimension_numbers<[1], [0], [0], [1], [0, 0, 1, 1], [], []>} : vector<64x64xf32>, vector<64x128xf32>, vector<64x128xf32> -> vector<64x128xf32>
    %31 = arith.addf %27, %30 : vector<64x128xf32>
    %c0_21 = arith.constant 0 : index
    %c0_22 = arith.constant 0 : index
    %32 = vector.load %arg9[%c0_21, %c0_22] : memref<64x128xf32, #tpu.memory_space<vmem>>, vector<64x128xf32>
    tpu.vector_store %arg9[%c0_21, %c0_22], %31 {strides = array<i32>} : memref<64x128xf32, #tpu.memory_space<vmem>>, vector<64x128xf32>,
    %c0_23 = arith.constant 0 : index
    %c0_24 = arith.constant 0 : index
    %33 = vector.load %arg7[%c0_23, %c0_24] : memref<64x1xf32, #tpu.memory_space<vmem>>, vector<64x1xf32>
    tpu.vector_store %arg7[%c0_23, %c0_24], %13 {strides = array<i32>} : memref<64x1xf32, #tpu.memory_space<vmem>>, vector<64x1xf32>,
    %c0_i32_25 = arith.constant 0 : i32
    %34 = arith.cmpi eq, %arg2, %c0_i32_25 : i32
    %35 = arith.extui %34 : i1 to i32
    %c0_i32_26 = arith.constant 0 : i32
    %36 = arith.cmpi ne, %35, %c0_i32_26 : i32
    scf.if %36 {
      %c0_27 = arith.constant 0 : index
      %c0_28 = arith.constant 0 : index
      %37 = vector.load %arg9[%c0_27, %c0_28] : memref<64x128xf32, #tpu.memory_space<vmem>>, vector<64x128xf32>
      %c0_29 = arith.constant 0 : index
      %c0_30 = arith.constant 0 : index
      %38 = vector.load %arg8[%c0_29, %c0_30] : memref<64x1xf32, #tpu.memory_space<vmem>>, vector<64x1xf32>
      %39 = vector.broadcast %38 : vector<64x1xf32> to vector<64x128xf32>
      %40 = arith.divf %37, %39 : vector<64x128xf32>
      %c0_31 = arith.constant 0 : index
      %c0_32 = arith.constant 0 : index
      %c0_33 = arith.constant 0 : index
      %41 = vector.load %arg6[%c0_31, %c0_32, %c0_33] : memref<1x64x128xf32, #tpu.memory_space<vmem>>, vector<1x64x128xf32>
      %42 = vector.shape_cast %41 : vector<1x64x128xf32> to vector<64x128xf32>
      %43 = vector.shape_cast %40 : vector<64x128xf32> to vector<1x64x128xf32>
      tpu.vector_store %arg6[%c0_31, %c0_32, %c0_33], %43 {strides = array<i32>} : memref<1x64x128xf32, #tpu.memory_space<vmem>>, vector<1x64x128xf32>,
    } else {
    }
    return
  }
  func.func @transform_0(%arg0: i32, %arg1: i32, %arg2: i32) -> (i32, i32, i32) {
    %c0_i32 = arith.constant 0 : i32
    %c0_i32_0 = arith.constant 0 : i32
    return %arg0, %arg1, %c0_i32 : i32, i32, i32
  }
  func.func @transform_1(%arg0: i32, %arg1: i32, %arg2: i32) -> (i32, i32, i32) {
    %c0_i32 = arith.constant 0 : i32
    %c0_i32_0 = arith.constant 0 : i32
    return %arg0, %arg2, %c0_i32 : i32, i32, i32
  }
  func.func @transform_2(%arg0: i32, %arg1: i32, %arg2: i32) -> (i32, i32, i32) {
    %c0_i32 = arith.constant 0 : i32
    %c0_i32_0 = arith.constant 0 : i32
    %c0_i32_1 = arith.constant 0 : i32
    return %c0_i32, %arg2, %c0_i32_0 : i32, i32, i32
  }
  func.func @transform_3(%arg0: i32, %arg1: i32, %arg2: i32) -> (i32, i32, i32) {
    %c0_i32 = arith.constant 0 : i32
    %c0_i32_0 = arith.constant 0 : i32
    return %arg0, %arg1, %c0_i32 : i32, i32, i32
  }
}

</mosaic_0001>

<bundles_post_ra>
// kernel: _lambda_.12
= control target key start
LH: loop header
LB: loop body
LE: loop exit
PB: predicated region body
PF: predicated region fallthrough
CT: control target
= control target key end

     0   :  { %s752_s12 = smov 0   ;;  %s838_s0 = inlined_call_operand.vmem [shape: f32[256,48], index: 0, kind: input, shape index: {}]   ;;  %s839_s1 = inlined_call_operand.vmem [shape: f32[48,128], index: 1, kind: input, shape index: {}]   ;;  %s840_s2 = inlined_call_operand.vmem [shape: f32[1,128], index: 2, kind: input, shape index: {}]   ;;  %s841_s3 = inlined_call_operand.vmem [shape: bf16[256,128], index: 3, kind: output, shape index: {}]  }
   0x1 LB: > { %s533_s13 = sadd.s32 4294967295, %s730_s12   ;;  %p537_p0 = scmp.ge.s32.totalorder %s730_s12, 1  ;;  %s730_s12 = sphi %s752_s12, %s13_s12  }
   0x2   : > { %p138_p1 = scmp.lt.s32.totalorder %s730_s12, 3 }
   0x4   : > { %p139_p2 = pnand %p537_p0, %p138_p1 }
   0x5   : > { %v190_v0 = vld [vmem:[%s839_s1] sm:$0xff] (!%p139_p2)  ;;  %v191_v1 = vld [vmem:[%s839_s1 + $0x8] sm:$0xff] (!%p139_p2)  ;;  %v192_v2 = vld [vmem:[%s839_s1 + $0x10] sm:$0xff] (!%p139_p2)  ;;  %s538_s20 = sshll.u32 (!%p139_p2), %s533_s13, 4  ;;  %vm203_vm0 = vcmask (!%p139_p2), 392192  }
   0x6   : > { %142 = sbr.rel (%p139_p2) target bundleno = 251 (0xfb), region = 32  ;;  %v698_v3 = vpack.c.bf16 (!%p139_p2), %v191_v1, %v190_v0  ;;  %v193_v4 = vld [vmem:[%s839_s1 + $0x18] sm:$0xff] (!%p139_p2)  ;;  %p163_p3 = scmp.lt.s32.totalorder (!%p139_p2), %s538_s20, 31  ;;  %v194_v6 = vld [vmem:[%s839_s1 + $0x20] sm:$0xff] (!%p139_p2)  ;;  %v195_v7 = vld [vmem:[%s839_s1 + $0x28] sm:$0xff] (!%p139_p2) }
   0x7   : > { %v702_v5 = vpack.c.bf16 (!%p139_p2), %v193_v4, %v192_v2  ;;  %v706_v8 = vpack.c.bf16 (!%p139_p2), %v195_v7, %v194_v6  ;;  %v542_v25 = vld [vmem:[%s840_s2] ss:$0 sm:$0xff] (!%p139_p2) }
   0x8   : > { %699 = vmatprep.subr.bf16.mxu0 (!%p139_p2), %v698_v3  ;;  %710 = vmatprep.subr.bf16.mxu1 (!%p139_p2), %v698_v3 }
   0x9   : > { %701 = vmatpush3.bf16.msra.mxu0 (!%p139_p2), %v698_v3  ;;  %713 = vmatpush3.bf16.msra.mxu1 (!%p139_p2), %v698_v3 }
   0xa   : > { %703 = vmatprep.subr.bf16.mxu0 (!%p139_p2), %v702_v5  ;;  %711 = vmatprep.subr.bf16.mxu1 (!%p139_p2), %v702_v5 }
   0xd   : > { %s843_s20 = smov (!%p163_p3, %s538_s20), 31  ;;  %705 = vmatpush3.bf16.msra.mxu0 %v702_v5  ;;  %714 = vmatpush3.bf16.msra.mxu1 %v702_v5 }
   0xe   : > { %s539_s27 = sshll.u32 %s843_s20, 3  ;;  %707 = vmatprep.subr.bf16.mxu0 %v706_v8  ;;  %712 = vmatprep.subr.bf16.mxu1 %v706_v8  ;;  %s541_s6 = sshll.u32 %s843_s20, 2 }
   0xf   : > { %s784_s30 = scalar_lea.vmem %s838_s0, %s539_s27  ;;  %s825_s9 = scalar_lea.vmem %s841_s3, %s541_s6 }
  0x10   : > { %v174_v9 = vld [vmem:[%s784_s30] sm:$0xff]  ;;  %v175_v11 = vld [vmem:[%s784_s30 + $0x8] sm:$0xff]  ;;  %v176_v13 = vld [vmem:[%s784_s30 + $0x10] sm:$0xff] }
  0x11   : > { %v182_v10 = vld [vmem:[%s784_s30 + $0x40] sm:$0xff]  ;;  %674 = vmatprep.mubr.msk.f32.mxu0 %vm203_vm0, %v174_v9  ;;  %709 = vmatpush3.bf16.msra.mxu0 %v706_v8  ;;  %v183_v12 = vld [vmem:[%s784_s30 + $0x48] sm:$0xff]  ;;  %v184_v14 = vld [vmem:[%s784_s30 + $0x50] sm:$0xff] }
  0x12   : > { %686 = vmatprep.mubr.msk.f32.mxu1 %vm203_vm0, %v182_v10  ;;  %715 = vmatpush3.bf16.msra.mxu1 %v706_v8  ;;  %v177_v15 = vld [vmem:[%s784_s30 + $0x18] sm:$0xff]  ;;  %v178_v17 = vld [vmem:[%s784_s30 + $0x20] sm:$0xff]  ;;  %v179_v19 = vld [vmem:[%s784_s30 + $0x28] sm:$0xff] }
  0x13   : > { %v185_v16 = vld [vmem:[%s784_s30 + $0x58] sm:$0xff]  ;;  %v186_v18 = vld [vmem:[%s784_s30 + $0x60] sm:$0xff]  ;;  %v187_v20 = vld [vmem:[%s784_s30 + $0x68] sm:$0xff] }
  0x14   : > { %675 = vmatmul.mubr.msk.f32.vlgmr.msra.gmra.mrb[0].mxu0 %vm203_vm0, %v175_v11  ;;  %v180_v21 = vld [vmem:[%s784_s30 + $0x30] sm:$0xff]  ;;  %v181_v23 = vld [vmem:[%s784_s30 + $0x38] sm:$0xff] }
  0x15   : > { %687 = vmatmul.mubr.msk.f32.vlgmr.msra.gmra.mrb[0].mxu1 %vm203_vm0, %v183_v12  ;;  %677 = vmatprep.mubr.msk.f32.mxu0 %vm203_vm0, %v176_v13  ;;  %v188_v22 = vld [vmem:[%s784_s30 + $0x70] sm:$0xff]  ;;  %v189_v24 = vld [vmem:[%s784_s30 + $0x78] sm:$0xff] }
  0x16   : > { %689 = vmatprep.mubr.msk.f32.mxu1 %vm203_vm0, %v184_v14 }
  0x18   : > { %678 = vmatmul.mubr.msk.f32.gmra.mrb[2].mxu0 %vm203_vm0, %v177_v15 }
  0x19   : > { %690 = vmatmul.mubr.msk.f32.gmra.mrb[2].mxu1 %vm203_vm0, %v185_v16  ;;  %680 = vmatprep.mubr.msk.f32.mxu0 %vm203_vm0, %v178_v17 }
  0x1a   : > { %692 = vmatprep.mubr.msk.f32.mxu1 %vm203_vm0, %v186_v18 }
  0x1c   : > { %681 = vmatmul.mubr.msk.f32.gmra.mrb[4].mxu0 %vm203_vm0, %v179_v19 }
  0x1d   : > { %693 = vmatmul.mubr.msk.f32.gmra.mrb[4].mxu1 %vm203_vm0, %v187_v20  ;;  %683 = vmatprep.mubr.msk.f32.mxu0 %vm203_vm0, %v180_v21 }
  0x1e   : > { %695 = vmatprep.mubr.msk.f32.mxu1 %vm203_vm0, %v188_v22 }
  0x20   : > { %684 = vmatmul.mubr.msk.f32.gmra.mrb[6].mxu0 %vm203_vm0, %v181_v23 }
  0x21   : > { %696 = vmatmul.mubr.msk.f32.gmra.mrb[6].mxu1 %vm203_vm0, %v189_v24 }
  0xe7   : > { %v676_v26 = vpop.f32.mrb[0].mxu0 }
  0xe8   : > { %v688_v27 = vpop.f32.mrb[0].mxu1  ;;  %v324_v28 = vadd.f32 %v676_v26, %v542_v25  ;;  %v318_v30 = vpop.f32.mrb[1].mxu0 }
  0xe9   : > { %v364_v29 = vadd.f32 %v688_v27, %v542_v25  ;;  %v358_v31 = vpop.f32.mrb[1].mxu1  ;;  %v319_v32 = vadd.f32 %v542_v25, %v318_v30 }
  0xea   : > { %v359_v33 = vadd.f32 %v542_v25, %v358_v31 }
  0xeb   : > { %v596_v34 = vpack.c.bf16 %v324_v28, %v319_v32  ;;  %v679_v36 = vpop.f32.mrb[2].mxu0 }
  0xec   : > { %v616_v35 = vpack.c.bf16 %v364_v29, %v359_v33  ;;  %v691_v37 = vpop.f32.mrb[2].mxu1  ;;  %v334_v38 = vadd.f32 %v679_v36, %v542_v25  ;;  %v328_v40 = vpop.f32.mrb[3].mxu0 }
  0xed   : > { %v374_v39 = vadd.f32 %v691_v37, %v542_v25  ;;  %v368_v41 = vpop.f32.mrb[3].mxu1  ;;  %597 = vst [vmem:[%s825_s9] sm:$0xff] %v596_v34   ;;  %v329_v42 = vadd.f32 %v542_v25, %v328_v40 }
  0xee   : > { %636 = vst [vmem:[%s825_s9 + $0x20] sm:$0xff] %v616_v35   ;;  %v369_v43 = vadd.f32 %v542_v25, %v368_v41 }
  0xef   : > { %v601_v44 = vpack.c.bf16 %v334_v38, %v329_v42  ;;  %v682_v46 = vpop.f32.mrb[4].mxu0 }
  0xf0   : > { %v621_v45 = vpack.c.bf16 %v374_v39, %v369_v43  ;;  %v694_v47 = vpop.f32.mrb[4].mxu1  ;;  %v344_v48 = vadd.f32 %v682_v46, %v542_v25  ;;  %v338_v50 = vpop.f32.mrb[5].mxu0 }
  0xf1   : > { %v384_v49 = vadd.f32 %v694_v47, %v542_v25  ;;  %v378_v51 = vpop.f32.mrb[5].mxu1  ;;  %633 = vst [vmem:[%s825_s9 + $0x8] sm:$0xff] %v601_v44   ;;  %v339_v52 = vadd.f32 %v542_v25, %v338_v50 }
  0xf2   : > { %637 = vst [vmem:[%s825_s9 + $0x28] sm:$0xff] %v621_v45   ;;  %v379_v53 = vadd.f32 %v542_v25, %v378_v51 }
  0xf3   : > { %v606_v54 = vpack.c.bf16 %v344_v48, %v339_v52  ;;  %v685_v56 = vpop.f32.mrb[6].mxu0 }
  0xf4   : > { %v626_v55 = vpack.c.bf16 %v384_v49, %v379_v53  ;;  %v697_v57 = vpop.f32.mrb[6].mxu1  ;;  %v354_v58 = vadd.f32 %v685_v56, %v542_v25  ;;  %v348_v60 = vpop.f32.mrb[7].mxu0 }
  0xf5   : > { %v394_v59 = vadd.f32 %v697_v57, %v542_v25  ;;  %v388_v61 = vpop.f32.mrb[7].mxu1  ;;  %634 = vst [vmem:[%s825_s9 + $0x10] sm:$0xff] %v606_v54   ;;  %v349_v62 = vadd.f32 %v542_v25, %v348_v60 }
  0xf6   : > { %638 = vst [vmem:[%s825_s9 + $0x30] sm:$0xff] %v626_v55   ;;  %v389_v63 = vadd.f32 %v542_v25, %v388_v61 }
  0xf7   : > { %v611_v0 = vpack.c.bf16 %v354_v58, %v349_v62 }
  0xf8   : > { %v631_v1 = vpack.c.bf16 %v394_v59, %v389_v63 }
  0xf9   : > { %635 = vst [vmem:[%s825_s9 + $0x18] sm:$0xff] %v611_v0  }
  0xfa   : > { %639 = vst [vmem:[%s825_s9 + $0x38] sm:$0xff] %v631_v1  }
  0xfb PF: > { %s13_s12 = sadd.s32 1, %s730_s12  }
  0xfc   : > { %p10_p4 = scmp.ge.s32.totalorder %s13_s12, 4  }
  0xfe   :  { %12 = sbr.rel (!%p10_p4) target bundleno = 1 (0x1), region = 62 }

// kernel: _lambda_.13
= control target key start
LH: loop header
LB: loop body
LE: loop exit
PB: predicated region body
PF: predicated region fallthrough
CT: control target
= control target key end

     0   :  { %s1112_s12 = smov 0   ;;  %s1314_s0 = inlined_call_operand.vmem [shape: bf16[256,128], index: 0, kind: input, shape index: {}]   ;;  %s1315_s1 = inlined_call_operand.vmem [shape: bf16[128,384], index: 1, kind: input, shape index: {}]   ;;  %s1316_s2 = inlined_call_operand.vmem [shape: f32[1,384], index: 2, kind: input, shape index: {}]   ;;  %s1317_s3 = inlined_call_operand.vmem [shape: bf16[256,384], index: 3, kind: output, shape index: {}]  }
   0x1 LB: > { %s878_s13 = sadd.s32 4294967295, %s1089_s12   ;;  %p882_p0 = scmp.ge.s32.totalorder %s1089_s12, 1  ;;  %s1089_s12 = sphi %s1112_s12, %s13_s12  }
   0x2   : > { %p138_p1 = scmp.lt.s32.totalorder %s1089_s12, 3 }
   0x4   : > { %p139_p2 = pnand %p882_p0, %p138_p1 }
   0x5   : > { %v1043_v0 = vld [vmem:[%s1315_s1 + $0x4] ss:$12 sps:$4 sm:$0xff] (!%p139_p2)   ;;  %s883_s16 = sshll.u32 (!%p139_p2), %s878_s13, 4  ;;  %v1045_v1 = vld [vmem:[%s1315_s1] ss:$12 sps:$4 sm:$0xff] (!%p139_p2)   ;;  %v1091_v2 = vmov (!%p139_p2), 0   ;;  %v227_v33 = vlaneseq (!%p139_p2) }
   0x6   : > { %142 = sbr.rel (%p139_p2) target bundleno = 314 (0x13a), region = 32  ;;  %450 = vmatprep.mubr.bf16.mxu0 (!%p139_p2), %v1091_v2  ;;  %p164_p3 = scmp.lt.s32.totalorder (!%p139_p2), %s883_s16, 31  ;;  %418 = vmatprep.subr.bf16.mxu0 (!%p139_p2), %v1043_v0  ;;  %v1046_v3 = vld [vmem:[%s1315_s1 + $0x1c] ss:$12 sps:$4 sm:$0xff] (!%p139_p2)   ;;  %v1048_v4 = vld [vmem:[%s1315_s1 + $0x18] ss:$12 sps:$4 sm:$0xff] (!%p139_p2)  }
   0x7   : > { %419 = vmatpush1.bf16.msra.mxu0 (!%p139_p2), %v1045_v1  ;;  %v1049_v5 = vld [vmem:[%s1315_s1 + $0x34] ss:$12 sps:$4 sm:$0xff] (!%p139_p2)   ;;  %v1051_v6 = vld [vmem:[%s1315_s1 + $0x30] ss:$12 sps:$4 sm:$0xff] (!%p139_p2)   ;;  %v1052_v7 = vld [vmem:[%s1315_s1 + $0x4c] ss:$12 sps:$4 sm:$0xff] (!%p139_p2)  }
   0x8   : > { %420 = vmatprep.subr.bf16.mxu0 (!%p139_p2), %v1046_v3  ;;  %v1054_v8 = vld [vmem:[%s1315_s1 + $0x48] ss:$12 sps:$4 sm:$0xff] (!%p139_p2)   ;;  %v1055_v9 = vld [vmem:[%s1315_s1 + $0x64] ss:$12 sps:$4 sm:$0xff] (!%p139_p2)   ;;  %v1069_v12 = vld [vmem:[%s1315_s1 + $0x20] ss:$12 sps:$4 sm:$0xff] (!%p139_p2)  }
   0x9   : > { %v1067_v10 = vld [vmem:[%s1315_s1 + $0x8] ss:$12 sps:$4 sm:$0xff] (!%p139_p2)   ;;  %v1057_v13 = vld [vmem:[%s1315_s1 + $0x60] ss:$12 sps:$4 sm:$0xff] (!%p139_p2)   ;;  %v1070_v14 = vld [vmem:[%s1315_s1 + $0x38] ss:$12 sps:$4 sm:$0xff] (!%p139_p2)  }
   0xa   : > { %1001 = vmatprep.subr.bf16.mxu1 (!%p139_p2), %v1067_v10  ;;  %v1058_v15 = vld [vmem:[%s1315_s1 + $0x7c] ss:$12 sps:$4 sm:$0xff] (!%p139_p2)   ;;  %v1060_v16 = vld [vmem:[%s1315_s1 + $0x78] ss:$12 sps:$4 sm:$0xff] (!%p139_p2)   ;;  %v1061_v18 = vld [vmem:[%s1315_s1 + $0x94] ss:$12 sps:$4 sm:$0xff] (!%p139_p2)  }
   0xb   : > { %421 = vmatpush1.bf16.msra.mxu0 (!%p139_p2), %v1048_v4  ;;  %1002 = vmatpush3.bf16.msra.mxu1 (!%p139_p2), %v1067_v10  ;;  %v1072_v17 = vld [vmem:[%s1315_s1 + $0x50] ss:$12 sps:$4 sm:$0xff] (!%p139_p2)   ;;  %v1073_v20 = vld [vmem:[%s1315_s1 + $0x68] ss:$12 sps:$4 sm:$0xff] (!%p139_p2)   ;;  %v1064_v21 = vld [vmem:[%s1315_s1 + $0xac] ss:$12 sps:$4 sm:$0xff] (!%p139_p2)  }
   0xc   : > { %422 = vmatprep.subr.bf16.mxu0 (!%p139_p2), %v1049_v5  ;;  %1003 = vmatprep.subr.bf16.mxu1 (!%p139_p2), %v1069_v12  ;;  %v1063_v19 = vld [vmem:[%s1315_s1 + $0x90] ss:$12 sps:$4 sm:$0xff] (!%p139_p2)   ;;  %v1066_v22 = vld [vmem:[%s1315_s1 + $0xa8] ss:$12 sps:$4 sm:$0xff] (!%p139_p2)   ;;  %v1075_v23 = vld [vmem:[%s1315_s1 + $0x80] ss:$12 sps:$4 sm:$0xff] (!%p139_p2)  }
   0xd   : > { %s1319_s16 = smov (!%p164_p3, %s883_s16), 31  ;;  %v1076_v24 = vld [vmem:[%s1315_s1 + $0x98] ss:$12 sps:$4 sm:$0xff]   ;;  %v1078_v25 = vld [vmem:[%s1315_s1 + $0xb0] ss:$12 sps:$4 sm:$0xff]   ;;  %v228_v34 = vshrl.u32 %v227_v33, 7 }
   0xe   : > { %s884_s25 = sshll.u32 %s1319_s16, 2  ;;  %v225_v36 = vld [vmem:[%s1316_s2] sm:$0x7] }
   0xf   : > { %s1148_s5 = scalar_lea.vmem %s1314_s0, %s884_s25  ;;  %423 = vmatpush1.bf16.msra.mxu0 %v1051_v6  ;;  %1004 = vmatpush3.bf16.msra.mxu1 %v1069_v12  ;;  %v229_v35 = vsub.s32 0, %v228_v34  ;;  %v233_v37 = vsub.s32 1, %v228_v34  ;;  %v237_v49 = vsub.s32 2, %v228_v34 }
  0x10   : > { %424 = vmatprep.subr.bf16.mxu0 %v1052_v7  ;;  %v1068_v11 = vld [vmem:[%s1148_s5] sm:$0xff]   ;;  %1005 = vmatprep.subr.bf16.mxu1 %v1070_v14  ;;  %v1071_v26 = vld [vmem:[%s1148_s5 + $0x8] sm:$0xff]   ;;  %v1074_v27 = vld [vmem:[%s1148_s5 + $0x10] sm:$0xff]  }
  0x11   : > { %1017 = vmatprep.mubr.bf16.mxu1 %v1068_v11  ;;  %v1077_v28 = vld [vmem:[%s1148_s5 + $0x18] sm:$0xff]   ;;  %v1079_v29 = vld [vmem:[%s1148_s5 + $0x20] sm:$0xff]   ;;  %v1080_v30 = vld [vmem:[%s1148_s5 + $0x28] sm:$0xff]   ;;  %v1219_v38 = vrot.slane %v225_v36, %v229_v35  ;;  %v1221_v39 = vrot.slane %v225_v36, %v233_v37  ;;  %v1235_v52 = vrot.slane %v225_v36, %v237_v49 }
  0x12   : > { %v1081_v31 = vld [vmem:[%s1148_s5 + $0x30] sm:$0xff]   ;;  %v1082_v32 = vld [vmem:[%s1148_s5 + $0x38] sm:$0xff]   ;;  %s1033_s5 = smul.u32 12, %s1319_s16 }
  0x13   : > { %425 = vmatpush1.bf16.msra.mxu0 %v1054_v8  ;;  %1006 = vmatpush3.bf16.msra.mxu1 %v1070_v14 }
  0x14   : > { %426 = vmatprep.subr.bf16.mxu0 %v1055_v9  ;;  %1007 = vmatprep.subr.bf16.mxu1 %v1072_v17  ;;  %s1229_s22 = scalar_lea.vmem %s1317_s3, %s1033_s5 }
  0x17   : > { %427 = vmatpush1.bf16.msra.mxu0 %v1057_v13  ;;  %1008 = vmatpush3.bf16.msra.mxu1 %v1072_v17 }
  0x18   : > { %428 = vmatprep.subr.bf16.mxu0 %v1058_v15  ;;  %1009 = vmatprep.subr.bf16.mxu1 %v1073_v20 }
  0x1b   : > { %429 = vmatpush1.bf16.msra.mxu0 %v1060_v16  ;;  %1010 = vmatpush3.bf16.msra.mxu1 %v1073_v20 }
  0x1c   : > { %430 = vmatprep.subr.bf16.mxu0 %v1061_v18  ;;  %1011 = vmatprep.subr.bf16.mxu1 %v1075_v23 }
  0x1f   : > { %431 = vmatpush1.bf16.msra.mxu0 %v1063_v19  ;;  %1012 = vmatpush3.bf16.msra.mxu1 %v1075_v23 }
  0x20   : > { %432 = vmatprep.subr.bf16.mxu0 %v1064_v21  ;;  %1013 = vmatprep.subr.bf16.mxu1 %v1076_v24 }
  0x23   : > { %433 = vmatpush1.bf16.msra.mxu0 %v1066_v22  ;;  %1014 = vmatpush3.bf16.msra.mxu1 %v1076_v24 }
  0x24   : > { %1015 = vmatprep.subr.bf16.mxu1 %v1078_v25 }
  0x26   : > { %451 = vmatmul.mubr.bf16.vlgmr.msra.gmra.mrb[0].mxu0 %v1068_v11 }
  0x27   : > { %460 = vmatprep.mubr.bf16.mxu0 %v1091_v2  ;;  %1016 = vmatpush3.bf16.msra.mxu1 %v1078_v25 }
  0x2a   : > { %1018 = vmatmul.mubr.bf16.vlgmr.msra.gmra.mrb[0].mxu1 %v1071_v26 }
  0x2b   : > { %1021 = vmatprep.mubr.bf16.mxu1 %v1074_v27 }
  0x2e   : > { %461 = vmatmul.mubr.bf16.gmra.mrb[4].mxu0 %v1071_v26 }
  0x2f   : > { %470 = vmatprep.mubr.bf16.mxu0 %v1091_v2 }
  0x32   : > { %1022 = vmatmul.mubr.bf16.gmra.mrb[4].mxu1 %v1077_v28 }
  0x33   : > { %1025 = vmatprep.mubr.bf16.mxu1 %v1079_v29 }
  0x36   : > { %471 = vmatmul.mubr.bf16.gmra.mrb[8].mxu0 %v1074_v27 }
  0x37   : > { %480 = vmatprep.mubr.bf16.mxu0 %v1091_v2 }
  0x3a   : > { %1026 = vmatmul.mubr.bf16.gmra.mrb[8].mxu1 %v1080_v30 }
  0x3b   : > { %1029 = vmatprep.mubr.bf16.mxu1 %v1081_v31 }
  0x3e   : > { %481 = vmatmul.mubr.bf16.gmra.mrb[12].mxu0 %v1077_v28 }
  0x3f   : > { %490 = vmatprep.mubr.bf16.mxu0 %v1091_v2 }
  0x42   : > { %1030 = vmatmul.mubr.bf16.gmra.mrb[12].mxu1 %v1082_v32 }
  0x46   : > { %491 = vmatmul.mubr.bf16.gmra.mrb[16].mxu0 %v1079_v29 }
  0x47   : > { %500 = vmatprep.mubr.bf16.mxu0 %v1091_v2 }
  0x4e   : > { %501 = vmatmul.mubr.bf16.gmra.mrb[20].mxu0 %v1080_v30 }
  0x4f   : > { %510 = vmatprep.mubr.bf16.mxu0 %v1091_v2 }
  0x56   : > { %511 = vmatmul.mubr.bf16.gmra.mrb[24].mxu0 %v1081_v31 }
  0x57   : > { %520 = vmatprep.mubr.bf16.mxu0 %v1091_v2 }
  0x5e   : > { %521 = vmatmul.mubr.bf16.gmra.mrb[28].mxu0 %v1082_v32 }
  0xf9   : > { %v452_v40 = vpop.f32.mrb[0].mxu0 }
  0xfa   : > { %v453_v41 = vadd.f32 %v452_v40, %v1219_v38  ;;  %v454_v42 = vpop.f32.mrb[1].mxu0 }
  0xfb   : > { %v455_v43 = vadd.f32 %v454_v42, %v1221_v39  ;;  %v456_v44 = vpop.f32.mrb[2].mxu0 }
  0xfc   : > { %v457_v45 = vadd.f32 %v456_v44, %v1219_v38  ;;  %v458_v46 = vpop.f32.mrb[3].mxu0 }
  0xfd   : > { %v953_v47 = vpack.c.bf16 %v455_v43, %v453_v41  ;;  %v459_v48 = vadd.f32 %v458_v46, %v1221_v39  ;;  %v1019_v59 = vpop.f32.mrb[0].mxu1 }
  0xfe   : > { %v574_v62 = vadd.f32 %v1019_v59, %v1235_v52  ;;  %v565_v63 = vpop.f32.mrb[1].mxu1 }
  0xff   : > { %788 = vst [vmem:[%s1229_s22] sm:$0xff] %v953_v47  ;;  %v955_v50 = vpack.c.bf16 %v459_v48, %v457_v45  ;;  %v566_v0 = vadd.f32 %v565_v63, %v1235_v52  ;;  %v1020_v1 = vpop.f32.mrb[2].mxu1 }
 0x100   : > { %v958_v3 = vpack.c.bf16 %v574_v62, %v574_v62  ;;  %v577_v4 = vadd.f32 %v1020_v1, %v1235_v52  ;;  %v568_v5 = vpop.f32.mrb[3].mxu1 }
 0x101   : > { %790 = vst [vmem:[%s1229_s22 + $0xc] sm:$0xff] %v955_v50  ;;  %v462_v51 = vpop.f32.mrb[4].mxu0  ;;  %v954_v6 = vpack.c.bf16 %v566_v0, %v566_v0  ;;  %v569_v7 = vadd.f32 %v568_v5, %v1235_v52 }
 0x102   : > { %v463_v53 = vadd.f32 %v462_v51, %v1219_v38  ;;  %v464_v54 = vpop.f32.mrb[5].mxu0  ;;  %793 = vst [vmem:[%s1229_s22 + $0x20] sm:$0xf] %v958_v3  ;;  %v960_v9 = vpack.c.bf16 %v577_v4, %v577_v4 }
 0x103   : > { %v465_v55 = vadd.f32 %v464_v54, %v1221_v39  ;;  %v466_v56 = vpop.f32.mrb[6].mxu0  ;;  %789 = vst [vmem:[%s1229_s22 + $0x8] sm:$0xf] %v954_v6  ;;  %v956_v12 = vpack.c.bf16 %v569_v7, %v569_v7 }
 0x104   : > { %v467_v57 = vadd.f32 %v466_v56, %v1219_v38  ;;  %v468_v58 = vpop.f32.mrb[7].mxu0  ;;  %795 = vst [vmem:[%s1229_s22 + $0x2c] sm:$0xf] %v960_v9 }
 0x105   : > { %v957_v60 = vpack.c.bf16 %v465_v55, %v463_v53  ;;  %v469_v61 = vadd.f32 %v468_v58, %v1221_v39  ;;  %791 = vst [vmem:[%s1229_s22 + $0x14] sm:$0xf] %v956_v12  ;;  %v1023_v17 = vpop.f32.mrb[4].mxu1 }
 0x106   : > { %v590_v20 = vadd.f32 %v1023_v17, %v1235_v52  ;;  %v581_v21 = vpop.f32.mrb[5].mxu1 }
 0x107   : > { %792 = vst [vmem:[%s1229_s22 + $0x18] sm:$0xff] %v957_v60  ;;  %v959_v2 = vpack.c.bf16 %v469_v61, %v467_v57  ;;  %v582_v22 = vadd.f32 %v581_v21, %v1235_v52  ;;  %v1024_v23 = vpop.f32.mrb[6].mxu1 }
 0x108   : > { %v966_v25 = vpack.c.bf16 %v590_v20, %v590_v20  ;;  %v593_v26 = vadd.f32 %v1024_v23, %v1235_v52  ;;  %v584_v27 = vpop.f32.mrb[7].mxu1 }
 0x109   : > { %794 = vst [vmem:[%s1229_s22 + $0x24] sm:$0xff] %v959_v2  ;;  %v472_v8 = vpop.f32.mrb[8].mxu0  ;;  %v962_v28 = vpack.c.bf16 %v582_v22, %v582_v22  ;;  %v585_v29 = vadd.f32 %v584_v27, %v1235_v52 }
 0x10a   : > { %v473_v10 = vadd.f32 %v472_v8, %v1219_v38  ;;  %v474_v11 = vpop.f32.mrb[9].mxu0  ;;  %801 = vst [vmem:[%s1229_s22 + $0x50] sm:$0xf] %v966_v25  ;;  %v968_v31 = vpack.c.bf16 %v593_v26, %v593_v26 }
 0x10b   : > { %v475_v13 = vadd.f32 %v474_v11, %v1221_v39  ;;  %v476_v14 = vpop.f32.mrb[10].mxu0  ;;  %797 = vst [vmem:[%s1229_s22 + $0x38] sm:$0xf] %v962_v28  ;;  %v964_v34 = vpack.c.bf16 %v585_v29, %v585_v29 }
 0x10c   : > { %v477_v15 = vadd.f32 %v476_v14, %v1219_v38  ;;  %v478_v16 = vpop.f32.mrb[11].mxu0  ;;  %803 = vst [vmem:[%s1229_s22 + $0x5c] sm:$0xf] %v968_v31 }
 0x10d   : > { %v961_v18 = vpack.c.bf16 %v475_v13, %v473_v10  ;;  %v479_v19 = vadd.f32 %v478_v16, %v1221_v39  ;;  %799 = vst [vmem:[%s1229_s22 + $0x44] sm:$0xf] %v964_v34  ;;  %v1027_v41 = vpop.f32.mrb[8].mxu1 }
 0x10e   : > { %v606_v44 = vadd.f32 %v1027_v41, %v1235_v52  ;;  %v597_v45 = vpop.f32.mrb[9].mxu1 }
 0x10f   : > { %796 = vst [vmem:[%s1229_s22 + $0x30] sm:$0xff] %v961_v18  ;;  %v963_v24 = vpack.c.bf16 %v479_v19, %v477_v15  ;;  %v598_v46 = vadd.f32 %v597_v45, %v1235_v52  ;;  %v1028_v47 = vpop.f32.mrb[10].mxu1 }
 0x110   : > { %v974_v49 = vpack.c.bf16 %v606_v44, %v606_v44  ;;  %v609_v50 = vadd.f32 %v1028_v47, %v1235_v52  ;;  %v600_v51 = vpop.f32.mrb[11].mxu1 }
 0x111   : > { %798 = vst [vmem:[%s1229_s22 + $0x3c] sm:$0xff] %v963_v24  ;;  %v482_v30 = vpop.f32.mrb[12].mxu0  ;;  %v970_v53 = vpack.c.bf16 %v598_v46, %v598_v46  ;;  %v601_v54 = vadd.f32 %v600_v51, %v1235_v52 }
 0x112   : > { %v483_v32 = vadd.f32 %v482_v30, %v1219_v38  ;;  %v484_v33 = vpop.f32.mrb[13].mxu0  ;;  %809 = vst [vmem:[%s1229_s22 + $0x80] sm:$0xf] %v974_v49  ;;  %v976_v56 = vpack.c.bf16 %v609_v50, %v609_v50 }
 0x113   : > { %v485_v35 = vadd.f32 %v484_v33, %v1221_v39  ;;  %v486_v36 = vpop.f32.mrb[14].mxu0  ;;  %805 = vst [vmem:[%s1229_s22 + $0x68] sm:$0xf] %v970_v53  ;;  %v972_v59 = vpack.c.bf16 %v601_v54, %v601_v54 }
 0x114   : > { %v487_v37 = vadd.f32 %v486_v36, %v1219_v38  ;;  %v488_v40 = vpop.f32.mrb[15].mxu0  ;;  %811 = vst [vmem:[%s1229_s22 + $0x8c] sm:$0xf] %v976_v56 }
 0x115   : > { %v965_v42 = vpack.c.bf16 %v485_v35, %v483_v32  ;;  %v489_v43 = vadd.f32 %v488_v40, %v1221_v39  ;;  %807 = vst [vmem:[%s1229_s22 + $0x74] sm:$0xf] %v972_v59  ;;  %v1031_v0 = vpop.f32.mrb[12].mxu1 }
 0x116   : > { %v622_v3 = vadd.f32 %v1031_v0, %v1235_v52  ;;  %v613_v4 = vpop.f32.mrb[13].mxu1 }
 0x117   : > { %800 = vst [vmem:[%s1229_s22 + $0x48] sm:$0xff] %v965_v42  ;;  %v967_v48 = vpack.c.bf16 %v489_v43, %v487_v37  ;;  %v614_v5 = vadd.f32 %v613_v4, %v1235_v52  ;;  %v1032_v6 = vpop.f32.mrb[14].mxu1 }
 0x118   : > { %v982_v8 = vpack.c.bf16 %v622_v3, %v622_v3  ;;  %v625_v9 = vadd.f32 %v1032_v6, %v1235_v52  ;;  %v616_v10 = vpop.f32.mrb[15].mxu1 }
 0x119   : > { %802 = vst [vmem:[%s1229_s22 + $0x54] sm:$0xff] %v967_v48  ;;  %v492_v55 = vpop.f32.mrb[16].mxu0  ;;  %v978_v11 = vpack.c.bf16 %v614_v5, %v614_v5  ;;  %v617_v12 = vadd.f32 %v616_v10, %v1235_v52 }
 0x11a   : > { %v493_v57 = vadd.f32 %v492_v55, %v1219_v38  ;;  %v494_v58 = vpop.f32.mrb[17].mxu0  ;;  %817 = vst [vmem:[%s1229_s22 + $0xb0] sm:$0xf] %v982_v8  ;;  %v984_v14 = vpack.c.bf16 %v625_v9, %v625_v9 }
 0x11b   : > { %v495_v60 = vadd.f32 %v494_v58, %v1221_v39  ;;  %v496_v61 = vpop.f32.mrb[18].mxu0  ;;  %813 = vst [vmem:[%s1229_s22 + $0x98] sm:$0xf] %v978_v11  ;;  %v980_v17 = vpack.c.bf16 %v617_v12, %v617_v12 }
 0x11c   : > { %v497_v62 = vadd.f32 %v496_v61, %v1219_v38  ;;  %v498_v63 = vpop.f32.mrb[19].mxu0  ;;  %819 = vst [vmem:[%s1229_s22 + $0xbc] sm:$0xf] %v984_v14 }
 0x11d   : > { %v969_v1 = vpack.c.bf16 %v495_v60, %v493_v57  ;;  %v499_v2 = vadd.f32 %v498_v63, %v1221_v39  ;;  %815 = vst [vmem:[%s1229_s22 + $0xa4] sm:$0xf] %v980_v17 }
 0x11f   : > { %804 = vst [vmem:[%s1229_s22 + $0x60] sm:$0xff] %v969_v1  ;;  %v971_v7 = vpack.c.bf16 %v499_v2, %v497_v62 }
 0x121   : > { %806 = vst [vmem:[%s1229_s22 + $0x6c] sm:$0xff] %v971_v7  ;;  %v502_v13 = vpop.f32.mrb[20].mxu0 }
 0x122   : > { %v503_v15 = vadd.f32 %v502_v13, %v1219_v38  ;;  %v504_v16 = vpop.f32.mrb[21].mxu0 }
 0x123   : > { %v505_v18 = vadd.f32 %v504_v16, %v1221_v39  ;;  %v506_v19 = vpop.f32.mrb[22].mxu0 }
 0x124   : > { %v507_v20 = vadd.f32 %v506_v19, %v1219_v38  ;;  %v508_v21 = vpop.f32.mrb[23].mxu0 }
 0x125   : > { %v973_v52 = vpack.c.bf16 %v505_v18, %v503_v15  ;;  %v509_v22 = vadd.f32 %v508_v21, %v1221_v39 }
 0x127   : > { %808 = vst [vmem:[%s1229_s22 + $0x78] sm:$0xff] %v973_v52  ;;  %v975_v23 = vpack.c.bf16 %v509_v22, %v507_v20 }
 0x129   : > { %810 = vst [vmem:[%s1229_s22 + $0x84] sm:$0xff] %v975_v23  ;;  %v512_v24 = vpop.f32.mrb[24].mxu0 }
 0x12a   : > { %v513_v25 = vadd.f32 %v512_v24, %v1219_v38  ;;  %v514_v26 = vpop.f32.mrb[25].mxu0 }
 0x12b   : > { %v515_v27 = vadd.f32 %v514_v26, %v1221_v39  ;;  %v516_v28 = vpop.f32.mrb[26].mxu0 }
 0x12c   : > { %v517_v29 = vadd.f32 %v516_v28, %v1219_v38  ;;  %v518_v30 = vpop.f32.mrb[27].mxu0 }
 0x12d   : > { %v977_v31 = vpack.c.bf16 %v515_v27, %v513_v25  ;;  %v519_v32 = vadd.f32 %v518_v30, %v1221_v39 }
 0x12f   : > { %812 = vst [vmem:[%s1229_s22 + $0x90] sm:$0xff] %v977_v31  ;;  %v979_v33 = vpack.c.bf16 %v519_v32, %v517_v29 }
 0x131   : > { %814 = vst [vmem:[%s1229_s22 + $0x9c] sm:$0xff] %v979_v33  ;;  %v522_v34 = vpop.f32.mrb[28].mxu0 }
 0x132   : > { %v523_v35 = vadd.f32 %v522_v34, %v1219_v38  ;;  %v524_v36 = vpop.f32.mrb[29].mxu0 }
 0x133   : > { %v525_v37 = vadd.f32 %v524_v36, %v1221_v39  ;;  %v526_v40 = vpop.f32.mrb[30].mxu0 }
 0x134   : > { %v527_v41 = vadd.f32 %v526_v40, %v1219_v38  ;;  %v528_v42 = vpop.f32.mrb[31].mxu0 }
 0x135   : > { %v981_v43 = vpack.c.bf16 %v525_v37, %v523_v35  ;;  %v529_v44 = vadd.f32 %v528_v42, %v1221_v39 }
 0x137   : > { %816 = vst [vmem:[%s1229_s22 + $0xa8] sm:$0xff] %v981_v43  ;;  %v983_v45 = vpack.c.bf16 %v529_v44, %v527_v41 }
 0x139   : > { %818 = vst [vmem:[%s1229_s22 + $0xb4] sm:$0xff] %v983_v45 }
 0x13a PF: > { %s13_s12 = sadd.s32 1, %s1089_s12  }
 0x13b   : > { %p10_p4 = scmp.ge.s32.totalorder %s13_s12, 4  }
 0x13d   :  { %12 = sbr.rel (!%p10_p4) target bundleno = 1 (0x1), region = 62 }

// kernel: _lambda_.14
= control target key start
LH: loop header
LB: loop body
LE: loop exit
PB: predicated region body
PF: predicated region fallthrough
CT: control target
= control target key end

     0   :  { %s2166_s27 = smov 0   ;;  %s2168_s28 = smov 0   ;;  %s2515_s0 = inlined_call_operand.vmem [shape: bf16[4,64,384], index: 0, kind: input, shape index: {}, may-alias: {0,1,2}]   ;;  %s2516_s1 = inlined_call_operand.vmem [shape: bf16[4,64,384], index: 1, kind: input, shape index: {}, may-alias: {0,1,2}]   ;;  %s2517_s2 = inlined_call_operand.vmem [shape: bf16[4,64,384], index: 2, kind: input, shape index: {}, may-alias: {0,1,2}]   ;;  %s2518_s3 = inlined_call_operand.vmem [shape: bf16[128,128], index: 3, kind: input, shape index: {}]   ;;  %s2519_s4 = inlined_call_operand.vmem [shape: f32[1,128], index: 4, kind: input, shape index: {}]   ;;  %s2520_s5 = inlined_call_operand.vmem [shape: bf16[4,64,128], index: 5, kind: input, shape index: {}]   ;;  %s2521_s6 = inlined_call_operand.vmem [shape: f32[1,128], index: 6, kind: input, shape index: {}]   ;;  %s2522_s7 = inlined_call_operand.vmem [shape: f32[1,128], index: 7, kind: input, shape index: {}]   ;;  %s2523_s8 = inlined_call_operand.vmem [shape: bf16[4,64,128], index: 8, kind: output, shape index: {}]  }
   0x1   :  { %s2170_s29 = smov 0   ;;  %s2172_s30 = smov 0  }
   0x2   :  { %s2174_s9 = smov 0  }
   0x3 LB: > { %s37_s10 = sadd.s32 1, %s2112_s30  ;;  %p53_p1 = scmp.ne.s32.totalorder %s2104_s28, %s2100_s27  ;;  %s2116_s9 = sphi %s2174_s9, %s18_s9   ;;  %s2112_s30 = sphi %s2172_s30, %s2528_s30   ;;  %s2108_s29 = sphi %s2170_s29, %s2527_s29   ;;  %s2104_s28 = sphi %s2168_s28, %s2526_s28   ;;  %s2100_s27 = sphi %s2166_s27, %s2525_s27  }
   0x4   : > { %p39_p0 = scmp.ge.s32.totalorder %s37_s10, 4  ;;  %p54_p2 = scmp.eq.s32.totalorder %s2116_s9, 0 }
   0x5   : > { %s46_s13 = sadd.s32 1, %s2104_s28  ;;  %p1744_p5 = scmp.ge.s32.totalorder %s2116_s9, 4 }
   0x6   : > { %s2530_s10 = smov (%p39_p0, %s37_s10), 0  ;;  %p2197_p3 = por %p54_p2, %p53_p1 }
   0x7   : > { %s41_s12 = ssub.s32 %s2112_s30, %s2530_s10  ;;  %287 = sbr.rel (%p1744_p5) target bundleno = 44 (0x2c), region = 32 }
   0x8   : > { %p44_p4 = scmp.eq.s32.totalorder %s41_s12, 0 }
   0xa   : > { %s2205_s14 = scalar_select %p44_p4, %s2104_s28, %s46_s13  }
   0xe   : > { %290 = sbr.rel (!%p2197_p3) target bundleno = 24 (0x18), region = 36  ;;  %s292_s15 = sand.u32 (%p2197_p3), 1, %s2104_s28  }
   0xf   : > { %s1948_s16 = smul.u32 (%p2197_p3), 96, %s2112_s30  ;;  %s1745_s17 = sshll.u32 (%p2197_p3), %s292_s15, 5 }
  0x10   : > { %s294_s21 = scalar_lea.vmem (%p2197_p3), [#allocation5], %s1745_s17 }
  0x11   : > { %s300_s20 = scalar_lea.vmem (%p2197_p3), %s2515_s0, %s1948_s16 }
  0x12   : > { %v316_v0 = vld [vmem:[%s300_s20] sm:$0xf] (%p2197_p3)  ;;  %v318_v1 = vld [vmem:[%s300_s20 + $0xc] sm:$0xf] (%p2197_p3)  ;;  %v320_v2 = vld [vmem:[%s300_s20 + $0x18] sm:$0xf] (%p2197_p3) }
  0x13   : > { %317 = vst [vmem:[%s294_s21] sm:$0xf] (%p2197_p3), %v316_v0  ;;  %319 = vst [vmem:[%s294_s21 + $0x4] sm:$0xf] (%p2197_p3), %v318_v1  ;;  %v322_v3 = vld [vmem:[%s300_s20 + $0x24] sm:$0xf] (%p2197_p3) }
  0x14   : > { %321 = vst [vmem:[%s294_s21 + $0x8] sm:$0xf] (%p2197_p3), %v320_v2  ;;  %v324_v4 = vld [vmem:[%s300_s20 + $0x30] sm:$0xf] (%p2197_p3)  ;;  %v326_v5 = vld [vmem:[%s300_s20 + $0x3c] sm:$0xf] (%p2197_p3) }
  0x15   : > { %323 = vst [vmem:[%s294_s21 + $0xc] sm:$0xf] %v322_v3  ;;  %325 = vst [vmem:[%s294_s21 + $0x10] sm:$0xf] %v324_v4  ;;  %v328_v6 = vld [vmem:[%s300_s20 + $0x48] sm:$0xf] }
  0x16   : > { %327 = vst [vmem:[%s294_s21 + $0x14] sm:$0xf] %v326_v5  ;;  %v330_v7 = vld [vmem:[%s300_s20 + $0x54] sm:$0xf]  ;;  %329 = vst [vmem:[%s294_s21 + $0x18] sm:$0xf] %v328_v6 }
  0x17   : > { %331 = vst [vmem:[%s294_s21 + $0x1c] sm:$0xf] %v330_v7 }
  0x18 PF: > { %370 = sbr.rel (!%p2197_p3) target bundleno = 34 (0x22), region = 77  ;;  %s372_s22 = sand.u32 (%p2197_p3), 1, %s2104_s28  }
  0x19   : > { %s1748_s23 = smul.u32 (%p2197_p3), 96, %s2112_s30  ;;  %s1747_s24 = sshll.u32 (%p2197_p3), %s372_s22, 5 }
  0x1a   : > { %s374_s13 = scalar_lea.vmem (%p2197_p3), [#allocation6], %s1747_s24 }
  0x1b   : > { %s1629_s12 = scalar_lea.vmem (%p2197_p3), %s2516_s1, %s1748_s23 }
  0x1c   : > { %v1749_v8 = vld [vmem:[%s1629_s12 + $0x4] sm:$0xf] (%p2197_p3)  ;;  %v1750_v9 = vld [vmem:[%s1629_s12 + $0x10] sm:$0xf] (%p2197_p3)  ;;  %v1751_v10 = vld [vmem:[%s1629_s12 + $0x1c] sm:$0xf] (%p2197_p3) }
  0x1d   : > { %398 = vst [vmem:[%s374_s13] sm:$0xf] (%p2197_p3), %v1749_v8  ;;  %400 = vst [vmem:[%s374_s13 + $0x4] sm:$0xf] (%p2197_p3), %v1750_v9  ;;  %v1752_v11 = vld [vmem:[%s1629_s12 + $0x28] sm:$0xf] (%p2197_p3) }
  0x1e   : > { %402 = vst [vmem:[%s374_s13 + $0x8] sm:$0xf] (%p2197_p3), %v1751_v10  ;;  %v1753_v12 = vld [vmem:[%s1629_s12 + $0x34] sm:$0xf] (%p2197_p3)  ;;  %v1754_v13 = vld [vmem:[%s1629_s12 + $0x40] sm:$0xf] (%p2197_p3) }
  0x1f   : > { %404 = vst [vmem:[%s374_s13 + $0xc] sm:$0xf] %v1752_v11  ;;  %406 = vst [vmem:[%s374_s13 + $0x10] sm:$0xf] %v1753_v12  ;;  %v1755_v14 = vld [vmem:[%s1629_s12 + $0x4c] sm:$0xf] }
  0x20   : > { %408 = vst [vmem:[%s374_s13 + $0x14] sm:$0xf] %v1754_v13  ;;  %v1756_v15 = vld [vmem:[%s1629_s12 + $0x58] sm:$0xf]  ;;  %410 = vst [vmem:[%s374_s13 + $0x18] sm:$0xf] %v1755_v14 }
  0x21   : > { %412 = vst [vmem:[%s374_s13 + $0x1c] sm:$0xf] %v1756_v15 }
  0x22 PF: > { %451 = sbr.rel (!%p2197_p3) target bundleno = 44 (0x2c), region = 118  ;;  %s453_s15 = sand.u32 (%p2197_p3), 1, %s2104_s28  }
  0x23   : > { %s1758_s16 = smul.u32 (%p2197_p3), 96, %s2112_s30  ;;  %s1757_s17 = sshll.u32 (%p2197_p3), %s453_s15, 5 }
  0x24   : > { %s455_s21 = scalar_lea.vmem (%p2197_p3), [#allocation7], %s1757_s17 }
  0x25   : > { %s1637_s20 = scalar_lea.vmem (%p2197_p3), %s2517_s2, %s1758_s16 }
  0x26   : > { %v1759_v16 = vld [vmem:[%s1637_s20 + $0x8] sm:$0xf] (%p2197_p3)  ;;  %v1760_v17 = vld [vmem:[%s1637_s20 + $0x14] sm:$0xf] (%p2197_p3)  ;;  %v1761_v18 = vld [vmem:[%s1637_s20 + $0x20] sm:$0xf] (%p2197_p3) }
  0x27   : > { %479 = vst [vmem:[%s455_s21] sm:$0xf] (%p2197_p3), %v1759_v16  ;;  %481 = vst [vmem:[%s455_s21 + $0x4] sm:$0xf] (%p2197_p3), %v1760_v17  ;;  %v1762_v19 = vld [vmem:[%s1637_s20 + $0x2c] sm:$0xf] (%p2197_p3) }
  0x28   : > { %483 = vst [vmem:[%s455_s21 + $0x8] sm:$0xf] (%p2197_p3), %v1761_v18  ;;  %v1763_v20 = vld [vmem:[%s1637_s20 + $0x38] sm:$0xf] (%p2197_p3)  ;;  %v1764_v21 = vld [vmem:[%s1637_s20 + $0x44] sm:$0xf] (%p2197_p3) }
  0x29   : > { %485 = vst [vmem:[%s455_s21 + $0xc] sm:$0xf] %v1762_v19  ;;  %487 = vst [vmem:[%s455_s21 + $0x10] sm:$0xf] %v1763_v20  ;;  %v1765_v22 = vld [vmem:[%s1637_s20 + $0x50] sm:$0xf] }
  0x2a   : > { %489 = vst [vmem:[%s455_s21 + $0x14] sm:$0xf] %v1764_v21  ;;  %v1766_v23 = vld [vmem:[%s1637_s20 + $0x5c] sm:$0xf]  ;;  %491 = vst [vmem:[%s455_s21 + $0x18] sm:$0xf] %v1765_v22 }
  0x2b   : > { %493 = vst [vmem:[%s455_s21 + $0x1c] sm:$0xf] %v1766_v23 }
  0x2c PF: > { %p1767_p6 = scmp.ge.s32.totalorder %s2116_s9, 1  ;;  %p544_p7 = scmp.lt.s32.totalorder %s2116_s9, 5 }
  0x2e   : > { %p545_p8 = pnand %p1767_p6, %p544_p7 }
  0x2f   : > { %s551_s11 = sand.u32 (!%p545_p8), 1, %s2100_s27   ;;  %vm647_vm0 = vcmask (!%p545_p8), 7168   ;;  %v2118_v32 = vmov (!%p545_p8), -inf   ;;  %vm817_vm1 = vcmask (!%p545_p8), 523264   ;;  %v2119_v57 = vmov (!%p545_p8), 0   ;;  %p623_p9 = scmp.lt.s32.totalorder (!%p545_p8), %s2108_s29, 3 }
  0x30   : > { %548 = sbr.rel (%p545_p8) target bundleno = 1446 (0x5a6), region = 163  ;;  %s2232_s22 = sshll.u32 (!%p545_p8), %s551_s11, 5  ;;  %650 = vst.msk [vmem:[#allocation2 + $0x10] sm:$0xff] (!%p545_p8), %vm647_vm0, %v2118_v32  ;;  %648 = vst.msk [vmem:[#allocation2] sm:$0xff] (!%p545_p8), %vm647_vm0, %v2118_v32  ;;  %1992 = vset.pattern.permute.xlu0 (!%p545_p8), %v2119_v57  ;;  %1993 = vset.pattern.permute.xlu1 (!%p545_p8), %v2119_v57  ;;  %v2120_v58 = vmov (!%p545_p8), 0.0  }
  0x31   : > { %s560_s23 = scalar_lea.vmem (!%p545_p8), [#allocation6], %s2232_s22  ;;  %s553_s24 = scalar_lea.vmem (!%p545_p8), [#allocation5], %s2232_s22  ;;  %649 = vst.msk [vmem:[#allocation2 + $0x8] sm:$0xff] (!%p545_p8), %vm647_vm0, %v2118_v32  ;;  %651 = vst.msk [vmem:[#allocation2 + $0x18] sm:$0xff] (!%p545_p8), %vm647_vm0, %v2118_v32 }
  0x32   : > { %v1994_v24 = vld [vmem:[%s560_s23] sm:$0xff] (!%p545_p8)   ;;  %v1995_v25 = vld [vmem:[%s560_s23 + $0x8] sm:$0xff] (!%p545_p8)   ;;  %v1996_v27 = vld [vmem:[%s560_s23 + $0x10] sm:$0xff] (!%p545_p8)   ;;  %652 = vst.msk [vmem:[#allocation2 + $0x20] sm:$0xff] (!%p545_p8), %vm647_vm0, %v2118_v32  ;;  %s567_s27 = scalar_lea.vmem (!%p545_p8), [#allocation7], %s2232_s22 }
  0x33   : > { %1892 = vmatprep.subr.bf16.mxu0 (!%p545_p8), %v1994_v24  ;;  %v1998_v26 = vld [vmem:[%s553_s24] sm:$0xff] (!%p545_p8)   ;;  %v1997_v28 = vld [vmem:[%s560_s23 + $0x18] sm:$0xff] (!%p545_p8)   ;;  %v1999_v29 = vld [vmem:[%s553_s24 + $0x8] sm:$0xff] (!%p545_p8)   ;;  %653 = vst.msk [vmem:[#allocation2 + $0x28] sm:$0xff] (!%p545_p8), %vm647_vm0, %v2118_v32 }
  0x34   : > { %1893 = vmatpush3.bf16.xpose.msra.mxu0 (!%p545_p8), %v1994_v24  ;;  %1900 = vmatprep.mubr.bf16.mxu0 (!%p545_p8), %v1998_v26  ;;  %v2000_v30 = vld [vmem:[%s553_s24 + $0x10] sm:$0xff] (!%p545_p8)   ;;  %v2001_v31 = vld [vmem:[%s553_s24 + $0x18] sm:$0xff] (!%p545_p8)   ;;  %654 = vst.msk [vmem:[#allocation2 + $0x30] sm:$0xff] (!%p545_p8), %vm647_vm0, %v2118_v32  ;;  %655 = vst.msk [vmem:[#allocation2 + $0x38] sm:$0xff] (!%p545_p8), %vm647_vm0, %v2118_v32 }
  0x35   : > { %1894 = vmatprep.subr.bf16.mxu0 (!%p545_p8), %v1995_v25  ;;  %656 = vst.msk [vmem:[#allocation3] sm:$0xff] (!%p545_p8), %vm647_vm0, %v2120_v58  ;;  %657 = vst.msk [vmem:[#allocation3 + $0x8] sm:$0xff] (!%p545_p8), %vm647_vm0, %v2120_v58  ;;  %v2002_v18 = vld [vmem:[%s567_s27] sm:$0xff] (!%p545_p8)  }
  0x36   : > { %658 = vst.msk [vmem:[#allocation3 + $0x10] sm:$0xff] (!%p545_p8), %vm647_vm0, %v2120_v58  ;;  %659 = vst.msk [vmem:[#allocation3 + $0x18] sm:$0xff] (!%p545_p8), %vm647_vm0, %v2120_v58  ;;  %1908 = vmatprep.subr.bf16.mxu1 (!%p545_p8), %v2002_v18 }
  0x37   : > { %660 = vst.msk [vmem:[#allocation3 + $0x20] sm:$0xff] %vm647_vm0, %v2120_v58  ;;  %661 = vst.msk [vmem:[#allocation3 + $0x28] sm:$0xff] %vm647_vm0, %v2120_v58  ;;  %v2284_v59 = vld [vmem:[#allocation2 + $0x10] sm:$0xff]  ;;  %v2286_v60 = vld [vmem:[#allocation2] sm:$0xff]  ;;  %1909 = vmatpush3.bf16.msra.mxu1 %v2002_v18  ;;  %s2532_s29 = smov (!%p623_p9, %s2108_s29), 3 }
  0x38   : > { %662 = vst.msk [vmem:[#allocation3 + $0x30] sm:$0xff] %vm647_vm0, %v2120_v58  ;;  %663 = vst.msk [vmem:[#allocation3 + $0x38] sm:$0xff] %vm647_vm0, %v2120_v58  ;;  %v2294_v1 = vld [vmem:[#allocation2 + $0x18] sm:$0xff]  ;;  %v2301_v3 = vld [vmem:[#allocation2 + $0x8] sm:$0xff]  ;;  %s1812_s25 = sshll.u32 %s2532_s29, 5 }
  0x39   : > { %v2319_v10 = vld [vmem:[#allocation2 + $0x20] sm:$0xff]  ;;  %s630_s13 = scalar_lea.vmem %s2520_s5, %s1812_s25  ;;  %s640_s22 = scalar_lea.vmem %s2523_s8, %s1812_s25 }
  0x3a   : > { %v2325_v13 = vld [vmem:[#allocation2 + $0x28] sm:$0xff] }
  0x3b   : > { %v2330_v15 = vld [vmem:[#allocation2 + $0x30] sm:$0xff]  ;;  %v2333_v17 = vld [vmem:[#allocation2 + $0x38] sm:$0xff] }
  0x3c   : > { %1895 = vmatpush3.bf16.xpose.msra.mxu0 %v1995_v25  ;;  %v2003_v25 = vld [vmem:[%s567_s27 + $0x8] sm:$0xff]  }
  0x3d   : > { %1896 = vmatprep.subr.bf16.mxu0 %v1996_v27  ;;  %1910 = vmatprep.subr.bf16.mxu1 %v2003_v25 }
  0x3e   : > { %1911 = vmatpush3.bf16.msra.mxu1 %v2003_v25 }
  0x44   : > { %1897 = vmatpush3.bf16.xpose.msra.mxu0 %v1996_v27 }
  0x45   : > { %1898 = vmatprep.subr.bf16.mxu0 %v1997_v28 }
  0x4c   : > { %1899 = vmatpush3.bf16.xpose.msra.mxu0 %v1997_v28 }
  0x53   : > { %1901 = vmatmul.mubr.bf16.vlgmr.msra.gmra.mrb[0].mxu0 %v1999_v29  ;;  %v2004_v29 = vld [vmem:[%s567_s27 + $0x10] sm:$0xff]  }
  0x54   : > { %1904 = vmatprep.mubr.bf16.mxu0 %v2000_v30  ;;  %1912 = vmatprep.subr.bf16.mxu1 %v2004_v29  ;;  %v2005_v30 = vld [vmem:[%s567_s27 + $0x18] sm:$0xff]  }
  0x55   : > { %1913 = vmatpush3.bf16.msra.mxu1 %v2004_v29 }
  0x56   : > { %1914 = vmatprep.subr.bf16.mxu1 %v2005_v30 }
  0x59   : > { %1915 = vmatpush3.bf16.msra.mxu1 %v2005_v30 }
  0x5b   : > { %1905 = vmatmul.mubr.bf16.gmra.mrb[4].mxu0 %v2001_v31 }
 0x126   : > { %v1902_v33 = vpop.f32.mrb[0].mxu0 }
 0x127   : > { %v2244_v34 = vmul.f32 0.088388346, %v1902_v33  ;;  %v770_v35 = vpop.f32.mrb[1].mxu0 }
 0x128   : > { %v2246_v36 = vmul.f32 0.088388346, %v770_v35  ;;  %v1903_v37 = vpop.f32.mrb[2].mxu0 }
 0x129   : > { %v2248_v38 = vmul.f32 0.088388346, %v1903_v37  ;;  %v773_v39 = vpop.f32.mrb[3].mxu0  ;;  %v824_v40 = vsel %vm817_vm1, %v2244_v34, -inf }
 0x12a   : > { %v2252_v41 = vmul.f32 0.088388346, %v773_v39  ;;  %825 = vmax.xlane.f32.xlu1 %v824_v40  ;;  %v818_v42 = vsel %vm817_vm1, %v2246_v36, -inf }
 0x12b   : > { %819 = vmax.xlane.f32.xlu0 %v818_v42  ;;  %v827_v43 = vsel %vm817_vm1, %v2248_v38, -inf }
 0x12c   : > { %v821_v45 = vsel %vm817_vm1, %v2252_v41, -inf }
 0x12e   : > { %828 = vmax.xlane.f32.xlu1 %v827_v43  ;;  %v1906_v44 = vpop.f32.mrb[4].mxu0 }
 0x12f   : > { %822 = vmax.xlane.f32.xlu0 %v821_v45  ;;  %v786_v46 = vpop.f32.mrb[5].mxu0  ;;  %v2262_v50 = vmul.f32 0.088388346, %v1906_v44 }
 0x130   : > { %v2260_v47 = vmul.f32 0.088388346, %v786_v46  ;;  %v1907_v48 = vpop.f32.mrb[6].mxu0 }
 0x131   : > { %v789_v49 = vpop.f32.mrb[7].mxu0  ;;  %v2268_v53 = vmul.f32 0.088388346, %v1907_v48  ;;  %v836_v55 = vsel %vm817_vm1, %v2262_v50, -inf }
 0x132   : > { %v2264_v51 = vmul.f32 0.088388346, %v789_v49  ;;  %v830_v52 = vsel %vm817_vm1, %v2260_v47, -inf }
 0x133   : > { %831 = vmax.xlane.f32.xlu0 %v830_v52  ;;  %v839_v56 = vsel %vm817_vm1, %v2268_v53, -inf }
 0x134   : > { %v833_v54 = vsel %vm817_vm1, %v2264_v51, -inf }
 0x135   : > { %834 = vmax.xlane.f32.xlu1 %v833_v54 }
 0x137   : > { %837 = vmax.xlane.f32.xlu0 %v836_v55 }
 0x139   : > { %840 = vmax.xlane.f32.xlu1 %v839_v56 }
 0x1b7   : > { %v826_v61 = vpop.xlane.xlu1 %825 }
 0x1b8   : > { %v2289_v62 = vmax.f32 %v2284_v59, %v826_v61  ;;  %v820_v63 = vpop.xlane.xlu0 %819 }
 0x1b9   : > { %v2292_v0 = vmax.f32 %v2286_v60, %v820_v63 }
 0x1ba   : > { %v852_v2 = vsub.f32 %v2284_v59, %v2289_v62  ;;  %1182 = vst.msk [vmem:[#allocation2 + $0x10] sm:$0xff] %vm647_vm0, %v2289_v62  ;;  %886 = vperm.xlu1 %1993, %v2289_v62  }
 0x1bb   : > { %v850_v4 = vsub.f32 %v2286_v60, %v2292_v0  ;;  %1180 = vst.msk [vmem:[#allocation2] sm:$0xff] %vm647_vm0, %v2292_v0  ;;  %v829_v5 = vpop.xlane.xlu1 %828  ;;  %876 = vperm.xlu0 %1992, %v2292_v0  }
 0x1bc   : > { %v2309_v6 = vmax.f32 %v2294_v1, %v829_v5  ;;  %v823_v7 = vpop.xlane.xlu0 %822 }
 0x1bd   : > { %v2312_v8 = vmax.f32 %v2301_v3, %v823_v7 }
 0x1be   : > { %v853_v9 = vsub.f32 %v2294_v1, %v2309_v6  ;;  %1183 = vst.msk [vmem:[#allocation2 + $0x18] sm:$0xff] %vm647_vm0, %v2309_v6  ;;  %891 = vperm.xlu1 %1993, %v2309_v6   ;;  %v2006_v6 = vld [vmem:[%s2518_s3] sm:$0xff]  }
 0x1bf   : > { %v851_v11 = vsub.f32 %v2301_v3, %v2312_v8  ;;  %1181 = vst.msk [vmem:[#allocation2 + $0x8] sm:$0xff] %vm647_vm0, %v2312_v8  ;;  %1924 = vmatprep.subr.bf16.mxu1 %v2006_v6 }
 0x1c0   : > { %v832_v12 = vpop.xlane.xlu0 %831 }
 0x1c1   : > { %v2328_v14 = vmax.f32 %v2319_v10, %v832_v12 }
 0x1c2   : > { %881 = vperm.xlu1 %1993, %v2312_v8   ;;  %v835_v16 = vpop.xlane.xlu1 %834  ;;  %v2007_v8 = vld [vmem:[%s2518_s3 + $0x8] sm:$0xff]  }
 0x1c3   : > { %v854_v19 = vsub.f32 %v2319_v10, %v2328_v14  ;;  %1184 = vst.msk [vmem:[#allocation2 + $0x20] sm:$0xff] %vm647_vm0, %v2328_v14  ;;  %v2341_v20 = vmax.f32 %v2325_v13, %v835_v16  ;;  %v2009_v10 = vld [vmem:[%s2518_s3 + $0x18] sm:$0xff]  }
 0x1c4   : > { %v838_v21 = vpop.xlane.xlu0 %837 }
 0x1c5   : > { %v855_v22 = vsub.f32 %v2325_v13, %v2341_v20  ;;  %1185 = vst.msk [vmem:[#allocation2 + $0x28] sm:$0xff] %vm647_vm0, %v2341_v20  ;;  %v2348_v23 = vmax.f32 %v2330_v15, %v838_v21  ;;  %v866_v3 = vmul.f32 1.442695, %v854_v19  ;;  %v941_v19 = vld [vmem:[#allocation3 + $0x18] sm:$0xff] }
 0x1c6   : > { %v841_v24 = vpop.xlane.xlu1 %840 }
 0x1c7   : > { %v856_v26 = vsub.f32 %v2330_v15, %v2348_v23  ;;  %1186 = vst.msk [vmem:[#allocation2 + $0x30] sm:$0xff] %vm647_vm0, %v2348_v23  ;;  %v2355_v27 = vmax.f32 %v2333_v17, %v841_v24  ;;  %906 = vperm.xlu1 %1993, %v2348_v23   ;;  %v868_v60 = vmul.f32 1.442695, %v855_v22 }
 0x1c9   : > { %v857_v28 = vsub.f32 %v2333_v17, %v2355_v27  ;;  %1187 = vst.msk [vmem:[#allocation2 + $0x38] sm:$0xff] %vm647_vm0, %v2355_v27  ;;  %v870_v22 = vmul.f32 1.442695, %v856_v26 }
 0x1cb   : > { %896 = vperm.xlu1 %1993, %v2328_v14  }
 0x1cf   : > { %901 = vperm.xlu1 %1993, %v2341_v20  }
 0x1d3   : > { %911 = vperm.xlu1 %1993, %v2355_v27  }
 0x239   : > { %v887_v31 = vpop.permute.xlu1 %886 }
 0x23a   : > { %v877_v32 = vpop.permute.xlu0 %876  ;;  %v916_v40 = vsub.f32 %v2244_v34, %v887_v31 }
 0x23b   : > { %v914_v33 = vsub.f32 %v2246_v36, %v877_v32 }
 0x23c   : > { %v926_v45 = vmul.f32 1.442695, %v916_v40  ;;  %v862_v40 = vmul.f32 1.442695, %v852_v2 }
 0x23d   : > { %v922_v35 = vmul.f32 1.442695, %v914_v33  ;;  %v892_v37 = vpop.permute.xlu1 %891 }
 0x23e   : > { %v917_v39 = vsub.f32 %v2248_v38, %v892_v37  ;;  %v860_v37 = vmul.f32 1.442695, %v851_v11  ;;  %v938_v11 = vld [vmem:[#allocation3] sm:$0xff] }
 0x23f   : > { %2014 = vpow2.f32 %v922_v35 }
 0x240   : > { %v928_v42 = vmul.f32 1.442695, %v917_v39  ;;  %v858_v39 = vmul.f32 1.442695, %v850_v4 }
 0x241   : > { %v882_v43 = vpop.permute.xlu1 %881 }
 0x242   : > { %2016 = vpow2.f32 %v928_v42  ;;  %v915_v44 = vsub.f32 %v2252_v41, %v882_v43  ;;  %v864_v42 = vmul.f32 1.442695, %v853_v9  ;;  %v2008_v9 = vld [vmem:[%s2518_s3 + $0x10] sm:$0xff]  }
 0x244   : > { %v924_v46 = vmul.f32 1.442695, %v915_v44  ;;  %v939_v44 = vld [vmem:[#allocation3 + $0x8] sm:$0xff] }
 0x246   : > { %2018 = vpow2.f32 %v924_v46  ;;  %v907_v48 = vpop.permute.xlu1 %906 }
 0x247   : > { %2020 = vpow2.f32 %v926_v45  ;;  %v920_v36 = vsub.f32 %v2262_v50, %v907_v48  ;;  %v872_v48 = vmul.f32 1.442695, %v857_v28  ;;  %v944_v28 = vld [vmem:[#allocation3 + $0x30] sm:$0xff] }
 0x249   : > { %v2015_v49 = vpop.eup %2014  ;;  %v934_v55 = vmul.f32 1.442695, %v920_v36 }
 0x24a   : > { %v897_v52 = vpop.permute.xlu1 %896  ;;  %v954_v54 = vsel %vm817_vm1, %v2015_v49, 0.0 }
 0x24b   : > { %v918_v38 = vsub.f32 %v2260_v47, %v897_v52  ;;  %955 = vadd.xlane.f32.xlu1 %v954_v54  ;;  %v940_v52 = vld [vmem:[#allocation3 + $0x10] sm:$0xff] }
 0x24c   : > { %v2017_v34 = vpop.eup %2016 }
 0x24d   : > { %v930_v56 = vmul.f32 1.442695, %v918_v38  ;;  %v963_v57 = vsel %vm817_vm1, %v2017_v34, 0.0  ;;  %v942_v38 = vld [vmem:[#allocation3 + $0x20] sm:$0xff] }
 0x24e   : > { %v902_v41 = vpop.permute.xlu1 %901 }
 0x24f   : > { %2022 = vpow2.f32 %v930_v56  ;;  %v919_v58 = vsub.f32 %v2264_v51, %v902_v41  ;;  %964 = vadd.xlane.f32.xlu1 %v963_v57  ;;  %v943_v56 = vld [vmem:[#allocation3 + $0x28] sm:$0xff] }
 0x250   : > { %v2019_v61 = vpop.eup %2018  ;;  %2024 = vpow2.f32 %v934_v55 }
 0x251   : > { %v2021_v63 = vpop.eup %2020  ;;  %v932_v50 = vmul.f32 1.442695, %v919_v58  ;;  %v957_v5 = vsel %vm817_vm1, %v2019_v61, 0.0  ;;  %v1051_v7 = vpack.c.bf16 %v2019_v61, %v2015_v49 }
 0x252   : > { %958 = vadd.xlane.f32.xlu0 %v957_v5  ;;  %v912_v47 = vpop.permute.xlu1 %911  ;;  %v1052_v12 = vpack.c.bf16 %v2017_v34, %v2021_v63  ;;  %v960_v51 = vsel %vm817_vm1, %v2021_v63, 0.0 }
 0x253   : > { %2026 = vpow2.f32 %v932_v50  ;;  %v921_v16 = vsub.f32 %v2268_v53, %v912_v47  ;;  %1916 = vmatprep.mubr.msk.bf16.mxu1 %vm817_vm1, %v1051_v7  ;;  %v945_v7 = vld [vmem:[#allocation3 + $0x38] sm:$0xff] }
 0x254   : > { %1917 = vmatmul.mubr.msk.bf16.vlgmr.msra.gmra.mrb[0].mxu1 %vm817_vm1, %v1052_v12 }
 0x255   : > { %v936_v18 = vmul.f32 1.442695, %v921_v16  ;;  %1925 = vmatpush3.bf16.msra.mxu1 %v2006_v6 }
 0x256   : > { %961 = vadd.xlane.f32.xlu0 %v960_v51  ;;  %1926 = vmatprep.subr.bf16.mxu1 %v2007_v8 }
 0x257   : > { %2028 = vpow2.f32 %v936_v18 }
 0x258   : > { %2030 = vpow2.f32 %v860_v37 }
 0x259   : > { %v2023_v21 = vpop.eup %2022  ;;  %2032 = vpow2.f32 %v858_v39  ;;  %1927 = vmatpush3.bf16.msra.mxu1 %v2007_v8 }
 0x25a   : > { %v966_v24 = vsel %vm817_vm1, %v2023_v21, 0.0  ;;  %v2025_v25 = vpop.eup %2024  ;;  %2034 = vpow2.f32 %v862_v40  ;;  %1928 = vmatprep.subr.bf16.mxu1 %v2008_v9 }
 0x25b   : > { %967 = vadd.xlane.f32.xlu0 %v966_v24  ;;  %v972_v30 = vsel %vm817_vm1, %v2025_v25, 0.0  ;;  %2036 = vpow2.f32 %v864_v42  ;;  %v2013_v42 = vld [vmem:[%s2518_s3 + $0x38] sm:$0xff]  }
 0x25c   : > { %2038 = vpow2.f32 %v866_v3 }
 0x25d   : > { %v2027_v29 = vpop.eup %2026  ;;  %2040 = vpow2.f32 %v868_v60  ;;  %1929 = vmatpush3.bf16.msra.mxu1 %v2008_v9 }
 0x25e   : > { %v969_v31 = vsel %vm817_vm1, %v2027_v29, 0.0  ;;  %v1053_v53 = vpack.c.bf16 %v2027_v29, %v2023_v21  ;;  %1930 = vmatprep.subr.bf16.mxu1 %v2009_v10  ;;  %2042 = vpow2.f32 %v870_v22  ;;  %v2010_v29 = vld [vmem:[%s2518_s3 + $0x20] sm:$0xff]  }
 0x25f   : > { %973 = vadd.xlane.f32.xlu0 %v972_v30  ;;  %970 = vadd.xlane.f32.xlu1 %v969_v31  ;;  %2044 = vpow2.f32 %v872_v48  ;;  %v2011_v31 = vld [vmem:[%s2518_s3 + $0x28] sm:$0xff]  }
 0x260   : > { %1920 = vmatprep.mubr.msk.bf16.mxu1 %vm817_vm1, %v1053_v53 }
 0x261   : > { %v2029_v32 = vpop.eup %2028  ;;  %1931 = vmatpush3.bf16.msra.mxu1 %v2009_v10 }
 0x262   : > { %v975_v33 = vsel %vm817_vm1, %v2029_v32, 0.0  ;;  %v1054_v35 = vpack.c.bf16 %v2029_v32, %v2025_v25  ;;  %v2031_v59 = vpop.eup %2030  ;;  %1932 = vmatprep.subr.bf16.mxu1 %v2010_v29 }
 0x263   : > { %976 = vadd.xlane.f32.xlu1 %v975_v33  ;;  %v2033_v62 = vpop.eup %2032  ;;  %v947_v49 = vmul.f32 %v2031_v59, %v939_v44 }
 0x264   : > { %1921 = vmatmul.mubr.msk.bf16.gmra.mrb[4].mxu1 %vm817_vm1, %v1054_v35  ;;  %v2035_v0 = vpop.eup %2034  ;;  %v946_v13 = vmul.f32 %v2033_v62, %v938_v11  ;;  %v2012_v35 = vld [vmem:[%s2518_s3 + $0x30] sm:$0xff]  }
 0x265   : > { %v2037_v2 = vpop.eup %2036  ;;  %v948_v15 = vmul.f32 %v2035_v0, %v940_v52  ;;  %1933 = vmatpush3.bf16.msra.mxu1 %v2010_v29 }
 0x266   : > { %v2039_v1 = vpop.eup %2038  ;;  %v949_v43 = vmul.f32 %v2037_v2, %v941_v19  ;;  %1934 = vmatprep.subr.bf16.mxu1 %v2011_v31 }
 0x267   : > { %v2041_v4 = vpop.eup %2040  ;;  %v950_v55 = vmul.f32 %v2039_v1, %v942_v38 }
 0x268   : > { %v2043_v17 = vpop.eup %2042  ;;  %v951_v61 = vmul.f32 %v2041_v4, %v943_v56 }
 0x269   : > { %v952_v58 = vmul.f32 %v2043_v17, %v944_v28  ;;  %v2045_v63 = vpop.eup %2044  ;;  %1935 = vmatpush3.bf16.msra.mxu1 %v2011_v31 }
 0x26a   : > { %v953_v18 = vmul.f32 %v2045_v63, %v945_v7  ;;  %1936 = vmatprep.subr.bf16.mxu1 %v2012_v35 }
 0x26d   : > { %1937 = vmatpush3.bf16.msra.mxu1 %v2012_v35 }
 0x26e   : > { %1938 = vmatprep.subr.bf16.mxu1 %v2013_v42 }
 0x271   : > { %1939 = vmatpush3.bf16.msra.mxu1 %v2013_v42 }
 0x274   : > { %1010 = vperm.xlu1 %1993, %v2031_v59  }
 0x275   : > { %1005 = vperm.xlu0 %1992, %v2033_v62  }
 0x278   : > { %1015 = vperm.xlu1 %1993, %v2035_v0  }
 0x279   : > { %1020 = vperm.xlu0 %1992, %v2037_v2  }
 0x27c   : > { %1025 = vperm.xlu1 %1993, %v2039_v1  }
 0x27d   : > { %1030 = vperm.xlu0 %1992, %v2041_v4  }
 0x2d8   : > { %v956_v14 = vpop.xlane.xlu1 %955 }
 0x2d9   : > { %v978_v20 = vadd.f32 %v956_v14, %v946_v13 }
 0x2db   : > { %987 = vst.msk [vmem:[#allocation3] sm:$0xff] %vm647_vm0, %v978_v20 }
 0x2dc   : > { %v965_v45 = vpop.xlane.xlu1 %964 }
 0x2dd   : > { %v981_v46 = vadd.f32 %v965_v45, %v949_v43 }
 0x2df   : > { %990 = vst.msk [vmem:[#allocation3 + $0x18] sm:$0xff] %vm647_vm0, %v981_v46  ;;  %v959_v36 = vpop.xlane.xlu0 %958 }
 0x2e0   : > { %v979_v54 = vadd.f32 %v959_v36, %v947_v49 }
 0x2e2   : > { %988 = vst.msk [vmem:[#allocation3 + $0x8] sm:$0xff] %vm647_vm0, %v979_v54  ;;  %v1199_v51 = vld [vmem:[#allocation3] sm:$0xff] }
 0x2e3   : > { %v962_v23 = vpop.xlane.xlu0 %961 }
 0x2e4   : > { %v980_v26 = vadd.f32 %v962_v23, %v948_v15 }
 0x2e6   : > { %989 = vst.msk [vmem:[#allocation3 + $0x10] sm:$0xff] %vm647_vm0, %v980_v26  ;;  %v1202_v34 = vld [vmem:[#allocation3 + $0x18] sm:$0xff] }
 0x2e7   : > { %2046 = vrcp.f32 %v1202_v34 }
 0x2e8   : > { %v968_v27 = vpop.xlane.xlu0 %967 }
 0x2e9   : > { %v982_v57 = vadd.f32 %v968_v27, %v950_v55  ;;  %v1200_v41 = vld [vmem:[#allocation3 + $0x8] sm:$0xff] }
 0x2ea   : > { %2048 = vrcp.f32 %v1200_v41 }
 0x2eb   : > { %991 = vst.msk [vmem:[#allocation3 + $0x20] sm:$0xff] %vm647_vm0, %v982_v57 }
 0x2ec   : > { %v974_v50 = vpop.xlane.xlu0 %973  ;;  %v971_v5 = vpop.xlane.xlu1 %970 }
 0x2ed   : > { %v984_v47 = vadd.f32 %v974_v50, %v952_v58  ;;  %v983_v12 = vadd.f32 %v971_v5, %v951_v61  ;;  %v1201_v16 = vld [vmem:[#allocation3 + $0x10] sm:$0xff] }
 0x2ee   : > { %2050 = vrcp.f32 %v1201_v16 }
 0x2ef   : > { %993 = vst.msk [vmem:[#allocation3 + $0x30] sm:$0xff] %vm647_vm0, %v984_v47  ;;  %992 = vst.msk [vmem:[#allocation3 + $0x28] sm:$0xff] %vm647_vm0, %v983_v12  ;;  %2052 = vrcp.f32 %v1199_v51 }
 0x2f0   : > { %v977_v21 = vpop.xlane.xlu1 %976 }
 0x2f1   : > { %v2047_v24 = vpop.eup %2046  ;;  %v985_v25 = vadd.f32 %v977_v21, %v953_v18 }
 0x2f2   : > { %1232 = vperm.xlu0 %1992, %v2047_v24   ;;  %v1203_v32 = vld [vmem:[#allocation3 + $0x20] sm:$0xff] }
 0x2f3   : > { %994 = vst.msk [vmem:[#allocation3 + $0x38] sm:$0xff] %vm647_vm0, %v985_v25 }
 0x2f4   : > { %v2049_v30 = vpop.eup %2048  ;;  %v1006_v11 = vpop.permute.xlu0 %1005 }
 0x2f5   : > { %v1011_v14 = vpop.permute.xlu1 %1010  ;;  %v1043_v52 = vmul.f32 0.0, %v1006_v11 }
 0x2f6   : > { %1222 = vperm.xlu0 %1992, %v2049_v30   ;;  %v1204_v53 = vld [vmem:[#allocation3 + $0x28] sm:$0xff]  ;;  %v1205_v39 = vld [vmem:[#allocation3 + $0x30] sm:$0xff]  ;;  %v1044_v54 = vmul.f32 0.0, %v1011_v14 }
 0x2f7   : > { %2054 = vrcp.f32 %v1204_v53  ;;  %v1858_v53 = vld [vmem:[%s630_s13 + $0x8] sm:$0xff]  }
 0x2f8   : > { %v2051_v33 = vpop.eup %2050  ;;  %2056 = vrcp.f32 %v1203_v32  ;;  %v1021_v13 = vpop.permute.xlu0 %1020  ;;  %v1823_v32 = vld [vmem:[%s630_s13] sm:$0xff]   ;;  %v1828_v35 = vunpack.c.l.bf16 %v1858_v53 }
 0x2f9   : > { %1227 = vperm.xlu1 %1993, %v2051_v33   ;;  %v2053_v40 = vpop.eup %2052  ;;  %v1016_v20 = vpop.permute.xlu1 %1015  ;;  %v1046_v44 = vmul.f32 0.0, %v1021_v13  ;;  %v1791_v33 = vld [vmem:[%s2519_s4] ss:$0 sm:$0xff] }
 0x2fa   : > { %1040 = vperm.xlu0 %1992, %v2045_v63   ;;  %v1206_v37 = vld [vmem:[#allocation3 + $0x38] sm:$0xff]  ;;  %v1045_v45 = vmul.f32 0.0, %v1016_v20 }
 0x2fb   : > { %2058 = vrcp.f32 %v1206_v37 }
 0x2fc   : > { %2060 = vrcp.f32 %v1205_v39  ;;  %v1031_v19 = vpop.permute.xlu0 %1030  ;;  %v1824_v39 = vunpack.c.l.bf16 %v1823_v32 }
 0x2fd   : > { %1217 = vperm.xlu1 %1993, %v2053_v40   ;;  %v1026_v43 = vpop.permute.xlu1 %1025  ;;  %v1048_v41 = vmul.f32 0.0, %v1031_v19  ;;  %v1860_v19 = vld [vmem:[%s630_s13 + $0x18] sm:$0xff]  }
 0x2fe   : > { %v1047_v58 = vmul.f32 0.0, %v1026_v43 }
 0x301   : > { %v2055_v3 = vpop.eup %2054  ;;  %1035 = vperm.xlu1 %1993, %v2043_v17  }
 0x302   : > { %1242 = vperm.xlu0 %1992, %v2055_v3   ;;  %v2057_v60 = vpop.eup %2056 }
 0x305   : > { %v2059_v59 = vpop.eup %2058  ;;  %1237 = vperm.xlu1 %1993, %v2057_v60  }
 0x306   : > { %1252 = vperm.xlu0 %1992, %v2059_v59   ;;  %v2061_v62 = vpop.eup %2060  ;;  %v1825_v59 = vunpack.c.h.bf16 %v1823_v32 }
 0x309   : > { %1247 = vperm.xlu1 %1993, %v2061_v62  }
 0x327   : > { %v1918_v0 = vpop.f32.mrb[0].mxu1 }
 0x328   : > { %v1133_v2 = vpop.f32.mrb[1].mxu1  ;;  %v1166_v46 = vadd.f32 %v1918_v0, %v1045_v45 }
 0x329   : > { %v1919_v1 = vpop.f32.mrb[2].mxu1  ;;  %v1164_v26 = vadd.f32 %v1133_v2, %v1043_v52 }
 0x32a   : > { %v1136_v4 = vpop.f32.mrb[3].mxu1  ;;  %v1167_v48 = vadd.f32 %v1919_v1, %v1046_v44 }
 0x32b   : > { %v1165_v38 = vadd.f32 %v1136_v4, %v1044_v54  ;;  %v1837_v54 = vunpack.c.h.bf16 %v1860_v19 }
 0x337   : > { %v1922_v6 = vpop.f32.mrb[4].mxu1 }
 0x338   : > { %v1149_v8 = vpop.f32.mrb[5].mxu1 }
 0x339   : > { %v1923_v9 = vpop.f32.mrb[6].mxu1  ;;  %v1168_v63 = vadd.f32 %v1149_v8, %v1047_v58 }
 0x33a   : > { %v1152_v10 = vpop.f32.mrb[7].mxu1 }
 0x33b   : > { %v1169_v50 = vadd.f32 %v1152_v10, %v1048_v41  ;;  %v1859_v10 = vld [vmem:[%s630_s13 + $0x10] sm:$0xff]  }
 0x33c   : > { %v1832_v13 = vunpack.c.l.bf16 %v1859_v10  ;;  %v1833_v43 = vunpack.c.h.bf16 %v1859_v10 }
 0x371   : > { %v1233_v22 = vpop.permute.xlu0 %1232 }
 0x372   : > { %v1258_v15 = vmul.f32 %v1233_v22, %v1167_v48 }
 0x375   : > { %v1223_v49 = vpop.permute.xlu0 %1222 }
 0x376   : > { %v1256_v17 = vmul.f32 %v1223_v49, %v1165_v38  ;;  %v1836_v49 = vunpack.c.l.bf16 %v1860_v19 }
 0x378   : > { %v1228_v36 = vpop.permute.xlu1 %1227 }
 0x379   : > { %v1257_v23 = vmul.f32 %v1228_v36, %v1166_v46  ;;  %v1041_v27 = vpop.permute.xlu0 %1040 }
 0x37a   : > { %v1050_v5 = vmul.f32 0.0, %v1041_v27 }
 0x37b   : > { %v1264_v34 = vpack.c.bf16 %v1258_v15, %v1257_v23 }
 0x37c   : > { %v1218_v55 = vpop.permute.xlu1 %1217  ;;  %v1171_v21 = vadd.f32 %v1923_v9, %v1050_v5 }
 0x37d   : > { %v1255_v28 = vmul.f32 %v1218_v55, %v1164_v26 }
 0x37f   : > { %v1263_v56 = vpack.c.bf16 %v1256_v17, %v1255_v28 }
 0x380   : > { %v1036_v57 = vpop.permute.xlu1 %1035 }
 0x381   : > { %v1243_v61 = vpop.permute.xlu0 %1242  ;;  %1940 = vmatprep.mubr.bf16.mxu1 %v1263_v56  ;;  %v1049_v7 = vmul.f32 0.0, %v1036_v57 }
 0x382   : > { %1941 = vmatmul.mubr.bf16.vlgmr.msra.gmra.mrb[8].mxu1 %v1264_v34  ;;  %v1260_v12 = vmul.f32 %v1243_v61, %v1169_v50 }
 0x383   : > { %v1170_v24 = vadd.f32 %v1922_v6, %v1049_v7  ;;  %v1829_v6 = vunpack.c.h.bf16 %v1858_v53 }
 0x384   : > { %v1238_v47 = vpop.permute.xlu1 %1237 }
 0x385   : > { %v1259_v16 = vmul.f32 %v1238_v47, %v1168_v63  ;;  %v1253_v18 = vpop.permute.xlu0 %1252 }
 0x386   : > { %v1262_v29 = vmul.f32 %v1253_v18, %v1171_v21 }
 0x387   : > { %v1265_v51 = vpack.c.bf16 %v1260_v12, %v1259_v16 }
 0x388   : > { %v1248_v25 = vpop.permute.xlu1 %1247 }
 0x389   : > { %v1261_v30 = vmul.f32 %v1248_v25, %v1170_v24  ;;  %1944 = vmatprep.mubr.bf16.mxu1 %v1265_v51 }
 0x38b   : > { %v1266_v31 = vpack.c.bf16 %v1262_v29, %v1261_v30 }
 0x38d   : > { %1945 = vmatmul.mubr.bf16.gmra.mrb[12].mxu1 %v1266_v31 }
 0x455   : > { %v1942_v37 = vpop.f32.mrb[8].mxu1 }
 0x456   : > { %v1381_v40 = vadd.f32 %v1942_v37, %v1791_v33  ;;  %v1372_v42 = vpop.f32.mrb[9].mxu1 }
 0x457   : > { %v1373_v3 = vadd.f32 %v1791_v33, %v1372_v42  ;;  %v1943_v60 = vpop.f32.mrb[10].mxu1 }
 0x458   : > { %v1375_v62 = vpop.f32.mrb[11].mxu1  ;;  %v1421_v0 = vadd.f32 %v1828_v35, %v1381_v40  ;;  %v1384_v2 = vadd.f32 %v1943_v60, %v1791_v33 }
 0x459   : > { %v1376_v1 = vadd.f32 %v1791_v33, %v1375_v62  ;;  %v1419_v4 = vadd.f32 %v1824_v39, %v1373_v3 }
 0x45a   : > { %1431 = vadd.xlane.f32.xlu0 %v1421_v0  ;;  %v1422_v9 = vadd.f32 %v1829_v6, %v1384_v2 }
 0x45b   : > { %1427 = vadd.xlane.f32.xlu1 %v1419_v4  ;;  %v1420_v8 = vadd.f32 %v1825_v59, %v1376_v1 }
 0x45e   : > { %1429 = vadd.xlane.f32.xlu0 %v1420_v8 }
 0x45f   : > { %1433 = vadd.xlane.f32.xlu1 %v1422_v9 }
 0x460   : > { %v1946_v11 = vpop.f32.mrb[12].mxu1 }
 0x461   : > { %v1388_v14 = vpop.f32.mrb[13].mxu1  ;;  %v1397_v45 = vadd.f32 %v1946_v11, %v1791_v33 }
 0x462   : > { %v1389_v20 = vadd.f32 %v1791_v33, %v1388_v14  ;;  %v1947_v22 = vpop.f32.mrb[14].mxu1 }
 0x463   : > { %v1391_v44 = vpop.f32.mrb[15].mxu1  ;;  %v1400_v36 = vadd.f32 %v1947_v22, %v1791_v33  ;;  %v1425_v15 = vadd.f32 %v1836_v49, %v1397_v45  ;;  %v1800_v22 = vld [vmem:[%s2521_s6] ss:$0 sm:$0xff] }
 0x464   : > { %v1392_v46 = vadd.f32 %v1791_v33, %v1391_v44  ;;  %v1423_v48 = vadd.f32 %v1832_v13, %v1389_v20 }
 0x465   : > { %v1426_v23 = vadd.f32 %v1837_v54, %v1400_v36 }
 0x466   : > { %1435 = vadd.xlane.f32.xlu0 %v1423_v48  ;;  %v1424_v52 = vadd.f32 %v1833_v43, %v1392_v46 }
 0x468   : > { %1437 = vadd.xlane.f32.xlu1 %v1424_v52 }
 0x46a   : > { %1439 = vadd.xlane.f32.xlu0 %v1425_v15 }
 0x46c   : > { %1441 = vadd.xlane.f32.xlu1 %v1426_v23 }
 0x4e7   : > { %v1432_v26 = vpop.xlane.xlu0 %1431 }
 0x4e8   : > { %v1446_v38 = vmul.f32 0.0078125, %v1432_v26  ;;  %v1428_v34 = vpop.xlane.xlu1 %1427  ;;  %v1801_v26 = vld [vmem:[%s2522_s7] ss:$0 sm:$0xff] }
 0x4e9   : > { %v1444_v55 = vmul.f32 0.0078125, %v1428_v34 }
 0x4ea   : > { %v1454_v17 = vsub.f32 %v1421_v0, %v1446_v38 }
 0x4eb   : > { %v1430_v27 = vpop.xlane.xlu0 %1429  ;;  %v2454_v28 = vsub.f32 %v1419_v4, %v1444_v55 }
 0x4ec   : > { %v1434_v56 = vpop.xlane.xlu1 %1433  ;;  %v1462_v57 = vmul.f32 %v1454_v17, %v1454_v17  ;;  %v1445_v41 = vmul.f32 0.0078125, %v1430_v27 }
 0x4ed   : > { %v1447_v58 = vmul.f32 0.0078125, %v1434_v56  ;;  %v1460_v63 = vmul.f32 %v2454_v28, %v2454_v28 }
 0x4ee   : > { %1472 = vadd.xlane.f32.xlu0 %v1462_v57  ;;  %v2460_v50 = vsub.f32 %v1420_v8, %v1445_v41 }
 0x4ef   : > { %v2456_v61 = vsub.f32 %v1422_v9, %v1447_v58 }
 0x4f0   : > { %v1461_v16 = vmul.f32 %v2460_v50, %v2460_v50 }
 0x4f1   : > { %v1463_v5 = vmul.f32 %v2456_v61, %v2456_v61 }
 0x4f2   : > { %1468 = vadd.xlane.f32.xlu0 %v1460_v63 }
 0x4f3   : > { %v1436_v7 = vpop.xlane.xlu0 %1435  ;;  %1474 = vadd.xlane.f32.xlu1 %v1463_v5 }
 0x4f4   : > { %v1448_v47 = vmul.f32 0.0078125, %v1436_v7 }
 0x4f5   : > { %v1438_v12 = vpop.xlane.xlu1 %1437 }
 0x4f6   : > { %v2466_v18 = vsub.f32 %v1423_v48, %v1448_v47  ;;  %v1449_v51 = vmul.f32 0.0078125, %v1438_v12 }
 0x4f7   : > { %v1440_v21 = vpop.xlane.xlu0 %1439  ;;  %1470 = vadd.xlane.f32.xlu1 %v1461_v16 }
 0x4f8   : > { %v2468_v24 = vsub.f32 %v1424_v52, %v1449_v51  ;;  %v1450_v25 = vmul.f32 0.0078125, %v1440_v21  ;;  %v1464_v29 = vmul.f32 %v2466_v18, %v2466_v18 }
 0x4f9   : > { %v1442_v30 = vpop.xlane.xlu1 %1441 }
 0x4fa   : > { %v2472_v31 = vsub.f32 %v1425_v15, %v1450_v25  ;;  %v1451_v53 = vmul.f32 0.0078125, %v1442_v30  ;;  %1476 = vadd.xlane.f32.xlu0 %v1464_v29  ;;  %v1465_v32 = vmul.f32 %v2468_v24, %v2468_v24 }
 0x4fc   : > { %v2476_v33 = vsub.f32 %v1426_v23, %v1451_v53  ;;  %1478 = vadd.xlane.f32.xlu1 %v1465_v32  ;;  %v1466_v35 = vmul.f32 %v2472_v31, %v2472_v31 }
 0x4fe   : > { %1480 = vadd.xlane.f32.xlu0 %v1466_v35  ;;  %v1467_v37 = vmul.f32 %v2476_v33, %v2476_v33 }
 0x500   : > { %1482 = vadd.xlane.f32.xlu1 %v1467_v37 }
 0x57b   : > { %v1473_v39 = vpop.xlane.xlu0 %1472 }
 0x57c   : > { %v1486_v40 = vmul.f32 0.0078125, %v1473_v39 }
 0x57e   : > { %v1494_v42 = vadd.f32 1e-05, %v1486_v40 }
 0x57f   : > { %v1469_v3 = vpop.xlane.xlu0 %1468 }
 0x580   : > { %2062 = vrsqrt.f32 %v1494_v42  ;;  %v1484_v60 = vmul.f32 0.0078125, %v1469_v3  ;;  %v1475_v59 = vpop.xlane.xlu1 %1474 }
 0x581   : > { %v1487_v62 = vmul.f32 0.0078125, %v1475_v59 }
 0x582   : > { %v1492_v0 = vadd.f32 1e-05, %v1484_v60 }
 0x583   : > { %v1495_v2 = vadd.f32 1e-05, %v1487_v62 }
 0x584   : > { %2064 = vrsqrt.f32 %v1492_v0  ;;  %v1471_v1 = vpop.xlane.xlu1 %1470 }
 0x585   : > { %2066 = vrsqrt.f32 %v1495_v2  ;;  %v1485_v4 = vmul.f32 0.0078125, %v1471_v1 }
 0x587   : > { %v1493_v6 = vadd.f32 1e-05, %v1485_v4  ;;  %v1477_v8 = vpop.xlane.xlu0 %1476 }
 0x588   : > { %v1488_v9 = vmul.f32 0.0078125, %v1477_v8 }
 0x589   : > { %2068 = vrsqrt.f32 %v1493_v6  ;;  %v1479_v10 = vpop.xlane.xlu1 %1478 }
 0x58a   : > { %v2063_v11 = vpop.eup %2062  ;;  %v1496_v13 = vadd.f32 1e-05, %v1488_v9  ;;  %v1489_v14 = vmul.f32 0.0078125, %v1479_v10 }
 0x58b   : > { %v1510_v19 = vmul.f32 %v2063_v11, %v1454_v17  ;;  %v1481_v20 = vpop.xlane.xlu0 %1480 }
 0x58c   : > { %2070 = vrsqrt.f32 %v1496_v13  ;;  %v1497_v43 = vadd.f32 1e-05, %v1489_v14  ;;  %v1490_v44 = vmul.f32 0.0078125, %v1481_v20 }
 0x58d   : > { %v1483_v45 = vpop.xlane.xlu1 %1482  ;;  %v1525_v52 = vmul.f32 %v1800_v22, %v1510_v19 }
 0x58e   : > { %v2065_v46 = vpop.eup %2064  ;;  %2072 = vrsqrt.f32 %v1497_v43  ;;  %v1498_v48 = vadd.f32 1e-05, %v1490_v44  ;;  %v1491_v49 = vmul.f32 0.0078125, %v1483_v45 }
 0x58f   : > { %v2067_v36 = vpop.eup %2066  ;;  %v1508_v54 = vmul.f32 %v2065_v46, %v2454_v28  ;;  %v1540_v55 = vadd.f32 %v1801_v26, %v1525_v52 }
 0x590   : > { %v1511_v15 = vmul.f32 %v2067_v36, %v2456_v61  ;;  %2074 = vrsqrt.f32 %v1498_v48  ;;  %v1499_v23 = vadd.f32 1e-05, %v1491_v49 }
 0x591   : > { %v1523_v17 = vmul.f32 %v1800_v22, %v1508_v54 }
 0x592   : > { %v1526_v38 = vmul.f32 %v1800_v22, %v1511_v15  ;;  %2076 = vrsqrt.f32 %v1499_v23 }
 0x593   : > { %v2069_v34 = vpop.eup %2068  ;;  %v1538_v63 = vadd.f32 %v1801_v26, %v1523_v17 }
 0x594   : > { %v1541_v27 = vadd.f32 %v1801_v26, %v1526_v38  ;;  %v1509_v56 = vmul.f32 %v2069_v34, %v2460_v50 }
 0x596   : > { %v2071_v28 = vpop.eup %2070  ;;  %v1846_v57 = vpack.c.bf16 %v1541_v27, %v1540_v55  ;;  %v1524_v41 = vmul.f32 %v1800_v22, %v1509_v56 }
 0x597   : > { %v1512_v58 = vmul.f32 %v2071_v28, %v2466_v18 }
 0x598   : > { %v2073_v61 = vpop.eup %2072  ;;  %1861 = vst [vmem:[%s640_s22 + $0x8] sm:$0xff] %v1846_v57   ;;  %v1539_v5 = vadd.f32 %v1801_v26, %v1524_v41 }
 0x599   : > { %v1527_v7 = vmul.f32 %v1800_v22, %v1512_v58  ;;  %v1513_v47 = vmul.f32 %v2073_v61, %v2468_v24 }
 0x59a   : > { %v2075_v12 = vpop.eup %2074  ;;  %v1841_v16 = vpack.c.bf16 %v1539_v5, %v1538_v63 }
 0x59b   : > { %v1528_v50 = vmul.f32 %v1800_v22, %v1513_v47  ;;  %v1514_v51 = vmul.f32 %v2075_v12, %v2472_v31  ;;  %v1542_v25 = vadd.f32 %v1801_v26, %v1527_v7 }
 0x59c   : > { %v2077_v21 = vpop.eup %2076  ;;  %1842 = vst [vmem:[%s640_s22] sm:$0xff] %v1841_v16  }
 0x59d   : > { %v1543_v29 = vadd.f32 %v1801_v26, %v1528_v50  ;;  %v1529_v30 = vmul.f32 %v1800_v22, %v1514_v51  ;;  %v1515_v53 = vmul.f32 %v2077_v21, %v2476_v33 }
 0x59f   : > { %v1851_v18 = vpack.c.bf16 %v1543_v29, %v1542_v25  ;;  %v1530_v32 = vmul.f32 %v1800_v22, %v1515_v53  ;;  %v1544_v35 = vadd.f32 %v1801_v26, %v1529_v30 }
 0x5a1   : > { %1862 = vst [vmem:[%s640_s22 + $0x10] sm:$0xff] %v1851_v18   ;;  %v1545_v37 = vadd.f32 %v1801_v26, %v1530_v32 }
 0x5a3   : > { %v1856_v39 = vpack.c.bf16 %v1545_v37, %v1544_v35 }
 0x5a5   : > { %1863 = vst [vmem:[%s640_s22 + $0x18] sm:$0xff] %v1856_v39  }
 0x5a6 PF: > { %s18_s9 = sadd.s32 1, %s2116_s9   ;;  %s2525_s27 = smov %s2104_s28 }
 0x5a7   : > { %p15_p10 = scmp.ge.s32.totalorder %s18_s9, 6   ;;  %s2526_s28 = smov %s2205_s14 }
 0x5a8   : > { %s2527_s29 = smov %s2112_s30  ;;  %s2528_s30 = smov %s2530_s10 }
 0x5a9   :  { %17 = sbr.rel (!%p15_p10) target bundleno = 3 (0x3), region = 237 }

// kernel: _lambda_.16
= control target key start
LH: loop header
LB: loop body
LE: loop exit
PB: predicated region body
PF: predicated region fallthrough
CT: control target
= control target key end

     0   :  { %s2320_s27 = smov 0   ;;  %s2322_s28 = smov 0   ;;  %s2704_s0 = inlined_call_operand.vmem [shape: bf16[4,64,384], index: 0, kind: input, shape index: {}, may-alias: {0,1,2}]   ;;  %s2705_s1 = inlined_call_operand.vmem [shape: bf16[4,64,384], index: 1, kind: input, shape index: {}, may-alias: {0,1,2}]   ;;  %s2706_s2 = inlined_call_operand.vmem [shape: bf16[4,64,384], index: 2, kind: input, shape index: {}, may-alias: {0,1,2}]   ;;  %s2707_s3 = inlined_call_operand.vmem [shape: bf16[128,128], index: 3, kind: input, shape index: {}]   ;;  %s2708_s4 = inlined_call_operand.vmem [shape: f32[1,128], index: 4, kind: input, shape index: {}]   ;;  %s2709_s5 = inlined_call_operand.vmem [shape: bf16[4,64,128], index: 5, kind: input, shape index: {}]   ;;  %s2710_s6 = inlined_call_operand.vmem [shape: f32[1,128], index: 6, kind: input, shape index: {}]   ;;  %s2711_s7 = inlined_call_operand.vmem [shape: f32[1,128], index: 7, kind: input, shape index: {}]   ;;  %s2712_s8 = inlined_call_operand.vmem [shape: bf16[4,64,128], index: 8, kind: output, shape index: {}]  }
   0x1   :  { %s2324_s29 = smov 0   ;;  %s2326_s30 = smov 0  }
   0x2   :  { %s2328_s9 = smov 0   ;;  %s2330_s10 = smov 0  }
   0x3   :  { %s2332_s11 = smov 0  }
   0x4 LB: > { %s37_s12 = sadd.s32 1, %s2266_s10  ;;  %s46_s13 = sadd.s32 1, %s2258_s30  ;;  %s2270_s11 = sphi %s2332_s11, %s18_s11   ;;  %s2266_s10 = sphi %s2330_s10, %s2720_s10   ;;  %s2262_s9 = sphi %s2328_s9, %s2719_s9   ;;  %s2258_s30 = sphi %s2326_s30, %s2718_s30   ;;  %s2254_s29 = sphi %s2324_s29, %s2717_s29   ;;  %s2250_s28 = sphi %s2322_s28, %s2716_s28   ;;  %s2246_s27 = sphi %s2320_s27, %s2715_s27  }
   0x5   : > { %p39_p0 = scmp.ge.s32.totalorder %s37_s12, 4  ;;  %p53_p1 = scmp.ne.s32.totalorder %s2258_s30, %s2254_s29 }
   0x6   : > { %p54_p2 = scmp.eq.s32.totalorder %s2270_s11, 0  ;;  %s69_s14 = sadd.s32 2, %s2266_s10 }
   0x7   : > { %s2722_s12 = smov (%p39_p0, %s37_s12), 0  ;;  %s71_s17 = ssub.s32 0, %s69_s14 }
   0x8   : > { %p2365_p3 = por %p54_p2, %p53_p1  ;;  %s41_s16 = ssub.s32 %s2266_s10, %s2722_s12 }
   0x9   : > { %p44_p4 = scmp.eq.s32.totalorder %s41_s16, 0  ;;  %s1847_s18 = smin.u32 %s71_s17, %s69_s14 }
   0xa   : > { %s73_s19 = sand.u32 3, %s1847_s18   ;;  %s82_s20 = sadd.s32 2, %s2722_s12 }
   0xb   : > { %s2373_s21 = scalar_select %p44_p4, %s2258_s30, %s46_s13  }
   0xc   : > { %s84_s22 = ssub.s32 0, %s82_s20  ;;  %p107_p5 = scmp.ne.s32.totalorder %s2250_s28, %s2246_s27 }
   0xd   : > { %s1850_s23 = smin.u32 %s84_s22, %s82_s20  ;;  %p1849_p6 = scmp.lt.s32.totalorder %s73_s19, 0 }
   0xe   : > { %s80_s24 = sadd.s32 4, %s73_s19  ;;  %s86_s25 = sand.u32 3, %s1850_s23  }
   0xf   : > { %p2379_p7 = por %p107_p5, %p54_p2  ;;  %s2724_s24 = smov (!%p1849_p6, %s80_s24), %s73_s19 }
  0x10   : > { %p1852_p8 = scmp.lt.s32.totalorder %s86_s25, 0  ;;  %s93_s14 = sadd.s32 4, %s86_s25 }
  0x11   : > { %s100_s13 = sadd.s32 1, %s2250_s28  ;;  %p1860_p10 = scmp.ge.s32.totalorder %s2270_s11, 4 }
  0x12   : > { %s2726_s14 = smov (!%p1852_p8, %s93_s14), %s86_s25 }
  0x13   : > { %s95_s16 = ssub.s32 %s2724_s24, %s2726_s14  ;;  %339 = sbr.rel (%p1860_p10) target bundleno = 56 (0x38), region = 32 }
  0x14   : > { %p98_p9 = scmp.eq.s32.totalorder %s95_s16, 0 }
  0x16   : > { %s2388_s17 = scalar_select %p98_p9, %s2250_s28, %s100_s13  }
  0x1a   : > { %342 = sbr.rel (!%p2365_p3) target bundleno = 36 (0x24), region = 36  ;;  %s344_s18 = sand.u32 (%p2365_p3), 1, %s2258_s30  }
  0x1b   : > { %s2070_s19 = smul.u32 (%p2365_p3), 96, %s2266_s10  ;;  %s1861_s20 = sshll.u32 (%p2365_p3), %s344_s18, 5 }
  0x1c   : > { %s346_s14 = scalar_lea.vmem (%p2365_p3), [#allocation5], %s1861_s20 }
  0x1d   : > { %s352_s25 = scalar_lea.vmem (%p2365_p3), %s2704_s0, %s2070_s19 }
  0x1e   : > { %v368_v0 = vld [vmem:[%s352_s25] sm:$0xf] (%p2365_p3)  ;;  %v370_v1 = vld [vmem:[%s352_s25 + $0xc] sm:$0xf] (%p2365_p3)  ;;  %v372_v2 = vld [vmem:[%s352_s25 + $0x18] sm:$0xf] (%p2365_p3) }
  0x1f   : > { %369 = vst [vmem:[%s346_s14] sm:$0xf] (%p2365_p3), %v368_v0  ;;  %371 = vst [vmem:[%s346_s14 + $0x4] sm:$0xf] (%p2365_p3), %v370_v1  ;;  %v374_v3 = vld [vmem:[%s352_s25 + $0x24] sm:$0xf] (%p2365_p3) }
  0x20   : > { %373 = vst [vmem:[%s346_s14 + $0x8] sm:$0xf] (%p2365_p3), %v372_v2  ;;  %v376_v4 = vld [vmem:[%s352_s25 + $0x30] sm:$0xf] (%p2365_p3)  ;;  %v378_v5 = vld [vmem:[%s352_s25 + $0x3c] sm:$0xf] (%p2365_p3) }
  0x21   : > { %375 = vst [vmem:[%s346_s14 + $0xc] sm:$0xf] %v374_v3  ;;  %377 = vst [vmem:[%s346_s14 + $0x10] sm:$0xf] %v376_v4  ;;  %v380_v6 = vld [vmem:[%s352_s25 + $0x48] sm:$0xf] }
  0x22   : > { %379 = vst [vmem:[%s346_s14 + $0x14] sm:$0xf] %v378_v5  ;;  %v382_v7 = vld [vmem:[%s352_s25 + $0x54] sm:$0xf]  ;;  %381 = vst [vmem:[%s346_s14 + $0x18] sm:$0xf] %v380_v6 }
  0x23   : > { %383 = vst [vmem:[%s346_s14 + $0x1c] sm:$0xf] %v382_v7 }
  0x24 PF: > { %422 = sbr.rel (!%p2379_p7) target bundleno = 46 (0x2e), region = 77  ;;  %s424_s15 = sand.u32 (%p2379_p7), 1, %s2250_s28  }
  0x25   : > { %s1867_s16 = smul.u32 (%p2379_p7), 96, %s2724_s24  ;;  %s1863_s13 = sshll.u32 (%p2379_p7), %s424_s15, 5 }
  0x26   : > { %s426_s22 = scalar_lea.vmem (%p2379_p7), [#allocation6], %s1863_s13 }
  0x27   : > { %s1733_s20 = scalar_lea.vmem (%p2379_p7), %s2705_s1, %s1867_s16 }
  0x28   : > { %v1868_v8 = vld [vmem:[%s1733_s20 + $0x4] sm:$0xf] (%p2379_p7)  ;;  %v1869_v9 = vld [vmem:[%s1733_s20 + $0x10] sm:$0xf] (%p2379_p7)  ;;  %v1870_v10 = vld [vmem:[%s1733_s20 + $0x1c] sm:$0xf] (%p2379_p7) }
  0x29   : > { %463 = vst [vmem:[%s426_s22] sm:$0xf] (%p2379_p7), %v1868_v8  ;;  %465 = vst [vmem:[%s426_s22 + $0x4] sm:$0xf] (%p2379_p7), %v1869_v9  ;;  %v1871_v11 = vld [vmem:[%s1733_s20 + $0x28] sm:$0xf] (%p2379_p7) }
  0x2a   : > { %467 = vst [vmem:[%s426_s22 + $0x8] sm:$0xf] (%p2379_p7), %v1870_v10  ;;  %v1872_v12 = vld [vmem:[%s1733_s20 + $0x34] sm:$0xf] (%p2379_p7)  ;;  %v1873_v13 = vld [vmem:[%s1733_s20 + $0x40] sm:$0xf] (%p2379_p7) }
  0x2b   : > { %469 = vst [vmem:[%s426_s22 + $0xc] sm:$0xf] %v1871_v11  ;;  %471 = vst [vmem:[%s426_s22 + $0x10] sm:$0xf] %v1872_v12  ;;  %v1874_v14 = vld [vmem:[%s1733_s20 + $0x4c] sm:$0xf] }
  0x2c   : > { %473 = vst [vmem:[%s426_s22 + $0x14] sm:$0xf] %v1873_v13  ;;  %v1875_v15 = vld [vmem:[%s1733_s20 + $0x58] sm:$0xf]  ;;  %475 = vst [vmem:[%s426_s22 + $0x18] sm:$0xf] %v1874_v14 }
  0x2d   : > { %477 = vst [vmem:[%s426_s22 + $0x1c] sm:$0xf] %v1875_v15 }
  0x2e PF: > { %516 = sbr.rel (!%p2379_p7) target bundleno = 56 (0x38), region = 118  ;;  %s518_s23 = sand.u32 (%p2379_p7), 1, %s2250_s28  }
  0x2f   : > { %s1880_s25 = smul.u32 (%p2379_p7), 96, %s2724_s24  ;;  %s1876_s14 = sshll.u32 (%p2379_p7), %s518_s23, 5 }
  0x30   : > { %s520_s18 = scalar_lea.vmem (%p2379_p7), [#allocation7], %s1876_s14 }
  0x31   : > { %s1741_s13 = scalar_lea.vmem (%p2379_p7), %s2706_s2, %s1880_s25 }
  0x32   : > { %v1881_v16 = vld [vmem:[%s1741_s13 + $0x8] sm:$0xf] (%p2379_p7)  ;;  %v1882_v17 = vld [vmem:[%s1741_s13 + $0x14] sm:$0xf] (%p2379_p7)  ;;  %v1883_v18 = vld [vmem:[%s1741_s13 + $0x20] sm:$0xf] (%p2379_p7) }
  0x33   : > { %557 = vst [vmem:[%s520_s18] sm:$0xf] (%p2379_p7), %v1881_v16  ;;  %559 = vst [vmem:[%s520_s18 + $0x4] sm:$0xf] (%p2379_p7), %v1882_v17  ;;  %v1884_v19 = vld [vmem:[%s1741_s13 + $0x2c] sm:$0xf] (%p2379_p7) }
  0x34   : > { %561 = vst [vmem:[%s520_s18 + $0x8] sm:$0xf] (%p2379_p7), %v1883_v18  ;;  %v1885_v20 = vld [vmem:[%s1741_s13 + $0x38] sm:$0xf] (%p2379_p7)  ;;  %v1886_v21 = vld [vmem:[%s1741_s13 + $0x44] sm:$0xf] (%p2379_p7) }
  0x35   : > { %563 = vst [vmem:[%s520_s18 + $0xc] sm:$0xf] %v1884_v19  ;;  %565 = vst [vmem:[%s520_s18 + $0x10] sm:$0xf] %v1885_v20  ;;  %v1887_v22 = vld [vmem:[%s1741_s13 + $0x50] sm:$0xf] }
  0x36   : > { %567 = vst [vmem:[%s520_s18 + $0x14] sm:$0xf] %v1886_v21  ;;  %v1888_v23 = vld [vmem:[%s1741_s13 + $0x5c] sm:$0xf]  ;;  %569 = vst [vmem:[%s520_s18 + $0x18] sm:$0xf] %v1887_v22 }
  0x37   : > { %571 = vst [vmem:[%s520_s18 + $0x1c] sm:$0xf] %v1888_v23 }
  0x38 PF: > { %p1889_p11 = scmp.ge.s32.totalorder %s2270_s11, 1  ;;  %p622_p12 = scmp.lt.s32.totalorder %s2270_s11, 5 }
  0x3a   : > { %p623_p13 = pnand %p1889_p11, %p622_p12 }
  0x3b   : > { %s636_s24 = sand.u32 (!%p623_p13), 1, %s2246_s27   ;;  %s629_s26 = sand.u32 (!%p623_p13), 1, %s2254_s29   ;;  %vm751_vm0 = vcmask (!%p623_p13), 7168   ;;  %v2272_v32 = vmov (!%p623_p13), -inf   ;;  %vm921_vm1 = vcmask (!%p623_p13), 523264   ;;  %v2273_v57 = vmov (!%p623_p13), 0  }
  0x3c   : > { %626 = sbr.rel (%p623_p13) target bundleno = 1458 (0x5b2), region = 163  ;;  %s2416_s19 = sshll.u32 (!%p623_p13), %s636_s24, 5  ;;  %754 = vst.msk [vmem:[#allocation2 + $0x10] sm:$0xff] (!%p623_p13), %vm751_vm0, %v2272_v32  ;;  %752 = vst.msk [vmem:[#allocation2] sm:$0xff] (!%p623_p13), %vm751_vm0, %v2272_v32  ;;  %2130 = vset.pattern.permute.xlu0 (!%p623_p13), %v2273_v57  ;;  %2131 = vset.pattern.permute.xlu1 (!%p623_p13), %v2273_v57  ;;  %v2274_v58 = vmov (!%p623_p13), 0.0  }
  0x3d   : > { %s1890_s20 = sshll.u32 (!%p623_p13), %s629_s26, 5  ;;  %s638_s22 = scalar_lea.vmem (!%p623_p13), [#allocation6], %s2416_s19  ;;  %753 = vst.msk [vmem:[#allocation2 + $0x8] sm:$0xff] (!%p623_p13), %vm751_vm0, %v2272_v32  ;;  %755 = vst.msk [vmem:[#allocation2 + $0x18] sm:$0xff] (!%p623_p13), %vm751_vm0, %v2272_v32 }
  0x3e   : > { %v2132_v24 = vld [vmem:[%s638_s22] sm:$0xff] (!%p623_p13)   ;;  %v2133_v25 = vld [vmem:[%s638_s22 + $0x8] sm:$0xff] (!%p623_p13)   ;;  %s631_s23 = scalar_lea.vmem (!%p623_p13), [#allocation5], %s1890_s20  ;;  %v2134_v27 = vld [vmem:[%s638_s22 + $0x10] sm:$0xff] (!%p623_p13)   ;;  %756 = vst.msk [vmem:[#allocation2 + $0x20] sm:$0xff] (!%p623_p13), %vm751_vm0, %v2272_v32  ;;  %s645_s27 = scalar_lea.vmem (!%p623_p13), [#allocation7], %s2416_s19 }
  0x3f   : > { %2014 = vmatprep.subr.bf16.mxu0 (!%p623_p13), %v2132_v24  ;;  %v2136_v26 = vld [vmem:[%s631_s23] sm:$0xff] (!%p623_p13)   ;;  %v2135_v28 = vld [vmem:[%s638_s22 + $0x18] sm:$0xff] (!%p623_p13)   ;;  %v2137_v29 = vld [vmem:[%s631_s23 + $0x8] sm:$0xff] (!%p623_p13)   ;;  %757 = vst.msk [vmem:[#allocation2 + $0x28] sm:$0xff] (!%p623_p13), %vm751_vm0, %v2272_v32  ;;  %p727_p0 = scmp.lt.s32.totalorder (!%p623_p13), %s2262_s9, 3 }
  0x40   : > { %2015 = vmatpush3.bf16.xpose.msra.mxu0 (!%p623_p13), %v2132_v24  ;;  %2022 = vmatprep.mubr.bf16.mxu0 (!%p623_p13), %v2136_v26  ;;  %v2138_v30 = vld [vmem:[%s631_s23 + $0x10] sm:$0xff] (!%p623_p13)   ;;  %v2139_v31 = vld [vmem:[%s631_s23 + $0x18] sm:$0xff] (!%p623_p13)   ;;  %758 = vst.msk [vmem:[#allocation2 + $0x30] sm:$0xff] (!%p623_p13), %vm751_vm0, %v2272_v32  ;;  %759 = vst.msk [vmem:[#allocation2 + $0x38] sm:$0xff] (!%p623_p13), %vm751_vm0, %v2272_v32 }
  0x41   : > { %2016 = vmatprep.subr.bf16.mxu0 (!%p623_p13), %v2133_v25  ;;  %760 = vst.msk [vmem:[#allocation3] sm:$0xff] (!%p623_p13), %vm751_vm0, %v2274_v58  ;;  %761 = vst.msk [vmem:[#allocation3 + $0x8] sm:$0xff] (!%p623_p13), %vm751_vm0, %v2274_v58  ;;  %v2140_v18 = vld [vmem:[%s645_s27] sm:$0xff] (!%p623_p13)  }
  0x42   : > { %762 = vst.msk [vmem:[#allocation3 + $0x10] sm:$0xff] (!%p623_p13), %vm751_vm0, %v2274_v58  ;;  %763 = vst.msk [vmem:[#allocation3 + $0x18] sm:$0xff] (!%p623_p13), %vm751_vm0, %v2274_v58  ;;  %2030 = vmatprep.subr.bf16.mxu1 (!%p623_p13), %v2140_v18 }
  0x43   : > { %764 = vst.msk [vmem:[#allocation3 + $0x20] sm:$0xff] %vm751_vm0, %v2274_v58  ;;  %765 = vst.msk [vmem:[#allocation3 + $0x28] sm:$0xff] %vm751_vm0, %v2274_v58  ;;  %v2467_v59 = vld [vmem:[#allocation2 + $0x10] sm:$0xff]  ;;  %v2469_v60 = vld [vmem:[#allocation2] sm:$0xff]  ;;  %2031 = vmatpush3.bf16.msra.mxu1 %v2140_v18  ;;  %s2728_s9 = smov (!%p727_p0, %s2262_s9), 3 }
  0x44   : > { %766 = vst.msk [vmem:[#allocation3 + $0x30] sm:$0xff] %vm751_vm0, %v2274_v58  ;;  %767 = vst.msk [vmem:[#allocation3 + $0x38] sm:$0xff] %vm751_vm0, %v2274_v58  ;;  %v2477_v1 = vld [vmem:[#allocation2 + $0x18] sm:$0xff]  ;;  %v2484_v3 = vld [vmem:[#allocation2 + $0x8] sm:$0xff]  ;;  %s1934_s14 = sshll.u32 %s2728_s9, 5 }
  0x45   : > { %v2502_v10 = vld [vmem:[#allocation2 + $0x20] sm:$0xff]  ;;  %s734_s13 = scalar_lea.vmem %s2709_s5, %s1934_s14  ;;  %s744_s29 = scalar_lea.vmem %s2712_s8, %s1934_s14 }
  0x46   : > { %v2508_v13 = vld [vmem:[#allocation2 + $0x28] sm:$0xff] }
  0x47   : > { %v2513_v15 = vld [vmem:[#allocation2 + $0x30] sm:$0xff]  ;;  %v2516_v17 = vld [vmem:[#allocation2 + $0x38] sm:$0xff] }
  0x48   : > { %2017 = vmatpush3.bf16.xpose.msra.mxu0 %v2133_v25  ;;  %v2141_v25 = vld [vmem:[%s645_s27 + $0x8] sm:$0xff]  }
  0x49   : > { %2018 = vmatprep.subr.bf16.mxu0 %v2134_v27  ;;  %2032 = vmatprep.subr.bf16.mxu1 %v2141_v25 }
  0x4a   : > { %2033 = vmatpush3.bf16.msra.mxu1 %v2141_v25 }
  0x50   : > { %2019 = vmatpush3.bf16.xpose.msra.mxu0 %v2134_v27 }
  0x51   : > { %2020 = vmatprep.subr.bf16.mxu0 %v2135_v28 }
  0x58   : > { %2021 = vmatpush3.bf16.xpose.msra.mxu0 %v2135_v28 }
  0x5f   : > { %2023 = vmatmul.mubr.bf16.vlgmr.msra.gmra.mrb[0].mxu0 %v2137_v29  ;;  %v2142_v29 = vld [vmem:[%s645_s27 + $0x10] sm:$0xff]  }
  0x60   : > { %2026 = vmatprep.mubr.bf16.mxu0 %v2138_v30  ;;  %2034 = vmatprep.subr.bf16.mxu1 %v2142_v29  ;;  %v2143_v30 = vld [vmem:[%s645_s27 + $0x18] sm:$0xff]  }
  0x61   : > { %2035 = vmatpush3.bf16.msra.mxu1 %v2142_v29 }
  0x62   : > { %2036 = vmatprep.subr.bf16.mxu1 %v2143_v30 }
  0x65   : > { %2037 = vmatpush3.bf16.msra.mxu1 %v2143_v30 }
  0x67   : > { %2027 = vmatmul.mubr.bf16.gmra.mrb[4].mxu0 %v2139_v31 }
 0x132   : > { %v2024_v33 = vpop.f32.mrb[0].mxu0 }
 0x133   : > { %v2427_v34 = vmul.f32 0.088388346, %v2024_v33  ;;  %v874_v35 = vpop.f32.mrb[1].mxu0 }
 0x134   : > { %v2429_v36 = vmul.f32 0.088388346, %v874_v35  ;;  %v2025_v37 = vpop.f32.mrb[2].mxu0 }
 0x135   : > { %v2431_v38 = vmul.f32 0.088388346, %v2025_v37  ;;  %v877_v39 = vpop.f32.mrb[3].mxu0  ;;  %v928_v40 = vsel %vm921_vm1, %v2427_v34, -inf }
 0x136   : > { %v2435_v41 = vmul.f32 0.088388346, %v877_v39  ;;  %929 = vmax.xlane.f32.xlu1 %v928_v40  ;;  %v922_v42 = vsel %vm921_vm1, %v2429_v36, -inf }
 0x137   : > { %923 = vmax.xlane.f32.xlu0 %v922_v42  ;;  %v931_v43 = vsel %vm921_vm1, %v2431_v38, -inf }
 0x138   : > { %v925_v45 = vsel %vm921_vm1, %v2435_v41, -inf }
 0x13a   : > { %932 = vmax.xlane.f32.xlu1 %v931_v43  ;;  %v2028_v44 = vpop.f32.mrb[4].mxu0 }
 0x13b   : > { %926 = vmax.xlane.f32.xlu0 %v925_v45  ;;  %v890_v46 = vpop.f32.mrb[5].mxu0  ;;  %v2445_v50 = vmul.f32 0.088388346, %v2028_v44 }
 0x13c   : > { %v2443_v47 = vmul.f32 0.088388346, %v890_v46  ;;  %v2029_v48 = vpop.f32.mrb[6].mxu0 }
 0x13d   : > { %v893_v49 = vpop.f32.mrb[7].mxu0  ;;  %v2451_v53 = vmul.f32 0.088388346, %v2029_v48  ;;  %v940_v55 = vsel %vm921_vm1, %v2445_v50, -inf }
 0x13e   : > { %v2447_v51 = vmul.f32 0.088388346, %v893_v49  ;;  %v934_v52 = vsel %vm921_vm1, %v2443_v47, -inf }
 0x13f   : > { %935 = vmax.xlane.f32.xlu0 %v934_v52  ;;  %v943_v56 = vsel %vm921_vm1, %v2451_v53, -inf }
 0x140   : > { %v937_v54 = vsel %vm921_vm1, %v2447_v51, -inf }
 0x141   : > { %938 = vmax.xlane.f32.xlu1 %v937_v54 }
 0x143   : > { %941 = vmax.xlane.f32.xlu0 %v940_v55 }
 0x145   : > { %944 = vmax.xlane.f32.xlu1 %v943_v56 }
 0x1c3   : > { %v930_v61 = vpop.xlane.xlu1 %929 }
 0x1c4   : > { %v2472_v62 = vmax.f32 %v2467_v59, %v930_v61  ;;  %v924_v63 = vpop.xlane.xlu0 %923 }
 0x1c5   : > { %v2475_v0 = vmax.f32 %v2469_v60, %v924_v63 }
 0x1c6   : > { %v956_v2 = vsub.f32 %v2467_v59, %v2472_v62  ;;  %1286 = vst.msk [vmem:[#allocation2 + $0x10] sm:$0xff] %vm751_vm0, %v2472_v62  ;;  %990 = vperm.xlu1 %2131, %v2472_v62  }
 0x1c7   : > { %v954_v4 = vsub.f32 %v2469_v60, %v2475_v0  ;;  %1284 = vst.msk [vmem:[#allocation2] sm:$0xff] %vm751_vm0, %v2475_v0  ;;  %v933_v5 = vpop.xlane.xlu1 %932  ;;  %980 = vperm.xlu0 %2130, %v2475_v0  }
 0x1c8   : > { %v2492_v6 = vmax.f32 %v2477_v1, %v933_v5  ;;  %v927_v7 = vpop.xlane.xlu0 %926 }
 0x1c9   : > { %v2495_v8 = vmax.f32 %v2484_v3, %v927_v7 }
 0x1ca   : > { %v957_v9 = vsub.f32 %v2477_v1, %v2492_v6  ;;  %1287 = vst.msk [vmem:[#allocation2 + $0x18] sm:$0xff] %vm751_vm0, %v2492_v6  ;;  %995 = vperm.xlu1 %2131, %v2492_v6   ;;  %v2144_v6 = vld [vmem:[%s2707_s3] sm:$0xff]  }
 0x1cb   : > { %v955_v11 = vsub.f32 %v2484_v3, %v2495_v8  ;;  %1285 = vst.msk [vmem:[#allocation2 + $0x8] sm:$0xff] %vm751_vm0, %v2495_v8  ;;  %2046 = vmatprep.subr.bf16.mxu1 %v2144_v6 }
 0x1cc   : > { %v936_v12 = vpop.xlane.xlu0 %935 }
 0x1cd   : > { %v2511_v14 = vmax.f32 %v2502_v10, %v936_v12 }
 0x1ce   : > { %985 = vperm.xlu1 %2131, %v2495_v8   ;;  %v939_v16 = vpop.xlane.xlu1 %938  ;;  %v2145_v8 = vld [vmem:[%s2707_s3 + $0x8] sm:$0xff]  }
 0x1cf   : > { %v958_v19 = vsub.f32 %v2502_v10, %v2511_v14  ;;  %1288 = vst.msk [vmem:[#allocation2 + $0x20] sm:$0xff] %vm751_vm0, %v2511_v14  ;;  %v2524_v20 = vmax.f32 %v2508_v13, %v939_v16  ;;  %v2147_v10 = vld [vmem:[%s2707_s3 + $0x18] sm:$0xff]  }
 0x1d0   : > { %v942_v21 = vpop.xlane.xlu0 %941 }
 0x1d1   : > { %v959_v22 = vsub.f32 %v2508_v13, %v2524_v20  ;;  %1289 = vst.msk [vmem:[#allocation2 + $0x28] sm:$0xff] %vm751_vm0, %v2524_v20  ;;  %v2531_v23 = vmax.f32 %v2513_v15, %v942_v21  ;;  %v970_v3 = vmul.f32 1.442695, %v958_v19  ;;  %v1045_v19 = vld [vmem:[#allocation3 + $0x18] sm:$0xff] }
 0x1d2   : > { %v945_v24 = vpop.xlane.xlu1 %944 }
 0x1d3   : > { %v960_v26 = vsub.f32 %v2513_v15, %v2531_v23  ;;  %1290 = vst.msk [vmem:[#allocation2 + $0x30] sm:$0xff] %vm751_vm0, %v2531_v23  ;;  %v2538_v27 = vmax.f32 %v2516_v17, %v945_v24  ;;  %1010 = vperm.xlu1 %2131, %v2531_v23   ;;  %v972_v60 = vmul.f32 1.442695, %v959_v22 }
 0x1d5   : > { %v961_v28 = vsub.f32 %v2516_v17, %v2538_v27  ;;  %1291 = vst.msk [vmem:[#allocation2 + $0x38] sm:$0xff] %vm751_vm0, %v2538_v27  ;;  %v974_v22 = vmul.f32 1.442695, %v960_v26 }
 0x1d7   : > { %1000 = vperm.xlu1 %2131, %v2511_v14  }
 0x1db   : > { %1005 = vperm.xlu1 %2131, %v2524_v20  }
 0x1df   : > { %1015 = vperm.xlu1 %2131, %v2538_v27  }
 0x245   : > { %v991_v31 = vpop.permute.xlu1 %990 }
 0x246   : > { %v981_v32 = vpop.permute.xlu0 %980  ;;  %v1020_v40 = vsub.f32 %v2427_v34, %v991_v31 }
 0x247   : > { %v1018_v33 = vsub.f32 %v2429_v36, %v981_v32 }
 0x248   : > { %v1030_v45 = vmul.f32 1.442695, %v1020_v40  ;;  %v966_v40 = vmul.f32 1.442695, %v956_v2 }
 0x249   : > { %v1026_v35 = vmul.f32 1.442695, %v1018_v33  ;;  %v996_v37 = vpop.permute.xlu1 %995 }
 0x24a   : > { %v1021_v39 = vsub.f32 %v2431_v38, %v996_v37  ;;  %v964_v37 = vmul.f32 1.442695, %v955_v11  ;;  %v1042_v11 = vld [vmem:[#allocation3] sm:$0xff] }
 0x24b   : > { %2152 = vpow2.f32 %v1026_v35 }
 0x24c   : > { %v1032_v42 = vmul.f32 1.442695, %v1021_v39  ;;  %v962_v39 = vmul.f32 1.442695, %v954_v4 }
 0x24d   : > { %v986_v43 = vpop.permute.xlu1 %985 }
 0x24e   : > { %2154 = vpow2.f32 %v1032_v42  ;;  %v1019_v44 = vsub.f32 %v2435_v41, %v986_v43  ;;  %v968_v42 = vmul.f32 1.442695, %v957_v9  ;;  %v2146_v9 = vld [vmem:[%s2707_s3 + $0x10] sm:$0xff]  }
 0x250   : > { %v1028_v46 = vmul.f32 1.442695, %v1019_v44  ;;  %v1043_v44 = vld [vmem:[#allocation3 + $0x8] sm:$0xff] }
 0x252   : > { %2156 = vpow2.f32 %v1028_v46  ;;  %v1011_v48 = vpop.permute.xlu1 %1010 }
 0x253   : > { %2158 = vpow2.f32 %v1030_v45  ;;  %v1024_v36 = vsub.f32 %v2445_v50, %v1011_v48  ;;  %v976_v48 = vmul.f32 1.442695, %v961_v28  ;;  %v1048_v28 = vld [vmem:[#allocation3 + $0x30] sm:$0xff] }
 0x255   : > { %v2153_v49 = vpop.eup %2152  ;;  %v1038_v55 = vmul.f32 1.442695, %v1024_v36 }
 0x256   : > { %v1001_v52 = vpop.permute.xlu1 %1000  ;;  %v1058_v54 = vsel %vm921_vm1, %v2153_v49, 0.0 }
 0x257   : > { %v1022_v38 = vsub.f32 %v2443_v47, %v1001_v52  ;;  %1059 = vadd.xlane.f32.xlu1 %v1058_v54  ;;  %v1044_v52 = vld [vmem:[#allocation3 + $0x10] sm:$0xff] }
 0x258   : > { %v2155_v34 = vpop.eup %2154 }
 0x259   : > { %v1034_v56 = vmul.f32 1.442695, %v1022_v38  ;;  %v1067_v57 = vsel %vm921_vm1, %v2155_v34, 0.0  ;;  %v1046_v38 = vld [vmem:[#allocation3 + $0x20] sm:$0xff] }
 0x25a   : > { %v1006_v41 = vpop.permute.xlu1 %1005 }
 0x25b   : > { %2160 = vpow2.f32 %v1034_v56  ;;  %v1023_v58 = vsub.f32 %v2447_v51, %v1006_v41  ;;  %1068 = vadd.xlane.f32.xlu1 %v1067_v57  ;;  %v1047_v56 = vld [vmem:[#allocation3 + $0x28] sm:$0xff] }
 0x25c   : > { %v2157_v61 = vpop.eup %2156  ;;  %2162 = vpow2.f32 %v1038_v55 }
 0x25d   : > { %v2159_v63 = vpop.eup %2158  ;;  %v1036_v50 = vmul.f32 1.442695, %v1023_v58  ;;  %v1061_v5 = vsel %vm921_vm1, %v2157_v61, 0.0  ;;  %v1155_v7 = vpack.c.bf16 %v2157_v61, %v2153_v49 }
 0x25e   : > { %1062 = vadd.xlane.f32.xlu0 %v1061_v5  ;;  %v1016_v47 = vpop.permute.xlu1 %1015  ;;  %v1156_v12 = vpack.c.bf16 %v2155_v34, %v2159_v63  ;;  %v1064_v51 = vsel %vm921_vm1, %v2159_v63, 0.0 }
 0x25f   : > { %2164 = vpow2.f32 %v1036_v50  ;;  %v1025_v16 = vsub.f32 %v2451_v53, %v1016_v47  ;;  %2038 = vmatprep.mubr.msk.bf16.mxu1 %vm921_vm1, %v1155_v7  ;;  %v1049_v7 = vld [vmem:[#allocation3 + $0x38] sm:$0xff] }
 0x260   : > { %2039 = vmatmul.mubr.msk.bf16.vlgmr.msra.gmra.mrb[0].mxu1 %vm921_vm1, %v1156_v12 }
 0x261   : > { %v1040_v18 = vmul.f32 1.442695, %v1025_v16  ;;  %2047 = vmatpush3.bf16.msra.mxu1 %v2144_v6 }
 0x262   : > { %1065 = vadd.xlane.f32.xlu0 %v1064_v51  ;;  %2048 = vmatprep.subr.bf16.mxu1 %v2145_v8 }
 0x263   : > { %2166 = vpow2.f32 %v1040_v18 }
 0x264   : > { %2168 = vpow2.f32 %v964_v37 }
 0x265   : > { %v2161_v21 = vpop.eup %2160  ;;  %2170 = vpow2.f32 %v962_v39  ;;  %2049 = vmatpush3.bf16.msra.mxu1 %v2145_v8 }
 0x266   : > { %v1070_v24 = vsel %vm921_vm1, %v2161_v21, 0.0  ;;  %v2163_v25 = vpop.eup %2162  ;;  %2172 = vpow2.f32 %v966_v40  ;;  %2050 = vmatprep.subr.bf16.mxu1 %v2146_v9 }
 0x267   : > { %1071 = vadd.xlane.f32.xlu0 %v1070_v24  ;;  %v1076_v30 = vsel %vm921_vm1, %v2163_v25, 0.0  ;;  %2174 = vpow2.f32 %v968_v42  ;;  %v2151_v42 = vld [vmem:[%s2707_s3 + $0x38] sm:$0xff]  }
 0x268   : > { %2176 = vpow2.f32 %v970_v3 }
 0x269   : > { %v2165_v29 = vpop.eup %2164  ;;  %2178 = vpow2.f32 %v972_v60  ;;  %2051 = vmatpush3.bf16.msra.mxu1 %v2146_v9 }
 0x26a   : > { %v1073_v31 = vsel %vm921_vm1, %v2165_v29, 0.0  ;;  %v1157_v53 = vpack.c.bf16 %v2165_v29, %v2161_v21  ;;  %2052 = vmatprep.subr.bf16.mxu1 %v2147_v10  ;;  %2180 = vpow2.f32 %v974_v22  ;;  %v2148_v29 = vld [vmem:[%s2707_s3 + $0x20] sm:$0xff]  }
 0x26b   : > { %1077 = vadd.xlane.f32.xlu0 %v1076_v30  ;;  %1074 = vadd.xlane.f32.xlu1 %v1073_v31  ;;  %2182 = vpow2.f32 %v976_v48  ;;  %v2149_v31 = vld [vmem:[%s2707_s3 + $0x28] sm:$0xff]  }
 0x26c   : > { %2042 = vmatprep.mubr.msk.bf16.mxu1 %vm921_vm1, %v1157_v53 }
 0x26d   : > { %v2167_v32 = vpop.eup %2166  ;;  %2053 = vmatpush3.bf16.msra.mxu1 %v2147_v10 }
 0x26e   : > { %v1079_v33 = vsel %vm921_vm1, %v2167_v32, 0.0  ;;  %v1158_v35 = vpack.c.bf16 %v2167_v32, %v2163_v25  ;;  %v2169_v59 = vpop.eup %2168  ;;  %2054 = vmatprep.subr.bf16.mxu1 %v2148_v29 }
 0x26f   : > { %1080 = vadd.xlane.f32.xlu1 %v1079_v33  ;;  %v2171_v62 = vpop.eup %2170  ;;  %v1051_v49 = vmul.f32 %v2169_v59, %v1043_v44 }
 0x270   : > { %2043 = vmatmul.mubr.msk.bf16.gmra.mrb[4].mxu1 %vm921_vm1, %v1158_v35  ;;  %v2173_v0 = vpop.eup %2172  ;;  %v1050_v13 = vmul.f32 %v2171_v62, %v1042_v11  ;;  %v2150_v35 = vld [vmem:[%s2707_s3 + $0x30] sm:$0xff]  }
 0x271   : > { %v2175_v2 = vpop.eup %2174  ;;  %v1052_v15 = vmul.f32 %v2173_v0, %v1044_v52  ;;  %2055 = vmatpush3.bf16.msra.mxu1 %v2148_v29 }
 0x272   : > { %v2177_v1 = vpop.eup %2176  ;;  %v1053_v43 = vmul.f32 %v2175_v2, %v1045_v19  ;;  %2056 = vmatprep.subr.bf16.mxu1 %v2149_v31 }
 0x273   : > { %v2179_v4 = vpop.eup %2178  ;;  %v1054_v55 = vmul.f32 %v2177_v1, %v1046_v38 }
 0x274   : > { %v2181_v17 = vpop.eup %2180  ;;  %v1055_v61 = vmul.f32 %v2179_v4, %v1047_v56 }
 0x275   : > { %v1056_v58 = vmul.f32 %v2181_v17, %v1048_v28  ;;  %v2183_v63 = vpop.eup %2182  ;;  %2057 = vmatpush3.bf16.msra.mxu1 %v2149_v31 }
 0x276   : > { %v1057_v18 = vmul.f32 %v2183_v63, %v1049_v7  ;;  %2058 = vmatprep.subr.bf16.mxu1 %v2150_v35 }
 0x279   : > { %2059 = vmatpush3.bf16.msra.mxu1 %v2150_v35 }
 0x27a   : > { %2060 = vmatprep.subr.bf16.mxu1 %v2151_v42 }
 0x27d   : > { %2061 = vmatpush3.bf16.msra.mxu1 %v2151_v42 }
 0x280   : > { %1114 = vperm.xlu1 %2131, %v2169_v59  }
 0x281   : > { %1109 = vperm.xlu0 %2130, %v2171_v62  }
 0x284   : > { %1119 = vperm.xlu1 %2131, %v2173_v0  }
 0x285   : > { %1124 = vperm.xlu0 %2130, %v2175_v2  }
 0x288   : > { %1129 = vperm.xlu1 %2131, %v2177_v1  }
 0x289   : > { %1134 = vperm.xlu0 %2130, %v2179_v4  }
 0x2e4   : > { %v1060_v14 = vpop.xlane.xlu1 %1059 }
 0x2e5   : > { %v1082_v20 = vadd.f32 %v1060_v14, %v1050_v13 }
 0x2e7   : > { %1091 = vst.msk [vmem:[#allocation3] sm:$0xff] %vm751_vm0, %v1082_v20 }
 0x2e8   : > { %v1069_v45 = vpop.xlane.xlu1 %1068 }
 0x2e9   : > { %v1085_v46 = vadd.f32 %v1069_v45, %v1053_v43 }
 0x2eb   : > { %1094 = vst.msk [vmem:[#allocation3 + $0x18] sm:$0xff] %vm751_vm0, %v1085_v46  ;;  %v1063_v36 = vpop.xlane.xlu0 %1062 }
 0x2ec   : > { %v1083_v54 = vadd.f32 %v1063_v36, %v1051_v49 }
 0x2ee   : > { %1092 = vst.msk [vmem:[#allocation3 + $0x8] sm:$0xff] %vm751_vm0, %v1083_v54  ;;  %v1303_v51 = vld [vmem:[#allocation3] sm:$0xff] }
 0x2ef   : > { %v1066_v23 = vpop.xlane.xlu0 %1065 }
 0x2f0   : > { %v1084_v26 = vadd.f32 %v1066_v23, %v1052_v15 }
 0x2f2   : > { %1093 = vst.msk [vmem:[#allocation3 + $0x10] sm:$0xff] %vm751_vm0, %v1084_v26  ;;  %v1306_v34 = vld [vmem:[#allocation3 + $0x18] sm:$0xff] }
 0x2f3   : > { %2184 = vrcp.f32 %v1306_v34 }
 0x2f4   : > { %v1072_v27 = vpop.xlane.xlu0 %1071 }
 0x2f5   : > { %v1086_v57 = vadd.f32 %v1072_v27, %v1054_v55  ;;  %v1304_v41 = vld [vmem:[#allocation3 + $0x8] sm:$0xff] }
 0x2f6   : > { %2186 = vrcp.f32 %v1304_v41 }
 0x2f7   : > { %1095 = vst.msk [vmem:[#allocation3 + $0x20] sm:$0xff] %vm751_vm0, %v1086_v57 }
 0x2f8   : > { %v1078_v50 = vpop.xlane.xlu0 %1077  ;;  %v1075_v5 = vpop.xlane.xlu1 %1074 }
 0x2f9   : > { %v1088_v47 = vadd.f32 %v1078_v50, %v1056_v58  ;;  %v1087_v12 = vadd.f32 %v1075_v5, %v1055_v61  ;;  %v1305_v16 = vld [vmem:[#allocation3 + $0x10] sm:$0xff] }
 0x2fa   : > { %2188 = vrcp.f32 %v1305_v16 }
 0x2fb   : > { %1097 = vst.msk [vmem:[#allocation3 + $0x30] sm:$0xff] %vm751_vm0, %v1088_v47  ;;  %1096 = vst.msk [vmem:[#allocation3 + $0x28] sm:$0xff] %vm751_vm0, %v1087_v12  ;;  %2190 = vrcp.f32 %v1303_v51 }
 0x2fc   : > { %v1081_v21 = vpop.xlane.xlu1 %1080 }
 0x2fd   : > { %v2185_v24 = vpop.eup %2184  ;;  %v1089_v25 = vadd.f32 %v1081_v21, %v1057_v18 }
 0x2fe   : > { %1336 = vperm.xlu0 %2130, %v2185_v24   ;;  %v1307_v32 = vld [vmem:[#allocation3 + $0x20] sm:$0xff] }
 0x2ff   : > { %1098 = vst.msk [vmem:[#allocation3 + $0x38] sm:$0xff] %vm751_vm0, %v1089_v25 }
 0x300   : > { %v2187_v30 = vpop.eup %2186  ;;  %v1110_v11 = vpop.permute.xlu0 %1109 }
 0x301   : > { %v1115_v14 = vpop.permute.xlu1 %1114  ;;  %v1147_v52 = vmul.f32 0.0, %v1110_v11 }
 0x302   : > { %1326 = vperm.xlu0 %2130, %v2187_v30   ;;  %v1308_v53 = vld [vmem:[#allocation3 + $0x28] sm:$0xff]  ;;  %v1309_v39 = vld [vmem:[#allocation3 + $0x30] sm:$0xff]  ;;  %v1148_v54 = vmul.f32 0.0, %v1115_v14 }
 0x303   : > { %2192 = vrcp.f32 %v1308_v53  ;;  %v1980_v53 = vld [vmem:[%s734_s13 + $0x8] sm:$0xff]  }
 0x304   : > { %v2189_v33 = vpop.eup %2188  ;;  %2194 = vrcp.f32 %v1307_v32  ;;  %v1125_v13 = vpop.permute.xlu0 %1124  ;;  %v1945_v32 = vld [vmem:[%s734_s13] sm:$0xff]   ;;  %v1950_v35 = vunpack.c.l.bf16 %v1980_v53 }
 0x305   : > { %1331 = vperm.xlu1 %2131, %v2189_v33   ;;  %v2191_v40 = vpop.eup %2190  ;;  %v1120_v20 = vpop.permute.xlu1 %1119  ;;  %v1150_v44 = vmul.f32 0.0, %v1125_v13  ;;  %v1913_v33 = vld [vmem:[%s2708_s4] ss:$0 sm:$0xff] }
 0x306   : > { %1144 = vperm.xlu0 %2130, %v2183_v63   ;;  %v1310_v37 = vld [vmem:[#allocation3 + $0x38] sm:$0xff]  ;;  %v1149_v45 = vmul.f32 0.0, %v1120_v20 }
 0x307   : > { %2196 = vrcp.f32 %v1310_v37 }
 0x308   : > { %2198 = vrcp.f32 %v1309_v39  ;;  %v1135_v19 = vpop.permute.xlu0 %1134  ;;  %v1946_v39 = vunpack.c.l.bf16 %v1945_v32 }
 0x309   : > { %1321 = vperm.xlu1 %2131, %v2191_v40   ;;  %v1130_v43 = vpop.permute.xlu1 %1129  ;;  %v1152_v41 = vmul.f32 0.0, %v1135_v19  ;;  %v1982_v19 = vld [vmem:[%s734_s13 + $0x18] sm:$0xff]  }
 0x30a   : > { %v1151_v58 = vmul.f32 0.0, %v1130_v43 }
 0x30d   : > { %v2193_v3 = vpop.eup %2192  ;;  %1139 = vperm.xlu1 %2131, %v2181_v17  }
 0x30e   : > { %1346 = vperm.xlu0 %2130, %v2193_v3   ;;  %v2195_v60 = vpop.eup %2194 }
 0x311   : > { %v2197_v59 = vpop.eup %2196  ;;  %1341 = vperm.xlu1 %2131, %v2195_v60  }
 0x312   : > { %1356 = vperm.xlu0 %2130, %v2197_v59   ;;  %v2199_v62 = vpop.eup %2198  ;;  %v1947_v59 = vunpack.c.h.bf16 %v1945_v32 }
 0x315   : > { %1351 = vperm.xlu1 %2131, %v2199_v62  }
 0x333   : > { %v2040_v0 = vpop.f32.mrb[0].mxu1 }
 0x334   : > { %v1237_v2 = vpop.f32.mrb[1].mxu1  ;;  %v1270_v46 = vadd.f32 %v2040_v0, %v1149_v45 }
 0x335   : > { %v2041_v1 = vpop.f32.mrb[2].mxu1  ;;  %v1268_v26 = vadd.f32 %v1237_v2, %v1147_v52 }
 0x336   : > { %v1240_v4 = vpop.f32.mrb[3].mxu1  ;;  %v1271_v48 = vadd.f32 %v2041_v1, %v1150_v44 }
 0x337   : > { %v1269_v38 = vadd.f32 %v1240_v4, %v1148_v54  ;;  %v1959_v54 = vunpack.c.h.bf16 %v1982_v19 }
 0x343   : > { %v2044_v6 = vpop.f32.mrb[4].mxu1 }
 0x344   : > { %v1253_v8 = vpop.f32.mrb[5].mxu1 }
 0x345   : > { %v2045_v9 = vpop.f32.mrb[6].mxu1  ;;  %v1272_v63 = vadd.f32 %v1253_v8, %v1151_v58 }
 0x346   : > { %v1256_v10 = vpop.f32.mrb[7].mxu1 }
 0x347   : > { %v1273_v50 = vadd.f32 %v1256_v10, %v1152_v41  ;;  %v1981_v10 = vld [vmem:[%s734_s13 + $0x10] sm:$0xff]  }
 0x348   : > { %v1954_v13 = vunpack.c.l.bf16 %v1981_v10  ;;  %v1955_v43 = vunpack.c.h.bf16 %v1981_v10 }
 0x37d   : > { %v1337_v22 = vpop.permute.xlu0 %1336 }
 0x37e   : > { %v1362_v15 = vmul.f32 %v1337_v22, %v1271_v48 }
 0x381   : > { %v1327_v49 = vpop.permute.xlu0 %1326 }
 0x382   : > { %v1360_v17 = vmul.f32 %v1327_v49, %v1269_v38  ;;  %v1958_v49 = vunpack.c.l.bf16 %v1982_v19 }
 0x384   : > { %v1332_v36 = vpop.permute.xlu1 %1331 }
 0x385   : > { %v1361_v23 = vmul.f32 %v1332_v36, %v1270_v46  ;;  %v1145_v27 = vpop.permute.xlu0 %1144 }
 0x386   : > { %v1154_v5 = vmul.f32 0.0, %v1145_v27 }
 0x387   : > { %v1368_v34 = vpack.c.bf16 %v1362_v15, %v1361_v23 }
 0x388   : > { %v1322_v55 = vpop.permute.xlu1 %1321  ;;  %v1275_v21 = vadd.f32 %v2045_v9, %v1154_v5 }
 0x389   : > { %v1359_v28 = vmul.f32 %v1322_v55, %v1268_v26 }
 0x38b   : > { %v1367_v56 = vpack.c.bf16 %v1360_v17, %v1359_v28 }
 0x38c   : > { %v1140_v57 = vpop.permute.xlu1 %1139 }
 0x38d   : > { %v1347_v61 = vpop.permute.xlu0 %1346  ;;  %2062 = vmatprep.mubr.bf16.mxu1 %v1367_v56  ;;  %v1153_v7 = vmul.f32 0.0, %v1140_v57 }
 0x38e   : > { %2063 = vmatmul.mubr.bf16.vlgmr.msra.gmra.mrb[8].mxu1 %v1368_v34  ;;  %v1364_v12 = vmul.f32 %v1347_v61, %v1273_v50 }
 0x38f   : > { %v1274_v24 = vadd.f32 %v2044_v6, %v1153_v7  ;;  %v1951_v6 = vunpack.c.h.bf16 %v1980_v53 }
 0x390   : > { %v1342_v47 = vpop.permute.xlu1 %1341 }
 0x391   : > { %v1363_v16 = vmul.f32 %v1342_v47, %v1272_v63  ;;  %v1357_v18 = vpop.permute.xlu0 %1356 }
 0x392   : > { %v1366_v29 = vmul.f32 %v1357_v18, %v1275_v21 }
 0x393   : > { %v1369_v51 = vpack.c.bf16 %v1364_v12, %v1363_v16 }
 0x394   : > { %v1352_v25 = vpop.permute.xlu1 %1351 }
 0x395   : > { %v1365_v30 = vmul.f32 %v1352_v25, %v1274_v24  ;;  %2066 = vmatprep.mubr.bf16.mxu1 %v1369_v51 }
 0x397   : > { %v1370_v31 = vpack.c.bf16 %v1366_v29, %v1365_v30 }
 0x399   : > { %2067 = vmatmul.mubr.bf16.gmra.mrb[12].mxu1 %v1370_v31 }
 0x461   : > { %v2064_v37 = vpop.f32.mrb[8].mxu1 }
 0x462   : > { %v1485_v40 = vadd.f32 %v2064_v37, %v1913_v33  ;;  %v1476_v42 = vpop.f32.mrb[9].mxu1 }
 0x463   : > { %v1477_v3 = vadd.f32 %v1913_v33, %v1476_v42  ;;  %v2065_v60 = vpop.f32.mrb[10].mxu1 }
 0x464   : > { %v1479_v62 = vpop.f32.mrb[11].mxu1  ;;  %v1525_v0 = vadd.f32 %v1950_v35, %v1485_v40  ;;  %v1488_v2 = vadd.f32 %v2065_v60, %v1913_v33 }
 0x465   : > { %v1480_v1 = vadd.f32 %v1913_v33, %v1479_v62  ;;  %v1523_v4 = vadd.f32 %v1946_v39, %v1477_v3 }
 0x466   : > { %1535 = vadd.xlane.f32.xlu0 %v1525_v0  ;;  %v1526_v9 = vadd.f32 %v1951_v6, %v1488_v2 }
 0x467   : > { %1531 = vadd.xlane.f32.xlu1 %v1523_v4  ;;  %v1524_v8 = vadd.f32 %v1947_v59, %v1480_v1 }
 0x46a   : > { %1533 = vadd.xlane.f32.xlu0 %v1524_v8 }
 0x46b   : > { %1537 = vadd.xlane.f32.xlu1 %v1526_v9 }
 0x46c   : > { %v2068_v11 = vpop.f32.mrb[12].mxu1 }
 0x46d   : > { %v1492_v14 = vpop.f32.mrb[13].mxu1  ;;  %v1501_v45 = vadd.f32 %v2068_v11, %v1913_v33 }
 0x46e   : > { %v1493_v20 = vadd.f32 %v1913_v33, %v1492_v14  ;;  %v2069_v22 = vpop.f32.mrb[14].mxu1 }
 0x46f   : > { %v1495_v44 = vpop.f32.mrb[15].mxu1  ;;  %v1504_v36 = vadd.f32 %v2069_v22, %v1913_v33  ;;  %v1529_v15 = vadd.f32 %v1958_v49, %v1501_v45  ;;  %v1922_v22 = vld [vmem:[%s2710_s6] ss:$0 sm:$0xff] }
 0x470   : > { %v1496_v46 = vadd.f32 %v1913_v33, %v1495_v44  ;;  %v1527_v48 = vadd.f32 %v1954_v13, %v1493_v20 }
 0x471   : > { %v1530_v23 = vadd.f32 %v1959_v54, %v1504_v36 }
 0x472   : > { %1539 = vadd.xlane.f32.xlu0 %v1527_v48  ;;  %v1528_v52 = vadd.f32 %v1955_v43, %v1496_v46 }
 0x474   : > { %1541 = vadd.xlane.f32.xlu1 %v1528_v52 }
 0x476   : > { %1543 = vadd.xlane.f32.xlu0 %v1529_v15 }
 0x478   : > { %1545 = vadd.xlane.f32.xlu1 %v1530_v23 }
 0x4f3   : > { %v1536_v26 = vpop.xlane.xlu0 %1535 }
 0x4f4   : > { %v1550_v38 = vmul.f32 0.0078125, %v1536_v26  ;;  %v1532_v34 = vpop.xlane.xlu1 %1531  ;;  %v1923_v26 = vld [vmem:[%s2711_s7] ss:$0 sm:$0xff] }
 0x4f5   : > { %v1548_v55 = vmul.f32 0.0078125, %v1532_v34 }
 0x4f6   : > { %v1558_v17 = vsub.f32 %v1525_v0, %v1550_v38 }
 0x4f7   : > { %v1534_v27 = vpop.xlane.xlu0 %1533  ;;  %v2637_v28 = vsub.f32 %v1523_v4, %v1548_v55 }
 0x4f8   : > { %v1538_v56 = vpop.xlane.xlu1 %1537  ;;  %v1566_v57 = vmul.f32 %v1558_v17, %v1558_v17  ;;  %v1549_v41 = vmul.f32 0.0078125, %v1534_v27 }
 0x4f9   : > { %v1551_v58 = vmul.f32 0.0078125, %v1538_v56  ;;  %v1564_v63 = vmul.f32 %v2637_v28, %v2637_v28 }
 0x4fa   : > { %1576 = vadd.xlane.f32.xlu0 %v1566_v57  ;;  %v2643_v50 = vsub.f32 %v1524_v8, %v1549_v41 }
 0x4fb   : > { %v2639_v61 = vsub.f32 %v1526_v9, %v1551_v58 }
 0x4fc   : > { %v1565_v16 = vmul.f32 %v2643_v50, %v2643_v50 }
 0x4fd   : > { %v1567_v5 = vmul.f32 %v2639_v61, %v2639_v61 }
 0x4fe   : > { %1572 = vadd.xlane.f32.xlu0 %v1564_v63 }
 0x4ff   : > { %v1540_v7 = vpop.xlane.xlu0 %1539  ;;  %1578 = vadd.xlane.f32.xlu1 %v1567_v5 }
 0x500   : > { %v1552_v47 = vmul.f32 0.0078125, %v1540_v7 }
 0x501   : > { %v1542_v12 = vpop.xlane.xlu1 %1541 }
 0x502   : > { %v2649_v18 = vsub.f32 %v1527_v48, %v1552_v47  ;;  %v1553_v51 = vmul.f32 0.0078125, %v1542_v12 }
 0x503   : > { %v1544_v21 = vpop.xlane.xlu0 %1543  ;;  %1574 = vadd.xlane.f32.xlu1 %v1565_v16 }
 0x504   : > { %v2651_v24 = vsub.f32 %v1528_v52, %v1553_v51  ;;  %v1554_v25 = vmul.f32 0.0078125, %v1544_v21  ;;  %v1568_v29 = vmul.f32 %v2649_v18, %v2649_v18 }
 0x505   : > { %v1546_v30 = vpop.xlane.xlu1 %1545 }
 0x506   : > { %v2655_v31 = vsub.f32 %v1529_v15, %v1554_v25  ;;  %v1555_v53 = vmul.f32 0.0078125, %v1546_v30  ;;  %1580 = vadd.xlane.f32.xlu0 %v1568_v29  ;;  %v1569_v32 = vmul.f32 %v2651_v24, %v2651_v24 }
 0x508   : > { %v2659_v33 = vsub.f32 %v1530_v23, %v1555_v53  ;;  %1582 = vadd.xlane.f32.xlu1 %v1569_v32  ;;  %v1570_v35 = vmul.f32 %v2655_v31, %v2655_v31 }
 0x50a   : > { %1584 = vadd.xlane.f32.xlu0 %v1570_v35  ;;  %v1571_v37 = vmul.f32 %v2659_v33, %v2659_v33 }
 0x50c   : > { %1586 = vadd.xlane.f32.xlu1 %v1571_v37 }
 0x587   : > { %v1577_v39 = vpop.xlane.xlu0 %1576 }
 0x588   : > { %v1590_v40 = vmul.f32 0.0078125, %v1577_v39 }
 0x58a   : > { %v1598_v42 = vadd.f32 1e-05, %v1590_v40 }
 0x58b   : > { %v1573_v3 = vpop.xlane.xlu0 %1572 }
 0x58c   : > { %2200 = vrsqrt.f32 %v1598_v42  ;;  %v1588_v60 = vmul.f32 0.0078125, %v1573_v3  ;;  %v1579_v59 = vpop.xlane.xlu1 %1578 }
 0x58d   : > { %v1591_v62 = vmul.f32 0.0078125, %v1579_v59 }
 0x58e   : > { %v1596_v0 = vadd.f32 1e-05, %v1588_v60 }
 0x58f   : > { %v1599_v2 = vadd.f32 1e-05, %v1591_v62 }
 0x590   : > { %2202 = vrsqrt.f32 %v1596_v0  ;;  %v1575_v1 = vpop.xlane.xlu1 %1574 }
 0x591   : > { %2204 = vrsqrt.f32 %v1599_v2  ;;  %v1589_v4 = vmul.f32 0.0078125, %v1575_v1 }
 0x593   : > { %v1597_v6 = vadd.f32 1e-05, %v1589_v4  ;;  %v1581_v8 = vpop.xlane.xlu0 %1580 }
 0x594   : > { %v1592_v9 = vmul.f32 0.0078125, %v1581_v8 }
 0x595   : > { %2206 = vrsqrt.f32 %v1597_v6  ;;  %v1583_v10 = vpop.xlane.xlu1 %1582 }
 0x596   : > { %v2201_v11 = vpop.eup %2200  ;;  %v1600_v13 = vadd.f32 1e-05, %v1592_v9  ;;  %v1593_v14 = vmul.f32 0.0078125, %v1583_v10 }
 0x597   : > { %v1614_v19 = vmul.f32 %v2201_v11, %v1558_v17  ;;  %v1585_v20 = vpop.xlane.xlu0 %1584 }
 0x598   : > { %2208 = vrsqrt.f32 %v1600_v13  ;;  %v1601_v43 = vadd.f32 1e-05, %v1593_v14  ;;  %v1594_v44 = vmul.f32 0.0078125, %v1585_v20 }
 0x599   : > { %v1587_v45 = vpop.xlane.xlu1 %1586  ;;  %v1629_v52 = vmul.f32 %v1922_v22, %v1614_v19 }
 0x59a   : > { %v2203_v46 = vpop.eup %2202  ;;  %2210 = vrsqrt.f32 %v1601_v43  ;;  %v1602_v48 = vadd.f32 1e-05, %v1594_v44  ;;  %v1595_v49 = vmul.f32 0.0078125, %v1587_v45 }
 0x59b   : > { %v2205_v36 = vpop.eup %2204  ;;  %v1612_v54 = vmul.f32 %v2203_v46, %v2637_v28  ;;  %v1644_v55 = vadd.f32 %v1923_v26, %v1629_v52 }
 0x59c   : > { %v1615_v15 = vmul.f32 %v2205_v36, %v2639_v61  ;;  %2212 = vrsqrt.f32 %v1602_v48  ;;  %v1603_v23 = vadd.f32 1e-05, %v1595_v49 }
 0x59d   : > { %v1627_v17 = vmul.f32 %v1922_v22, %v1612_v54 }
 0x59e   : > { %v1630_v38 = vmul.f32 %v1922_v22, %v1615_v15  ;;  %2214 = vrsqrt.f32 %v1603_v23 }
 0x59f   : > { %v2207_v34 = vpop.eup %2206  ;;  %v1642_v63 = vadd.f32 %v1923_v26, %v1627_v17 }
 0x5a0   : > { %v1645_v27 = vadd.f32 %v1923_v26, %v1630_v38  ;;  %v1613_v56 = vmul.f32 %v2207_v34, %v2643_v50 }
 0x5a2   : > { %v2209_v28 = vpop.eup %2208  ;;  %v1968_v57 = vpack.c.bf16 %v1645_v27, %v1644_v55  ;;  %v1628_v41 = vmul.f32 %v1922_v22, %v1613_v56 }
 0x5a3   : > { %v1616_v58 = vmul.f32 %v2209_v28, %v2649_v18 }
 0x5a4   : > { %v2211_v61 = vpop.eup %2210  ;;  %1983 = vst [vmem:[%s744_s29 + $0x8] sm:$0xff] %v1968_v57   ;;  %v1643_v5 = vadd.f32 %v1923_v26, %v1628_v41 }
 0x5a5   : > { %v1631_v7 = vmul.f32 %v1922_v22, %v1616_v58  ;;  %v1617_v47 = vmul.f32 %v2211_v61, %v2651_v24 }
 0x5a6   : > { %v2213_v12 = vpop.eup %2212  ;;  %v1963_v16 = vpack.c.bf16 %v1643_v5, %v1642_v63 }
 0x5a7   : > { %v1632_v50 = vmul.f32 %v1922_v22, %v1617_v47  ;;  %v1618_v51 = vmul.f32 %v2213_v12, %v2655_v31  ;;  %v1646_v25 = vadd.f32 %v1923_v26, %v1631_v7 }
 0x5a8   : > { %v2215_v21 = vpop.eup %2214  ;;  %1964 = vst [vmem:[%s744_s29] sm:$0xff] %v1963_v16  }
 0x5a9   : > { %v1647_v29 = vadd.f32 %v1923_v26, %v1632_v50  ;;  %v1633_v30 = vmul.f32 %v1922_v22, %v1618_v51  ;;  %v1619_v53 = vmul.f32 %v2215_v21, %v2659_v33 }
 0x5ab   : > { %v1973_v18 = vpack.c.bf16 %v1647_v29, %v1646_v25  ;;  %v1634_v32 = vmul.f32 %v1922_v22, %v1619_v53  ;;  %v1648_v35 = vadd.f32 %v1923_v26, %v1633_v30 }
 0x5ad   : > { %1984 = vst [vmem:[%s744_s29 + $0x10] sm:$0xff] %v1973_v18   ;;  %v1649_v37 = vadd.f32 %v1923_v26, %v1634_v32 }
 0x5af   : > { %v1978_v39 = vpack.c.bf16 %v1649_v37, %v1648_v35 }
 0x5b1   : > { %1985 = vst [vmem:[%s744_s29 + $0x18] sm:$0xff] %v1978_v39  }
 0x5b2 PF: > { %s18_s11 = sadd.s32 1, %s2270_s11   ;;  %s2715_s27 = smov %s2250_s28 }
 0x5b3   : > { %p15_p1 = scmp.ge.s32.totalorder %s18_s11, 6   ;;  %s2716_s28 = smov %s2388_s17 }
 0x5b4   : > { %s2717_s29 = smov %s2258_s30  ;;  %s2718_s30 = smov %s2373_s21 }
 0x5b5   : > { %s2719_s9 = smov %s2266_s10  ;;  %s2720_s10 = smov %s2722_s12 }
 0x5b6   :  { %17 = sbr.rel (!%p15_p1) target bundleno = 4 (0x4), region = 237 }

// kernel: _lambda_.17
= control target key start
LH: loop header
LB: loop body
LE: loop exit
PB: predicated region body
PF: predicated region fallthrough
CT: control target
= control target key end

     0   :  { %s2858_s24 = smov 0   ;;  %s4192_s0 = inlined_call_operand.vmem [shape: bf16[256,128], index: 0, kind: input, shape index: {}]   ;;  %s4193_s1 = inlined_call_operand.vmem [shape: bf16[128,512], index: 1, kind: input, shape index: {}]   ;;  %s4194_s2 = inlined_call_operand.vmem [shape: f32[1,512], index: 2, kind: input, shape index: {}]   ;;  %s4195_s3 = inlined_call_operand.vmem [shape: bf16[512,128], index: 3, kind: input, shape index: {}]   ;;  %s4196_s4 = inlined_call_operand.vmem [shape: f32[1,128], index: 4, kind: input, shape index: {}]   ;;  %s4197_s5 = inlined_call_operand.vmem [shape: f32[1,128], index: 5, kind: input, shape index: {}]   ;;  %s4198_s6 = inlined_call_operand.vmem [shape: f32[1,128], index: 6, kind: input, shape index: {}]   ;;  %s4199_s7 = inlined_call_operand.vmem [shape: bf16[256,128], index: 7, kind: output, shape index: {}]  }
   0x1 LB: > { %s2243_s25 = sadd.s32 4294967295, %s2815_s24   ;;  %p2247_p0 = scmp.ge.s32.totalorder %s2815_s24, 1  ;;  %s2815_s24 = sphi %s2858_s24, %s17_s24  }
   0x2   : > { %p238_p1 = scmp.lt.s32.totalorder %s2815_s24, 3 }
   0x4   : > { %p239_p2 = pnand %p2247_p0, %p238_p1 }
   0x6   : > { %242 = sbr.rel (%p239_p2) target bundleno = 975 (0x3cf), region = 48 }
   0xd   : > { %v2545_v0 = vld [vmem:[%s4193_s1 + $0x4] ss:$16 sps:$4 sm:$0xff]   ;;  %v2547_v1 = vld [vmem:[%s4193_s1 + $0xc] ss:$16 sps:$4 sm:$0xff]   ;;  %v2817_v2 = vmov 0   ;;  %s2248_s10 = sshll.u32 %s2243_s25, 4 }
   0xe   : > { %593 = vmatprep.mubr.bf16.mxu0 %v2817_v2  ;;  %706 = vmatprep.mubr.bf16.mxu1 %v2817_v2  ;;  %v2549_v3 = vld [vmem:[%s4193_s1] ss:$16 sps:$4 sm:$0xff]   ;;  %v2550_v4 = vld [vmem:[%s4193_s1 + $0x8] ss:$16 sps:$4 sm:$0xff]   ;;  %v2551_v5 = vld [vmem:[%s4193_s1 + $0x24] ss:$16 sps:$4 sm:$0xff]  }
   0xf   : > { %561 = vmatprep.subr.bf16.mxu0 %v2545_v0  ;;  %674 = vmatprep.subr.bf16.mxu1 %v2547_v1  ;;  %v2553_v6 = vld [vmem:[%s4193_s1 + $0x2c] ss:$16 sps:$4 sm:$0xff]   ;;  %v2555_v7 = vld [vmem:[%s4193_s1 + $0x20] ss:$16 sps:$4 sm:$0xff]   ;;  %v2556_v8 = vld [vmem:[%s4193_s1 + $0x28] ss:$16 sps:$4 sm:$0xff]  }
  0x10   : > { %562 = vmatpush1.bf16.msra.mxu0 %v2549_v3  ;;  %675 = vmatpush1.bf16.msra.mxu1 %v2550_v4  ;;  %v2557_v9 = vld [vmem:[%s4193_s1 + $0x44] ss:$16 sps:$4 sm:$0xff]   ;;  %v2559_v10 = vld [vmem:[%s4193_s1 + $0x4c] ss:$16 sps:$4 sm:$0xff]   ;;  %v2561_v11 = vld [vmem:[%s4193_s1 + $0x40] ss:$16 sps:$4 sm:$0xff]  }
  0x11   : > { %563 = vmatprep.subr.bf16.mxu0 %v2551_v5  ;;  %676 = vmatprep.subr.bf16.mxu1 %v2553_v6  ;;  %v2562_v12 = vld [vmem:[%s4193_s1 + $0x48] ss:$16 sps:$4 sm:$0xff]   ;;  %v2563_v13 = vld [vmem:[%s4193_s1 + $0x64] ss:$16 sps:$4 sm:$0xff]   ;;  %v2565_v14 = vld [vmem:[%s4193_s1 + $0x6c] ss:$16 sps:$4 sm:$0xff]  }
  0x12   : > { %v2567_v15 = vld [vmem:[%s4193_s1 + $0x60] ss:$16 sps:$4 sm:$0xff]   ;;  %v2568_v16 = vld [vmem:[%s4193_s1 + $0x68] ss:$16 sps:$4 sm:$0xff]   ;;  %v2569_v17 = vld [vmem:[%s4193_s1 + $0x84] ss:$16 sps:$4 sm:$0xff]  }
  0x13   : > { %v2571_v18 = vld [vmem:[%s4193_s1 + $0x8c] ss:$16 sps:$4 sm:$0xff]   ;;  %p271_p3 = scmp.lt.s32.totalorder %s2248_s10, 31  ;;  %v2573_v19 = vld [vmem:[%s4193_s1 + $0x80] ss:$16 sps:$4 sm:$0xff]  }
  0x14   : > { %564 = vmatpush1.bf16.msra.mxu0 %v2555_v7  ;;  %677 = vmatpush1.bf16.msra.mxu1 %v2556_v8  ;;  %v2574_v20 = vld [vmem:[%s4193_s1 + $0x88] ss:$16 sps:$4 sm:$0xff]   ;;  %v2575_v21 = vld [vmem:[%s4193_s1 + $0xa4] ss:$16 sps:$4 sm:$0xff]   ;;  %v2577_v22 = vld [vmem:[%s4193_s1 + $0xac] ss:$16 sps:$4 sm:$0xff]  }
  0x15   : > { %565 = vmatprep.subr.bf16.mxu0 %v2557_v9  ;;  %678 = vmatprep.subr.bf16.mxu1 %v2559_v10  ;;  %s4364_s10 = smov (!%p271_p3, %s2248_s10), 31  ;;  %v2579_v23 = vld [vmem:[%s4193_s1 + $0xa0] ss:$16 sps:$4 sm:$0xff]   ;;  %v2580_v24 = vld [vmem:[%s4193_s1 + $0xa8] ss:$16 sps:$4 sm:$0xff]   ;;  %v333_v9 = vlaneseq }
  0x16   : > { %v2581_v25 = vld [vmem:[%s4193_s1 + $0xc4] ss:$16 sps:$4 sm:$0xff]   ;;  %v2583_v26 = vld [vmem:[%s4193_s1 + $0xcc] ss:$16 sps:$4 sm:$0xff]   ;;  %s2249_s14 = sshll.u32 %s4364_s10, 2 }
  0x17   : > { %v2585_v27 = vld [vmem:[%s4193_s1 + $0xc0] ss:$16 sps:$4 sm:$0xff]   ;;  %v2586_v28 = vld [vmem:[%s4193_s1 + $0xc8] ss:$16 sps:$4 sm:$0xff]   ;;  %v2587_v29 = vld [vmem:[%s4193_s1 + $0xe4] ss:$16 sps:$4 sm:$0xff]   ;;  %s2965_s22 = scalar_lea.vmem %s4192_s0, %s2249_s14  ;;  %s4137_s28 = scalar_lea.vmem %s4199_s7, %s2249_s14 }
  0x18   : > { %566 = vmatpush1.bf16.msra.mxu0 %v2561_v11  ;;  %679 = vmatpush1.bf16.msra.mxu1 %v2562_v12  ;;  %v2589_v30 = vld [vmem:[%s4193_s1 + $0xec] ss:$16 sps:$4 sm:$0xff]   ;;  %v2591_v31 = vld [vmem:[%s4193_s1 + $0xe0] ss:$16 sps:$4 sm:$0xff]   ;;  %v2592_v32 = vld [vmem:[%s4193_s1 + $0xe8] ss:$16 sps:$4 sm:$0xff]  }
  0x19   : > { %567 = vmatprep.subr.bf16.mxu0 %v2563_v13  ;;  %680 = vmatprep.subr.bf16.mxu1 %v2565_v14  ;;  %v283_v33 = vld [vmem:[%s2965_s22] sm:$0xff]   ;;  %v2605_v38 = vld [vmem:[%s4195_s3 + $0x48] sm:$0xff]   ;;  %v2609_v43 = vld [vmem:[%s4195_s3 + $0x50] sm:$0xff]   ;;  %v334_v10 = vshrl.u32 %v333_v9, 7 }
  0x1a   : > { %v2601_v34 = vld [vmem:[%s4195_s3 + $0x40] sm:$0xff]   ;;  %v285_v39 = vld [vmem:[%s2965_s22 + $0x8] sm:$0xff]   ;;  %v2611_v44 = vld [vmem:[%s4195_s3 + $0xd0] sm:$0xff]  }
  0x1b   : > { %v2603_v35 = vld [vmem:[%s4195_s3 + $0xc0] sm:$0xff]   ;;  %v2607_v40 = vld [vmem:[%s4195_s3 + $0xc8] sm:$0xff]   ;;  %v2610_v45 = vld [vmem:[%s4195_s3 + $0x10] sm:$0xff]   ;;  %v335_v11 = vsub.s32 0, %v334_v10  ;;  %v343_v12 = vsub.s32 2, %v334_v10  ;;  %v339_v14 = vsub.s32 1, %v334_v10 }
  0x1c   : > { %568 = vmatpush1.bf16.msra.mxu0 %v2567_v15  ;;  %681 = vmatpush1.bf16.msra.mxu1 %v2568_v16  ;;  %v2602_v36 = vld [vmem:[%s4195_s3] sm:$0xff]   ;;  %v2606_v41 = vld [vmem:[%s4195_s3 + $0x8] sm:$0xff]   ;;  %v2612_v46 = vld [vmem:[%s4195_s3 + $0x90] sm:$0xff]   ;;  %v347_v15 = vsub.s32 3, %v334_v10 }
  0x1d   : > { %569 = vmatprep.subr.bf16.mxu0 %v2569_v17  ;;  %682 = vmatprep.subr.bf16.mxu1 %v2571_v18  ;;  %v2604_v37 = vld [vmem:[%s4195_s3 + $0x80] sm:$0xff]   ;;  %v2608_v42 = vld [vmem:[%s4195_s3 + $0x88] sm:$0xff]   ;;  %v2613_v47 = vld [vmem:[%s4195_s3 + $0x58] sm:$0xff]  }
  0x1e   : > { %v2615_v48 = vld [vmem:[%s4195_s3 + $0xd8] sm:$0xff]   ;;  %v287_v49 = vld [vmem:[%s2965_s22 + $0x10] sm:$0xff]   ;;  %v291_v53 = vld [vmem:[%s2965_s22 + $0x20] sm:$0xff]  }
  0x1f   : > { %v2614_v50 = vld [vmem:[%s4195_s3 + $0x18] sm:$0xff]   ;;  %v293_v54 = vld [vmem:[%s2965_s22 + $0x28] sm:$0xff]   ;;  %v295_v55 = vld [vmem:[%s2965_s22 + $0x30] sm:$0xff]  }
  0x20   : > { %570 = vmatpush1.bf16.msra.mxu0 %v2573_v19  ;;  %683 = vmatpush1.bf16.msra.mxu1 %v2574_v20  ;;  %v2616_v51 = vld [vmem:[%s4195_s3 + $0x98] sm:$0xff]   ;;  %v2617_v57 = vld [vmem:[%s4195_s3 + $0x60] sm:$0xff]   ;;  %v2621_v61 = vld [vmem:[%s4195_s3 + $0x68] sm:$0xff]  }
  0x21   : > { %571 = vmatprep.subr.bf16.mxu0 %v2575_v21  ;;  %684 = vmatprep.subr.bf16.mxu1 %v2577_v22  ;;  %v289_v52 = vld [vmem:[%s2965_s22 + $0x18] sm:$0xff]   ;;  %v2619_v58 = vld [vmem:[%s4195_s3 + $0xe0] sm:$0xff]   ;;  %v2623_v62 = vld [vmem:[%s4195_s3 + $0xe8] sm:$0xff]  }
  0x22   : > { %v297_v56 = vld [vmem:[%s2965_s22 + $0x38] sm:$0xff]   ;;  %v2618_v59 = vld [vmem:[%s4195_s3 + $0x20] sm:$0xff]   ;;  %v2622_v63 = vld [vmem:[%s4195_s3 + $0x28] sm:$0xff]  }
  0x23   : > { %v2620_v60 = vld [vmem:[%s4195_s3 + $0xa0] sm:$0xff]   ;;  %v2624_v0 = vld [vmem:[%s4195_s3 + $0xa8] sm:$0xff]   ;;  %v2625_v1 = vld [vmem:[%s4195_s3 + $0x70] sm:$0xff]  }
  0x24   : > { %572 = vmatpush1.bf16.msra.mxu0 %v2579_v23  ;;  %685 = vmatpush1.bf16.msra.mxu1 %v2580_v24  ;;  %v2626_v3 = vld [vmem:[%s4195_s3 + $0x30] sm:$0xff]   ;;  %v2629_v5 = vld [vmem:[%s4195_s3 + $0x78] sm:$0xff]   ;;  %v331_v13 = vld [vmem:[%s4194_s2] sm:$0xf] }
  0x25   : > { %573 = vmatprep.subr.bf16.mxu0 %v2581_v25  ;;  %686 = vmatprep.subr.bf16.mxu1 %v2583_v26  ;;  %v2628_v4 = vld [vmem:[%s4195_s3 + $0xb0] sm:$0xff]   ;;  %v2631_v6 = vld [vmem:[%s4195_s3 + $0xf8] sm:$0xff]   ;;  %v3097_v16 = vrot.slane %v331_v13, %v335_v11  ;;  %v3099_v17 = vrot.slane %v331_v13, %v343_v12  ;;  %v3101_v18 = vrot.slane %v331_v13, %v339_v14 }
  0x26   : > { %v2630_v7 = vld [vmem:[%s4195_s3 + $0x38] sm:$0xff]   ;;  %v3103_v19 = vrot.slane %v331_v13, %v347_v15 }
  0x27   : > { %v2632_v8 = vld [vmem:[%s4195_s3 + $0xb8] sm:$0xff]  }
  0x28   : > { %574 = vmatpush1.bf16.msra.mxu0 %v2585_v27  ;;  %687 = vmatpush1.bf16.msra.mxu1 %v2586_v28 }
  0x29   : > { %575 = vmatprep.subr.bf16.mxu0 %v2587_v29  ;;  %688 = vmatprep.subr.bf16.mxu1 %v2589_v30 }
  0x2c   : > { %576 = vmatpush1.bf16.msra.mxu0 %v2591_v31  ;;  %689 = vmatpush1.bf16.msra.mxu1 %v2592_v32 }
  0x2d   : > { %2408 = vmatprep.subr.bf16.mxu0 %v2601_v34  ;;  %2472 = vmatprep.subr.bf16.mxu1 %v2603_v35 }
  0x2f   : > { %594 = vmatmul.mubr.bf16.vlgmr.msra.gmra.mrb[0].mxu0 %v283_v33  ;;  %707 = vmatmul.mubr.bf16.vlgmr.msra.gmra.mrb[0].mxu1 %v283_v33 }
  0x30   : > { %603 = vmatprep.mubr.bf16.mxu0 %v2817_v2  ;;  %716 = vmatprep.mubr.bf16.mxu1 %v2817_v2 }
  0x31   : > { %2409 = vmatpush3.bf16.msra.mxu0 %v2602_v36  ;;  %2473 = vmatpush3.bf16.msra.mxu1 %v2604_v37 }
  0x32   : > { %2410 = vmatprep.subr.bf16.mxu0 %v2605_v38  ;;  %2474 = vmatprep.subr.bf16.mxu1 %v2607_v40 }
  0x35   : > { %2411 = vmatpush3.bf16.msra.mxu0 %v2606_v41  ;;  %2475 = vmatpush3.bf16.msra.mxu1 %v2608_v42 }
  0x36   : > { %2412 = vmatprep.subr.bf16.mxu0 %v2609_v43  ;;  %2476 = vmatprep.subr.bf16.mxu1 %v2611_v44 }
  0x37   : > { %604 = vmatmul.mubr.bf16.gmra.mrb[4].mxu0 %v285_v39  ;;  %717 = vmatmul.mubr.bf16.gmra.mrb[4].mxu1 %v285_v39 }
  0x38   : > { %613 = vmatprep.mubr.bf16.mxu0 %v2817_v2  ;;  %726 = vmatprep.mubr.bf16.mxu1 %v2817_v2 }
  0x39   : > { %2413 = vmatpush3.bf16.msra.mxu0 %v2610_v45  ;;  %2477 = vmatpush3.bf16.msra.mxu1 %v2612_v46 }
  0x3a   : > { %2414 = vmatprep.subr.bf16.mxu0 %v2613_v47  ;;  %2478 = vmatprep.subr.bf16.mxu1 %v2615_v48 }
  0x3d   : > { %2415 = vmatpush3.bf16.msra.mxu0 %v2614_v50  ;;  %2479 = vmatpush3.bf16.msra.mxu1 %v2616_v51 }
  0x3e   : > { %2416 = vmatprep.subr.bf16.mxu0 %v2617_v57  ;;  %2480 = vmatprep.subr.bf16.mxu1 %v2619_v58 }
  0x3f   : > { %614 = vmatmul.mubr.bf16.gmra.mrb[8].mxu0 %v287_v49  ;;  %727 = vmatmul.mubr.bf16.gmra.mrb[8].mxu1 %v287_v49 }
  0x40   : > { %623 = vmatprep.mubr.bf16.mxu0 %v2817_v2  ;;  %736 = vmatprep.mubr.bf16.mxu1 %v2817_v2 }
  0x41   : > { %2417 = vmatpush3.bf16.msra.mxu0 %v2618_v59  ;;  %2481 = vmatpush3.bf16.msra.mxu1 %v2620_v60 }
  0x42   : > { %2418 = vmatprep.subr.bf16.mxu0 %v2621_v61  ;;  %2482 = vmatprep.subr.bf16.mxu1 %v2623_v62 }
  0x45   : > { %2419 = vmatpush3.bf16.msra.mxu0 %v2622_v63  ;;  %2483 = vmatpush3.bf16.msra.mxu1 %v2624_v0 }
  0x46   : > { %2420 = vmatprep.subr.bf16.mxu0 %v2625_v1 }
  0x47   : > { %624 = vmatmul.mubr.bf16.gmra.mrb[12].mxu0 %v289_v52  ;;  %737 = vmatmul.mubr.bf16.gmra.mrb[12].mxu1 %v289_v52 }
  0x48   : > { %633 = vmatprep.mubr.bf16.mxu0 %v2817_v2  ;;  %746 = vmatprep.mubr.bf16.mxu1 %v2817_v2 }
  0x49   : > { %2421 = vmatpush3.bf16.msra.mxu0 %v2626_v3 }
  0x4a   : > { %2422 = vmatprep.subr.bf16.mxu0 %v2629_v5 }
  0x4d   : > { %2423 = vmatpush3.bf16.msra.mxu0 %v2630_v7 }
  0x4f   : > { %634 = vmatmul.mubr.bf16.gmra.mrb[16].mxu0 %v291_v53  ;;  %747 = vmatmul.mubr.bf16.gmra.mrb[16].mxu1 %v291_v53 }
  0x50   : > { %643 = vmatprep.mubr.bf16.mxu0 %v2817_v2  ;;  %756 = vmatprep.mubr.bf16.mxu1 %v2817_v2 }
  0x57   : > { %644 = vmatmul.mubr.bf16.gmra.mrb[20].mxu0 %v293_v54  ;;  %757 = vmatmul.mubr.bf16.gmra.mrb[20].mxu1 %v293_v54 }
  0x58   : > { %653 = vmatprep.mubr.bf16.mxu0 %v2817_v2  ;;  %766 = vmatprep.mubr.bf16.mxu1 %v2817_v2 }
  0x5f   : > { %654 = vmatmul.mubr.bf16.gmra.mrb[24].mxu0 %v295_v55  ;;  %767 = vmatmul.mubr.bf16.gmra.mrb[24].mxu1 %v295_v55 }
  0x60   : > { %663 = vmatprep.mubr.bf16.mxu0 %v2817_v2  ;;  %776 = vmatprep.mubr.bf16.mxu1 %v2817_v2  ;;  %v2627_v2 = vld [vmem:[%s4195_s3 + $0xf0] sm:$0xff]  }
  0x61   : > { %2484 = vmatprep.subr.bf16.mxu1 %v2627_v2 }
  0x62   : > { %2485 = vmatpush3.bf16.msra.mxu1 %v2628_v4 }
  0x63   : > { %2486 = vmatprep.subr.bf16.mxu1 %v2631_v6 }
  0x66   : > { %2487 = vmatpush3.bf16.msra.mxu1 %v2632_v8 }
  0x67   : > { %664 = vmatmul.mubr.bf16.gmra.mrb[28].mxu0 %v297_v56  ;;  %777 = vmatmul.mubr.bf16.gmra.mrb[28].mxu1 %v297_v56 }
 0x102   : > { %v595_v20 = vpop.f32.mrb[0].mxu0  ;;  %v708_v21 = vpop.f32.mrb[0].mxu1 }
 0x103   : > { %v3106_v22 = vadd.f32 %v595_v20, %v3097_v16  ;;  %v3109_v23 = vadd.f32 %v708_v21, %v3099_v17  ;;  %v597_v24 = vpop.f32.mrb[1].mxu0  ;;  %v710_v25 = vpop.f32.mrb[1].mxu1 }
 0x104   : > { %v3112_v26 = vadd.f32 %v597_v24, %v3101_v18  ;;  %v3115_v27 = vadd.f32 %v710_v25, %v3103_v19  ;;  %v599_v28 = vpop.f32.mrb[2].mxu0  ;;  %v712_v29 = vpop.f32.mrb[2].mxu1 }
 0x105   : > { %v787_v30 = vmul.f32 %v3106_v22, %v3106_v22  ;;  %v789_v31 = vmul.f32 %v3109_v23, %v3109_v23  ;;  %v3122_v32 = vadd.f32 %v599_v28, %v3097_v16  ;;  %v3125_v33 = vadd.f32 %v712_v29, %v3099_v17  ;;  %v601_v34 = vpop.f32.mrb[3].mxu0  ;;  %v714_v35 = vpop.f32.mrb[3].mxu1 }
 0x106   : > { %v788_v36 = vmul.f32 %v3112_v26, %v3112_v26  ;;  %v790_v37 = vmul.f32 %v3115_v27, %v3115_v27  ;;  %v3132_v38 = vadd.f32 %v601_v34, %v3101_v18  ;;  %v3135_v39 = vadd.f32 %v714_v35, %v3103_v19 }
 0x107   : > { %v851_v40 = vmul.f32 %v787_v30, %v3106_v22  ;;  %v853_v41 = vmul.f32 %v789_v31, %v3109_v23  ;;  %v791_v42 = vmul.f32 %v3122_v32, %v3122_v32  ;;  %v793_v43 = vmul.f32 %v3125_v33, %v3125_v33 }
 0x108   : > { %v852_v44 = vmul.f32 %v788_v36, %v3112_v26  ;;  %v854_v45 = vmul.f32 %v790_v37, %v3115_v27  ;;  %v792_v46 = vmul.f32 %v3132_v38, %v3132_v38  ;;  %v794_v47 = vmul.f32 %v3135_v39, %v3135_v39 }
 0x109   : > { %v915_v48 = vmul.f32 0.044715, %v851_v40  ;;  %v917_v49 = vmul.f32 0.044715, %v853_v41  ;;  %v855_v50 = vmul.f32 %v791_v42, %v3122_v32  ;;  %v857_v51 = vmul.f32 %v793_v43, %v3125_v33 }
 0x10a   : > { %v916_v52 = vmul.f32 0.044715, %v852_v44  ;;  %v918_v53 = vmul.f32 0.044715, %v854_v45  ;;  %v856_v54 = vmul.f32 %v792_v46, %v3132_v38  ;;  %v858_v55 = vmul.f32 %v794_v47, %v3135_v39  ;;  %v605_v56 = vpop.f32.mrb[4].mxu0  ;;  %v718_v57 = vpop.f32.mrb[4].mxu1 }
 0x10b   : > { %v979_v58 = vadd.f32 %v915_v48, %v3106_v22  ;;  %v981_v59 = vadd.f32 %v917_v49, %v3109_v23  ;;  %v919_v60 = vmul.f32 0.044715, %v855_v50  ;;  %v921_v61 = vmul.f32 0.044715, %v857_v51  ;;  %v607_v62 = vpop.f32.mrb[5].mxu0  ;;  %v720_v63 = vpop.f32.mrb[5].mxu1 }
 0x10c   : > { %v980_v0 = vadd.f32 %v916_v52, %v3112_v26  ;;  %v982_v1 = vadd.f32 %v918_v53, %v3115_v27  ;;  %v920_v2 = vmul.f32 0.044715, %v856_v54  ;;  %v922_v3 = vmul.f32 0.044715, %v858_v55  ;;  %v609_v4 = vpop.f32.mrb[6].mxu0  ;;  %v722_v5 = vpop.f32.mrb[6].mxu1 }
 0x10d   : > { %v1043_v6 = vmul.f32 0.7978846, %v979_v58  ;;  %v1045_v7 = vmul.f32 0.7978846, %v981_v59  ;;  %v983_v8 = vadd.f32 %v919_v60, %v3122_v32  ;;  %v985_v9 = vadd.f32 %v921_v61, %v3125_v33  ;;  %v611_v10 = vpop.f32.mrb[7].mxu0  ;;  %v724_v11 = vpop.f32.mrb[7].mxu1 }
 0x10e   : > { %v1044_v12 = vmul.f32 0.7978846, %v980_v0  ;;  %v1046_v13 = vmul.f32 0.7978846, %v982_v1  ;;  %v984_v14 = vadd.f32 %v920_v2, %v3132_v38  ;;  %v986_v15 = vadd.f32 %v922_v3, %v3135_v39 }
 0x10f   : > { %2641 = vtanh.f32 %v1043_v6  ;;  %v1047_v20 = vmul.f32 0.7978846, %v983_v8  ;;  %v1049_v21 = vmul.f32 0.7978846, %v985_v9  ;;  %v3162_v24 = vadd.f32 %v605_v56, %v3097_v16 }
 0x110   : > { %2643 = vtanh.f32 %v1045_v7  ;;  %v1048_v25 = vmul.f32 0.7978846, %v984_v14  ;;  %v1050_v28 = vmul.f32 0.7978846, %v986_v15  ;;  %v3165_v29 = vadd.f32 %v718_v57, %v3099_v17 }
 0x111   : > { %4239 = vst [vmem:[#allocation2_spill] sm:$0xff] %v3162_v24  ;;  %2645 = vtanh.f32 %v1044_v12  ;;  %v795_v30 = vmul.f32 %v3162_v24, %v3162_v24  ;;  %v3170_v31 = vadd.f32 %v607_v62, %v3101_v18  ;;  %v3173_v34 = vadd.f32 %v720_v63, %v3103_v19 }
 0x112   : > { %4240 = vst [vmem:[#allocation3_spill] sm:$0xff] %v3165_v29  ;;  %2647 = vtanh.f32 %v1046_v13  ;;  %v797_v35 = vmul.f32 %v3165_v29, %v3165_v29  ;;  %v3178_v36 = vadd.f32 %v609_v4, %v3097_v16  ;;  %v3181_v37 = vadd.f32 %v722_v5, %v3099_v17  ;;  %v3183_v40 = vpop.f32.mrb[8].mxu0  ;;  %v3185_v41 = vpop.f32.mrb[8].mxu1 }
 0x113   : > { %4241 = vst [vmem:[#allocation4_spill] sm:$0xff] %v3173_v34  ;;  %2649 = vtanh.f32 %v1047_v20  ;;  %v859_v42 = vmul.f32 %v795_v30, %v3162_v24  ;;  %v796_v43 = vmul.f32 %v3170_v31, %v3170_v31  ;;  %v798_v44 = vmul.f32 %v3173_v34, %v3173_v34  ;;  %v3192_v45 = vpop.f32.mrb[9].mxu0  ;;  %v3194_v46 = vpop.f32.mrb[9].mxu1 }
 0x114   : > { %4242 = vst [vmem:[#allocation5_spill] sm:$0xff] %v3178_v36  ;;  %4243 = vst [vmem:[#allocation6_spill] sm:$0xff] %v3181_v37  ;;  %2651 = vtanh.f32 %v1049_v21  ;;  %v861_v47 = vmul.f32 %v797_v35, %v3165_v29  ;;  %v799_v48 = vmul.f32 %v3178_v36, %v3178_v36  ;;  %v801_v49 = vmul.f32 %v3181_v37, %v3181_v37  ;;  %v3201_v50 = vpop.f32.mrb[10].mxu0  ;;  %v3203_v51 = vpop.f32.mrb[10].mxu1 }
 0x115   : > { %2653 = vtanh.f32 %v1048_v25  ;;  %v923_v52 = vmul.f32 0.044715, %v859_v42  ;;  %v860_v53 = vmul.f32 %v796_v43, %v3170_v31  ;;  %v862_v54 = vmul.f32 %v798_v44, %v3173_v34  ;;  %v3207_v55 = vpop.f32.mrb[11].mxu0  ;;  %v3209_v56 = vpop.f32.mrb[11].mxu1 }
 0x116   : > { %2655 = vtanh.f32 %v1050_v28  ;;  %v925_v57 = vmul.f32 0.044715, %v861_v47  ;;  %v863_v58 = vmul.f32 %v799_v48, %v3178_v36  ;;  %v865_v59 = vmul.f32 %v801_v49, %v3181_v37 }
 0x117   : > { %v987_v60 = vadd.f32 %v923_v52, %v3162_v24  ;;  %v924_v61 = vmul.f32 0.044715, %v860_v53  ;;  %v926_v62 = vmul.f32 0.044715, %v862_v54  ;;  %v3215_v63 = vadd.f32 %v611_v10, %v3101_v18 }
 0x118   : > { %v989_v0 = vadd.f32 %v925_v57, %v3165_v29  ;;  %v927_v1 = vmul.f32 0.044715, %v863_v58  ;;  %v929_v2 = vmul.f32 0.044715, %v865_v59  ;;  %v3219_v3 = vadd.f32 %v724_v11, %v3103_v19 }
 0x119   : > { %4244 = vst [vmem:[#allocation7_spill] sm:$0xff] %v3215_v63  ;;  %v2642_v4 = vpop.eup %2641  ;;  %v1051_v5 = vmul.f32 0.7978846, %v987_v60  ;;  %v988_v6 = vadd.f32 %v924_v61, %v3170_v31  ;;  %v990_v7 = vadd.f32 %v926_v62, %v3173_v34  ;;  %v800_v8 = vmul.f32 %v3215_v63, %v3215_v63 }
 0x11a   : > { %4245 = vst [vmem:[#allocation8_spill] sm:$0xff] %v3219_v3  ;;  %v2644_v9 = vpop.eup %2643  ;;  %v1171_v12 = vadd.f32 1.0, %v2642_v4  ;;  %v1053_v10 = vmul.f32 0.7978846, %v989_v0  ;;  %v991_v13 = vadd.f32 %v927_v1, %v3178_v36  ;;  %v993_v14 = vadd.f32 %v929_v2, %v3181_v37  ;;  %v3227_v15 = vpop.f32.mrb[12].mxu0 }
 0x11b   : > { %v3229_v11 = vpop.f32.mrb[12].mxu1  ;;  %v3231_v20 = vpop.eup %2645  ;;  %v1173_v21 = vadd.f32 1.0, %v2644_v9  ;;  %2657 = vtanh.f32 %v1051_v5  ;;  %v1052_v25 = vmul.f32 0.7978846, %v988_v6  ;;  %v1054_v28 = vmul.f32 0.7978846, %v990_v7 }
 0x11c   : > { %v3233_v30 = vpop.f32.mrb[13].mxu0  ;;  %v3235_v35 = vpop.eup %2647  ;;  %v1235_v42 = vmul.f32 0.5, %v1171_v12  ;;  %2659 = vtanh.f32 %v1053_v10  ;;  %v1055_v43 = vmul.f32 0.7978846, %v991_v13  ;;  %v1057_v44 = vmul.f32 0.7978846, %v993_v14 }
 0x11d   : > { %v3237_v47 = vpop.f32.mrb[13].mxu1  ;;  %v2650_v48 = vpop.eup %2649  ;;  %v1237_v49 = vmul.f32 0.5, %v1173_v21  ;;  %2661 = vtanh.f32 %v1052_v25  ;;  %v864_v52 = vmul.f32 %v800_v8, %v3215_v63  ;;  %v802_v53 = vmul.f32 %v3219_v3, %v3219_v3 }
 0x11e   : > { %v3242_v54 = vpop.f32.mrb[14].mxu0  ;;  %v3244_v57 = vpop.f32.mrb[14].mxu1  ;;  %v3247_v59 = vmul.f32 %v1235_v42, %v3106_v22  ;;  %v1175_v60 = vadd.f32 1.0, %v2650_v48  ;;  %2663 = vtanh.f32 %v1054_v28  ;;  %v3251_v61 = vadd.f32 %v3183_v40, %v3097_v16 }
 0x11f   : > { %v2652_v58 = vpop.eup %2651  ;;  %v3253_v62 = vpop.f32.mrb[15].mxu0  ;;  %v3260_v2 = vmul.f32 %v1237_v49, %v3109_v23  ;;  %2665 = vtanh.f32 %v1055_v43  ;;  %v928_v5 = vmul.f32 0.044715, %v864_v52  ;;  %v866_v7 = vmul.f32 %v802_v53, %v3219_v3 }
 0x120   : > { %4246 = vst [vmem:[#allocation9_spill] sm:$0xff] %v3251_v61  ;;  %v3255_v0 = vpop.f32.mrb[15].mxu1  ;;  %v3257_v1 = vpop.eup %2653  ;;  %v1177_v4 = vadd.f32 1.0, %v2652_v58  ;;  %v1239_v6 = vmul.f32 0.5, %v1175_v60  ;;  %2667 = vtanh.f32 %v1057_v44  ;;  %v803_v40 = vmul.f32 %v3251_v61, %v3251_v61 }
 0x121   : > { %v3262_v22 = vpop.eup %2655  ;;  %v992_v9 = vadd.f32 %v928_v5, %v3215_v63  ;;  %v3270_v12 = vadd.f32 %v3185_v41, %v3099_v17  ;;  %v3274_v23 = vadd.f32 %v3192_v45, %v3101_v18  ;;  %v930_v13 = vmul.f32 0.044715, %v866_v7 }
 0x122   : > { %v1241_v8 = vmul.f32 0.5, %v1177_v4  ;;  %v3277_v10 = vmul.f32 %v1239_v6, %v3122_v32  ;;  %v867_v14 = vmul.f32 %v803_v40, %v3251_v61  ;;  %v3282_v21 = vadd.f32 %v3194_v46, %v3103_v19  ;;  %v3284_v25 = vpop.f32.mrb[16].mxu0  ;;  %v3286_v28 = vpop.f32.mrb[16].mxu1 }
 0x123   : > { %4247 = vst [vmem:[#allocation10_spill] sm:$0xff] %v3270_v12  ;;  %4248 = vst [vmem:[#allocation11_spill] sm:$0xff] %v3274_v23  ;;  %v1056_v42 = vmul.f32 0.7978846, %v992_v9  ;;  %v805_v45 = vmul.f32 %v3270_v12, %v3270_v12  ;;  %v804_v32 = vmul.f32 %v3274_v23, %v3274_v23  ;;  %v3295_v43 = vpop.f32.mrb[17].mxu0  ;;  %v3297_v44 = vpop.f32.mrb[17].mxu1  ;;  %v994_v48 = vadd.f32 %v930_v13, %v3219_v3 }
 0x124   : > { %4249 = vst [vmem:[#allocation12_spill] sm:$0xff] %v3282_v21  ;;  %v3289_v41 = vmul.f32 %v1241_v8, %v3125_v33  ;;  %v931_v49 = vmul.f32 0.044715, %v867_v14  ;;  %v806_v33 = vmul.f32 %v3282_v21, %v3282_v21  ;;  %v3304_v52 = vpop.f32.mrb[18].mxu0  ;;  %v3306_v53 = vpop.f32.mrb[18].mxu1  ;;  %v3324_v14 = vadd.f32 %v3201_v50, %v3097_v16 }
 0x125   : > { %v3308_v58 = vpop.eup %2657  ;;  %2669 = vtanh.f32 %v1056_v42  ;;  %v869_v4 = vmul.f32 %v805_v45, %v3270_v12  ;;  %v868_v5 = vmul.f32 %v804_v32, %v3274_v23  ;;  %v3314_v6 = vpop.f32.mrb[19].mxu0  ;;  %v1058_v8 = vmul.f32 0.7978846, %v994_v48 }
 0x126   : > { %v3316_v7 = vpop.f32.mrb[19].mxu1  ;;  %v3318_v40 = vpop.eup %2659  ;;  %v995_v9 = vadd.f32 %v931_v49, %v3251_v61  ;;  %v870_v13 = vmul.f32 %v806_v33, %v3282_v21  ;;  %4251 = vst [vmem:[#allocation14_spill] sm:$0xff] %v3324_v14  ;;  %v3330_v32 = vadd.f32 %v3203_v51, %v3099_v17  ;;  %v3334_v46 = vadd.f32 %v3207_v55, %v3101_v18 }
 0x127   : > { %4250 = vst [vmem:[#allocation13_spill] sm:$0xff] %v3318_v40  ;;  %v3326_v42 = vpop.eup %2661  ;;  %v933_v45 = vmul.f32 0.044715, %v869_v4  ;;  %v932_v60 = vmul.f32 0.044715, %v868_v5  ;;  %2671 = vtanh.f32 %v1058_v8  ;;  %v807_v50 = vmul.f32 %v3324_v14, %v3324_v14 }
 0x128   : > { %4252 = vst [vmem:[#allocation15_spill] sm:$0xff] %v3330_v32  ;;  %4253 = vst [vmem:[#allocation16_spill] sm:$0xff] %v3334_v46  ;;  %v3336_v48 = vpop.eup %2663  ;;  %v1059_v49 = vmul.f32 0.7978846, %v995_v9  ;;  %v934_v33 = vmul.f32 0.044715, %v870_v13  ;;  %v809_v51 = vmul.f32 %v3330_v32, %v3330_v32  ;;  %v808_v55 = vmul.f32 %v3334_v46, %v3334_v46 }
 0x129   : > { %v3340_v61 = vpop.eup %2665  ;;  %v997_v4 = vadd.f32 %v933_v45, %v3270_v12  ;;  %v996_v5 = vadd.f32 %v932_v60, %v3274_v23  ;;  %v871_v9 = vmul.f32 %v807_v50, %v3324_v14  ;;  %v3354_v13 = vadd.f32 %v3209_v56, %v3103_v19 }
 0x12a   : > { %4254 = vst [vmem:[#allocation17_spill] sm:$0xff] %v3340_v61  ;;  %v3348_v37 = vpop.eup %2667  ;;  %2673 = vtanh.f32 %v1059_v49  ;;  %v998_v8 = vadd.f32 %v934_v33, %v3282_v21  ;;  %v3356_v45 = vpop.f32.mrb[20].mxu0  ;;  %v873_v29 = vmul.f32 %v809_v51, %v3330_v32  ;;  %v872_v36 = vmul.f32 %v808_v55, %v3334_v46 }
 0x12b   : > { %4255 = vst [vmem:[#allocation18_spill] sm:$0xff] %v3348_v37  ;;  %4256 = vst [vmem:[#allocation19_spill] sm:$0xff] %v3354_v13  ;;  %v3358_v60 = vpop.f32.mrb[20].mxu1  ;;  %v1061_v12 = vmul.f32 0.7978846, %v997_v4  ;;  %v3362_v24 = vpop.f32.mrb[21].mxu0  ;;  %v810_v56 = vmul.f32 %v3354_v13, %v3354_v13  ;;  %v3370_v21 = vadd.f32 %v3227_v15, %v3097_v16  ;;  %v3378_v55 = vadd.f32 %v3229_v11, %v3099_v17 }
 0x12c   : > { %v1060_v23 = vmul.f32 0.7978846, %v996_v5  ;;  %v3364_v49 = vpop.f32.mrb[21].mxu1  ;;  %v1062_v33 = vmul.f32 0.7978846, %v998_v8  ;;  %v3372_v37 = vpop.f32.mrb[22].mxu0 }
 0x12d   : > { %v935_v50 = vmul.f32 0.044715, %v871_v9  ;;  %4257 = vst [vmem:[#allocation20_spill] sm:$0xff] %v3370_v21  ;;  %v3374_v4 = vpop.f32.mrb[22].mxu1  ;;  %2675 = vtanh.f32 %v1061_v12  ;;  %v937_v5 = vmul.f32 0.044715, %v873_v29  ;;  %v874_v15 = vmul.f32 %v810_v56, %v3354_v13 }
 0x12e   : > { %v936_v51 = vmul.f32 0.044715, %v872_v36  ;;  %4258 = vst [vmem:[#allocation21_spill] sm:$0xff] %v3378_v55  ;;  %v3380_v8 = vpop.f32.mrb[23].mxu0  ;;  %v3382_v9 = vpop.f32.mrb[23].mxu1  ;;  %2677 = vtanh.f32 %v1060_v23  ;;  %v811_v3 = vmul.f32 %v3370_v21, %v3370_v21  ;;  %v813_v11 = vmul.f32 %v3378_v55, %v3378_v55 }
 0x12f   : > { %v999_v40 = vadd.f32 %v935_v50, %v3324_v14  ;;  %v3388_v61 = vpop.eup %2669  ;;  %2679 = vtanh.f32 %v1062_v33  ;;  %v1001_v29 = vadd.f32 %v937_v5, %v3330_v32  ;;  %v938_v34 = vmul.f32 0.044715, %v874_v15 }
 0x130   : > { %v1000_v36 = vadd.f32 %v936_v51, %v3334_v46  ;;  %v875_v23 = vmul.f32 %v811_v3, %v3370_v21  ;;  %v3397_v50 = vadd.f32 %v3233_v30, %v3101_v18  ;;  %v877_v63 = vmul.f32 %v813_v11, %v3378_v55 }
 0x131   : > { %v1063_v12 = vmul.f32 0.7978846, %v999_v40  ;;  %v1065_v56 = vmul.f32 0.7978846, %v1001_v29  ;;  %v3402_v33 = vadd.f32 %v3237_v47, %v3103_v19  ;;  %v3404_v5 = vpop.eup %2671  ;;  %v1002_v40 = vadd.f32 %v938_v34, %v3354_v13 }
 0x132   : > { %4259 = vst [vmem:[#allocation22_spill] sm:$0xff] %v3397_v50  ;;  %v1064_v14 = vmul.f32 0.7978846, %v1000_v36  ;;  %v939_v51 = vmul.f32 0.044715, %v875_v23  ;;  %v812_v3 = vmul.f32 %v3397_v50, %v3397_v50  ;;  %v3409_v15 = vpop.f32.mrb[24].mxu0  ;;  %v3417_v47 = vadd.f32 %v3242_v54, %v3097_v16 }
 0x133   : > { %4260 = vst [vmem:[#allocation23_spill] sm:$0xff] %v3402_v33  ;;  %2681 = vtanh.f32 %v1063_v12  ;;  %v3411_v30 = vpop.f32.mrb[24].mxu1  ;;  %v941_v29 = vmul.f32 0.044715, %v877_v63  ;;  %v814_v36 = vmul.f32 %v3402_v33, %v3402_v33  ;;  %v3419_v11 = vpop.f32.mrb[25].mxu0 }
 0x134   : > { %2683 = vtanh.f32 %v1065_v56  ;;  %4261 = vst [vmem:[#allocation24_spill] sm:$0xff] %v3417_v47  ;;  %4262 = vst [vmem:[#allocation25_spill] sm:$0xff] %v3419_v11  ;;  %v3421_v34 = vpop.f32.mrb[25].mxu1  ;;  %v3423_v12 = vpop.eup %2673  ;;  %v1066_v23 = vmul.f32 0.7978846, %v1002_v40  ;;  %v1003_v32 = vadd.f32 %v939_v51, %v3370_v21  ;;  %v876_v56 = vmul.f32 %v812_v3, %v3397_v50 }
 0x135   : > { %4263 = vst [vmem:[#allocation26_spill] sm:$0xff] %v3423_v12  ;;  %2685 = vtanh.f32 %v1064_v14  ;;  %v3427_v63 = vpop.f32.mrb[26].mxu0  ;;  %v3429_v13 = vpop.f32.mrb[26].mxu1  ;;  %v1005_v46 = vadd.f32 %v941_v29, %v3378_v55  ;;  %v878_v54 = vmul.f32 %v814_v36, %v3402_v33  ;;  %v815_v11 = vmul.f32 %v3417_v47, %v3417_v47 }
 0x136   : > { %4264 = vst [vmem:[#allocation27_spill] sm:$0xff] %v3427_v63  ;;  %4265 = vst [vmem:[#allocation28_spill] sm:$0xff] %v3429_v13  ;;  %v3437_v12 = vadd.f32 %v3244_v57, %v3099_v17  ;;  %v3439_v14 = vpop.f32.mrb[27].mxu0  ;;  %v3441_v40 = vpop.f32.mrb[27].mxu1  ;;  %2687 = vtanh.f32 %v1066_v23  ;;  %v1067_v51 = vmul.f32 0.7978846, %v1003_v32  ;;  %v3445_v21 = vadd.f32 %v3253_v62, %v3101_v18 }
 0x137   : > { %v940_v3 = vmul.f32 0.044715, %v876_v56  ;;  %v3447_v29 = vpop.eup %2675  ;;  %v1069_v36 = vmul.f32 0.7978846, %v1005_v46  ;;  %v942_v55 = vmul.f32 0.044715, %v878_v54  ;;  %v879_v13 = vmul.f32 %v815_v11, %v3417_v47 }
 0x138   : > { %4266 = vst [vmem:[#allocation29_spill] sm:$0xff] %v3437_v12  ;;  %4267 = vst [vmem:[#allocation30_spill] sm:$0xff] %v3445_v21  ;;  %v817_v57 = vmul.f32 %v3437_v12, %v3437_v12  ;;  %v3452_v63 = vpop.eup %2677  ;;  %2689 = vtanh.f32 %v1067_v51  ;;  %v816_v32 = vmul.f32 %v3445_v21, %v3445_v21  ;;  %v3459_v62 = vadd.f32 %v3255_v0, %v3103_v19 }
 0x139   : > { %4268 = vst [vmem:[#allocation31_spill] sm:$0xff] %v3447_v29  ;;  %4269 = vst [vmem:[#allocation32_spill] sm:$0xff] %v3452_v63  ;;  %v1004_v23 = vadd.f32 %v940_v3, %v3397_v50  ;;  %v3461_v56 = vpop.eup %2679  ;;  %2691 = vtanh.f32 %v1069_v36  ;;  %v1006_v46 = vadd.f32 %v942_v55, %v3402_v33  ;;  %v943_v11 = vmul.f32 0.044715, %v879_v13 }
 0x13a   : > { %4270 = vst [vmem:[#allocation33_spill] sm:$0xff] %v3459_v62  ;;  %v881_v54 = vmul.f32 %v817_v57, %v3437_v12  ;;  %v880_v51 = vmul.f32 %v816_v32, %v3445_v21  ;;  %v818_v3 = vmul.f32 %v3459_v62, %v3459_v62  ;;  %v3470_v50 = vadd.f32 %v3284_v25, %v3097_v16  ;;  %v3472_v0 = vpop.f32.mrb[28].mxu0  ;;  %v3474_v63 = vpop.f32.mrb[28].mxu1 }
 0x13b   : > { %v1068_v29 = vmul.f32 0.7978846, %v1004_v23  ;;  %4272 = vst [vmem:[#allocation35_spill] sm:$0xff] %v3472_v0  ;;  %4273 = vst [vmem:[#allocation36_spill] sm:$0xff] %v3474_v63  ;;  %v1070_v36 = vmul.f32 0.7978846, %v1006_v46  ;;  %v1007_v55 = vadd.f32 %v943_v11, %v3417_v47  ;;  %v3479_v57 = vadd.f32 %v3286_v28, %v3099_v17 }
 0x13c   : > { %4271 = vst [vmem:[#allocation34_spill] sm:$0xff] %v3470_v50  ;;  %v945_v13 = vmul.f32 0.044715, %v881_v54  ;;  %v3481_v23 = vpop.f32.mrb[29].mxu0  ;;  %v3483_v32 = vpop.f32.mrb[29].mxu1  ;;  %v882_v0 = vmul.f32 %v818_v3, %v3459_v62  ;;  %v819_v46 = vmul.f32 %v3470_v50, %v3470_v50 }
 0x13d   : > { %4274 = vst [vmem:[#allocation37_spill] sm:$0xff] %v3479_v57  ;;  %4275 = vst [vmem:[#allocation38_spill] sm:$0xff] %v3481_v23  ;;  %v3485_v33 = vpop.eup %2681  ;;  %2693 = vtanh.f32 %v1068_v29  ;;  %v944_v25 = vmul.f32 0.044715, %v880_v51  ;;  %v3490_v63 = vpop.f32.mrb[30].mxu0 }
 0x13e   : > { %4276 = vst [vmem:[#allocation39_spill] sm:$0xff] %v3483_v32  ;;  %4277 = vst [vmem:[#allocation40_spill] sm:$0xff] %v3490_v63  ;;  %v3492_v11 = vpop.f32.mrb[30].mxu1  ;;  %v3494_v54 = vpop.eup %2683  ;;  %2695 = vtanh.f32 %v1070_v36  ;;  %v1071_v28 = vmul.f32 0.7978846, %v1007_v55  ;;  %v1009_v47 = vadd.f32 %v945_v13, %v3437_v12  ;;  %v821_v32 = vmul.f32 %v3479_v57, %v3479_v57 }
 0x13f   : > { %4278 = vst [vmem:[#allocation41_spill] sm:$0xff] %v3492_v11  ;;  %v3499_v29 = vpop.f32.mrb[31].mxu0  ;;  %v3501_v51 = vpop.f32.mrb[31].mxu1  ;;  %v1008_v23 = vadd.f32 %v944_v25, %v3445_v21  ;;  %v946_v63 = vmul.f32 0.044715, %v882_v0  ;;  %v883_v11 = vmul.f32 %v819_v46, %v3470_v50  ;;  %v3509_v36 = vadd.f32 %v3295_v43, %v3101_v18 }
 0x140   : > { %4279 = vst [vmem:[#allocation42_spill] sm:$0xff] %v3499_v29  ;;  %4280 = vst [vmem:[#allocation43_spill] sm:$0xff] %v3501_v51  ;;  %v3503_v3 = vpop.eup %2685  ;;  %2697 = vtanh.f32 %v1071_v28  ;;  %v1073_v55 = vmul.f32 0.7978846, %v1009_v47  ;;  %v885_v13 = vmul.f32 %v821_v32, %v3479_v57  ;;  %v3514_v12 = vadd.f32 %v3297_v44, %v3103_v19 }
 0x141   : > { %4281 = vst [vmem:[#allocation44_spill] sm:$0xff] %v3509_v36  ;;  %v3516_v51 = vpop.eup %2687  ;;  %v1072_v29 = vmul.f32 0.7978846, %v1008_v23  ;;  %v1010_v25 = vadd.f32 %v946_v63, %v3459_v62  ;;  %v947_v0 = vmul.f32 0.044715, %v883_v11  ;;  %v820_v46 = vmul.f32 %v3509_v36, %v3509_v36 }
 0x142   : > { %4282 = vst [vmem:[#allocation45_spill] sm:$0xff] %v3514_v12  ;;  %2699 = vtanh.f32 %v1073_v55  ;;  %v949_v43 = vmul.f32 0.044715, %v885_v13  ;;  %v822_v47 = vmul.f32 %v3514_v12, %v3514_v12  ;;  %v3525_v32 = vadd.f32 %v3304_v52, %v3097_v16  ;;  %v3527_v44 = vpop.eup %2689 }
 0x143   : > { %4283 = vst [vmem:[#allocation46_spill] sm:$0xff] %v3527_v44  ;;  %2701 = vtanh.f32 %v1072_v29  ;;  %v1074_v28 = vmul.f32 0.7978846, %v1010_v25  ;;  %v1011_v23 = vadd.f32 %v947_v0, %v3470_v50  ;;  %v884_v63 = vmul.f32 %v820_v46, %v3509_v36  ;;  %v3531_v11 = vpop.eup %2691 }
 0x144   : > { %4284 = vst [vmem:[#allocation47_spill] sm:$0xff] %v3531_v11  ;;  %v1013_v55 = vadd.f32 %v949_v43, %v3479_v57  ;;  %v886_v13 = vmul.f32 %v822_v47, %v3514_v12  ;;  %v823_v62 = vmul.f32 %v3525_v32, %v3525_v32  ;;  %v3539_v52 = vadd.f32 %v3306_v53, %v3099_v17 }
 0x145   : > { %2703 = vtanh.f32 %v1074_v28  ;;  %v1075_v29 = vmul.f32 0.7978846, %v1011_v23  ;;  %v948_v25 = vmul.f32 0.044715, %v884_v63  ;;  %v3543_v0 = vadd.f32 %v3314_v6, %v3101_v18 }
 0x146   : > { %v1077_v46 = vmul.f32 0.7978846, %v1013_v55  ;;  %v950_v50 = vmul.f32 0.044715, %v886_v13  ;;  %v887_v43 = vmul.f32 %v823_v62, %v3525_v32  ;;  %v825_v47 = vmul.f32 %v3539_v52, %v3539_v52 }
 0x147   : > { %v3548_v57 = vpop.eup %2693  ;;  %2705 = vtanh.f32 %v1075_v29  ;;  %v1012_v53 = vadd.f32 %v948_v25, %v3509_v36  ;;  %v824_v28 = vmul.f32 %v3543_v0, %v3543_v0  ;;  %v3555_v23 = vadd.f32 %v3316_v7, %v3103_v19 }
 0x148   : > { %v3557_v6 = vpop.eup %2695  ;;  %2707 = vtanh.f32 %v1077_v46  ;;  %v1014_v62 = vadd.f32 %v950_v50, %v3514_v12  ;;  %v951_v63 = vmul.f32 0.044715, %v887_v43  ;;  %v889_v55 = vmul.f32 %v825_v47, %v3539_v52 }
 0x149   : > { %4285 = vst [vmem:[#allocation48_spill] sm:$0xff] %v3557_v6  ;;  %v1076_v13 = vmul.f32 0.7978846, %v1012_v53  ;;  %v888_v29 = vmul.f32 %v824_v28, %v3543_v0  ;;  %v826_v25 = vmul.f32 %v3555_v23, %v3555_v23  ;;  %v1172_v36 = vadd.f32 1.0, %v3231_v20 }
 0x14a   : > { %v3565_v11 = vpop.eup %2697  ;;  %v1078_v7 = vmul.f32 0.7978846, %v1014_v62  ;;  %v1015_v21 = vadd.f32 %v951_v63, %v3525_v32  ;;  %v953_v44 = vmul.f32 0.044715, %v889_v55  ;;  %v1176_v46 = vadd.f32 1.0, %v3257_v1 }
 0x14b   : > { %2709 = vtanh.f32 %v1076_v13  ;;  %v952_v50 = vmul.f32 0.044715, %v888_v29  ;;  %v890_v43 = vmul.f32 %v826_v25, %v3555_v23  ;;  %v1236_v47 = vmul.f32 0.5, %v1172_v36 }
 0x14c   : > { %v3570_v53 = vpop.eup %2699  ;;  %2711 = vtanh.f32 %v1078_v7  ;;  %v1079_v28 = vmul.f32 0.7978846, %v1015_v21  ;;  %v1017_v12 = vadd.f32 %v953_v44, %v3539_v52  ;;  %v1240_v20 = vmul.f32 0.5, %v1176_v46 }
 0x14d   : > { %v3573_v6 = vpop.eup %2701  ;;  %v1016_v62 = vadd.f32 %v952_v50, %v3543_v0  ;;  %v954_v63 = vmul.f32 0.044715, %v890_v43  ;;  %v1300_v55 = vmul.f32 %v1236_v47, %v3112_v26  ;;  %v1174_v1 = vadd.f32 1.0, %v3235_v35 }
 0x14e   : > { %2713 = vtanh.f32 %v1079_v28  ;;  %v1081_v13 = vmul.f32 0.7978846, %v1017_v12  ;;  %v1304_v36 = vmul.f32 %v1240_v20, %v3132_v38  ;;  %v1178_v29 = vadd.f32 1.0, %v3262_v22 }
 0x14f   : > { %v3580_v25 = vpop.eup %2703  ;;  %v1080_v21 = vmul.f32 0.7978846, %v1016_v62  ;;  %v1018_v44 = vadd.f32 %v954_v63, %v3555_v23  ;;  %v1238_v7 = vmul.f32 0.5, %v1174_v1  ;;  %v3585_v46 = vadd.f32 %v3356_v45, %v3097_v16 }
 0x150   : > { %2715 = vtanh.f32 %v1081_v13  ;;  %v1364_v26 = vpack.c.bf16 %v1304_v36, %v1300_v55  ;;  %v1242_v50 = vmul.f32 0.5, %v1178_v29  ;;  %v3589_v35 = vadd.f32 %v3358_v60, %v3099_v17 }
 0x151   : > { %4286 = vst [vmem:[#allocation49_spill] sm:$0xff] %v3585_v46  ;;  %v3591_v38 = vpop.eup %2705  ;;  %2717 = vtanh.f32 %v1080_v21  ;;  %v1082_v22 = vmul.f32 0.7978846, %v1018_v44  ;;  %v1302_v12 = vmul.f32 %v1238_v7, %v3115_v27  ;;  %v827_v43 = vmul.f32 %v3585_v46, %v3585_v46 }
 0x152   : > { %4287 = vst [vmem:[#allocation50_spill] sm:$0xff] %v3589_v35  ;;  %v3596_v47 = vpop.eup %2707  ;;  %1690 = vmatprep.mubr.bf16.mxu0 %v1364_v26  ;;  %v1306_v45 = vmul.f32 %v1242_v50, %v3135_v39  ;;  %v829_v28 = vmul.f32 %v3589_v35, %v3589_v35  ;;  %v3603_v60 = vadd.f32 %v3362_v24, %v3101_v18 }
 0x153   : > { %v3607_v20 = vadd.f32 %v3364_v49, %v3103_v19  ;;  %2719 = vtanh.f32 %v1082_v22  ;;  %v4288_v27 = vpack.c.bf16 %v3277_v10, %v3247_v59  ;;  %v891_v62 = vmul.f32 %v827_v43, %v3585_v46 }
 0x154   : > { %v3615_v39 = vadd.f32 %v3372_v37, %v3097_v16  ;;  %v3619_v63 = vadd.f32 %v3374_v4, %v3099_v17  ;;  %v1366_v24 = vpack.c.bf16 %v1306_v45, %v1302_v12  ;;  %v893_v55 = vmul.f32 %v829_v28, %v3589_v35 }
 0x155   : > { %1691 = vmatmul.mubr.bf16.vlgmr.msra.gmra.mrb[32].mxu0 %v4288_v27  ;;  %v828_v49 = vmul.f32 %v3603_v60, %v3603_v60  ;;  %v830_v59 = vmul.f32 %v3607_v20, %v3607_v20  ;;  %v3626_v10 = vpop.eup %2709  ;;  %v955_v1 = vmul.f32 0.044715, %v891_v62  ;;  %v3634_v4 = vadd.f32 %v3380_v8, %v3101_v18 }
 0x156   : > { %4289 = vst [vmem:[#allocation51_spill] sm:$0xff] %v3615_v39  ;;  %4290 = vst [vmem:[#allocation52_spill] sm:$0xff] %v3619_v63  ;;  %v831_v37 = vmul.f32 %v3615_v39, %v3615_v39  ;;  %v833_v13 = vmul.f32 %v3619_v63, %v3619_v63  ;;  %v3636_v36 = vpop.eup %2711  ;;  %1787 = vmatprep.mubr.bf16.mxu1 %v1366_v24  ;;  %v957_v29 = vmul.f32 0.044715, %v893_v55 }
 0x157   : > { %v892_v21 = vmul.f32 %v828_v49, %v3603_v60  ;;  %v894_v44 = vmul.f32 %v830_v59, %v3607_v20  ;;  %v3642_v7 = vadd.f32 %v3382_v9, %v3103_v19  ;;  %v4291_v26 = vpack.c.bf16 %v3289_v41, %v3260_v2 }
 0x158   : > { %v1019_v50 = vadd.f32 %v955_v1, %v3585_v46  ;;  %v895_v8 = vmul.f32 %v831_v37, %v3615_v39  ;;  %v897_v22 = vmul.f32 %v833_v13, %v3619_v63  ;;  %v832_v12 = vmul.f32 %v3634_v4, %v3634_v4  ;;  %v3652_v43 = vpop.eup %2713 }
 0x159   : > { %1788 = vmatmul.mubr.bf16.vlgmr.msra.gmra.mrb[32].mxu1 %v4291_v26  ;;  %v1021_v45 = vadd.f32 %v957_v29, %v3589_v35  ;;  %v956_v28 = vmul.f32 0.044715, %v892_v21  ;;  %v958_v9 = vmul.f32 0.044715, %v894_v44  ;;  %v834_v27 = vmul.f32 %v3642_v7, %v3642_v7 }
 0x15a   : > { %v1083_v2 = vmul.f32 0.7978846, %v1019_v50  ;;  %v959_v41 = vmul.f32 0.044715, %v895_v8  ;;  %v961_v62 = vmul.f32 0.044715, %v897_v22  ;;  %v896_v24 = vmul.f32 %v832_v12, %v3634_v4  ;;  %v3658_v55 = vpop.eup %2715 }
 0x15b   : > { %v1085_v49 = vmul.f32 0.7978846, %v1021_v45  ;;  %v1020_v59 = vadd.f32 %v956_v28, %v3603_v60  ;;  %v1022_v1 = vadd.f32 %v958_v9, %v3607_v20  ;;  %v898_v37 = vmul.f32 %v834_v27, %v3642_v7  ;;  %v3663_v13 = vpop.eup %2717 }
 0x15c   : > { %2721 = vtanh.f32 %v1083_v2  ;;  %v1023_v29 = vadd.f32 %v959_v41, %v3615_v39  ;;  %v1025_v21 = vadd.f32 %v961_v62, %v3619_v63  ;;  %v960_v44 = vmul.f32 0.044715, %v896_v24 }
 0x15d   : > { %2723 = vtanh.f32 %v1085_v49  ;;  %v1084_v26 = vmul.f32 0.7978846, %v1020_v59  ;;  %v1086_v50 = vmul.f32 0.7978846, %v1022_v1  ;;  %v962_v8 = vmul.f32 0.044715, %v898_v37  ;;  %v3667_v22 = vpop.eup %2719 }
 0x15e   : > { %v1087_v12 = vmul.f32 0.7978846, %v1023_v29  ;;  %v1089_v45 = vmul.f32 0.7978846, %v1025_v21  ;;  %v1024_v28 = vadd.f32 %v960_v44, %v3634_v4  ;;  %v1180_v9 = vadd.f32 1.0, %v3326_v42  ;;  %v4292_v44 = vld [vmem:[#allocation7_spill] sm:$0xff] }
 0x15f   : > { %2725 = vtanh.f32 %v1084_v26  ;;  %v1026_v27 = vadd.f32 %v962_v8, %v3642_v7  ;;  %v1184_v2 = vadd.f32 1.0, %v3388_v61  ;;  %v1182_v41 = vadd.f32 1.0, %v3336_v48  ;;  %v4293_v26 = vld [vmem:[#allocation4_spill] sm:$0xff] }
 0x160   : > { %2727 = vtanh.f32 %v1086_v50  ;;  %v1088_v62 = vmul.f32 0.7978846, %v1024_v28  ;;  %v1244_v24 = vmul.f32 0.5, %v1180_v9  ;;  %v1186_v49 = vadd.f32 1.0, %v3404_v5  ;;  %v4294_v50 = vld [vmem:[#allocation17_spill] sm:$0xff]  ;;  %v4295_v28 = vld [vmem:[#allocation8_spill] sm:$0xff] }
 0x161   : > { %2729 = vtanh.f32 %v1087_v12  ;;  %v1090_v59 = vmul.f32 0.7978846, %v1026_v27  ;;  %v1248_v1 = vmul.f32 0.5, %v1184_v2  ;;  %v1246_v37 = vmul.f32 0.5, %v1182_v41  ;;  %v4296_v9 = vld [vmem:[#allocation13_spill] sm:$0xff]  ;;  %v4297_v41 = vld [vmem:[#allocation18_spill] sm:$0xff] }
 0x162   : > { %2731 = vtanh.f32 %v1089_v45  ;;  %v1308_v29 = vmul.f32 %v1244_v24, %v3170_v31  ;;  %v1250_v42 = vmul.f32 0.5, %v1186_v49  ;;  %v1179_v21 = vadd.f32 1.0, %v3308_v58  ;;  %v4299_v49 = vld [vmem:[#allocation2_spill] sm:$0xff] }
 0x163   : > { %2733 = vtanh.f32 %v1088_v62  ;;  %v1312_v61 = vmul.f32 %v1248_v1, %v4292_v44  ;;  %v1310_v48 = vmul.f32 %v1246_v37, %v4293_v26  ;;  %v1183_v8 = vadd.f32 1.0, %v4294_v50 }
 0x164   : > { %2735 = vtanh.f32 %v1090_v59  ;;  %v1314_v5 = vmul.f32 %v1250_v42, %v4295_v28  ;;  %v1243_v12 = vmul.f32 0.5, %v1179_v21  ;;  %v1181_v27 = vadd.f32 1.0, %v4296_v9  ;;  %v4305_v28 = vld [vmem:[#allocation27_spill] sm:$0xff] }
 0x165   : > { %v1368_v2 = vpack.c.bf16 %v1312_v61, %v1308_v29  ;;  %v1247_v45 = vmul.f32 0.5, %v1183_v8  ;;  %v1185_v31 = vadd.f32 1.0, %v4297_v41  ;;  %v3685_v58 = vadd.f32 %v3409_v15, %v3097_v16  ;;  %v4301_v29 = vld [vmem:[#allocation5_spill] sm:$0xff] }
 0x166   : > { %v3687_v62 = vpop.eup %2721  ;;  %v1370_v24 = vpack.c.bf16 %v1314_v5, %v1310_v48  ;;  %v1307_v1 = vmul.f32 %v1243_v12, %v4299_v49  ;;  %v1245_v37 = vmul.f32 0.5, %v1181_v27  ;;  %v3692_v59 = vadd.f32 %v3411_v30, %v3099_v17  ;;  %v4302_v61 = vld [vmem:[#allocation25_spill] sm:$0xff]  ;;  %v4304_v48 = vld [vmem:[#allocation3_spill] sm:$0xff]  ;;  %v4307_v27 = vld [vmem:[#allocation6_spill] sm:$0xff] }
 0x167   : > { %4298 = vst [vmem:[#allocation7_spill] sm:$0xff] %v3685_v58  ;;  %v3694_v42 = vpop.eup %2723  ;;  %1698 = vmatprep.mubr.bf16.mxu0 %v1368_v2  ;;  %v1311_v21 = vmul.f32 %v1247_v45, %v4301_v29  ;;  %v1249_v44 = vmul.f32 0.5, %v1185_v31  ;;  %v835_v15 = vmul.f32 %v3685_v58, %v3685_v58  ;;  %v3701_v26 = vadd.f32 %v4302_v61, %v3101_v18 }
 0x168   : > { %4300 = vst [vmem:[#allocation4_spill] sm:$0xff] %v3692_v59  ;;  %1795 = vmatprep.mubr.bf16.mxu1 %v1370_v24  ;;  %v1309_v50 = vmul.f32 %v1245_v37, %v4304_v48  ;;  %v837_v30 = vmul.f32 %v3692_v59, %v3692_v59  ;;  %v3708_v8 = vadd.f32 %v3421_v34, %v3103_v19  ;;  %v4308_v37 = vld [vmem:[#allocation28_spill] sm:$0xff] }
 0x169   : > { %4303 = vst [vmem:[#allocation17_spill] sm:$0xff] %v3701_v26  ;;  %v3712_v5 = vadd.f32 %v4305_v28, %v3097_v16  ;;  %v3714_v12 = vpop.eup %2725  ;;  %v1367_v9 = vpack.c.bf16 %v1311_v21, %v1307_v1  ;;  %v1313_v2 = vmul.f32 %v1249_v44, %v4307_v27  ;;  %v899_v45 = vmul.f32 %v835_v15, %v3685_v58 }
 0x16a   : > { %v836_v41 = vmul.f32 %v3701_v26, %v3701_v26  ;;  %v3720_v31 = vpop.eup %2727  ;;  %v901_v24 = vmul.f32 %v837_v30, %v3692_v59  ;;  %v838_v34 = vmul.f32 %v3708_v8, %v3708_v8  ;;  %v3729_v1 = vadd.f32 %v4308_v37, %v3099_v17 }
 0x16b   : > { %4306 = vst [vmem:[#allocation8_spill] sm:$0xff] %v3712_v5  ;;  %v839_v49 = vmul.f32 %v3712_v5, %v3712_v5  ;;  %v3731_v29 = vpop.eup %2729  ;;  %1699 = vmatmul.mubr.bf16.gmra.mrb[36].mxu0 %v1367_v9  ;;  %v1369_v21 = vpack.c.bf16 %v1313_v2, %v1309_v50  ;;  %v963_v44 = vmul.f32 0.044715, %v899_v45  ;;  %v3736_v61 = vadd.f32 %v3439_v14, %v3101_v18 }
 0x16c   : > { %4309 = vst [vmem:[#allocation13_spill] sm:$0xff] %v3729_v1  ;;  %v900_v15 = vmul.f32 %v836_v41, %v3701_v26  ;;  %v3738_v48 = vpop.eup %2731  ;;  %v965_v30 = vmul.f32 0.044715, %v901_v24  ;;  %v902_v28 = vmul.f32 %v838_v34, %v3708_v8  ;;  %v841_v37 = vmul.f32 %v3729_v1, %v3729_v1 }
 0x16d   : > { %v903_v27 = vmul.f32 %v839_v49, %v3712_v5  ;;  %v3744_v63 = vpop.eup %2733  ;;  %1796 = vmatmul.mubr.bf16.gmra.mrb[36].mxu1 %v1369_v21  ;;  %v1027_v50 = vadd.f32 %v963_v44, %v3685_v58  ;;  %v840_v14 = vmul.f32 %v3736_v61, %v3736_v61  ;;  %v3751_v2 = vadd.f32 %v3441_v40, %v3103_v19 }
 0x16e   : > { %v964_v9 = vmul.f32 0.044715, %v900_v15  ;;  %v3753_v45 = vpop.eup %2735  ;;  %v1029_v41 = vadd.f32 %v965_v30, %v3692_v59  ;;  %v966_v24 = vmul.f32 0.044715, %v902_v28  ;;  %v905_v49 = vmul.f32 %v841_v37, %v3729_v1 }
 0x16f   : > { %4310 = vst [vmem:[#allocation18_spill] sm:$0xff] %v3751_v2  ;;  %v967_v34 = vmul.f32 0.044715, %v903_v27  ;;  %v1091_v35 = vmul.f32 0.7978846, %v1027_v50  ;;  %v904_v44 = vmul.f32 %v840_v14, %v3736_v61  ;;  %v842_v15 = vmul.f32 %v3751_v2, %v3751_v2 }
 0x170   : > { %v1028_v21 = vadd.f32 %v964_v9, %v3701_v26  ;;  %v1093_v58 = vmul.f32 0.7978846, %v1029_v41  ;;  %v1030_v40 = vadd.f32 %v966_v24, %v3708_v8  ;;  %v969_v46 = vmul.f32 0.044715, %v905_v49  ;;  %v4311_v41 = vld [vmem:[#allocation32_spill] sm:$0xff] }
 0x171   : > { %v1031_v39 = vadd.f32 %v967_v34, %v3712_v5  ;;  %2737 = vtanh.f32 %v1091_v35  ;;  %v968_v28 = vmul.f32 0.044715, %v904_v44  ;;  %v906_v27 = vmul.f32 %v842_v15, %v3751_v2 }
 0x172   : > { %v1092_v30 = vmul.f32 0.7978846, %v1028_v21  ;;  %2739 = vtanh.f32 %v1093_v58  ;;  %v1094_v37 = vmul.f32 0.7978846, %v1030_v40  ;;  %v1033_v9 = vadd.f32 %v969_v46, %v3729_v1  ;;  %v4312_v40 = vld [vmem:[#allocation11_spill] sm:$0xff] }
 0x173   : > { %v1095_v50 = vmul.f32 0.7978846, %v1031_v39  ;;  %v1032_v14 = vadd.f32 %v968_v28, %v3736_v61  ;;  %v970_v59 = vmul.f32 0.044715, %v906_v27  ;;  %v1188_v26 = vadd.f32 1.0, %v4311_v41  ;;  %v4313_v28 = vld [vmem:[#allocation26_spill] sm:$0xff] }
 0x174   : > { %2741 = vtanh.f32 %v1092_v30  ;;  %v1097_v24 = vmul.f32 0.7978846, %v1033_v9  ;;  %v1192_v34 = vadd.f32 1.0, %v3503_v3  ;;  %v1190_v35 = vadd.f32 1.0, %v3461_v56  ;;  %v4315_v56 = vld [vmem:[#allocation12_spill] sm:$0xff] }
 0x175   : > { %2743 = vtanh.f32 %v1094_v37  ;;  %v1096_v49 = vmul.f32 0.7978846, %v1032_v14  ;;  %v1034_v58 = vadd.f32 %v970_v59, %v3751_v2  ;;  %v1252_v21 = vmul.f32 0.5, %v1188_v26  ;;  %v4314_v37 = vld [vmem:[#allocation16_spill] sm:$0xff]  ;;  %v4316_v26 = vld [vmem:[#allocation31_spill] sm:$0xff] }
 0x176   : > { %2745 = vtanh.f32 %v1095_v50  ;;  %v1256_v39 = vmul.f32 0.5, %v1192_v34  ;;  %v1194_v46 = vadd.f32 1.0, %v3516_v51  ;;  %v1254_v44 = vmul.f32 0.5, %v1190_v35  ;;  %v4317_v34 = vld [vmem:[#allocation19_spill] sm:$0xff] }
 0x177   : > { %2747 = vtanh.f32 %v1097_v24  ;;  %v1098_v15 = vmul.f32 0.7978846, %v1034_v58  ;;  %v1316_v30 = vmul.f32 %v1252_v21, %v4312_v40  ;;  %v1187_v27 = vadd.f32 1.0, %v4313_v28  ;;  %v4318_v58 = vld [vmem:[#allocation35_spill] sm:$0xff] }
 0x178   : > { %2749 = vtanh.f32 %v1096_v49  ;;  %v1320_v3 = vmul.f32 %v1256_v39, %v4314_v37  ;;  %v1258_v9 = vmul.f32 0.5, %v1194_v46  ;;  %v1318_v50 = vmul.f32 %v1254_v44, %v4315_v56  ;;  %v4320_v46 = vld [vmem:[#allocation9_spill] sm:$0xff] }
 0x179   : > { %v1191_v14 = vadd.f32 1.0, %v3485_v33  ;;  %2751 = vtanh.f32 %v1098_v15  ;;  %v1251_v59 = vmul.f32 0.5, %v1187_v27  ;;  %v1189_v41 = vadd.f32 1.0, %v4316_v26  ;;  %v4321_v15 = vld [vmem:[#allocation36_spill] sm:$0xff] }
 0x17a   : > { %v1193_v51 = vadd.f32 1.0, %v3494_v54  ;;  %v1372_v24 = vpack.c.bf16 %v1320_v3, %v1316_v30  ;;  %v1322_v35 = vmul.f32 %v1258_v9, %v4317_v34  ;;  %v3781_v21 = vadd.f32 %v4318_v58, %v3097_v16  ;;  %v4324_v30 = vld [vmem:[#allocation14_spill] sm:$0xff] }
 0x17b   : > { %v1255_v49 = vmul.f32 0.5, %v1191_v14  ;;  %v3783_v39 = vpop.eup %2737  ;;  %v1315_v44 = vmul.f32 %v1251_v59, %v4320_v46  ;;  %v1253_v40 = vmul.f32 0.5, %v1189_v41  ;;  %v3788_v28 = vadd.f32 %v4321_v15, %v3099_v17  ;;  %v4325_v9 = vld [vmem:[#allocation38_spill] sm:$0xff]  ;;  %v4327_v41 = vld [vmem:[#allocation15_spill] sm:$0xff] }
 0x17c   : > { %4319 = vst [vmem:[#allocation2_spill] sm:$0xff] %v3781_v21  ;;  %v1257_v33 = vmul.f32 0.5, %v1193_v51  ;;  %v3790_v27 = vpop.eup %2739  ;;  %1706 = vmatprep.mubr.bf16.mxu0 %v1372_v24  ;;  %v1374_v54 = vpack.c.bf16 %v1322_v35, %v1318_v50  ;;  %v843_v3 = vmul.f32 %v3781_v21, %v3781_v21  ;;  %v3797_v56 = vadd.f32 %v4325_v9, %v3101_v18  ;;  %v4326_v59 = vld [vmem:[#allocation10_spill] sm:$0xff]  ;;  %v4328_v50 = vld [vmem:[#allocation39_spill] sm:$0xff] }
 0x17d   : > { %4322 = vst [vmem:[#allocation5_spill] sm:$0xff] %v3788_v28  ;;  %4323 = vst [vmem:[#allocation25_spill] sm:$0xff] %v3790_v27  ;;  %v1319_v37 = vmul.f32 %v1255_v49, %v4324_v30  ;;  %v1317_v26 = vmul.f32 %v1253_v40, %v4326_v59  ;;  %v845_v34 = vmul.f32 %v3788_v28, %v3788_v28  ;;  %v4329_v40 = vld [vmem:[#allocation40_spill] sm:$0xff] }
 0x17e   : > { %v3799_v14 = vpop.eup %2741  ;;  %v1321_v51 = vmul.f32 %v1257_v33, %v4327_v41  ;;  %v3807_v24 = vadd.f32 %v4328_v50, %v3103_v19  ;;  %1803 = vmatprep.mubr.bf16.mxu1 %v1374_v54  ;;  %v907_v58 = vmul.f32 %v843_v3, %v3781_v21  ;;  %v844_v46 = vmul.f32 %v3797_v56, %v3797_v56  ;;  %v4330_v54 = vld [vmem:[#allocation41_spill] sm:$0xff] }
 0x17f   : > { %v3809_v35 = vpop.eup %2743  ;;  %v1371_v49 = vpack.c.bf16 %v1319_v37, %v1315_v44  ;;  %v3816_v15 = vadd.f32 %v4329_v40, %v3097_v16  ;;  %v909_v9 = vmul.f32 %v845_v34, %v3788_v28  ;;  %v3825_v44 = vadd.f32 %v4330_v54, %v3099_v17 }
 0x180   : > { %v3818_v33 = vpop.eup %2745  ;;  %v1373_v30 = vpack.c.bf16 %v1321_v51, %v1317_v26  ;;  %v846_v59 = vmul.f32 %v3807_v24, %v3807_v24  ;;  %v971_v3 = vmul.f32 0.044715, %v907_v58  ;;  %v908_v41 = vmul.f32 %v844_v46, %v3797_v56  ;;  %v4332_v26 = vld [vmem:[#allocation42_spill] sm:$0xff] }
 0x181   : > { %v3827_v37 = vpop.eup %2747  ;;  %1707 = vmatmul.mubr.bf16.gmra.mrb[40].mxu0 %v1371_v49  ;;  %v847_v16 = vmul.f32 %v3816_v15, %v3816_v15  ;;  %v3834_v51 = vadd.f32 %v4332_v26, %v3101_v18  ;;  %v973_v50 = vmul.f32 0.044715, %v909_v9  ;;  %v849_v40 = vmul.f32 %v3825_v44, %v3825_v44  ;;  %v4333_v49 = vld [vmem:[#allocation43_spill] sm:$0xff] }
 0x182   : > { %4331 = vst [vmem:[#allocation3_spill] sm:$0xff] %v3827_v37  ;;  %v3836_v34 = vpop.eup %2749  ;;  %1804 = vmatmul.mubr.bf16.gmra.mrb[40].mxu1 %v1373_v30  ;;  %v910_v17 = vmul.f32 %v846_v59, %v3807_v24  ;;  %v3843_v58 = vadd.f32 %v4333_v49, %v3103_v19  ;;  %v1035_v46 = vadd.f32 %v971_v3, %v3781_v21  ;;  %v972_v54 = vmul.f32 0.044715, %v908_v41 }
 0x183   : > { %v911_v1 = vmul.f32 %v847_v16, %v3816_v15  ;;  %v848_v18 = vmul.f32 %v3834_v51, %v3834_v51  ;;  %v3849_v26 = vpop.eup %2751  ;;  %v1037_v30 = vadd.f32 %v973_v50, %v3788_v28  ;;  %v913_v59 = vmul.f32 %v849_v40, %v3825_v44 }
 0x184   : > { %v974_v9 = vmul.f32 0.044715, %v910_v17  ;;  %v850_v5 = vmul.f32 %v3843_v58, %v3843_v58  ;;  %v1099_v19 = vmul.f32 0.7978846, %v1035_v46  ;;  %v1036_v49 = vadd.f32 %v972_v54, %v3797_v56 }
 0x185   : > { %v975_v3 = vmul.f32 0.044715, %v911_v1  ;;  %v912_v41 = vmul.f32 %v848_v18, %v3834_v51  ;;  %v1101_v16 = vmul.f32 0.7978846, %v1037_v30  ;;  %v977_v2 = vmul.f32 0.044715, %v913_v59 }
 0x186   : > { %v1038_v21 = vadd.f32 %v974_v9, %v3807_v24  ;;  %v914_v37 = vmul.f32 %v850_v5, %v3843_v58  ;;  %2753 = vtanh.f32 %v1099_v19  ;;  %v1100_v50 = vmul.f32 0.7978846, %v1036_v49  ;;  %v4334_v49 = vld [vmem:[#allocation48_spill] sm:$0xff] }
 0x187   : > { %v1039_v17 = vadd.f32 %v975_v3, %v3816_v15  ;;  %v976_v40 = vmul.f32 0.044715, %v912_v41  ;;  %2755 = vtanh.f32 %v1101_v16  ;;  %v1041_v46 = vadd.f32 %v977_v2, %v3825_v44  ;;  %v4335_v41 = vld [vmem:[#allocation22_spill] sm:$0xff] }
 0x188   : > { %v1102_v28 = vmul.f32 0.7978846, %v1038_v21  ;;  %v978_v27 = vmul.f32 0.044715, %v914_v37  ;;  %2757 = vtanh.f32 %v1100_v50  ;;  %v1196_v18 = vadd.f32 1.0, %v3548_v57 }
 0x189   : > { %v1103_v1 = vmul.f32 0.7978846, %v1039_v17  ;;  %v1040_v54 = vadd.f32 %v976_v40, %v3834_v51  ;;  %v1105_v30 = vmul.f32 0.7978846, %v1041_v46  ;;  %v1200_v9 = vadd.f32 1.0, %v3573_v6  ;;  %v4338_v46 = vld [vmem:[#allocation23_spill] sm:$0xff] }
 0x18a   : > { %2759 = vtanh.f32 %v1102_v28  ;;  %v1042_v5 = vadd.f32 %v978_v27, %v3843_v58  ;;  %v1260_v19 = vmul.f32 0.5, %v1196_v18  ;;  %v1198_v21 = vadd.f32 1.0, %v4334_v49  ;;  %v4336_v28 = vld [vmem:[#allocation46_spill] sm:$0xff]  ;;  %v4339_v18 = vld [vmem:[#allocation47_spill] sm:$0xff] }
 0x18b   : > { %2761 = vtanh.f32 %v1103_v1  ;;  %v1104_v59 = vmul.f32 0.7978846, %v1040_v54  ;;  %v1264_v37 = vmul.f32 0.5, %v1200_v9  ;;  %v1202_v3 = vadd.f32 1.0, %v3580_v25  ;;  %v4337_v27 = vld [vmem:[#allocation30_spill] sm:$0xff]  ;;  %v4340_v9 = vld [vmem:[#allocation33_spill] sm:$0xff] }
 0x18c   : > { %2763 = vtanh.f32 %v1105_v30  ;;  %v1106_v2 = vmul.f32 0.7978846, %v1042_v5  ;;  %v1324_v16 = vmul.f32 %v1260_v19, %v4335_v41  ;;  %v1262_v57 = vmul.f32 0.5, %v1198_v21 }
 0x18d   : > { %2765 = vtanh.f32 %v1104_v59  ;;  %v1195_v50 = vadd.f32 1.0, %v4336_v28  ;;  %v1328_v17 = vmul.f32 %v1264_v37, %v4337_v27  ;;  %v1266_v6 = vmul.f32 0.5, %v1202_v3 }
 0x18e   : > { %2767 = vtanh.f32 %v1106_v2  ;;  %v1199_v40 = vadd.f32 1.0, %v3565_v11  ;;  %v1326_v1 = vmul.f32 %v1262_v57, %v4338_v46  ;;  %v1197_v30 = vadd.f32 1.0, %v4339_v18  ;;  %v4341_v2 = vld [vmem:[#allocation20_spill] sm:$0xff] }
 0x18f   : > { %v1259_v54 = vmul.f32 0.5, %v1195_v50  ;;  %v1201_v5 = vadd.f32 1.0, %v3570_v53  ;;  %v1376_v25 = vpack.c.bf16 %v1328_v17, %v1324_v16  ;;  %v1330_v59 = vmul.f32 %v1266_v6, %v4340_v9  ;;  %v4342_v50 = vld [vmem:[#allocation24_spill] sm:$0xff] }
 0x190   : > { %v1263_v19 = vmul.f32 0.5, %v1199_v40  ;;  %v1204_v49 = vadd.f32 1.0, %v3626_v10  ;;  %v3876_v21 = vpop.eup %2753  ;;  %v1261_v3 = vmul.f32 0.5, %v1197_v30  ;;  %v1208_v11 = vadd.f32 1.0, %v3663_v13  ;;  %v4343_v10 = vld [vmem:[#allocation21_spill] sm:$0xff] }
 0x191   : > { %v1323_v37 = vmul.f32 %v1259_v54, %v4341_v2  ;;  %v1265_v41 = vmul.f32 0.5, %v1201_v5  ;;  %v3880_v57 = vpop.eup %2755  ;;  %1714 = vmatprep.mubr.bf16.mxu0 %v1376_v25  ;;  %v1378_v28 = vpack.c.bf16 %v1330_v59, %v1326_v1  ;;  %v1206_v27 = vadd.f32 1.0, %v3636_v36  ;;  %v4344_v40 = vld [vmem:[#allocation29_spill] sm:$0xff]  ;;  %v4345_v5 = vld [vmem:[#allocation44_spill] sm:$0xff] }
 0x192   : > { %v1327_v53 = vmul.f32 %v1263_v19, %v4342_v50  ;;  %v1268_v16 = vmul.f32 0.5, %v1204_v49  ;;  %v3884_v17 = vpop.eup %2757  ;;  %v1325_v6 = vmul.f32 %v1261_v3, %v4343_v10  ;;  %v1272_v54 = vmul.f32 0.5, %v1208_v11 }
 0x193   : > { %v1329_v46 = vmul.f32 %v1265_v41, %v4344_v40  ;;  %v1210_v18 = vadd.f32 1.0, %v3667_v22  ;;  %1811 = vmatprep.mubr.bf16.mxu1 %v1378_v28  ;;  %v1270_v25 = vmul.f32 0.5, %v1206_v27  ;;  %v1203_v9 = vadd.f32 1.0, %v3591_v38  ;;  %v4346_v22 = vld [vmem:[#allocation45_spill] sm:$0xff]  ;;  %v4347_v27 = vld [vmem:[#allocation34_spill] sm:$0xff] }
 0x194   : > { %v3889_v30 = vpop.eup %2759  ;;  %v1375_v13 = vpack.c.bf16 %v1327_v53, %v1323_v37  ;;  %v1332_v1 = vmul.f32 %v1268_v16, %v4345_v5  ;;  %v1336_v19 = vmul.f32 %v1272_v54, %v3543_v0  ;;  %v1207_v2 = vadd.f32 1.0, %v3652_v43 }
 0x195   : > { %v3893_v59 = vpop.eup %2761  ;;  %v1377_v36 = vpack.c.bf16 %v1329_v46, %v1325_v6  ;;  %v1274_v49 = vmul.f32 0.5, %v1210_v18  ;;  %v1334_v41 = vmul.f32 %v1270_v25, %v4346_v22  ;;  %v1267_v11 = vmul.f32 0.5, %v1203_v9 }
 0x196   : > { %v3897_v3 = vpop.eup %2763  ;;  %1715 = vmatmul.mubr.bf16.gmra.mrb[44].mxu0 %v1375_v13  ;;  %v1205_v37 = vadd.f32 1.0, %v3596_v47  ;;  %v1209_v28 = vadd.f32 1.0, %v3658_v55  ;;  %v1380_v38 = vpack.c.bf16 %v1336_v19, %v1332_v1  ;;  %v1271_v0 = vmul.f32 0.5, %v1207_v2  ;;  %v4348_v13 = vld [vmem:[#allocation37_spill] sm:$0xff] }
 0x197   : > { %v3902_v50 = vpop.eup %2765  ;;  %1812 = vmatmul.mubr.bf16.gmra.mrb[44].mxu1 %v1377_v36  ;;  %v1338_v53 = vmul.f32 %v1274_v49, %v3555_v23  ;;  %v1212_v16 = vadd.f32 1.0, %v3714_v12  ;;  %v1331_v10 = vmul.f32 %v1267_v11, %v4347_v27  ;;  %v1216_v46 = vadd.f32 1.0, %v3744_v63 }
 0x198   : > { %v3906_v43 = vpop.eup %2767  ;;  %v1269_v6 = vmul.f32 0.5, %v1205_v37  ;;  %v1273_v40 = vmul.f32 0.5, %v1209_v28  ;;  %1722 = vmatprep.mubr.bf16.mxu0 %v1380_v38  ;;  %v1335_v55 = vmul.f32 %v1271_v0, %v3525_v32  ;;  %v1214_v18 = vadd.f32 1.0, %v3720_v31  ;;  %v4349_v37 = vld [vmem:[#allocation49_spill] sm:$0xff] }
 0x199   : > { %v1382_v47 = vpack.c.bf16 %v1338_v53, %v1334_v41  ;;  %v1276_v54 = vmul.f32 0.5, %v1212_v16  ;;  %v1280_v12 = vmul.f32 0.5, %v1216_v46  ;;  %v1218_v1 = vadd.f32 1.0, %v3753_v45  ;;  %v4350_v53 = vld [vmem:[#allocation51_spill] sm:$0xff]  ;;  %v4351_v16 = vld [vmem:[#allocation50_spill] sm:$0xff]  ;;  %v4353_v46 = vld [vmem:[#allocation17_spill] sm:$0xff] }
 0x19a   : > { %v1333_v23 = vmul.f32 %v1269_v6, %v4348_v13  ;;  %v1337_v5 = vmul.f32 %v1273_v40, %v3539_v52  ;;  %v1379_v25 = vpack.c.bf16 %v1335_v55, %v1331_v10  ;;  %v1278_v36 = vmul.f32 0.5, %v1214_v18 }
 0x19b   : > { %1819 = vmatprep.mubr.bf16.mxu1 %v1382_v47  ;;  %v1340_v9 = vmul.f32 %v1276_v54, %v3603_v60  ;;  %v1211_v63 = vadd.f32 1.0, %v3687_v62  ;;  %v1344_v32 = vmul.f32 %v1280_v12, %v3634_v4  ;;  %v1282_v49 = vmul.f32 0.5, %v1218_v1  ;;  %v4354_v12 = vld [vmem:[#allocation25_spill] sm:$0xff] }
 0x19c   : > { %v1381_v19 = vpack.c.bf16 %v1337_v5, %v1333_v23  ;;  %v1215_v31 = vadd.f32 1.0, %v3731_v29  ;;  %v1342_v2 = vmul.f32 %v1278_v36, %v3607_v20  ;;  %v1213_v52 = vadd.f32 1.0, %v3694_v42  ;;  %v4356_v36 = vld [vmem:[#allocation18_spill] sm:$0xff] }
 0x19d   : > { %v1275_v22 = vmul.f32 0.5, %v1211_v63  ;;  %v1217_v45 = vadd.f32 1.0, %v3738_v48  ;;  %v1384_v41 = vpack.c.bf16 %v1344_v32, %v1340_v9  ;;  %v1346_v60 = vmul.f32 %v1282_v49, %v3642_v7  ;;  %v4352_v7 = vld [vmem:[#allocation52_spill] sm:$0xff] }
 0x19e   : > { %1723 = vmatmul.mubr.bf16.gmra.mrb[48].mxu0 %v1379_v25  ;;  %v1279_v11 = vmul.f32 0.5, %v1215_v31  ;;  %v1220_v62 = vadd.f32 1.0, %v3799_v14  ;;  %v1277_v28 = vmul.f32 0.5, %v1213_v52  ;;  %v1224_v29 = vadd.f32 1.0, %v3836_v34  ;;  %v4355_v25 = vld [vmem:[#allocation3_spill] sm:$0xff] }
 0x19f   : > { %1820 = vmatmul.mubr.bf16.gmra.mrb[48].mxu1 %v1381_v19  ;;  %v1339_v4 = vmul.f32 %v1275_v22, %v4349_v37  ;;  %v1281_v38 = vmul.f32 0.5, %v1217_v45  ;;  %1730 = vmatprep.mubr.bf16.mxu0 %v1384_v41  ;;  %v1386_v20 = vpack.c.bf16 %v1346_v60, %v1342_v2  ;;  %v1222_v48 = vadd.f32 1.0, %v3809_v35  ;;  %v4358_v2 = vld [vmem:[#allocation8_spill] sm:$0xff] }
 0x1a0   : > { %v1343_v42 = vmul.f32 %v1279_v11, %v4350_v53  ;;  %v1284_v0 = vmul.f32 0.5, %v1220_v62  ;;  %v1341_v27 = vmul.f32 %v1277_v28, %v4351_v16  ;;  %v1288_v6 = vmul.f32 0.5, %v1224_v29  ;;  %v4359_v41 = vld [vmem:[#allocation4_spill] sm:$0xff]  ;;  %v4360_v11 = vld [vmem:[#allocation13_spill] sm:$0xff] }
 0x1a1   : > { %v1345_v10 = vmul.f32 %v1281_v38, %v4352_v7  ;;  %v1226_v14 = vadd.f32 1.0, %v3849_v26  ;;  %1827 = vmatprep.mubr.bf16.mxu1 %v1386_v20  ;;  %v1286_v55 = vmul.f32 0.5, %v1222_v48  ;;  %v1219_v34 = vadd.f32 1.0, %v3783_v39  ;;  %v4357_v39 = vld [vmem:[#allocation7_spill] sm:$0xff] }
 0x1a2   : > { %v1383_v40 = vpack.c.bf16 %v1343_v42, %v1339_v4  ;;  %v1348_v47 = vmul.f32 %v1284_v0, %v4353_v46  ;;  %v1352_v18 = vmul.f32 %v1288_v6, %v3736_v61  ;;  %v1223_v35 = vadd.f32 1.0, %v3818_v33  ;;  %v4361_v6 = vld [vmem:[#allocation2_spill] sm:$0xff] }
 0x1a3   : > { %v1385_v54 = vpack.c.bf16 %v1345_v10, %v1341_v27  ;;  %v1290_v13 = vmul.f32 0.5, %v1226_v14  ;;  %v1350_v23 = vmul.f32 %v1286_v55, %v3708_v8  ;;  %v1283_v5 = vmul.f32 0.5, %v1219_v34  ;;  %v3962_v46 = vld [vmem:[%s4196_s4] ss:$0 sm:$0xff] }
 0x1a4   : > { %v1221_v1 = vadd.f32 1.0, %v4354_v12  ;;  %v1225_v26 = vadd.f32 1.0, %v4355_v25  ;;  %v1388_v9 = vpack.c.bf16 %v1352_v18, %v1348_v47  ;;  %v1287_v19 = vmul.f32 0.5, %v1223_v35  ;;  %v2801_v12 = vld [vmem:[%s2965_s22] sm:$0xff]  }
 0x1a5   : > { %v1354_v63 = vmul.f32 %v1290_v13, %v4356_v36  ;;  %v1228_v32 = vadd.f32 1.0, %v3884_v17  ;;  %v1347_v49 = vmul.f32 %v1283_v5, %v4357_v39  ;;  %v1232_v33 = vadd.f32 1.0, %v3902_v50 }
 0x1a6   : > { %1731 = vmatmul.mubr.bf16.gmra.mrb[52].mxu0 %v1383_v40  ;;  %v1285_v61 = vmul.f32 0.5, %v1221_v1  ;;  %v1289_v31 = vmul.f32 0.5, %v1225_v26  ;;  %v1351_v22 = vmul.f32 %v1287_v19, %v4358_v2  ;;  %v1230_v45 = vadd.f32 1.0, %v3889_v30 }
 0x1a7   : > { %1828 = vmatmul.mubr.bf16.gmra.mrb[52].mxu1 %v1385_v54  ;;  %1738 = vmatprep.mubr.bf16.mxu0 %v1388_v9  ;;  %v1390_v8 = vpack.c.bf16 %v1354_v63, %v1350_v23  ;;  %v1292_v52 = vmul.f32 0.5, %v1228_v32  ;;  %v1296_v17 = vmul.f32 0.5, %v1232_v33  ;;  %v1234_v37 = vadd.f32 1.0, %v3906_v43 }
 0x1a8   : > { %v1349_v60 = vmul.f32 %v1285_v61, %v4359_v41  ;;  %v1353_v62 = vmul.f32 %v1289_v31, %v4360_v11  ;;  %v1387_v4 = vpack.c.bf16 %v1351_v22, %v1347_v49  ;;  %v1294_v50 = vmul.f32 0.5, %v1230_v45 }
 0x1a9   : > { %1835 = vmatprep.mubr.bf16.mxu1 %v1390_v8  ;;  %v1356_v28 = vmul.f32 %v1292_v52, %v3797_v56  ;;  %v1227_v38 = vadd.f32 1.0, %v3876_v21  ;;  %v1360_v20 = vmul.f32 %v1296_v17, %v3834_v51  ;;  %v1298_v53 = vmul.f32 0.5, %v1234_v37 }
 0x1aa   : > { %v1389_v29 = vpack.c.bf16 %v1353_v62, %v1349_v60  ;;  %v1231_v30 = vadd.f32 1.0, %v3893_v59  ;;  %v1229_v0 = vadd.f32 1.0, %v3880_v57  ;;  %v1233_v48 = vadd.f32 1.0, %v3897_v3  ;;  %v4362_v59 = vld [vmem:[#allocation5_spill] sm:$0xff]  ;;  %v2802_v60 = vld [vmem:[%s2965_s22 + $0x8] sm:$0xff]  }
 0x1ab   : > { %v1291_v42 = vmul.f32 0.5, %v1227_v38  ;;  %v1392_v16 = vpack.c.bf16 %v1360_v20, %v1356_v28  ;;  %v1358_v43 = vmul.f32 %v1294_v50, %v3807_v24  ;;  %v1362_v27 = vmul.f32 %v1298_v53, %v3843_v58 }
 0x1ac   : > { %v1295_v56 = vmul.f32 0.5, %v1231_v30  ;;  %v1293_v7 = vmul.f32 0.5, %v1229_v0  ;;  %v1297_v10 = vmul.f32 0.5, %v1233_v48  ;;  %v1852_v1 = vunpack.c.l.bf16 %v2801_v12 }
 0x1ad   : > { %v1394_v21 = vpack.c.bf16 %v1362_v27, %v1358_v43  ;;  %v1355_v51 = vmul.f32 %v1291_v42, %v4361_v6  ;;  %v1853_v19 = vunpack.c.h.bf16 %v2801_v12  ;;  %v1854_v11 = vunpack.c.l.bf16 %v2802_v60  ;;  %v2804_v12 = vld [vmem:[%s2965_s22 + $0x18] sm:$0xff]  }
 0x1ae   : > { %1739 = vmatmul.mubr.bf16.gmra.mrb[56].mxu0 %v1387_v4  ;;  %v1359_v14 = vmul.f32 %v1295_v56, %v3816_v15  ;;  %v1357_v57 = vmul.f32 %v1293_v7, %v4362_v59  ;;  %v1361_v3 = vmul.f32 %v1297_v10, %v3825_v44  ;;  %v1855_v38 = vunpack.c.h.bf16 %v2802_v60 }
 0x1af   : > { %1836 = vmatmul.mubr.bf16.gmra.mrb[56].mxu1 %v1389_v29  ;;  %1746 = vmatprep.mubr.bf16.mxu0 %v1392_v16 }
 0x1b0   : > { %1843 = vmatprep.mubr.bf16.mxu1 %v1394_v21  ;;  %v1391_v40 = vpack.c.bf16 %v1359_v14, %v1355_v51  ;;  %v1393_v24 = vpack.c.bf16 %v1361_v3, %v1357_v57  ;;  %v2803_v21 = vld [vmem:[%s2965_s22 + $0x10] sm:$0xff]  }
 0x1b1   : > { %v1856_v6 = vunpack.c.l.bf16 %v2803_v21  ;;  %v1857_v57 = vunpack.c.h.bf16 %v2803_v21 }
 0x1b6   : > { %1747 = vmatmul.mubr.bf16.gmra.mrb[60].mxu0 %v1391_v40 }
 0x1b7   : > { %1844 = vmatmul.mubr.bf16.gmra.mrb[60].mxu1 %v1393_v24 }
 0x228   : > { %v2424_v58 = vpop.f32.mrb[32].mxu0 }
 0x229   : > { %v2425_v47 = vpop.f32.mrb[33].mxu0 }
 0x22a   : > { %v2426_v15 = vadd.f32 %v2425_v47, %v2424_v58  ;;  %v2427_v55 = vpop.f32.mrb[34].mxu0 }
 0x22b   : > { %v2428_v34 = vpop.f32.mrb[35].mxu0 }
 0x22c   : > { %v2488_v54 = vpop.f32.mrb[32].mxu1  ;;  %v1693_v18 = vadd.f32 %v2426_v15, %v3962_v46  ;;  %v2429_v44 = vadd.f32 %v2428_v34, %v2427_v55 }
 0x22d   : > { %v2489_v13 = vpop.f32.mrb[33].mxu1 }
 0x22e   : > { %v2490_v35 = vadd.f32 %v2489_v13, %v2488_v54  ;;  %v2491_v23 = vpop.f32.mrb[34].mxu1  ;;  %v1696_v5 = vadd.f32 %v2429_v44, %v3962_v46 }
 0x22f   : > { %v2492_v25 = vpop.f32.mrb[35].mxu1 }
 0x230   : > { %v1790_v26 = vadd.f32 %v2490_v35, %v1693_v18  ;;  %v2493_v9 = vadd.f32 %v2492_v25, %v2491_v23 }
 0x232   : > { %v1793_v36 = vadd.f32 %v2493_v9, %v1696_v5  ;;  %v3967_v63 = vadd.f32 %v1852_v1, %v1790_v26  ;;  %v1858_v1 = vunpack.c.l.bf16 %v2804_v12 }
 0x234   : > { %1884 = vadd.xlane.f32.xlu0 %v3967_v63  ;;  %v3970_v32 = vadd.f32 %v1853_v19, %v1793_v36  ;;  %v1859_v36 = vunpack.c.h.bf16 %v2804_v12 }
 0x238   : > { %1886 = vadd.xlane.f32.xlu0 %v3970_v32 }
 0x23e   : > { %v2430_v39 = vpop.f32.mrb[36].mxu0 }
 0x23f   : > { %v2431_v49 = vpop.f32.mrb[37].mxu0 }
 0x240   : > { %v2494_v61 = vpop.f32.mrb[36].mxu1  ;;  %v2432_v31 = vadd.f32 %v2431_v49, %v2430_v39  ;;  %v2433_v33 = vpop.f32.mrb[38].mxu0 }
 0x241   : > { %v2495_v8 = vpop.f32.mrb[37].mxu1  ;;  %v2434_v2 = vpop.f32.mrb[39].mxu0 }
 0x242   : > { %v1701_v22 = vadd.f32 %v2432_v31, %v3962_v46  ;;  %v2496_v52 = vadd.f32 %v2495_v8, %v2494_v61  ;;  %v2497_v45 = vpop.f32.mrb[38].mxu1  ;;  %v2435_v41 = vadd.f32 %v2434_v2, %v2433_v33 }
 0x243   : > { %v2498_v62 = vpop.f32.mrb[39].mxu1 }
 0x244   : > { %v1798_v17 = vadd.f32 %v2496_v52, %v1701_v22  ;;  %v1704_v37 = vadd.f32 %v2435_v41, %v3962_v46  ;;  %v2499_v4 = vadd.f32 %v2498_v62, %v2497_v45 }
 0x246   : > { %v1801_v28 = vadd.f32 %v2499_v4, %v1704_v37  ;;  %v3976_v50 = vadd.f32 %v1854_v11, %v1798_v17  ;;  %v2805_v17 = vld [vmem:[%s2965_s22 + $0x20] sm:$0xff]  }
 0x247   : > { %v1860_v37 = vunpack.c.l.bf16 %v2805_v17 }
 0x248   : > { %1888 = vadd.xlane.f32.xlu1 %v3976_v50  ;;  %v3979_v29 = vadd.f32 %v1855_v38, %v1801_v28 }
 0x24c   : > { %1890 = vadd.xlane.f32.xlu1 %v3979_v29 }
 0x254   : > { %v2436_v20 = vpop.f32.mrb[40].mxu0 }
 0x255   : > { %v2500_v53 = vpop.f32.mrb[40].mxu1  ;;  %v2437_v30 = vpop.f32.mrb[41].mxu0 }
 0x256   : > { %v2438_v42 = vadd.f32 %v2437_v30, %v2436_v20  ;;  %v2501_v0 = vpop.f32.mrb[41].mxu1  ;;  %v2439_v48 = vpop.f32.mrb[42].mxu0  ;;  %v1861_v20 = vunpack.c.h.bf16 %v2805_v17 }
 0x257   : > { %v2502_v16 = vadd.f32 %v2501_v0, %v2500_v53  ;;  %v2503_v43 = vpop.f32.mrb[42].mxu1  ;;  %v2440_v27 = vpop.f32.mrb[43].mxu0 }
 0x258   : > { %v1709_v56 = vadd.f32 %v2438_v42, %v3962_v46  ;;  %v2441_v7 = vadd.f32 %v2440_v27, %v2439_v48  ;;  %v2504_v10 = vpop.f32.mrb[43].mxu1 }
 0x259   : > { %v2505_v51 = vadd.f32 %v2504_v10, %v2503_v43 }
 0x25a   : > { %v1806_v14 = vadd.f32 %v2502_v16, %v1709_v56  ;;  %v1712_v59 = vadd.f32 %v2441_v7, %v3962_v46 }
 0x25c   : > { %v1809_v3 = vadd.f32 %v2505_v51, %v1712_v59  ;;  %v3985_v40 = vadd.f32 %v1856_v6, %v1806_v14  ;;  %v2806_v59 = vld [vmem:[%s2965_s22 + $0x28] sm:$0xff]  }
 0x25e   : > { %1892 = vadd.xlane.f32.xlu0 %v3985_v40  ;;  %v3988_v24 = vadd.f32 %v1857_v57, %v1809_v3  ;;  %v1862_v57 = vunpack.c.l.bf16 %v2806_v59 }
 0x260   : > { %1894 = vadd.xlane.f32.xlu1 %v3988_v24 }
 0x269   : > { %v2442_v58 = vpop.f32.mrb[44].mxu0 }
 0x26a   : > { %v2506_v47 = vpop.f32.mrb[44].mxu1  ;;  %v2443_v15 = vpop.f32.mrb[45].mxu0 }
 0x26b   : > { %v2444_v55 = vadd.f32 %v2443_v15, %v2442_v58  ;;  %v2507_v34 = vpop.f32.mrb[45].mxu1  ;;  %v2445_v54 = vpop.f32.mrb[46].mxu0  ;;  %v1863_v15 = vunpack.c.h.bf16 %v2806_v59 }
 0x26c   : > { %v2508_v18 = vadd.f32 %v2507_v34, %v2506_v47  ;;  %v2509_v44 = vpop.f32.mrb[46].mxu1  ;;  %v2446_v13 = vpop.f32.mrb[47].mxu0 }
 0x26d   : > { %v1717_v35 = vadd.f32 %v2444_v55, %v3962_v46  ;;  %v2447_v23 = vadd.f32 %v2446_v13, %v2445_v54  ;;  %v2510_v5 = vpop.f32.mrb[47].mxu1 }
 0x26e   : > { %v2511_v25 = vadd.f32 %v2510_v5, %v2509_v44 }
 0x26f   : > { %v1814_v26 = vadd.f32 %v2508_v18, %v1717_v35  ;;  %v1720_v9 = vadd.f32 %v2447_v23, %v3962_v46 }
 0x271   : > { %v1817_v19 = vadd.f32 %v2511_v25, %v1720_v9  ;;  %v2448_v39 = vpop.f32.mrb[48].mxu0  ;;  %v3994_v49 = vadd.f32 %v1858_v1, %v1814_v26 }
 0x272   : > { %v2512_v61 = vpop.f32.mrb[48].mxu1  ;;  %v2449_v31 = vpop.f32.mrb[49].mxu0 }
 0x273   : > { %v2450_v33 = vadd.f32 %v2449_v31, %v2448_v39  ;;  %v2513_v8 = vpop.f32.mrb[49].mxu1  ;;  %v2451_v2 = vpop.f32.mrb[50].mxu0  ;;  %1896 = vadd.xlane.f32.xlu0 %v3994_v49  ;;  %v3997_v22 = vadd.f32 %v1859_v36, %v1817_v19  ;;  %v2807_v19 = vld [vmem:[%s2965_s22 + $0x30] sm:$0xff]  }
 0x274   : > { %v2514_v52 = vadd.f32 %v2513_v8, %v2512_v61  ;;  %v2515_v45 = vpop.f32.mrb[50].mxu1  ;;  %v2452_v41 = vpop.f32.mrb[51].mxu0  ;;  %v1864_v39 = vunpack.c.l.bf16 %v2807_v19  ;;  %v1865_v8 = vunpack.c.h.bf16 %v2807_v19 }
 0x275   : > { %v1725_v60 = vadd.f32 %v2450_v33, %v3962_v46  ;;  %v2453_v11 = vadd.f32 %v2452_v41, %v2451_v2  ;;  %v2516_v62 = vpop.f32.mrb[51].mxu1  ;;  %1898 = vadd.xlane.f32.xlu1 %v3997_v22 }
 0x276   : > { %v2517_v4 = vadd.f32 %v2516_v62, %v2515_v45 }
 0x277   : > { %v1822_v28 = vadd.f32 %v2514_v52, %v1725_v60  ;;  %v1728_v38 = vadd.f32 %v2453_v11, %v3962_v46 }
 0x279   : > { %v1825_v53 = vadd.f32 %v2517_v4, %v1728_v38  ;;  %v2454_v30 = vpop.f32.mrb[52].mxu0  ;;  %v4003_v42 = vadd.f32 %v1860_v37, %v1822_v28 }
 0x27a   : > { %v2518_v0 = vpop.f32.mrb[52].mxu1  ;;  %v2455_v48 = vpop.f32.mrb[53].mxu0 }
 0x27b   : > { %v2456_v16 = vadd.f32 %v2455_v48, %v2454_v30  ;;  %v2519_v43 = vpop.f32.mrb[53].mxu1  ;;  %v2457_v27 = vpop.f32.mrb[54].mxu0  ;;  %1900 = vadd.xlane.f32.xlu0 %v4003_v42  ;;  %v4006_v56 = vadd.f32 %v1861_v20, %v1825_v53 }
 0x27c   : > { %v2520_v7 = vadd.f32 %v2519_v43, %v2518_v0  ;;  %v2521_v10 = vpop.f32.mrb[54].mxu1  ;;  %v2458_v21 = vpop.f32.mrb[55].mxu0  ;;  %v2808_v0 = vld [vmem:[%s2965_s22 + $0x38] sm:$0xff]  }
 0x27d   : > { %v1733_v6 = vadd.f32 %v2456_v16, %v3962_v46  ;;  %v2459_v51 = vadd.f32 %v2458_v21, %v2457_v27  ;;  %v2522_v14 = vpop.f32.mrb[55].mxu1  ;;  %1902 = vadd.xlane.f32.xlu1 %v4006_v56  ;;  %v1866_v48 = vunpack.c.l.bf16 %v2808_v0 }
 0x27e   : > { %v2523_v3 = vadd.f32 %v2522_v14, %v2521_v10 }
 0x27f   : > { %v1830_v58 = vadd.f32 %v2520_v7, %v1733_v6  ;;  %v1736_v47 = vadd.f32 %v2459_v51, %v3962_v46  ;;  %v1867_v7 = vunpack.c.h.bf16 %v2808_v0 }
 0x281   : > { %v1833_v55 = vadd.f32 %v2523_v3, %v1736_v47  ;;  %v2460_v34 = vpop.f32.mrb[56].mxu0  ;;  %v4012_v54 = vadd.f32 %v1862_v57, %v1830_v58 }
 0x282   : > { %v2524_v18 = vpop.f32.mrb[56].mxu1  ;;  %v2461_v44 = vpop.f32.mrb[57].mxu0 }
 0x283   : > { %v2462_v13 = vadd.f32 %v2461_v44, %v2460_v34  ;;  %v2525_v35 = vpop.f32.mrb[57].mxu1  ;;  %v2463_v23 = vpop.f32.mrb[58].mxu0  ;;  %1904 = vadd.xlane.f32.xlu0 %v4012_v54  ;;  %v4015_v5 = vadd.f32 %v1863_v15, %v1833_v55 }
 0x284   : > { %v2526_v12 = vadd.f32 %v2525_v35, %v2524_v18  ;;  %v2527_v1 = vpop.f32.mrb[58].mxu1  ;;  %v2464_v25 = vpop.f32.mrb[59].mxu0 }
 0x285   : > { %v1741_v26 = vadd.f32 %v2462_v13, %v3962_v46  ;;  %v2465_v9 = vadd.f32 %v2464_v25, %v2463_v23  ;;  %v2528_v36 = vpop.f32.mrb[59].mxu1  ;;  %1906 = vadd.xlane.f32.xlu1 %v4015_v5 }
 0x286   : > { %v2529_v61 = vadd.f32 %v2528_v36, %v2527_v1 }
 0x287   : > { %v1838_v31 = vadd.f32 %v2526_v12, %v1741_v26  ;;  %v1744_v33 = vadd.f32 %v2465_v9, %v3962_v46 }
 0x289   : > { %v1841_v2 = vadd.f32 %v2529_v61, %v1744_v33  ;;  %v2466_v52 = vpop.f32.mrb[60].mxu0  ;;  %v4021_v45 = vadd.f32 %v1864_v39, %v1838_v31 }
 0x28a   : > { %v2530_v41 = vpop.f32.mrb[60].mxu1  ;;  %v2467_v60 = vpop.f32.mrb[61].mxu0 }
 0x28b   : > { %v2468_v11 = vadd.f32 %v2467_v60, %v2466_v52  ;;  %v2531_v62 = vpop.f32.mrb[61].mxu1  ;;  %v2469_v17 = vpop.f32.mrb[62].mxu0  ;;  %1908 = vadd.xlane.f32.xlu0 %v4021_v45  ;;  %v4024_v37 = vadd.f32 %v1865_v8, %v1841_v2 }
 0x28c   : > { %v2532_v4 = vadd.f32 %v2531_v62, %v2530_v41  ;;  %v2533_v28 = vpop.f32.mrb[62].mxu1  ;;  %v2470_v38 = vpop.f32.mrb[63].mxu0 }
 0x28d   : > { %v1749_v20 = vadd.f32 %v2468_v11, %v3962_v46  ;;  %v2471_v53 = vadd.f32 %v2470_v38, %v2469_v17  ;;  %v2534_v30 = vpop.f32.mrb[63].mxu1  ;;  %1910 = vadd.xlane.f32.xlu1 %v4024_v37 }
 0x28e   : > { %v2535_v16 = vadd.f32 %v2534_v30, %v2533_v28 }
 0x28f   : > { %v1846_v43 = vadd.f32 %v2532_v4, %v1749_v20  ;;  %v1752_v27 = vadd.f32 %v2471_v53, %v3962_v46 }
 0x291   : > { %v1849_v10 = vadd.f32 %v2535_v16, %v1752_v27  ;;  %v4030_v21 = vadd.f32 %v1866_v48, %v1846_v43 }
 0x293   : > { %1912 = vadd.xlane.f32.xlu0 %v4030_v21  ;;  %v4033_v6 = vadd.f32 %v1867_v7, %v1849_v10 }
 0x295   : > { %1914 = vadd.xlane.f32.xlu1 %v4033_v6 }
 0x2c1   : > { %v1885_v51 = vpop.xlane.xlu0 %1884 }
 0x2c2   : > { %v1917_v14 = vmul.f32 0.0078125, %v1885_v51 }
 0x2c4   : > { %v4037_v59 = vsub.f32 %v3967_v63, %v1917_v14 }
 0x2c5   : > { %v1887_v57 = vpop.xlane.xlu0 %1886 }
 0x2c6   : > { %v1918_v3 = vmul.f32 0.0078125, %v1887_v57  ;;  %v1949_v46 = vmul.f32 %v4037_v59, %v4037_v59 }
 0x2c8   : > { %v4042_v58 = vsub.f32 %v3970_v32, %v1918_v3  ;;  %1965 = vadd.xlane.f32.xlu0 %v1949_v46 }
 0x2ca   : > { %v1950_v47 = vmul.f32 %v4042_v58, %v4042_v58 }
 0x2cc   : > { %1967 = vadd.xlane.f32.xlu1 %v1950_v47 }
 0x2d5   : > { %v1889_v15 = vpop.xlane.xlu1 %1888 }
 0x2d6   : > { %v1919_v55 = vmul.f32 0.0078125, %v1889_v15 }
 0x2d8   : > { %v4047_v34 = vsub.f32 %v3976_v50, %v1919_v55 }
 0x2d9   : > { %v1891_v63 = vpop.xlane.xlu1 %1890 }
 0x2da   : > { %v1920_v18 = vmul.f32 0.0078125, %v1891_v63  ;;  %v1951_v44 = vmul.f32 %v4047_v34, %v4047_v34  ;;  %v4120_v63 = vld [vmem:[%s4197_s5] ss:$0 sm:$0xff] }
 0x2dc   : > { %v4052_v13 = vsub.f32 %v3979_v29, %v1920_v18  ;;  %1969 = vadd.xlane.f32.xlu0 %v1951_v44 }
 0x2de   : > { %v1952_v32 = vmul.f32 %v4052_v13, %v4052_v13 }
 0x2e0   : > { %1971 = vadd.xlane.f32.xlu1 %v1952_v32 }
 0x2eb   : > { %v1893_v35 = vpop.xlane.xlu0 %1892 }
 0x2ec   : > { %v1921_v23 = vmul.f32 0.0078125, %v1893_v35  ;;  %v4127_v35 = vld [vmem:[%s4198_s6] ss:$0 sm:$0xff] }
 0x2ed   : > { %v1895_v12 = vpop.xlane.xlu1 %1894 }
 0x2ee   : > { %v4057_v1 = vsub.f32 %v3985_v40, %v1921_v23  ;;  %v1922_v50 = vmul.f32 0.0078125, %v1895_v12 }
 0x2f0   : > { %v4060_v25 = vsub.f32 %v3988_v24, %v1922_v50  ;;  %v1953_v26 = vmul.f32 %v4057_v1, %v4057_v1 }
 0x2f2   : > { %1973 = vadd.xlane.f32.xlu0 %v1953_v26  ;;  %v1954_v29 = vmul.f32 %v4060_v25, %v4060_v25 }
 0x2f4   : > { %1975 = vadd.xlane.f32.xlu1 %v1954_v29 }
 0x300   : > { %v1897_v9 = vpop.xlane.xlu0 %1896 }
 0x301   : > { %v1923_v36 = vmul.f32 0.0078125, %v1897_v9 }
 0x302   : > { %v1899_v19 = vpop.xlane.xlu1 %1898 }
 0x303   : > { %v4067_v39 = vsub.f32 %v3994_v49, %v1923_v36  ;;  %v1924_v40 = vmul.f32 0.0078125, %v1899_v19 }
 0x305   : > { %v4070_v61 = vsub.f32 %v3997_v22, %v1924_v40  ;;  %v1955_v24 = vmul.f32 %v4067_v39, %v4067_v39 }
 0x307   : > { %1977 = vadd.xlane.f32.xlu0 %v1955_v24  ;;  %v1956_v31 = vmul.f32 %v4070_v61, %v4070_v61 }
 0x308   : > { %v1901_v33 = vpop.xlane.xlu0 %1900 }
 0x309   : > { %v1925_v8 = vmul.f32 0.0078125, %v1901_v33  ;;  %1979 = vadd.xlane.f32.xlu1 %v1956_v31 }
 0x30a   : > { %v1903_v2 = vpop.xlane.xlu1 %1902 }
 0x30b   : > { %v4077_v52 = vsub.f32 %v4003_v42, %v1925_v8  ;;  %v1926_v49 = vmul.f32 0.0078125, %v1903_v2 }
 0x30d   : > { %v4080_v41 = vsub.f32 %v4006_v56, %v1926_v49  ;;  %v1957_v22 = vmul.f32 %v4077_v52, %v4077_v52 }
 0x30f   : > { %1981 = vadd.xlane.f32.xlu0 %v1957_v22  ;;  %v1958_v60 = vmul.f32 %v4080_v41, %v4080_v41 }
 0x310   : > { %v1905_v11 = vpop.xlane.xlu0 %1904 }
 0x311   : > { %v1927_v62 = vmul.f32 0.0078125, %v1905_v11  ;;  %1983 = vadd.xlane.f32.xlu1 %v1958_v60 }
 0x312   : > { %v1907_v17 = vpop.xlane.xlu1 %1906 }
 0x313   : > { %v4087_v4 = vsub.f32 %v4012_v54, %v1927_v62  ;;  %v1928_v42 = vmul.f32 0.0078125, %v1907_v17 }
 0x315   : > { %v4090_v28 = vsub.f32 %v4015_v5, %v1928_v42  ;;  %v1959_v56 = vmul.f32 %v4087_v4, %v4087_v4 }
 0x317   : > { %1985 = vadd.xlane.f32.xlu0 %v1959_v56  ;;  %v1960_v38 = vmul.f32 %v4090_v28, %v4090_v28 }
 0x318   : > { %v1909_v20 = vpop.xlane.xlu0 %1908 }
 0x319   : > { %v1929_v53 = vmul.f32 0.0078125, %v1909_v20  ;;  %1987 = vadd.xlane.f32.xlu1 %v1960_v38 }
 0x31a   : > { %v1911_v30 = vpop.xlane.xlu1 %1910 }
 0x31b   : > { %v4097_v0 = vsub.f32 %v4021_v45, %v1929_v53  ;;  %v1930_v54 = vmul.f32 0.0078125, %v1911_v30 }
 0x31d   : > { %v4100_v48 = vsub.f32 %v4024_v37, %v1930_v54  ;;  %v1961_v5 = vmul.f32 %v4097_v0, %v4097_v0 }
 0x31f   : > { %1989 = vadd.xlane.f32.xlu0 %v1961_v5  ;;  %v1962_v16 = vmul.f32 %v4100_v48, %v4100_v48 }
 0x320   : > { %v1913_v43 = vpop.xlane.xlu0 %1912 }
 0x321   : > { %v1931_v27 = vmul.f32 0.0078125, %v1913_v43  ;;  %1991 = vadd.xlane.f32.xlu1 %v1962_v16 }
 0x322   : > { %v1915_v7 = vpop.xlane.xlu1 %1914 }
 0x323   : > { %v4107_v10 = vsub.f32 %v4030_v21, %v1931_v27  ;;  %v1932_v45 = vmul.f32 0.0078125, %v1915_v7 }
 0x325   : > { %v4110_v51 = vsub.f32 %v4033_v6, %v1932_v45  ;;  %v1963_v37 = vmul.f32 %v4107_v10, %v4107_v10 }
 0x327   : > { %1993 = vadd.xlane.f32.xlu0 %v1963_v37  ;;  %v1964_v14 = vmul.f32 %v4110_v51, %v4110_v51 }
 0x329   : > { %1995 = vadd.xlane.f32.xlu1 %v1964_v14 }
 0x355   : > { %v1966_v57 = vpop.xlane.xlu0 %1965 }
 0x356   : > { %v1997_v3 = vmul.f32 0.0078125, %v1966_v57 }
 0x358   : > { %v2013_v46 = vadd.f32 1e-05, %v1997_v3 }
 0x359   : > { %v1968_v47 = vpop.xlane.xlu1 %1967 }
 0x35a   : > { %2769 = vrsqrt.f32 %v2013_v46  ;;  %v1998_v15 = vmul.f32 0.0078125, %v1968_v47 }
 0x35c   : > { %v2014_v21 = vadd.f32 1e-05, %v1998_v15 }
 0x35e   : > { %2771 = vrsqrt.f32 %v2014_v21 }
 0x364   : > { %v2770_v55 = vpop.eup %2769 }
 0x365   : > { %v2045_v6 = vmul.f32 %v2770_v55, %v4037_v59 }
 0x367   : > { %v2068_v44 = vmul.f32 %v4120_v63, %v2045_v6 }
 0x368   : > { %v2772_v18 = vpop.eup %2771 }
 0x369   : > { %v2046_v32 = vmul.f32 %v2772_v18, %v4042_v58  ;;  %v1970_v23 = vpop.xlane.xlu0 %1969  ;;  %v2091_v59 = vadd.f32 %v4127_v35, %v2068_v44 }
 0x36a   : > { %v1999_v50 = vmul.f32 0.0078125, %v1970_v23 }
 0x36b   : > { %v2069_v12 = vmul.f32 %v4120_v63, %v2046_v32 }
 0x36c   : > { %v2015_v29 = vadd.f32 1e-05, %v1999_v50 }
 0x36d   : > { %v2092_v26 = vadd.f32 %v4127_v35, %v2069_v12  ;;  %v1972_v58 = vpop.xlane.xlu1 %1971 }
 0x36e   : > { %2773 = vrsqrt.f32 %v2015_v29  ;;  %v2000_v36 = vmul.f32 0.0078125, %v1972_v58 }
 0x36f   : > { %v2364_v9 = vpack.c.bf16 %v2092_v26, %v2091_v59 }
 0x370   : > { %v2016_v19 = vadd.f32 1e-05, %v2000_v36 }
 0x371   : > { %2365 = vst [vmem:[%s4137_s28] sm:$0xff] %v2364_v9  }
 0x372   : > { %2775 = vrsqrt.f32 %v2016_v19 }
 0x378   : > { %v2774_v40 = vpop.eup %2773 }
 0x379   : > { %v2047_v24 = vmul.f32 %v2774_v40, %v4047_v34 }
 0x37b   : > { %v2070_v33 = vmul.f32 %v4120_v63, %v2047_v24 }
 0x37c   : > { %v2776_v31 = vpop.eup %2775 }
 0x37d   : > { %v2048_v8 = vmul.f32 %v2776_v31, %v4052_v13  ;;  %v2093_v11 = vadd.f32 %v4127_v35, %v2070_v33 }
 0x37f   : > { %v1974_v2 = vpop.xlane.xlu0 %1973  ;;  %v2071_v49 = vmul.f32 %v4120_v63, %v2048_v8 }
 0x380   : > { %v2001_v22 = vmul.f32 0.0078125, %v1974_v2 }
 0x381   : > { %v1976_v60 = vpop.xlane.xlu1 %1975  ;;  %v2094_v62 = vadd.f32 %v4127_v35, %v2071_v49 }
 0x382   : > { %v2017_v17 = vadd.f32 1e-05, %v2001_v22  ;;  %v2002_v42 = vmul.f32 0.0078125, %v1976_v60 }
 0x383   : > { %v2369_v56 = vpack.c.bf16 %v2094_v62, %v2093_v11 }
 0x384   : > { %2777 = vrsqrt.f32 %v2017_v17  ;;  %v2018_v38 = vadd.f32 1e-05, %v2002_v42 }
 0x385   : > { %2401 = vst [vmem:[%s4137_s28 + $0x8] sm:$0xff] %v2369_v56  }
 0x386   : > { %2779 = vrsqrt.f32 %v2018_v38 }
 0x38e   : > { %v2778_v34 = vpop.eup %2777 }
 0x38f   : > { %v2049_v13 = vmul.f32 %v2778_v34, %v4057_v1 }
 0x390   : > { %v2780_v20 = vpop.eup %2779 }
 0x391   : > { %v2072_v53 = vmul.f32 %v4120_v63, %v2049_v13  ;;  %v2050_v30 = vmul.f32 %v2780_v20, %v4060_v25 }
 0x393   : > { %v2073_v54 = vmul.f32 %v4120_v63, %v2050_v30  ;;  %v2095_v16 = vadd.f32 %v4127_v35, %v2072_v53 }
 0x394   : > { %v1978_v5 = vpop.xlane.xlu0 %1977 }
 0x395   : > { %v2096_v43 = vadd.f32 %v4127_v35, %v2073_v54  ;;  %v2003_v27 = vmul.f32 0.0078125, %v1978_v5 }
 0x396   : > { %v1980_v7 = vpop.xlane.xlu1 %1979 }
 0x397   : > { %v2374_v45 = vpack.c.bf16 %v2096_v43, %v2095_v16  ;;  %v2019_v37 = vadd.f32 1e-05, %v2003_v27  ;;  %v2004_v14 = vmul.f32 0.0078125, %v1980_v7 }
 0x399   : > { %2402 = vst [vmem:[%s4137_s28 + $0x10] sm:$0xff] %v2374_v45   ;;  %2781 = vrsqrt.f32 %v2019_v37  ;;  %v2020_v1 = vadd.f32 1e-05, %v2004_v14 }
 0x39b   : > { %2783 = vrsqrt.f32 %v2020_v1 }
 0x39c   : > { %v1982_v57 = vpop.xlane.xlu0 %1981 }
 0x39d   : > { %v2005_v3 = vmul.f32 0.0078125, %v1982_v57 }
 0x39e   : > { %v1984_v46 = vpop.xlane.xlu1 %1983 }
 0x39f   : > { %v2021_v25 = vadd.f32 1e-05, %v2005_v3  ;;  %v2006_v47 = vmul.f32 0.0078125, %v1984_v46 }
 0x3a1   : > { %2785 = vrsqrt.f32 %v2021_v25  ;;  %v2022_v15 = vadd.f32 1e-05, %v2006_v47 }
 0x3a3   : > { %v2782_v21 = vpop.eup %2781  ;;  %2787 = vrsqrt.f32 %v2022_v15 }
 0x3a4   : > { %v2051_v55 = vmul.f32 %v2782_v21, %v4067_v39  ;;  %v1986_v6 = vpop.xlane.xlu0 %1985 }
 0x3a5   : > { %v2784_v18 = vpop.eup %2783  ;;  %v2007_v44 = vmul.f32 0.0078125, %v1986_v6 }
 0x3a6   : > { %v2074_v32 = vmul.f32 %v4120_v63, %v2051_v55  ;;  %v2052_v23 = vmul.f32 %v2784_v18, %v4070_v61  ;;  %v1988_v12 = vpop.xlane.xlu1 %1987 }
 0x3a7   : > { %v2023_v50 = vadd.f32 1e-05, %v2007_v44  ;;  %v2008_v59 = vmul.f32 0.0078125, %v1988_v12 }
 0x3a8   : > { %v2075_v26 = vmul.f32 %v4120_v63, %v2052_v23  ;;  %v2097_v58 = vadd.f32 %v4127_v35, %v2074_v32 }
 0x3a9   : > { %2789 = vrsqrt.f32 %v2023_v50  ;;  %v2024_v29 = vadd.f32 1e-05, %v2008_v59 }
 0x3aa   : > { %v2098_v9 = vadd.f32 %v4127_v35, %v2075_v26 }
 0x3ab   : > { %v2786_v39 = vpop.eup %2785  ;;  %2791 = vrsqrt.f32 %v2024_v29 }
 0x3ac   : > { %v2379_v36 = vpack.c.bf16 %v2098_v9, %v2097_v58  ;;  %v2053_v19 = vmul.f32 %v2786_v39, %v4077_v52  ;;  %v1990_v40 = vpop.xlane.xlu0 %1989 }
 0x3ad   : > { %v2788_v24 = vpop.eup %2787  ;;  %v2009_v61 = vmul.f32 0.0078125, %v1990_v40 }
 0x3ae   : > { %2403 = vst [vmem:[%s4137_s28 + $0x18] sm:$0xff] %v2379_v36   ;;  %v2076_v31 = vmul.f32 %v4120_v63, %v2053_v19  ;;  %v2054_v33 = vmul.f32 %v2788_v24, %v4080_v41  ;;  %v1992_v8 = vpop.xlane.xlu1 %1991 }
 0x3af   : > { %v2025_v2 = vadd.f32 1e-05, %v2009_v61  ;;  %v2010_v49 = vmul.f32 0.0078125, %v1992_v8 }
 0x3b0   : > { %v2077_v22 = vmul.f32 %v4120_v63, %v2054_v33  ;;  %v2099_v11 = vadd.f32 %v4127_v35, %v2076_v31 }
 0x3b1   : > { %2793 = vrsqrt.f32 %v2025_v2  ;;  %v2026_v60 = vadd.f32 1e-05, %v2010_v49 }
 0x3b2   : > { %v2100_v52 = vadd.f32 %v4127_v35, %v2077_v22 }
 0x3b3   : > { %v2790_v62 = vpop.eup %2789  ;;  %2795 = vrsqrt.f32 %v2026_v60 }
 0x3b4   : > { %v2384_v17 = vpack.c.bf16 %v2100_v52, %v2099_v11  ;;  %v2055_v42 = vmul.f32 %v2790_v62, %v4087_v4  ;;  %v1994_v56 = vpop.xlane.xlu0 %1993 }
 0x3b5   : > { %v2792_v38 = vpop.eup %2791  ;;  %v2011_v41 = vmul.f32 0.0078125, %v1994_v56 }
 0x3b6   : > { %2404 = vst [vmem:[%s4137_s28 + $0x20] sm:$0xff] %v2384_v17   ;;  %v2078_v34 = vmul.f32 %v4120_v63, %v2055_v42  ;;  %v2056_v13 = vmul.f32 %v2792_v38, %v4090_v28  ;;  %v1996_v20 = vpop.xlane.xlu1 %1995 }
 0x3b7   : > { %v2027_v53 = vadd.f32 1e-05, %v2011_v41  ;;  %v2012_v30 = vmul.f32 0.0078125, %v1996_v20 }
 0x3b8   : > { %v2079_v54 = vmul.f32 %v4120_v63, %v2056_v13  ;;  %v2101_v16 = vadd.f32 %v4127_v35, %v2078_v34 }
 0x3b9   : > { %2797 = vrsqrt.f32 %v2027_v53  ;;  %v2028_v5 = vadd.f32 1e-05, %v2012_v30 }
 0x3ba   : > { %v2102_v4 = vadd.f32 %v4127_v35, %v2079_v54 }
 0x3bb   : > { %v2794_v43 = vpop.eup %2793  ;;  %2799 = vrsqrt.f32 %v2028_v5 }
 0x3bc   : > { %v2389_v27 = vpack.c.bf16 %v2102_v4, %v2101_v16  ;;  %v2057_v7 = vmul.f32 %v2794_v43, %v4097_v0 }
 0x3bd   : > { %v2796_v45 = vpop.eup %2795 }
 0x3be   : > { %2405 = vst [vmem:[%s4137_s28 + $0x28] sm:$0xff] %v2389_v27   ;;  %v2080_v28 = vmul.f32 %v4120_v63, %v2057_v7  ;;  %v2058_v37 = vmul.f32 %v2796_v45, %v4100_v48 }
 0x3c0   : > { %v2081_v14 = vmul.f32 %v4120_v63, %v2058_v37  ;;  %v2103_v1 = vadd.f32 %v4127_v35, %v2080_v28 }
 0x3c2   : > { %v2104_v57 = vadd.f32 %v4127_v35, %v2081_v14 }
 0x3c3   : > { %v2798_v3 = vpop.eup %2797 }
 0x3c4   : > { %v2394_v46 = vpack.c.bf16 %v2104_v57, %v2103_v1  ;;  %v2059_v25 = vmul.f32 %v2798_v3, %v4107_v10 }
 0x3c5   : > { %v2800_v47 = vpop.eup %2799 }
 0x3c6   : > { %2406 = vst [vmem:[%s4137_s28 + $0x30] sm:$0xff] %v2394_v46   ;;  %v2082_v0 = vmul.f32 %v4120_v63, %v2059_v25  ;;  %v2060_v15 = vmul.f32 %v2800_v47, %v4110_v51 }
 0x3c8   : > { %v2083_v21 = vmul.f32 %v4120_v63, %v2060_v15  ;;  %v2105_v48 = vadd.f32 %v4127_v35, %v2082_v0 }
 0x3ca   : > { %v2106_v55 = vadd.f32 %v4127_v35, %v2083_v21 }
 0x3cc   : > { %v2399_v6 = vpack.c.bf16 %v2106_v55, %v2105_v48 }
 0x3ce   : > { %2407 = vst [vmem:[%s4137_s28 + $0x38] sm:$0xff] %v2399_v6  }
 0x3cf PF: > { %s17_s24 = sadd.s32 1, %s2815_s24  }
 0x3d0   : > { %p14_p4 = scmp.ge.s32.totalorder %s17_s24, 4  }
 0x3d2   :  { %16 = sbr.rel (!%p14_p4) target bundleno = 1 (0x1), region = 78 }

// kernel: _lambda_.23
= control target key start
LH: loop header
LB: loop body
LE: loop exit
PB: predicated region body
PF: predicated region fallthrough
CT: control target
= control target key end

     0   :  { %s1300_s12 = smov 0   ;;  %s1302_s13 = smov 0   ;;  %s1558_s0 = inlined_call_operand.vmem [shape: bf16[2,64,128], index: 0, kind: input, shape index: {}]   ;;  %s1559_s1 = inlined_call_operand.vmem [shape: bf16[2,64,128], index: 1, kind: input, shape index: {}]   ;;  %s1560_s2 = inlined_call_operand.vmem [shape: f32[1,64,128], index: 2, kind: input, shape index: {}]   ;;  %s1561_s3 = inlined_call_operand.vmem [shape: f32[2,64,128], index: 3, kind: output, shape index: {}]  }
   0x1   :  { %s1304_s14 = smov 0  }
   0x2 LB: > { %s32_s15 = sadd.s32 1, %s1271_s13  ;;  %p1056_p0 = scmp.ge.s32.totalorder %s1275_s14, 1  ;;  %s1275_s14 = sphi %s1304_s14, %s13_s14   ;;  %s1271_s13 = sphi %s1302_s13, %s1563_s13   ;;  %s1267_s12 = sphi %s1300_s12, %s1562_s12  }
   0x3   : > { %p34_p1 = scmp.ge.s32.totalorder %s32_s15, 2  ;;  %p193_p2 = scmp.lt.s32.totalorder %s1275_s14, 3 }
   0x5   : > { %s1565_s15 = smov (%p34_p1, %s32_s15), 0  ;;  %p194_p3 = pnand %p1056_p0, %p193_p2 }
   0x6   : > { %p240_p4 = scmp.lt.s32.totalorder (!%p194_p3), %s1267_s12, 1  ;;  %vm280_vm0 = vcmask (!%p194_p3), 7168   ;;  %v1277_v8 = vmov (!%p194_p3), -inf   ;;  %vm450_vm1 = vcmask (!%p194_p3), 523264   ;;  %v1278_v33 = vmov (!%p194_p3), 0   ;;  %v684_v51 = vld [vmem:[%s1560_s2] sm:$0xff] (!%p194_p3) }
   0x7   : > { %197 = sbr.rel (%p194_p3) target bundleno = 878 (0x36e), region = 32  ;;  %283 = vst.msk [vmem:[#allocation2 + $0x10] sm:$0xff] (!%p194_p3), %vm280_vm0, %v1277_v8  ;;  %281 = vst.msk [vmem:[#allocation2] sm:$0xff] (!%p194_p3), %vm280_vm0, %v1277_v8  ;;  %1195 = vset.pattern.permute.xlu0 (!%p194_p3), %v1278_v33  ;;  %1196 = vset.pattern.permute.xlu1 (!%p194_p3), %v1278_v33  ;;  %v1279_v34 = vmov (!%p194_p3), 0.0   ;;  %v685_v52 = vld [vmem:[%s1560_s2 + $0x8] sm:$0xff] (!%p194_p3)  ;;  %v686_v60 = vld [vmem:[%s1560_s2 + $0x10] sm:$0xff] (!%p194_p3) }
   0x8   : > { %282 = vst.msk [vmem:[#allocation2 + $0x8] sm:$0xff] (!%p194_p3), %vm280_vm0, %v1277_v8  ;;  %284 = vst.msk [vmem:[#allocation2 + $0x18] sm:$0xff] (!%p194_p3), %vm280_vm0, %v1277_v8  ;;  %v1152_v54 = vpack.c.bf16 (!%p194_p3), %v685_v52, %v684_v51  ;;  %v687_v61 = vld [vmem:[%s1560_s2 + $0x18] sm:$0xff] (!%p194_p3) }
   0x9   : > { %285 = vst.msk [vmem:[#allocation2 + $0x20] sm:$0xff] (!%p194_p3), %vm280_vm0, %v1277_v8  ;;  %286 = vst.msk [vmem:[#allocation2 + $0x28] sm:$0xff] (!%p194_p3), %vm280_vm0, %v1277_v8 }
   0xa   : > { %287 = vst.msk [vmem:[#allocation2 + $0x30] sm:$0xff] (!%p194_p3), %vm280_vm0, %v1277_v8  ;;  %288 = vst.msk [vmem:[#allocation2 + $0x38] sm:$0xff] (!%p194_p3), %vm280_vm0, %v1277_v8  ;;  %1153 = vmatprep.subr.bf16.mxu1 (!%p194_p3), %v1152_v54 }
   0xb   : > { %291 = vst.msk [vmem:[#allocation3 + $0x10] sm:$0xff] (!%p194_p3), %vm280_vm0, %v1279_v34  ;;  %289 = vst.msk [vmem:[#allocation3] sm:$0xff] (!%p194_p3), %vm280_vm0, %v1279_v34  ;;  %1155 = vmatpush3.bf16.msra.mxu1 (!%p194_p3), %v1152_v54 }
   0xc   : > { %290 = vst.msk [vmem:[#allocation3 + $0x8] sm:$0xff] (!%p194_p3), %vm280_vm0, %v1279_v34  ;;  %292 = vst.msk [vmem:[#allocation3 + $0x18] sm:$0xff] (!%p194_p3), %vm280_vm0, %v1279_v34 }
   0xd   : > { %293 = vst.msk [vmem:[#allocation3 + $0x20] sm:$0xff] (!%p194_p3), %vm280_vm0, %v1279_v34  ;;  %294 = vst.msk [vmem:[#allocation3 + $0x28] sm:$0xff] (!%p194_p3), %vm280_vm0, %v1279_v34 }
   0xe   : > { %s1567_s12 = smov (!%p240_p4, %s1267_s12), 1  ;;  %295 = vst.msk [vmem:[#allocation3 + $0x30] sm:$0xff] %vm280_vm0, %v1279_v34  ;;  %296 = vst.msk [vmem:[#allocation3 + $0x38] sm:$0xff] %vm280_vm0, %v1279_v34  ;;  %v1375_v35 = vld [vmem:[#allocation2 + $0x10] sm:$0xff]  ;;  %v1377_v36 = vld [vmem:[#allocation2] sm:$0xff] }
   0xf   : > { %s1081_s16 = sshll.u32 %s1567_s12, 5  ;;  %v1385_v41 = vld [vmem:[#allocation2 + $0x18] sm:$0xff]  ;;  %v1392_v43 = vld [vmem:[#allocation2 + $0x8] sm:$0xff] }
  0x10   : > { %s257_s19 = scalar_lea.vmem %s1559_s1, %s1081_s16  ;;  %s247_s22 = scalar_lea.vmem %s1558_s0, %s1081_s16  ;;  %v1410_v50 = vld [vmem:[#allocation2 + $0x20] sm:$0xff]  ;;  %v1422_v56 = vld [vmem:[#allocation2 + $0x28] sm:$0xff] }
  0x11   : > { %v1197_v0 = vld [vmem:[%s257_s19] sm:$0xff]   ;;  %v1198_v1 = vld [vmem:[%s257_s19 + $0x8] sm:$0xff]   ;;  %v1199_v3 = vld [vmem:[%s257_s19 + $0x10] sm:$0xff]   ;;  %s1083_s16 = sshll.u32 %s1567_s12, 6 }
  0x12   : > { %1108 = vmatprep.subr.bf16.mxu0 %v1197_v0  ;;  %v1201_v2 = vld [vmem:[%s247_s22] sm:$0xff]   ;;  %v1200_v4 = vld [vmem:[%s257_s19 + $0x18] sm:$0xff]   ;;  %v1202_v5 = vld [vmem:[%s247_s22 + $0x8] sm:$0xff]   ;;  %s1539_s19 = scalar_lea.vmem %s1561_s3, %s1083_s16 }
  0x13   : > { %1109 = vmatpush3.bf16.xpose.msra.mxu0 %v1197_v0  ;;  %1116 = vmatprep.mubr.bf16.mxu0 %v1201_v2  ;;  %v1203_v6 = vld [vmem:[%s247_s22 + $0x10] sm:$0xff]   ;;  %v1204_v7 = vld [vmem:[%s247_s22 + $0x18] sm:$0xff]   ;;  %v1156_v0 = vpack.c.bf16 %v687_v61, %v686_v60 }
  0x14   : > { %1110 = vmatprep.subr.bf16.mxu0 %v1198_v1  ;;  %v1428_v59 = vld [vmem:[#allocation2 + $0x30] sm:$0xff]  ;;  %v1443_v2 = vld [vmem:[#allocation2 + $0x38] sm:$0xff] }
  0x15   : > { %1157 = vmatprep.subr.bf16.mxu1 %v1156_v0 }
  0x16   : > { %1159 = vmatpush3.bf16.msra.mxu1 %v1156_v0 }
  0x1b   : > { %1111 = vmatpush3.bf16.xpose.msra.mxu0 %v1198_v1 }
  0x1c   : > { %1112 = vmatprep.subr.bf16.mxu0 %v1199_v3 }
  0x23   : > { %1113 = vmatpush3.bf16.xpose.msra.mxu0 %v1199_v3 }
  0x24   : > { %1114 = vmatprep.subr.bf16.mxu0 %v1200_v4 }
  0x2b   : > { %1115 = vmatpush3.bf16.xpose.msra.mxu0 %v1200_v4 }
  0x32   : > { %1117 = vmatmul.mubr.bf16.vlgmr.msra.gmra.mrb[0].mxu0 %v1202_v5 }
  0x33   : > { %1120 = vmatprep.mubr.bf16.mxu0 %v1203_v6  ;;  %v688_v6 = vld [vmem:[%s1560_s2 + $0x20] sm:$0xff] }
  0x3a   : > { %1121 = vmatmul.mubr.bf16.gmra.mrb[4].mxu0 %v1204_v7  ;;  %v689_v7 = vld [vmem:[%s1560_s2 + $0x28] sm:$0xff] }
 0x105   : > { %v1118_v9 = vpop.f32.mrb[0].mxu0 }
 0x106   : > { %v1335_v10 = vmul.f32 0.088388346, %v1118_v9  ;;  %v403_v11 = vpop.f32.mrb[1].mxu0 }
 0x107   : > { %v1337_v12 = vmul.f32 0.088388346, %v403_v11  ;;  %v1119_v13 = vpop.f32.mrb[2].mxu0  ;;  %v1160_v11 = vpack.c.bf16 %v689_v7, %v688_v6 }
 0x108   : > { %v1339_v14 = vmul.f32 0.088388346, %v1119_v13  ;;  %v406_v15 = vpop.f32.mrb[3].mxu0  ;;  %v457_v16 = vsel %vm450_vm1, %v1335_v10, -inf }
 0x109   : > { %v1343_v17 = vmul.f32 0.088388346, %v406_v15  ;;  %458 = vmax.xlane.f32.xlu1 %v457_v16  ;;  %v451_v18 = vsel %vm450_vm1, %v1337_v12, -inf  ;;  %1161 = vmatprep.subr.bf16.mxu1 %v1160_v11  ;;  %v690_v15 = vld [vmem:[%s1560_s2 + $0x30] sm:$0xff]  ;;  %v691_v16 = vld [vmem:[%s1560_s2 + $0x38] sm:$0xff] }
 0x10a   : > { %452 = vmax.xlane.f32.xlu0 %v451_v18  ;;  %v460_v19 = vsel %vm450_vm1, %v1339_v14, -inf  ;;  %1163 = vmatpush3.bf16.msra.mxu1 %v1160_v11  ;;  %v1164_v18 = vpack.c.bf16 %v691_v16, %v690_v15 }
 0x10b   : > { %v454_v21 = vsel %vm450_vm1, %v1343_v17, -inf }
 0x10c   : > { %1165 = vmatprep.subr.bf16.mxu1 %v1164_v18 }
 0x10d   : > { %461 = vmax.xlane.f32.xlu1 %v460_v19  ;;  %v1122_v20 = vpop.f32.mrb[4].mxu0 }
 0x10e   : > { %455 = vmax.xlane.f32.xlu0 %v454_v21  ;;  %v419_v22 = vpop.f32.mrb[5].mxu0  ;;  %v1353_v26 = vmul.f32 0.088388346, %v1122_v20  ;;  %1167 = vmatpush3.bf16.msra.mxu1 %v1164_v18 }
 0x10f   : > { %v1351_v23 = vmul.f32 0.088388346, %v419_v22  ;;  %v1123_v24 = vpop.f32.mrb[6].mxu0 }
 0x110   : > { %v422_v25 = vpop.f32.mrb[7].mxu0  ;;  %v1359_v29 = vmul.f32 0.088388346, %v1123_v24  ;;  %v469_v31 = vsel %vm450_vm1, %v1353_v26, -inf }
 0x111   : > { %v1355_v27 = vmul.f32 0.088388346, %v422_v25  ;;  %v463_v28 = vsel %vm450_vm1, %v1351_v23, -inf }
 0x112   : > { %464 = vmax.xlane.f32.xlu0 %v463_v28  ;;  %v472_v32 = vsel %vm450_vm1, %v1359_v29, -inf }
 0x113   : > { %v466_v30 = vsel %vm450_vm1, %v1355_v27, -inf }
 0x114   : > { %467 = vmax.xlane.f32.xlu1 %v466_v30 }
 0x116   : > { %470 = vmax.xlane.f32.xlu0 %v469_v31 }
 0x118   : > { %473 = vmax.xlane.f32.xlu1 %v472_v32 }
 0x196   : > { %v459_v37 = vpop.xlane.xlu1 %458 }
 0x197   : > { %v1380_v38 = vmax.f32 %v1375_v35, %v459_v37  ;;  %v453_v39 = vpop.xlane.xlu0 %452 }
 0x198   : > { %v1383_v40 = vmax.f32 %v1377_v36, %v453_v39 }
 0x199   : > { %v485_v42 = vsub.f32 %v1375_v35, %v1380_v38  ;;  %839 = vst.msk [vmem:[#allocation2 + $0x10] sm:$0xff] %vm280_vm0, %v1380_v38  ;;  %519 = vperm.xlu1 %1196, %v1380_v38   ;;  %v573_v38 = vld [vmem:[#allocation3 + $0x10] sm:$0xff] }
 0x19a   : > { %v483_v44 = vsub.f32 %v1377_v36, %v1383_v40  ;;  %837 = vst.msk [vmem:[#allocation2] sm:$0xff] %vm280_vm0, %v1383_v40  ;;  %v462_v45 = vpop.xlane.xlu1 %461  ;;  %509 = vperm.xlu0 %1195, %v1383_v40   ;;  %v571_v40 = vld [vmem:[#allocation3] sm:$0xff] }
 0x19b   : > { %v1400_v46 = vmax.f32 %v1385_v41, %v462_v45  ;;  %v456_v47 = vpop.xlane.xlu0 %455 }
 0x19c   : > { %v1403_v48 = vmax.f32 %v1392_v43, %v456_v47 }
 0x19d   : > { %v486_v49 = vsub.f32 %v1385_v41, %v1400_v46  ;;  %840 = vst.msk [vmem:[#allocation2 + $0x18] sm:$0xff] %vm280_vm0, %v1400_v46  ;;  %524 = vperm.xlu1 %1196, %v1400_v46  }
 0x19e   : > { %v484_v53 = vsub.f32 %v1392_v43, %v1403_v48  ;;  %838 = vst.msk [vmem:[#allocation2 + $0x8] sm:$0xff] %vm280_vm0, %v1403_v48 }
 0x19f   : > { %v465_v55 = vpop.xlane.xlu0 %464 }
 0x1a0   : > { %v1425_v57 = vmax.f32 %v1410_v50, %v465_v55 }
 0x1a1   : > { %514 = vperm.xlu1 %1196, %v1403_v48   ;;  %v468_v58 = vpop.xlane.xlu1 %467 }
 0x1a2   : > { %v487_v62 = vsub.f32 %v1410_v50, %v1425_v57  ;;  %841 = vst.msk [vmem:[#allocation2 + $0x20] sm:$0xff] %vm280_vm0, %v1425_v57  ;;  %v1441_v63 = vmax.f32 %v1422_v56, %v468_v58 }
 0x1a3   : > { %v471_v1 = vpop.xlane.xlu0 %470 }
 0x1a4   : > { %v488_v3 = vsub.f32 %v1422_v56, %v1441_v63  ;;  %842 = vst.msk [vmem:[#allocation2 + $0x28] sm:$0xff] %vm280_vm0, %v1441_v63  ;;  %v1450_v4 = vmax.f32 %v1428_v59, %v471_v1 }
 0x1a5   : > { %v474_v5 = vpop.xlane.xlu1 %473 }
 0x1a6   : > { %v489_v8 = vsub.f32 %v1428_v59, %v1450_v4  ;;  %843 = vst.msk [vmem:[#allocation2 + $0x30] sm:$0xff] %vm280_vm0, %v1450_v4  ;;  %v1463_v9 = vmax.f32 %v1443_v2, %v474_v5  ;;  %539 = vperm.xlu1 %1196, %v1450_v4  }
 0x1a8   : > { %v490_v13 = vsub.f32 %v1443_v2, %v1463_v9  ;;  %844 = vst.msk [vmem:[#allocation2 + $0x38] sm:$0xff] %vm280_vm0, %v1463_v9  ;;  %v577_v2 = vld [vmem:[#allocation3 + $0x30] sm:$0xff] }
 0x1aa   : > { %529 = vperm.xlu1 %1196, %v1425_v57   ;;  %v572_v57 = vld [vmem:[#allocation3 + $0x8] sm:$0xff]  ;;  %v505_v59 = vmul.f32 1.442695, %v490_v13 }
 0x1ae   : > { %534 = vperm.xlu1 %1196, %v1441_v63  }
 0x1b2   : > { %544 = vperm.xlu1 %1196, %v1463_v9  }
 0x218   : > { %v520_v19 = vpop.permute.xlu1 %519 }
 0x219   : > { %v549_v20 = vsub.f32 %v1335_v10, %v520_v19  ;;  %v510_v21 = vpop.permute.xlu0 %509  ;;  %v495_v19 = vmul.f32 1.442695, %v485_v42  ;;  %v499_v42 = vmul.f32 1.442695, %v487_v62 }
 0x21a   : > { %v547_v22 = vsub.f32 %v1337_v12, %v510_v21  ;;  %v493_v21 = vmul.f32 1.442695, %v484_v53 }
 0x21b   : > { %v559_v24 = vmul.f32 1.442695, %v549_v20  ;;  %v491_v20 = vmul.f32 1.442695, %v483_v44 }
 0x21c   : > { %v555_v25 = vmul.f32 1.442695, %v547_v22  ;;  %v525_v28 = vpop.permute.xlu1 %524  ;;  %v497_v22 = vmul.f32 1.442695, %v486_v49  ;;  %v574_v49 = vld [vmem:[#allocation3 + $0x18] sm:$0xff] }
 0x21d   : > { %1205 = vpow2.f32 %v559_v24  ;;  %v550_v30 = vsub.f32 %v1339_v14, %v525_v28  ;;  %v503_v28 = vmul.f32 1.442695, %v489_v8 }
 0x21e   : > { %1207 = vpow2.f32 %v555_v25 }
 0x21f   : > { %v561_v31 = vmul.f32 1.442695, %v550_v30  ;;  %v501_v30 = vmul.f32 1.442695, %v488_v3  ;;  %v575_v3 = vld [vmem:[#allocation3 + $0x20] sm:$0xff] }
 0x220   : > { %v515_v32 = vpop.permute.xlu1 %514 }
 0x221   : > { %1209 = vpow2.f32 %v561_v31  ;;  %v548_v33 = vsub.f32 %v1343_v17, %v515_v32 }
 0x223   : > { %v557_v34 = vmul.f32 1.442695, %v548_v33 }
 0x225   : > { %1211 = vpow2.f32 %v557_v34  ;;  %v540_v37 = vpop.permute.xlu1 %539 }
 0x226   : > { %v553_v45 = vsub.f32 %v1353_v26, %v540_v37 }
 0x227   : > { %v1206_v39 = vpop.eup %1205 }
 0x228   : > { %v1208_v10 = vpop.eup %1207  ;;  %v593_v12 = vsel %vm450_vm1, %v1206_v39, 0.0  ;;  %v567_v17 = vmul.f32 1.442695, %v553_v45 }
 0x229   : > { %1140 = vmatprep.mubr.msk.f32.mxu1 %vm450_vm1, %v1208_v10  ;;  %594 = vadd.xlane.f32.xlu0 %v593_v12  ;;  %v530_v47 = vpop.permute.xlu1 %529  ;;  %v587_v14 = vsel %vm450_vm1, %v1208_v10, 0.0  ;;  %v576_v12 = vld [vmem:[#allocation3 + $0x28] sm:$0xff] }
 0x22a   : > { %v551_v51 = vsub.f32 %v1351_v23, %v530_v47  ;;  %588 = vadd.xlane.f32.xlu1 %v587_v14 }
 0x22b   : > { %v1210_v52 = vpop.eup %1209 }
 0x22c   : > { %v563_v54 = vmul.f32 1.442695, %v551_v51  ;;  %v596_v55 = vsel %vm450_vm1, %v1210_v52, 0.0 }
 0x22d   : > { %v535_v58 = vpop.permute.xlu1 %534 }
 0x22e   : > { %1213 = vpow2.f32 %v563_v54  ;;  %v552_v26 = vsub.f32 %v1355_v27, %v535_v58  ;;  %597 = vadd.xlane.f32.xlu1 %v596_v55  ;;  %v578_v55 = vld [vmem:[#allocation3 + $0x38] sm:$0xff] }
 0x22f   : > { %v1212_v60 = vpop.eup %1211  ;;  %1215 = vpow2.f32 %v567_v17 }
 0x230   : > { %v565_v61 = vmul.f32 1.442695, %v552_v26  ;;  %1141 = vmatmul.mubr.msk.f32.vlgmr.msra.gmra.mrb[0].mxu1 %vm450_vm1, %v1212_v60  ;;  %v590_v0 = vsel %vm450_vm1, %v1212_v60, 0.0 }
 0x231   : > { %1143 = vmatprep.mubr.msk.f32.mxu1 %vm450_vm1, %v1206_v39  ;;  %591 = vadd.xlane.f32.xlu0 %v590_v0  ;;  %v545_v23 = vpop.permute.xlu1 %544 }
 0x232   : > { %1217 = vpow2.f32 %v565_v61  ;;  %v554_v1 = vsub.f32 %v1359_v29, %v545_v23 }
 0x234   : > { %v569_v5 = vmul.f32 1.442695, %v554_v1  ;;  %1144 = vmatmul.mubr.msk.f32.gmra.mrb[2].mxu1 %vm450_vm1, %v1210_v52 }
 0x236   : > { %1219 = vpow2.f32 %v569_v5 }
 0x237   : > { %1221 = vpow2.f32 %v495_v19 }
 0x238   : > { %v1214_v27 = vpop.eup %1213  ;;  %1223 = vpow2.f32 %v491_v20 }
 0x239   : > { %1146 = vmatprep.mubr.msk.f32.mxu1 %vm450_vm1, %v1214_v27  ;;  %v599_v6 = vsel %vm450_vm1, %v1214_v27, 0.0  ;;  %v1216_v7 = vpop.eup %1215  ;;  %1225 = vpow2.f32 %v493_v21 }
 0x23a   : > { %600 = vadd.xlane.f32.xlu0 %v599_v6  ;;  %v605_v15 = vsel %vm450_vm1, %v1216_v7, 0.0  ;;  %1227 = vpow2.f32 %v497_v22 }
 0x23b   : > { %1229 = vpow2.f32 %v499_v42 }
 0x23c   : > { %v1218_v11 = vpop.eup %1217  ;;  %1231 = vpow2.f32 %v503_v28 }
 0x23d   : > { %1147 = vmatmul.mubr.msk.f32.gmra.mrb[4].mxu1 %vm450_vm1, %v1218_v11  ;;  %v602_v16 = vsel %vm450_vm1, %v1218_v11, 0.0  ;;  %1233 = vpow2.f32 %v501_v30 }
 0x23e   : > { %606 = vadd.xlane.f32.xlu0 %v605_v15  ;;  %1149 = vmatprep.mubr.msk.f32.mxu1 %vm450_vm1, %v1216_v7  ;;  %1235 = vpow2.f32 %v505_v59 }
 0x23f   : > { %603 = vadd.xlane.f32.xlu1 %v602_v16 }
 0x240   : > { %v1220_v29 = vpop.eup %1219 }
 0x241   : > { %1150 = vmatmul.mubr.msk.f32.gmra.mrb[6].mxu1 %vm450_vm1, %v1220_v29  ;;  %v608_v18 = vsel %vm450_vm1, %v1220_v29, 0.0  ;;  %v1222_v24 = vpop.eup %1221 }
 0x242   : > { %v1224_v25 = vpop.eup %1223  ;;  %v581_v43 = vmul.f32 %v1222_v24, %v573_v38 }
 0x243   : > { %609 = vadd.xlane.f32.xlu1 %v608_v18  ;;  %v1226_v35 = vpop.eup %1225  ;;  %v579_v41 = vmul.f32 %v1224_v25, %v571_v40 }
 0x244   : > { %v1228_v36 = vpop.eup %1227  ;;  %v580_v32 = vmul.f32 %v1226_v35, %v572_v57 }
 0x245   : > { %v582_v50 = vmul.f32 %v1228_v36, %v574_v49  ;;  %v1230_v63 = vpop.eup %1229 }
 0x246   : > { %v583_v37 = vmul.f32 %v1230_v63, %v575_v3  ;;  %v1232_v39 = vpop.eup %1231 }
 0x247   : > { %v1234_v9 = vpop.eup %1233  ;;  %v585_v47 = vmul.f32 %v1232_v39, %v577_v2 }
 0x248   : > { %v584_v51 = vmul.f32 %v1234_v9, %v576_v12  ;;  %v1236_v52 = vpop.eup %1235 }
 0x249   : > { %v586_v26 = vmul.f32 %v1236_v52, %v578_v55 }
 0x254   : > { %648 = vperm.xlu1 %1196, %v1222_v24   ;;  %638 = vperm.xlu0 %1195, %v1224_v25  }
 0x258   : > { %643 = vperm.xlu0 %1195, %v1226_v35  }
 0x25c   : > { %653 = vperm.xlu0 %1195, %v1228_v36  }
 0x2b6   : > { %v595_v44 = vpop.xlane.xlu0 %594 }
 0x2b7   : > { %v613_v46 = vadd.f32 %v595_v44, %v581_v43  ;;  %v589_v48 = vpop.xlane.xlu1 %588 }
 0x2b8   : > { %v611_v53 = vadd.f32 %v589_v48, %v579_v41 }
 0x2b9   : > { %622 = vst.msk [vmem:[#allocation3 + $0x10] sm:$0xff] %vm280_vm0, %v613_v46 }
 0x2ba   : > { %620 = vst.msk [vmem:[#allocation3] sm:$0xff] %vm280_vm0, %v611_v53 }
 0x2bb   : > { %v598_v62 = vpop.xlane.xlu1 %597 }
 0x2bc   : > { %v614_v31 = vadd.f32 %v598_v62, %v582_v50 }
 0x2be   : > { %623 = vst.msk [vmem:[#allocation3 + $0x18] sm:$0xff] %vm280_vm0, %v614_v31  ;;  %v592_v4 = vpop.xlane.xlu0 %591 }
 0x2bf   : > { %v612_v8 = vadd.f32 %v592_v4, %v580_v32 }
 0x2c0   : > { %v858_v33 = vld [vmem:[#allocation3 + $0x10] sm:$0xff] }
 0x2c1   : > { %621 = vst.msk [vmem:[#allocation3 + $0x8] sm:$0xff] %vm280_vm0, %v612_v8  ;;  %876 = vperm.xlu0 %1195, %v858_v33   ;;  %v856_v56 = vld [vmem:[#allocation3] sm:$0xff] }
 0x2c2   : > { %866 = vperm.xlu1 %1196, %v856_v56  }
 0x2c5   : > { %v859_v34 = vld [vmem:[#allocation3 + $0x18] sm:$0xff] }
 0x2c6   : > { %881 = vperm.xlu1 %1196, %v859_v34  }
 0x2c7   : > { %v601_v10 = vpop.xlane.xlu0 %600 }
 0x2c8   : > { %v615_v13 = vadd.f32 %v601_v10, %v583_v37  ;;  %v857_v45 = vld [vmem:[#allocation3 + $0x8] sm:$0xff] }
 0x2ca   : > { %624 = vst.msk [vmem:[#allocation3 + $0x20] sm:$0xff] %vm280_vm0, %v615_v13  ;;  %871 = vperm.xlu1 %1196, %v857_v45  }
 0x2cb   : > { %v607_v14 = vpop.xlane.xlu0 %606 }
 0x2cc   : > { %v617_v17 = vadd.f32 %v607_v14, %v585_v47  ;;  %v604_v54 = vpop.xlane.xlu1 %603 }
 0x2cd   : > { %v616_v58 = vadd.f32 %v604_v54, %v584_v51 }
 0x2ce   : > { %626 = vst.msk [vmem:[#allocation3 + $0x30] sm:$0xff] %vm280_vm0, %v617_v17 }
 0x2cf   : > { %625 = vst.msk [vmem:[#allocation3 + $0x28] sm:$0xff] %vm280_vm0, %v616_v58 }
 0x2d0   : > { %v610_v60 = vpop.xlane.xlu1 %609 }
 0x2d1   : > { %v618_v61 = vadd.f32 %v610_v60, %v586_v26  ;;  %v860_v23 = vld [vmem:[#allocation3 + $0x20] sm:$0xff] }
 0x2d3   : > { %627 = vst.msk [vmem:[#allocation3 + $0x38] sm:$0xff] %vm280_vm0, %v618_v61  ;;  %v639_v19 = vpop.permute.xlu0 %638 }
 0x2d4   : > { %v649_v22 = vpop.permute.xlu1 %648  ;;  %v676_v38 = vmul.f32 0.0, %v639_v19 }
 0x2d5   : > { %v862_v0 = vld [vmem:[#allocation3 + $0x30] sm:$0xff]  ;;  %v678_v36 = vmul.f32 0.0, %v649_v22 }
 0x2d6   : > { %896 = vperm.xlu0 %1195, %v862_v0   ;;  %v861_v5 = vld [vmem:[#allocation3 + $0x28] sm:$0xff] }
 0x2d7   : > { %v644_v20 = vpop.permute.xlu0 %643 }
 0x2d8   : > { %v677_v30 = vmul.f32 0.0, %v644_v20 }
 0x2da   : > { %886 = vperm.xlu0 %1195, %v860_v23   ;;  %v863_v1 = vld [vmem:[#allocation3 + $0x38] sm:$0xff] }
 0x2db   : > { %901 = vperm.xlu1 %1196, %v863_v1   ;;  %v654_v21 = vpop.permute.xlu0 %653 }
 0x2dc   : > { %v679_v48 = vmul.f32 0.0, %v654_v21 }
 0x2de   : > { %663 = vperm.xlu0 %1195, %v1234_v9  }
 0x2df   : > { %891 = vperm.xlu1 %1196, %v861_v5  }
 0x2e2   : > { %673 = vperm.xlu0 %1195, %v1236_v52  }
 0x2e3   : > { %658 = vperm.xlu1 %1196, %v1230_v63  }
 0x2e7   : > { %668 = vperm.xlu1 %1196, %v1232_v39  }
 0x303   : > { %v1142_v27 = vpop.f32.mrb[0].mxu1 }
 0x304   : > { %v782_v6 = vpop.f32.mrb[1].mxu1  ;;  %v822_v57 = vadd.f32 %v1142_v27, %v677_v30 }
 0x305   : > { %v821_v44 = vadd.f32 %v782_v6, %v676_v38 }
 0x307   : > { %v1145_v7 = vpop.f32.mrb[2].mxu1 }
 0x308   : > { %v792_v11 = vpop.f32.mrb[3].mxu1  ;;  %v824_v53 = vadd.f32 %v1145_v7, %v679_v48 }
 0x309   : > { %v823_v42 = vadd.f32 %v792_v11, %v678_v36 }
 0x310   : > { %v1148_v15 = vpop.f32.mrb[4].mxu1 }
 0x311   : > { %v802_v16 = vpop.f32.mrb[5].mxu1 }
 0x314   : > { %v1151_v29 = vpop.f32.mrb[6].mxu1 }
 0x315   : > { %v812_v18 = vpop.f32.mrb[7].mxu1 }
 0x340   : > { %v877_v24 = vpop.permute.xlu0 %876 }
 0x341   : > { %1237 = vrcp.f32 %v877_v24  ;;  %v867_v25 = vpop.permute.xlu1 %866 }
 0x342   : > { %1239 = vrcp.f32 %v867_v25 }
 0x345   : > { %v882_v35 = vpop.permute.xlu1 %881 }
 0x346   : > { %1241 = vrcp.f32 %v882_v35 }
 0x349   : > { %v872_v40 = vpop.permute.xlu1 %871 }
 0x34a   : > { %1243 = vrcp.f32 %v872_v40 }
 0x34b   : > { %v1238_v43 = vpop.eup %1237 }
 0x34c   : > { %v1240_v41 = vpop.eup %1239  ;;  %v909_v46 = vmul.f32 %v1238_v43, %v823_v42 }
 0x34d   : > { %v905_v49 = vmul.f32 %v1240_v41, %v821_v44 }
 0x34e   : > { %922 = vst [vmem:[%s1539_s19 + $0x10] sm:$0xff] %v909_v46 }
 0x34f   : > { %920 = vst [vmem:[%s1539_s19] sm:$0xff] %v905_v49 }
 0x350   : > { %v1242_v28 = vpop.eup %1241 }
 0x351   : > { %v911_v50 = vmul.f32 %v1242_v28, %v824_v53 }
 0x353   : > { %923 = vst [vmem:[%s1539_s19 + $0x18] sm:$0xff] %v911_v50 }
 0x354   : > { %v1244_v62 = vpop.eup %1243 }
 0x355   : > { %v907_v31 = vmul.f32 %v1244_v62, %v822_v57  ;;  %v897_v32 = vpop.permute.xlu0 %896 }
 0x357   : > { %921 = vst [vmem:[%s1539_s19 + $0x8] sm:$0xff] %v907_v31 }
 0x359   : > { %v887_v59 = vpop.permute.xlu0 %886 }
 0x35a   : > { %1245 = vrcp.f32 %v887_v59  ;;  %v902_v4 = vpop.permute.xlu1 %901 }
 0x35b   : > { %1247 = vrcp.f32 %v902_v4 }
 0x35d   : > { %v664_v8 = vpop.permute.xlu0 %663 }
 0x35e   : > { %v892_v33 = vpop.permute.xlu1 %891  ;;  %v681_v39 = vmul.f32 0.0, %v664_v8 }
 0x35f   : > { %1249 = vrcp.f32 %v892_v33 }
 0x360   : > { %1251 = vrcp.f32 %v897_v32  ;;  %v826_v14 = vadd.f32 %v1148_v15, %v681_v39 }
 0x361   : > { %v674_v56 = vpop.permute.xlu0 %673 }
 0x362   : > { %v683_v63 = vmul.f32 0.0, %v674_v56  ;;  %v659_v3 = vpop.permute.xlu1 %658 }
 0x363   : > { %v680_v34 = vmul.f32 0.0, %v659_v3 }
 0x364   : > { %v1246_v37 = vpop.eup %1245  ;;  %v828_v10 = vadd.f32 %v1151_v29, %v683_v63 }
 0x365   : > { %v1248_v2 = vpop.eup %1247  ;;  %v825_v9 = vadd.f32 %v802_v16, %v680_v34 }
 0x366   : > { %v919_v13 = vmul.f32 %v1248_v2, %v828_v10  ;;  %v669_v45 = vpop.permute.xlu1 %668 }
 0x367   : > { %v913_v12 = vmul.f32 %v1246_v37, %v825_v9  ;;  %v682_v47 = vmul.f32 0.0, %v669_v45 }
 0x368   : > { %927 = vst [vmem:[%s1539_s19 + $0x38] sm:$0xff] %v919_v13 }
 0x369   : > { %v1250_v51 = vpop.eup %1249  ;;  %924 = vst [vmem:[%s1539_s19 + $0x20] sm:$0xff] %v913_v12  ;;  %v827_v52 = vadd.f32 %v812_v18, %v682_v47 }
 0x36a   : > { %v1252_v17 = vpop.eup %1251  ;;  %v915_v54 = vmul.f32 %v1250_v51, %v826_v14 }
 0x36b   : > { %v917_v55 = vmul.f32 %v1252_v17, %v827_v52 }
 0x36c   : > { %925 = vst [vmem:[%s1539_s19 + $0x28] sm:$0xff] %v915_v54 }
 0x36d   : > { %926 = vst [vmem:[%s1539_s19 + $0x30] sm:$0xff] %v917_v55 }
 0x36e PF: > { %s13_s14 = sadd.s32 1, %s1275_s14   ;;  %s1562_s12 = smov %s1271_s13 }
 0x36f   : > { %p10_p5 = scmp.ge.s32.totalorder %s13_s14, 4   ;;  %s1563_s13 = smov %s1565_s15 }
 0x371   :  { %12 = sbr.rel (!%p10_p5) target bundleno = 2 (0x2), region = 76 }

</bundles_post_ra>
